<compile_context>
chip_gen: v7x
topology: tpu7x:2x2x1
jax: 0.10.0
libtpu: 0.0.40
codegen_flags: <defaults>
</compile_context>

<pallas_src>
import functools

import jax
import jax.numpy as jnp
from jax.experimental import pallas as pl
from jax.experimental.pallas import tpu as pltpu

GROUPS = 8
CMID = 64
CPG = CMID // GROUPS
EPS = 1e-5


# ----------------------------- in-kernel helpers -----------------------------
def _silu(x):
    # Single EUP transcendental: sigmoid(x) = 0.5*(1 + tanh(x/2)).
    return x * (0.5 * (jnp.tanh(x * 0.5) + 1.0))


def _gn_scale_shift(s1, s2, n_rows, lanes_per_group, bias, gt, gtT, gamma, beta):
    """GroupNorm + affine + conv-bias folded into per-lane (scale, shift).

    s1/s2 are per-lane sums of the *bias-free* matmul output and its square over
    n_rows rows; the conv bias is folded in analytically so the kernel never
    materializes `h + b`.
    """
    s1b = s1 + n_rows * bias
    s2b = s2 + 2.0 * bias * s1 + n_rows * (bias * bias)
    gs1 = jnp.dot(s1b, gt, preferred_element_type=jnp.float32)      # (1, GROUPS)
    gs2 = jnp.dot(s2b, gt, preferred_element_type=jnp.float32)      # (1, GROUPS)
    count = n_rows * lanes_per_group
    gmean = gs1 / count
    gvar = gs2 / count - gmean * gmean
    ginv = jax.lax.rsqrt(gvar + EPS)
    mean_c = jnp.dot(gmean, gtT, preferred_element_type=jnp.float32)
    inv_c = jnp.dot(ginv, gtT, preferred_element_type=jnp.float32)
    scale = inv_c * gamma
    shift = beta + (bias - mean_c) * scale
    return scale, shift


def _conv3_assemble(yb, w3b, b3t, tin, hw_t, cout):
    """Fused conv3: one bf16 matmul + two full-width time-shifted adds.

    w3b column blocks (all 4*cout wide, lane-aligned with the output):
      [0:co4)       same-frame contributions for the 4 temporal offsets,
      [co4:2*co4)   w3[0].ys[3]  -> belongs to the *next* input frame's k=0 slot,
      [2*co4:3*co4) w3[2].ys[0]  -> belongs to the *previous* frame's k=3 slot.
    """
    co4 = 4 * cout
    z = jnp.dot(yb, w3b, preferred_element_type=jnp.float32)        # (rows, 3*co4)
    z3 = z.reshape(tin, hw_t, 3 * co4)
    out = z3[:, :, :co4]
    if tin > 1:
        zero = jnp.zeros((1, hw_t, co4), jnp.float32)
        prev = jnp.concatenate([zero, z3[:-1, :, co4:2 * co4]], axis=0)
        nxt = jnp.concatenate([z3[1:, :, 2 * co4:3 * co4], zero], axis=0)
        out = out + prev + nxt
    # tin == 1: both boundary corrections come from padded (zero) frames.
    return out + b3t.reshape(1, 1, co4)


# --------------------------------- kernels -----------------------------------
def _decoder_kernel_resident(x_ref, w1_ref, b1_ref, g1_ref, be1_ref,
                             w2_ref, b2_ref, g2_ref, be2_ref,
                             w3_ref, b3_ref,
                             gt1_ref, gt1T_ref, gt2_ref, gt2T_ref,
                             o_ref, *, tin, hw, cout, act2_bf16):
    """Whole-sample-resident path: one grid step per batch element."""
    n = tin * hw
    cin = x_ref.shape[-1]
    x = x_ref[0].reshape(n, cin).astype(jnp.bfloat16)

    # conv1: 1x1x1 Conv3d == per-pixel channel matmul (bf16 MXU, f32 acc);
    # bias is folded into the GN1 shift.
    h = jnp.dot(x, w1_ref[...], preferred_element_type=jnp.float32)

    # GroupNorm(8, 64); conv bias + affine folded into per-channel scale/shift.
    s1 = jnp.sum(h, axis=0, keepdims=True)
    s2 = jnp.sum(h * h, axis=0, keepdims=True)
    scale1, shift1 = _gn_scale_shift(s1, s2, float(n), CPG, b1_ref[...],
                                     gt1_ref[...], gt1T_ref[...],
                                     g1_ref[...], be1_ref[...])
    h = _silu(h * scale1 + shift1)

    # conv2: ConvTranspose3d (4,1,1)/(4,1,1) as ONE fused bf16 matmul; the four
    # temporal offsets k live on the output-lane axis (lane block k = offset k).
    y = jnp.dot(h.astype(jnp.bfloat16), w2_ref[...],
                preferred_element_type=jnp.float32)

    # GroupNorm(8, 64) over the full upsampled time axis (all 4 offsets jointly).
    s1 = jnp.sum(y, axis=0, keepdims=True)
    s2 = jnp.sum(y * y, axis=0, keepdims=True)
    scale2, shift2 = _gn_scale_shift(s1, s2, float(n), 4 * CPG, b2_ref[...],
                                     gt2_ref[...], gt2T_ref[...],
                                     g2_ref[...], be2_ref[...])
    yn = y * scale2 + shift2
    if act2_bf16:                       # bf16 VPU/EUP on v6e/v7x; f32 on v5e
        yn = yn.astype(jnp.bfloat16)
    ya = _silu(yn).astype(jnp.bfloat16)

    # conv3 fused; single lane-dense 4*Cout store.
    o_ref[0] = _conv3_assemble(ya, w3_ref[...], b3_ref[...], tin, hw, cout)


def _decoder_kernel_tiled(x_ref, w1_ref, b1_ref, g1_ref, be1_ref,
                          w2_ref, b2_ref, g2_ref, be2_ref,
                          w3_ref, b3_ref,
                          gt1_ref, gt1T_ref, gt2_ref, gt2T_ref,
                          o_ref,
                          s1a_ref, s1b_ref, s2a_ref, s2b_ref,
                          sc1_ref, sh1_ref, sc2_ref, sh2_ref,
                          *, tin, hw_tile, hw_total, cout, act2_bf16):
    """HW-tiled 3-phase path: GroupNorm stats accumulate in VMEM scratch; the
    cheap convs are recomputed per phase so per-step VMEM stays bounded. The
    GN scale/shift are computed once per (batch, phase) and reused by tiles."""
    phase = pl.program_id(1)
    tile = pl.program_id(2)
    n_t = tin * hw_tile
    n_full = tin * hw_total
    cin = x_ref.shape[-1]

    @pl.when((phase == 0) & (tile == 0))
    def _():  # reset per-sample stats accumulators
        s1a_ref[...] = jnp.zeros_like(s1a_ref)
        s1b_ref[...] = jnp.zeros_like(s1b_ref)
        s2a_ref[...] = jnp.zeros_like(s2a_ref)
        s2b_ref[...] = jnp.zeros_like(s2b_ref)

    x = x_ref[0].reshape(n_t, cin).astype(jnp.bfloat16)
    h = jnp.dot(x, w1_ref[...], preferred_element_type=jnp.float32)

    @pl.when(phase == 0)
    def _():  # GN1 statistics (bias-free; folded analytically later)
        s1a_ref[...] += jnp.sum(h, axis=0, keepdims=True)
        s1b_ref[...] += jnp.sum(h * h, axis=0, keepdims=True)

    @pl.when((phase == 1) & (tile == 0))
    def _():  # GN1 scale/shift once per sample, reused by all phase-1/2 tiles
        sc, sh = _gn_scale_shift(s1a_ref[...], s1b_ref[...], float(n_full), CPG,
                                 b1_ref[...], gt1_ref[...], gt1T_ref[...],
                                 g1_ref[...], be1_ref[...])
        sc1_ref[...] = sc
        sh1_ref[...] = sh

    @pl.when(phase >= 1)
    def _():
        hh = _silu(h * sc1_ref[...] + sh1_ref[...])
        y = jnp.dot(hh.astype(jnp.bfloat16), w2_ref[...],
                    preferred_element_type=jnp.float32)

        @pl.when(phase == 1)
        def _():  # GN2 statistics
            s2a_ref[...] += jnp.sum(y, axis=0, keepdims=True)
            s2b_ref[...] += jnp.sum(y * y, axis=0, keepdims=True)

        @pl.when((phase == 2) & (tile == 0))
        def _():  # GN2 scale/shift once per sample
            sc, sh = _gn_scale_shift(s2a_ref[...], s2b_ref[...], float(n_full),
                                     4 * CPG, b2_ref[...],
                                     gt2_ref[...], gt2T_ref[...],
                                     g2_ref[...], be2_ref[...])
            sc2_ref[...] = sc
            sh2_ref[...] = sh

        @pl.when(phase == 2)
        def _():  # final normalize + conv3 + output
            yn = y * sc2_ref[...] + sh2_ref[...]
            if act2_bf16:
                yn = yn.astype(jnp.bfloat16)
            ya = _silu(yn).astype(jnp.bfloat16)
            o_ref[0] = _conv3_assemble(ya, w3_ref[...], b3_ref[...],
                                       tin, hw_tile, cout)


# --------------------------------- wrapper ------------------------------------
def _const_spec(a):
    nd = a.ndim
    return pl.BlockSpec(a.shape, lambda *_, nd=nd: (0,) * nd)


def _pick_hw_tile(hw, tin, max_rows):
    best = hw
    for d in range(8, hw, 8):
        if hw % d == 0 and tin * d <= max_rows:
            best = d
    return best


def _vmem_capacity_bytes():
    try:
        cap = int(getattr(pltpu.get_tpu_info(), "vmem_capacity_bytes", 0))
        if cap > 0:
            return cap
    except Exception:
        pass
    return 64 * 2**20   # conservative default (v7x per-TensorCore)


def _bf16_vector_act():
    """Use bf16 for the wide normalize+SiLU pass only where the VPU/EUP are
    bf16-capable (v6e / v7x); keep f32 on v5e and earlier."""
    try:
        kind = jax.devices()[0].device_kind.lower()
    except Exception:
        return False
    for tag in ("v2", "v3", "v4", "v5"):
        if tag in kind:
            return False
    return ("v6" in kind) or ("v7" in kind) or ("trillium" in kind)


def _vmem_limit(rows, cap):
    # rough working-set estimate per resident row of intermediates
    per_row = 4 * CMID * 4 + 4 * CMID * 2 + CMID * 4 + 3 * 64 + 2 * 64 + 64
    est = rows * per_row + (2 << 20)
    hi = min((cap * 5) // 8, 96 * 2**20)          # ~40 MiB on v7x, ~80 MiB on v5e/v6e
    lo = min(32 * 2**20, hi)
    return int(min(max(3 * est, lo), hi))


def temporal_decoder(x_ncthw, params, *, hw_tile=None, max_rows=None):
    """x_ncthw: [B, Cin, T/4, H, W] (PyTorch layout) -> [B, Cout, T, H, W]."""
    B, Cin, Tin, H, W = x_ncthw.shape
    HW = H * W
    Cout = params["w3"].shape[-1]
    co4 = 4 * Cout

    cap = _vmem_capacity_bytes()
    if max_rows is None:
        max_rows = 8192 if cap >= 100 * 2**20 else 4096
    act2_bf16 = _bf16_vector_act()

    # ---- wrapper-side weight packing (glue, not compute) ----
    w1 = params["w1"].astype(jnp.bfloat16)                               # (Cin, 64)
    b1 = params["b1"].reshape(1, CMID).astype(jnp.float32)
    g1 = params["g1"].reshape(1, CMID).astype(jnp.float32)
    be1 = params["be1"].reshape(1, CMID).astype(jnp.float32)

    w2 = params["w2"].astype(jnp.float32)                                # (4, 64, 64) [k, cin, cout]
    w2_big = jnp.concatenate([w2[k] for k in range(4)], axis=1).astype(jnp.bfloat16)  # (64, 256)
    b2_w = jnp.tile(params["b2"].reshape(1, CMID), (1, 4)).astype(jnp.float32)
    g2_w = jnp.tile(params["g2"].reshape(1, CMID), (1, 4)).astype(jnp.float32)
    be2_w = jnp.tile(params["be2"].reshape(1, CMID), (1, 4)).astype(jnp.float32)

    w3 = params["w3"].astype(jnp.float32)                                # (3, 64, Cout) [tap, cin, cout]
    zb = jnp.zeros((CMID, Cout), jnp.float32)
    # Column block 0 (same-frame, 4*Cout): out offset k gets taps from same input frame.
    same = jnp.concatenate([
        jnp.concatenate([w3[1], w3[0], zb,    zb   ], axis=1),   # rows: ys[0]
        jnp.concatenate([w3[2], w3[1], w3[0], zb   ], axis=1),   # rows: ys[1]
        jnp.concatenate([zb,    w3[2], w3[1], w3[0]], axis=1),   # rows: ys[2]
        jnp.concatenate([zb,    zb,    w3[2], w3[1]], axis=1),   # rows: ys[3]
    ], axis=0)                                                    # (256, 4*Cout)
    # Column block 1 (prev-frame term, lane-aligned at k=0 slot): w3[0].ys[3].
    prev = jnp.concatenate([
        jnp.zeros((3 * CMID, co4), jnp.float32),
        jnp.concatenate([w3[0], jnp.zeros((CMID, 3 * Cout), jnp.float32)], axis=1),
    ], axis=0)                                                    # (256, 4*Cout)
    # Column block 2 (next-frame term, lane-aligned at k=3 slot): w3[2].ys[0].
    nxt = jnp.concatenate([
        jnp.concatenate([jnp.zeros((CMID, 3 * Cout), jnp.float32), w3[2]], axis=1),
        jnp.zeros((3 * CMID, co4), jnp.float32),
    ], axis=0)                                                    # (256, 4*Cout)
    w3_big = jnp.concatenate([same, prev, nxt], axis=1).astype(jnp.bfloat16)  # (256, 12*Cout)
    b3_w = jnp.tile(params["b3"].reshape(1, Cout), (1, 4)).astype(jnp.float32)  # (1, 4*Cout)

    cidx = jnp.arange(CMID)
    gidx = jnp.arange(GROUPS)
    gt1 = (cidx[:, None] // CPG == gidx[None, :]).astype(jnp.float32)           # (64, 8)
    lidx = jnp.arange(4 * CMID)
    gt2 = ((lidx[:, None] % CMID) // CPG == gidx[None, :]).astype(jnp.float32)  # (256, 8)
    gt1T, gt2T = gt1.T, gt2.T

    weights = (w1, b1, g1, be1, w2_big, b2_w, g2_w, be2_w, w3_big, b3_w,
               gt1, gt1T, gt2, gt2T)
    weight_specs = [_const_spec(a) for a in weights]

    x = jnp.transpose(x_ncthw, (0, 2, 3, 4, 1)).reshape(B, Tin, HW, Cin)
    x = x.astype(jnp.float32)

    # ---- pick execution path ----
    if hw_tile is None:
        hw_tile = HW if (Tin * HW <= max_rows or HW % 8 != 0) \
            else _pick_hw_tile(HW, Tin, max_rows)
    tiled = (hw_tile < HW) and (HW % hw_tile == 0) and (hw_tile % 8 == 0)
    # TODO(synk): if HW has no suitable divisor the resident path is used even
    # when it exceeds the VMEM budget; a padded-HW tiling would remove that gap.

    out_shape = jax.ShapeDtypeStruct((B, Tin, HW, co4), jnp.float32)

    if not tiled:
        kern = functools.partial(_decoder_kernel_resident, tin=Tin, hw=HW,
                                 cout=Cout, act2_bf16=act2_bf16)
        out = pl.pallas_call(
            kern,
            out_shape=out_shape,
            grid=(B,),
            in_specs=[pl.BlockSpec((1, Tin, HW, Cin), lambda b: (b, 0, 0, 0))]
                     + weight_specs,
            out_specs=pl.BlockSpec((1, Tin, HW, co4), lambda b: (b, 0, 0, 0)),
            compiler_params=pltpu.CompilerParams(
                dimension_semantics=("parallel",),
                vmem_limit_bytes=_vmem_limit(Tin * HW, cap)),
        )(x, *weights)
    else:
        n_tiles = HW // hw_tile
        kern = functools.partial(_decoder_kernel_tiled, tin=Tin, hw_tile=hw_tile,
                                 hw_total=HW, cout=Cout, act2_bf16=act2_bf16)
        out = pl.pallas_call(
            kern,
            out_shape=out_shape,
            grid=(B, 3, n_tiles),
            in_specs=[pl.BlockSpec((1, Tin, hw_tile, Cin),
                                   lambda b, p, t: (b, 0, t, 0))]
                     + weight_specs,
            # Phases 0/1 park the (unwritten) output window on tile 0; the block
            # only changes -- and is copied back -- after phase 2 writes it.
            out_specs=pl.BlockSpec((1, Tin, hw_tile, co4),
                                   lambda b, p, t: (b, 0, t * (p // 2), 0)),
            scratch_shapes=[pltpu.VMEM((1, CMID), jnp.float32),       # GN1 sum
                            pltpu.VMEM((1, CMID), jnp.float32),       # GN1 sumsq
                            pltpu.VMEM((1, 4 * CMID), jnp.float32),   # GN2 sum
                            pltpu.VMEM((1, 4 * CMID), jnp.float32),   # GN2 sumsq
                            pltpu.VMEM((1, CMID), jnp.float32),       # GN1 scale
                            pltpu.VMEM((1, CMID), jnp.float32),       # GN1 shift
                            pltpu.VMEM((1, 4 * CMID), jnp.float32),   # GN2 scale
                            pltpu.VMEM((1, 4 * CMID), jnp.float32)],  # GN2 shift
            compiler_params=pltpu.CompilerParams(
                # GN stats accumulate across phase/tile in per-core scratch, so
                # those axes must stay "arbitrary"; only batch is megacore-parallel.
                # TODO(synk): for B=1 on a dual-TensorCore chip, per-core partial
                # stats + a cross-core combine would let the tile axis go parallel.
                dimension_semantics=("parallel", "arbitrary", "arbitrary"),
                vmem_limit_bytes=_vmem_limit(Tin * hw_tile, cap)),
        )(x, *weights)

    # glue: un-fold the offset axis (t_out = 4*t_in + k) and return NCTHW.
    # TODO(synk): a consumer that accepts NTHWC would avoid this full-output
    # transpose round-trip through HBM.
    out = out.reshape(B, Tin, H, W, 4, Cout)
    out = jnp.transpose(out, (0, 1, 4, 2, 3, 5)).reshape(B, 4 * Tin, H, W, Cout)
    return jnp.transpose(out, (0, 4, 1, 2, 3))


# --------------------------- params & pure-JAX reference ----------------------
def init_params(key, cin=4, cout=4):
    ks = jax.random.split(key, 10)
    return {
        "w1": 0.2 * jax.random.normal(ks[0], (cin, CMID), jnp.float32),
        "b1": 0.1 * jax.random.normal(ks[1], (1, CMID), jnp.float32),
        "g1": 1.0 + 0.1 * jax.random.normal(ks[2], (1, CMID), jnp.float32),
        "be1": 0.1 * jax.random.normal(ks[3], (1, CMID), jnp.float32),
        # ConvTranspose3d weight [Cin=64, Cout=64, kT=4] stored as [k, cin, cout]
        "w2": 0.1 * jax.random.normal(ks[4], (4, CMID, CMID), jnp.float32),
        "b2": 0.1 * jax.random.normal(ks[5], (1, CMID), jnp.float32),
        "g2": 1.0 + 0.1 * jax.random.normal(ks[6], (1, CMID), jnp.float32),
        "be2": 0.1 * jax.random.normal(ks[7], (1, CMID), jnp.float32),
        # Conv3d weight [Cout, Cin=64, kT=3] stored as [tap, cin, cout]
        "w3": 0.1 * jax.random.normal(ks[8], (3, CMID, cout), jnp.float32),
        "b3": 0.1 * jax.random.normal(ks[9], (1, cout), jnp.float32),
    }


def _group_norm_ref(x, groups, gamma, beta, eps=EPS):
    B, C = x.shape[0], x.shape[1]
    xs = x.reshape(B, groups, C // groups, -1)
    mean = xs.mean(axis=(2, 3), keepdims=True)
    var = xs.var(axis=(2, 3), keepdims=True)
    xs = (xs - mean) / jnp.sqrt(var + eps)
    x = xs.reshape(x.shape)
    shp = (1, C) + (1,) * (x.ndim - 2)
    return x * gamma.reshape(shp) + beta.reshape(shp)


def ref_forward(x, p):
    B, Cin, Tin, H, W = x.shape
    h = jnp.einsum('bcthw,cd->bdthw', x, p['w1']) + p['b1'].reshape(1, CMID, 1, 1, 1)
    h = _group_norm_ref(h, GROUPS, p['g1'], p['be1'])
    h = jax.nn.silu(h)
    y = jnp.einsum('bcthw,kcd->bdtkhw', h, p['w2'])
    y = y.reshape(B, CMID, Tin * 4, H, W) + p['b2'].reshape(1, CMID, 1, 1, 1)
    y = _group_norm_ref(y, GROUPS, p['g2'], p['be2'])
    y = jax.nn.silu(y)
    T = Tin * 4
    ypad = jnp.pad(y, ((0, 0), (0, 0), (1, 1), (0, 0), (0, 0)))
    out = sum(jnp.einsum('bcthw,cd->bdthw', ypad[:, :, i:i + T], p['w3'][i]) for i in range(3))
    Cout = p['w3'].shape[-1]
    return out + p['b3'].reshape(1, Cout, 1, 1, 1)


if __name__ == "__main__":
    key = jax.random.PRNGKey(0)
    kx, kp = jax.random.split(key)
    B, Cin, Tin, H, W = 2, 4, 2, 16, 16        # input is [B, C, T/4, H, W]
    x = jax.random.normal(kx, (B, Cin, Tin, H, W), jnp.float32)
    params = init_params(kp, cin=Cin, cout=4)

    ref = ref_forward(x, params)

    # path 1: whole-sample-resident kernel (auto-selected at this small size)
    out_resident = jax.block_until_ready(temporal_decoder(x, params))
    # path 2: HW-tiled 3-phase kernel (forced, 4 tiles of 64 pixels)
    out_tiled = jax.block_until_ready(temporal_decoder(x, params, hw_tile=64))

    assert out_resident.shape == (B, 4, 4 * Tin, H, W), out_resident.shape
    assert out_tiled.shape == (B, 4, 4 * Tin, H, W), out_tiled.shape

    err_r = float(jnp.max(jnp.abs(out_resident - ref)))
    err_t = float(jnp.max(jnp.abs(out_tiled - ref)))
    err_x = float(jnp.max(jnp.abs(out_tiled - out_resident)))
    assert err_r < 1e-1, f"resident path max abs err {err_r}"
    assert err_t < 1e-1, f"tiled path max abs err {err_t}"
    assert err_x < 1e-2, f"resident/tiled mismatch {err_x}"
    print("KERNEL_OK")
</pallas_src>

<mosaic_0001>
module attributes {stable_mosaic.version = 11 : i64} {
  func.func @_decoder_kernel_resident(%arg0: i32, %arg1: memref<1x2x256x4xf32, #tpu.memory_space<vmem>>, %arg2: memref<4x64xbf16, #tpu.memory_space<vmem>>, %arg3: memref<1x64xf32, #tpu.memory_space<vmem>>, %arg4: memref<1x64xf32, #tpu.memory_space<vmem>>, %arg5: memref<1x64xf32, #tpu.memory_space<vmem>>, %arg6: memref<64x256xbf16, #tpu.memory_space<vmem>>, %arg7: memref<1x256xf32, #tpu.memory_space<vmem>>, %arg8: memref<1x256xf32, #tpu.memory_space<vmem>>, %arg9: memref<1x256xf32, #tpu.memory_space<vmem>>, %arg10: memref<256x48xbf16, #tpu.memory_space<vmem>>, %arg11: memref<1x16xf32, #tpu.memory_space<vmem>>, %arg12: memref<64x8xf32, #tpu.memory_space<vmem>>, %arg13: memref<8x64xf32, #tpu.memory_space<vmem>>, %arg14: memref<256x8xf32, #tpu.memory_space<vmem>>, %arg15: memref<8x256xf32, #tpu.memory_space<vmem>>, %arg16: memref<1x2x256x16xf32, #tpu.memory_space<vmem>>) attributes {dimension_semantics = [#tpu.dimension_semantics<parallel>], iteration_bounds = array<i64: 2>, scalar_prefetch = 0 : i64, scratch_operands = 0 : i64, tpu.core_type = #tpu.core_type<tc>, window_params = [{transform_indices = @transform_0, window_bounds = array<i64: 1, 2, 256, 4>}, {pipeline_mode = #tpu.pipeline_mode<synchronous>, transform_indices = @transform_1, window_bounds = array<i64: 4, 64>}, {pipeline_mode = #tpu.pipeline_mode<synchronous>, transform_indices = @transform_2, window_bounds = array<i64: 1, 64>}, {pipeline_mode = #tpu.pipeline_mode<synchronous>, transform_indices = @transform_3, window_bounds = array<i64: 1, 64>}, {pipeline_mode = #tpu.pipeline_mode<synchronous>, transform_indices = @transform_4, window_bounds = array<i64: 1, 64>}, {pipeline_mode = #tpu.pipeline_mode<synchronous>, transform_indices = @transform_5, window_bounds = array<i64: 64, 256>}, {pipeline_mode = #tpu.pipeline_mode<synchronous>, transform_indices = @transform_6, window_bounds = array<i64: 1, 256>}, {pipeline_mode = #tpu.pipeline_mode<synchronous>, transform_indices = @transform_7, window_bounds = array<i64: 1, 256>}, {pipeline_mode = #tpu.pipeline_mode<synchronous>, transform_indices = @transform_8, window_bounds = array<i64: 1, 256>}, {pipeline_mode = #tpu.pipeline_mode<synchronous>, transform_indices = @transform_9, window_bounds = array<i64: 256, 48>}, {pipeline_mode = #tpu.pipeline_mode<synchronous>, transform_indices = @transform_10, window_bounds = array<i64: 1, 16>}, {pipeline_mode = #tpu.pipeline_mode<synchronous>, transform_indices = @transform_11, window_bounds = array<i64: 64, 8>}, {pipeline_mode = #tpu.pipeline_mode<synchronous>, transform_indices = @transform_12, window_bounds = array<i64: 8, 64>}, {pipeline_mode = #tpu.pipeline_mode<synchronous>, transform_indices = @transform_13, window_bounds = array<i64: 256, 8>}, {pipeline_mode = #tpu.pipeline_mode<synchronous>, transform_indices = @transform_14, window_bounds = array<i64: 8, 256>}, {transform_indices = @transform_15, window_bounds = array<i64: 1, 2, 256, 16>}]} {
    %c0 = arith.constant 0 : index
    %c0_0 = arith.constant 0 : index
    %c0_1 = arith.constant 0 : index
    %c0_2 = arith.constant 0 : index
    %0 = vector.load %arg1[%c0, %c0_0, %c0_1, %c0_2] : memref<1x2x256x4xf32, #tpu.memory_space<vmem>>, vector<1x2x256x4xf32>
    %1 = vector.shape_cast %0 : vector<1x2x256x4xf32> to vector<2x256x4xf32>
    %2 = vector.shape_cast %1 : vector<2x256x4xf32> to vector<512x4xf32>
    %3 = arith.truncf %2 : vector<512x4xf32> to vector<512x4xbf16>
    %c0_3 = arith.constant 0 : index
    %c0_4 = arith.constant 0 : index
    %4 = vector.load %arg2[%c0_3, %c0_4] : memref<4x64xbf16, #tpu.memory_space<vmem>>, vector<4x64xbf16>
    %cst = arith.constant dense<0.000000e+00> : vector<512x64xf32>
    %5 = tpu.matmul %3, %4, %cst {dimension_numbers = #tpu.dot_dimension_numbers<[1], [0], [0], [1], [0, 0, 1, 1], [], []>} : vector<512x4xbf16>, vector<4x64xbf16>, vector<512x64xf32> -> vector<512x64xf32>
    %cst_5 = arith.constant dense<0.000000e+00> : vector<64xf32>
    %6 = vector.multi_reduction <add>, %5, %cst_5 [0] : vector<512x64xf32> to vector<64xf32>
    %7 = vector.shape_cast %6 : vector<64xf32> to vector<1x64xf32>
    %8 = arith.mulf %5, %5 : vector<512x64xf32>
    %cst_6 = arith.constant dense<0.000000e+00> : vector<64xf32>
    %9 = vector.multi_reduction <add>, %8, %cst_6 [0] : vector<512x64xf32> to vector<64xf32>
    %10 = vector.shape_cast %9 : vector<64xf32> to vector<1x64xf32>
    %c0_7 = arith.constant 0 : index
    %c0_8 = arith.constant 0 : index
    %11 = vector.load %arg3[%c0_7, %c0_8] : memref<1x64xf32, #tpu.memory_space<vmem>>, vector<1x64xf32>
    %c0_9 = arith.constant 0 : index
    %c0_10 = arith.constant 0 : index
    %12 = vector.load %arg12[%c0_9, %c0_10] : memref<64x8xf32, #tpu.memory_space<vmem>>, vector<64x8xf32>
    %c0_11 = arith.constant 0 : index
    %c0_12 = arith.constant 0 : index
    %13 = vector.load %arg13[%c0_11, %c0_12] : memref<8x64xf32, #tpu.memory_space<vmem>>, vector<8x64xf32>
    %c0_13 = arith.constant 0 : index
    %c0_14 = arith.constant 0 : index
    %14 = vector.load %arg4[%c0_13, %c0_14] : memref<1x64xf32, #tpu.memory_space<vmem>>, vector<1x64xf32>
    %c0_15 = arith.constant 0 : index
    %c0_16 = arith.constant 0 : index
    %15 = vector.load %arg5[%c0_15, %c0_16] : memref<1x64xf32, #tpu.memory_space<vmem>>, vector<1x64xf32>
    %cst_17 = arith.constant 5.120000e+02 : f32
    %16 = vector.broadcast %cst_17 : f32 to vector<1x64xf32>
    %17 = arith.mulf %16, %11 : vector<1x64xf32>
    %18 = arith.addf %7, %17 : vector<1x64xf32>
    %cst_18 = arith.constant 2.000000e+00 : f32
    %19 = vector.broadcast %cst_18 : f32 to vector<1x64xf32>
    %20 = arith.mulf %19, %11 : vector<1x64xf32>
    %21 = arith.mulf %20, %7 : vector<1x64xf32>
    %22 = arith.addf %10, %21 : vector<1x64xf32>
    %23 = arith.mulf %11, %11 : vector<1x64xf32>
    %cst_19 = arith.constant 5.120000e+02 : f32
    %24 = vector.broadcast %cst_19 : f32 to vector<1x64xf32>
    %25 = arith.mulf %24, %23 : vector<1x64xf32>
    %26 = arith.addf %22, %25 : vector<1x64xf32>
    %cst_20 = arith.constant dense<0.000000e+00> : vector<1x8xf32>
    %27 = tpu.matmul %18, %12, %cst_20 {dimension_numbers = #tpu.dot_dimension_numbers<[1], [0], [0], [1], [0, 0, 1, 1], [], []>} : vector<1x64xf32>, vector<64x8xf32>, vector<1x8xf32> -> vector<1x8xf32>
    %cst_21 = arith.constant dense<0.000000e+00> : vector<1x8xf32>
    %28 = tpu.matmul %26, %12, %cst_21 {dimension_numbers = #tpu.dot_dimension_numbers<[1], [0], [0], [1], [0, 0, 1, 1], [], []>} : vector<1x64xf32>, vector<64x8xf32>, vector<1x8xf32> -> vector<1x8xf32>
    %cst_22 = arith.constant 4.096000e+03 : f32
    %29 = vector.broadcast %cst_22 : f32 to vector<1x8xf32>
    %30 = arith.divf %27, %29 : vector<1x8xf32>
    %cst_23 = arith.constant 4.096000e+03 : f32
    %31 = vector.broadcast %cst_23 : f32 to vector<1x8xf32>
    %32 = arith.divf %28, %31 : vector<1x8xf32>
    %33 = arith.mulf %30, %30 : vector<1x8xf32>
    %34 = arith.subf %32, %33 : vector<1x8xf32>
    %cst_24 = arith.constant 9.99999974E-6 : f32
    %35 = vector.broadcast %cst_24 : f32 to vector<1x8xf32>
    %36 = arith.addf %34, %35 : vector<1x8xf32>
    %37 = math.rsqrt %36 : vector<1x8xf32>
    %cst_25 = arith.constant dense<0.000000e+00> : vector<1x64xf32>
    %38 = tpu.matmul %30, %13, %cst_25 {dimension_numbers = #tpu.dot_dimension_numbers<[1], [0], [0], [1], [0, 0, 1, 1], [], []>} : vector<1x8xf32>, vector<8x64xf32>, vector<1x64xf32> -> vector<1x64xf32>
    %cst_26 = arith.constant dense<0.000000e+00> : vector<1x64xf32>
    %39 = tpu.matmul %37, %13, %cst_26 {dimension_numbers = #tpu.dot_dimension_numbers<[1], [0], [0], [1], [0, 0, 1, 1], [], []>} : vector<1x8xf32>, vector<8x64xf32>, vector<1x64xf32> -> vector<1x64xf32>
    %40 = arith.mulf %39, %14 : vector<1x64xf32>
    %41 = arith.subf %11, %38 : vector<1x64xf32>
    %42 = arith.mulf %41, %40 : vector<1x64xf32>
    %43 = arith.addf %15, %42 : vector<1x64xf32>
    %44 = vector.broadcast %40 : vector<1x64xf32> to vector<512x64xf32>
    %45 = arith.mulf %5, %44 : vector<512x64xf32>
    %46 = vector.broadcast %43 : vector<1x64xf32> to vector<512x64xf32>
    %47 = arith.addf %45, %46 : vector<512x64xf32>
    %cst_27 = arith.constant 5.000000e-01 : f32
    %48 = vector.broadcast %cst_27 : f32 to vector<512x64xf32>
    %49 = arith.mulf %47, %48 : vector<512x64xf32>
    %50 = math.tanh %49 : vector<512x64xf32>
    %cst_28 = arith.constant 1.000000e+00 : f32
    %51 = vector.broadcast %cst_28 : f32 to vector<512x64xf32>
    %52 = arith.addf %50, %51 : vector<512x64xf32>
    %cst_29 = arith.constant 5.000000e-01 : f32
    %53 = vector.broadcast %cst_29 : f32 to vector<512x64xf32>
    %54 = arith.mulf %53, %52 : vector<512x64xf32>
    %55 = arith.mulf %47, %54 : vector<512x64xf32>
    %56 = arith.truncf %55 : vector<512x64xf32> to vector<512x64xbf16>
    %c0_30 = arith.constant 0 : index
    %c0_31 = arith.constant 0 : index
    %57 = vector.load %arg6[%c0_30, %c0_31] : memref<64x256xbf16, #tpu.memory_space<vmem>>, vector<64x256xbf16>
    %cst_32 = arith.constant dense<0.000000e+00> : vector<512x256xf32>
    %58 = tpu.matmul %56, %57, %cst_32 {dimension_numbers = #tpu.dot_dimension_numbers<[1], [0], [0], [1], [0, 0, 1, 1], [], []>} : vector<512x64xbf16>, vector<64x256xbf16>, vector<512x256xf32> -> vector<512x256xf32>
    %cst_33 = arith.constant dense<0.000000e+00> : vector<256xf32>
    %59 = vector.multi_reduction <add>, %58, %cst_33 [0] : vector<512x256xf32> to vector<256xf32>
    %60 = vector.shape_cast %59 : vector<256xf32> to vector<1x256xf32>
    %61 = arith.mulf %58, %58 : vector<512x256xf32>
    %cst_34 = arith.constant dense<0.000000e+00> : vector<256xf32>
    %62 = vector.multi_reduction <add>, %61, %cst_34 [0] : vector<512x256xf32> to vector<256xf32>
    %63 = vector.shape_cast %62 : vector<256xf32> to vector<1x256xf32>
    %c0_35 = arith.constant 0 : index
    %c0_36 = arith.constant 0 : index
    %64 = vector.load %arg7[%c0_35, %c0_36] : memref<1x256xf32, #tpu.memory_space<vmem>>, vector<1x256xf32>
    %c0_37 = arith.constant 0 : index
    %c0_38 = arith.constant 0 : index
    %65 = vector.load %arg14[%c0_37, %c0_38] : memref<256x8xf32, #tpu.memory_space<vmem>>, vector<256x8xf32>
    %c0_39 = arith.constant 0 : index
    %c0_40 = arith.constant 0 : index
    %66 = vector.load %arg15[%c0_39, %c0_40] : memref<8x256xf32, #tpu.memory_space<vmem>>, vector<8x256xf32>
    %c0_41 = arith.constant 0 : index
    %c0_42 = arith.constant 0 : index
    %67 = vector.load %arg8[%c0_41, %c0_42] : memref<1x256xf32, #tpu.memory_space<vmem>>, vector<1x256xf32>
    %c0_43 = arith.constant 0 : index
    %c0_44 = arith.constant 0 : index
    %68 = vector.load %arg9[%c0_43, %c0_44] : memref<1x256xf32, #tpu.memory_space<vmem>>, vector<1x256xf32>
    %cst_45 = arith.constant 5.120000e+02 : f32
    %69 = vector.broadcast %cst_45 : f32 to vector<1x256xf32>
    %70 = arith.mulf %69, %64 : vector<1x256xf32>
    %71 = arith.addf %60, %70 : vector<1x256xf32>
    %cst_46 = arith.constant 2.000000e+00 : f32
    %72 = vector.broadcast %cst_46 : f32 to vector<1x256xf32>
    %73 = arith.mulf %72, %64 : vector<1x256xf32>
    %74 = arith.mulf %73, %60 : vector<1x256xf32>
    %75 = arith.addf %63, %74 : vector<1x256xf32>
    %76 = arith.mulf %64, %64 : vector<1x256xf32>
    %cst_47 = arith.constant 5.120000e+02 : f32
    %77 = vector.broadcast %cst_47 : f32 to vector<1x256xf32>
    %78 = arith.mulf %77, %76 : vector<1x256xf32>
    %79 = arith.addf %75, %78 : vector<1x256xf32>
    %cst_48 = arith.constant dense<0.000000e+00> : vector<1x8xf32>
    %80 = tpu.matmul %71, %65, %cst_48 {dimension_numbers = #tpu.dot_dimension_numbers<[1], [0], [0], [1], [0, 0, 1, 1], [], []>} : vector<1x256xf32>, vector<256x8xf32>, vector<1x8xf32> -> vector<1x8xf32>
    %cst_49 = arith.constant dense<0.000000e+00> : vector<1x8xf32>
    %81 = tpu.matmul %79, %65, %cst_49 {dimension_numbers = #tpu.dot_dimension_numbers<[1], [0], [0], [1], [0, 0, 1, 1], [], []>} : vector<1x256xf32>, vector<256x8xf32>, vector<1x8xf32> -> vector<1x8xf32>
    %cst_50 = arith.constant 1.638400e+04 : f32
    %82 = vector.broadcast %cst_50 : f32 to vector<1x8xf32>
    %83 = arith.divf %80, %82 : vector<1x8xf32>
    %cst_51 = arith.constant 1.638400e+04 : f32
    %84 = vector.broadcast %cst_51 : f32 to vector<1x8xf32>
    %85 = arith.divf %81, %84 : vector<1x8xf32>
    %86 = arith.mulf %83, %83 : vector<1x8xf32>
    %87 = arith.subf %85, %86 : vector<1x8xf32>
    %cst_52 = arith.constant 9.99999974E-6 : f32
    %88 = vector.broadcast %cst_52 : f32 to vector<1x8xf32>
    %89 = arith.addf %87, %88 : vector<1x8xf32>
    %90 = math.rsqrt %89 : vector<1x8xf32>
    %cst_53 = arith.constant dense<0.000000e+00> : vector<1x256xf32>
    %91 = tpu.matmul %83, %66, %cst_53 {dimension_numbers = #tpu.dot_dimension_numbers<[1], [0], [0], [1], [0, 0, 1, 1], [], []>} : vector<1x8xf32>, vector<8x256xf32>, vector<1x256xf32> -> vector<1x256xf32>
    %cst_54 = arith.constant dense<0.000000e+00> : vector<1x256xf32>
    %92 = tpu.matmul %90, %66, %cst_54 {dimension_numbers = #tpu.dot_dimension_numbers<[1], [0], [0], [1], [0, 0, 1, 1], [], []>} : vector<1x8xf32>, vector<8x256xf32>, vector<1x256xf32> -> vector<1x256xf32>
    %93 = arith.mulf %92, %67 : vector<1x256xf32>
    %94 = arith.subf %64, %91 : vector<1x256xf32>
    %95 = arith.mulf %94, %93 : vector<1x256xf32>
    %96 = arith.addf %68, %95 : vector<1x256xf32>
    %97 = vector.broadcast %93 : vector<1x256xf32> to vector<512x256xf32>
    %98 = arith.mulf %58, %97 : vector<512x256xf32>
    %99 = vector.broadcast %96 : vector<1x256xf32> to vector<512x256xf32>
    %100 = arith.addf %98, %99 : vector<512x256xf32>
    %cst_55 = arith.constant 5.000000e-01 : f32
    %101 = vector.broadcast %cst_55 : f32 to vector<512x256xf32>
    %102 = arith.mulf %100, %101 : vector<512x256xf32>
    %103 = math.tanh %102 : vector<512x256xf32>
    %cst_56 = arith.constant 1.000000e+00 : f32
    %104 = vector.broadcast %cst_56 : f32 to vector<512x256xf32>
    %105 = arith.addf %103, %104 : vector<512x256xf32>
    %cst_57 = arith.constant 5.000000e-01 : f32
    %106 = vector.broadcast %cst_57 : f32 to vector<512x256xf32>
    %107 = arith.mulf %106, %105 : vector<512x256xf32>
    %108 = arith.mulf %100, %107 : vector<512x256xf32>
    %109 = arith.truncf %108 : vector<512x256xf32> to vector<512x256xbf16>
    %c0_58 = arith.constant 0 : index
    %c0_59 = arith.constant 0 : index
    %110 = vector.load %arg10[%c0_58, %c0_59] : memref<256x48xbf16, #tpu.memory_space<vmem>>, vector<256x48xbf16>
    %c0_60 = arith.constant 0 : index
    %c0_61 = arith.constant 0 : index
    %111 = vector.load %arg11[%c0_60, %c0_61] : memref<1x16xf32, #tpu.memory_space<vmem>>, vector<1x16xf32>
    %cst_62 = arith.constant dense<0.000000e+00> : vector<512x48xf32>
    %112 = tpu.matmul %109, %110, %cst_62 {dimension_numbers = #tpu.dot_dimension_numbers<[1], [0], [0], [1], [0, 0, 1, 1], [], []>} : vector<512x256xbf16>, vector<256x48xbf16>, vector<512x48xf32> -> vector<512x48xf32>
    %113 = vector.shape_cast %112 : vector<512x48xf32> to vector<2x256x48xf32>
    %114 = vector.extract_strided_slice %113 {offsets = [0, 0, 0], sizes = [2, 256, 16], strides = [1, 1, 1]} : vector<2x256x48xf32> to vector<2x256x16xf32>
    %cst_63 = arith.constant 0.000000e+00 : f32
    %115 = vector.broadcast %cst_63 : f32 to vector<1x256x16xf32>
    %116 = vector.extract_strided_slice %113 {offsets = [0, 0, 16], sizes = [1, 256, 16], strides = [1, 1, 1]} : vector<2x256x48xf32> to vector<1x256x16xf32>
    %117 = tpu.concatenate %115, %116 in 0 : vector<1x256x16xf32>, vector<1x256x16xf32> -> vector<2x256x16xf32>
    %118 = vector.extract_strided_slice %113 {offsets = [1, 0, 32], sizes = [1, 256, 16], strides = [1, 1, 1]} : vector<2x256x48xf32> to vector<1x256x16xf32>
    %119 = tpu.concatenate %118, %115 in 0 : vector<1x256x16xf32>, vector<1x256x16xf32> -> vector<2x256x16xf32>
    %120 = arith.addf %114, %117 : vector<2x256x16xf32>
    %121 = arith.addf %120, %119 : vector<2x256x16xf32>
    %122 = vector.shape_cast %111 : vector<1x16xf32> to vector<1x1x16xf32>
    %123 = vector.broadcast %122 : vector<1x1x16xf32> to vector<2x256x16xf32>
    %124 = arith.addf %121, %123 : vector<2x256x16xf32>
    %c0_64 = arith.constant 0 : index
    %c0_65 = arith.constant 0 : index
    %c0_66 = arith.constant 0 : index
    %c0_67 = arith.constant 0 : index
    %125 = vector.load %arg16[%c0_64, %c0_65, %c0_66, %c0_67] : memref<1x2x256x16xf32, #tpu.memory_space<vmem>>, vector<1x2x256x16xf32>
    %126 = vector.shape_cast %125 : vector<1x2x256x16xf32> to vector<2x256x16xf32>
    %127 = vector.shape_cast %124 : vector<2x256x16xf32> to vector<1x2x256x16xf32>
    tpu.vector_store %arg16[%c0_64, %c0_65, %c0_66, %c0_67], %127 {strides = array<i32>} : memref<1x2x256x16xf32, #tpu.memory_space<vmem>>, vector<1x2x256x16xf32>,
    return
  }
  func.func @transform_0(%arg0: i32) -> (i32, i32, i32, i32) {
    %c0_i32 = arith.constant 0 : i32
    %c0_i32_0 = arith.constant 0 : i32
    %c0_i32_1 = arith.constant 0 : i32
    %c0_i32_2 = arith.constant 0 : i32
    return %arg0, %c0_i32, %c0_i32_0, %c0_i32_1 : i32, i32, i32, i32
  }
  func.func @transform_1(%arg0: i32) -> (i32, i32) {
    %c0_i32 = arith.constant 0 : i32
    %c0_i32_0 = arith.constant 0 : i32
    %c0_i32_1 = arith.constant 0 : i32
    return %c0_i32, %c0_i32_0 : i32, i32
  }
  func.func @transform_2(%arg0: i32) -> (i32, i32) {
    %c0_i32 = arith.constant 0 : i32
    %c0_i32_0 = arith.constant 0 : i32
    %c0_i32_1 = arith.constant 0 : i32
    return %c0_i32, %c0_i32_0 : i32, i32
  }
  func.func @transform_3(%arg0: i32) -> (i32, i32) {
    %c0_i32 = arith.constant 0 : i32
    %c0_i32_0 = arith.constant 0 : i32
    %c0_i32_1 = arith.constant 0 : i32
    return %c0_i32, %c0_i32_0 : i32, i32
  }
  func.func @transform_4(%arg0: i32) -> (i32, i32) {
    %c0_i32 = arith.constant 0 : i32
    %c0_i32_0 = arith.constant 0 : i32
    %c0_i32_1 = arith.constant 0 : i32
    return %c0_i32, %c0_i32_0 : i32, i32
  }
  func.func @transform_5(%arg0: i32) -> (i32, i32) {
    %c0_i32 = arith.constant 0 : i32
    %c0_i32_0 = arith.constant 0 : i32
    %c0_i32_1 = arith.constant 0 : i32
    return %c0_i32, %c0_i32_0 : i32, i32
  }
  func.func @transform_6(%arg0: i32) -> (i32, i32) {
    %c0_i32 = arith.constant 0 : i32
    %c0_i32_0 = arith.constant 0 : i32
    %c0_i32_1 = arith.constant 0 : i32
    return %c0_i32, %c0_i32_0 : i32, i32
  }
  func.func @transform_7(%arg0: i32) -> (i32, i32) {
    %c0_i32 = arith.constant 0 : i32
    %c0_i32_0 = arith.constant 0 : i32
    %c0_i32_1 = arith.constant 0 : i32
    return %c0_i32, %c0_i32_0 : i32, i32
  }
  func.func @transform_8(%arg0: i32) -> (i32, i32) {
    %c0_i32 = arith.constant 0 : i32
    %c0_i32_0 = arith.constant 0 : i32
    %c0_i32_1 = arith.constant 0 : i32
    return %c0_i32, %c0_i32_0 : i32, i32
  }
  func.func @transform_9(%arg0: i32) -> (i32, i32) {
    %c0_i32 = arith.constant 0 : i32
    %c0_i32_0 = arith.constant 0 : i32
    %c0_i32_1 = arith.constant 0 : i32
    return %c0_i32, %c0_i32_0 : i32, i32
  }
  func.func @transform_10(%arg0: i32) -> (i32, i32) {
    %c0_i32 = arith.constant 0 : i32
    %c0_i32_0 = arith.constant 0 : i32
    %c0_i32_1 = arith.constant 0 : i32
    return %c0_i32, %c0_i32_0 : i32, i32
  }
  func.func @transform_11(%arg0: i32) -> (i32, i32) {
    %c0_i32 = arith.constant 0 : i32
    %c0_i32_0 = arith.constant 0 : i32
    %c0_i32_1 = arith.constant 0 : i32
    return %c0_i32, %c0_i32_0 : i32, i32
  }
  func.func @transform_12(%arg0: i32) -> (i32, i32) {
    %c0_i32 = arith.constant 0 : i32
    %c0_i32_0 = arith.constant 0 : i32
    %c0_i32_1 = arith.constant 0 : i32
    return %c0_i32, %c0_i32_0 : i32, i32
  }
  func.func @transform_13(%arg0: i32) -> (i32, i32) {
    %c0_i32 = arith.constant 0 : i32
    %c0_i32_0 = arith.constant 0 : i32
    %c0_i32_1 = arith.constant 0 : i32
    return %c0_i32, %c0_i32_0 : i32, i32
  }
  func.func @transform_14(%arg0: i32) -> (i32, i32) {
    %c0_i32 = arith.constant 0 : i32
    %c0_i32_0 = arith.constant 0 : i32
    %c0_i32_1 = arith.constant 0 : i32
    return %c0_i32, %c0_i32_0 : i32, i32
  }
  func.func @transform_15(%arg0: i32) -> (i32, i32, i32, i32) {
    %c0_i32 = arith.constant 0 : i32
    %c0_i32_0 = arith.constant 0 : i32
    %c0_i32_1 = arith.constant 0 : i32
    %c0_i32_2 = arith.constant 0 : i32
    return %arg0, %c0_i32, %c0_i32_0, %c0_i32_1 : i32, i32, i32, i32
  }
}

</mosaic_0001>

<bundles_post_ra>
// kernel: tpu_custom_call.1
= control target key start
LH: loop header
LB: loop body
LE: loop exit
PB: predicated region body
PF: predicated region fallthrough
CT: control target
= control target key end

     0   :  { %s6415_s18 = smov 0   ;;  %s11935_s0 = inlined_call_operand.vmem [shape: f32[2,2,256,4], index: 0, kind: input, shape index: {}]   ;;  %s11936_s1 = inlined_call_operand.vmem [shape: bf16[4,64], index: 1, kind: input, shape index: {}]   ;;  %s11937_s2 = inlined_call_operand.vmem [shape: f32[1,64], index: 2, kind: input, shape index: {}]   ;;  %s11938_s3 = inlined_call_operand.vmem [shape: f32[1,64], index: 3, kind: input, shape index: {}]   ;;  %s11939_s4 = inlined_call_operand.vmem [shape: f32[1,64], index: 4, kind: input, shape index: {}]   ;;  %s11940_s5 = inlined_call_operand.vmem [shape: bf16[64,256], index: 5, kind: input, shape index: {}]   ;;  %s11941_s6 = inlined_call_operand.vmem [shape: f32[1,256], index: 6, kind: input, shape index: {}]   ;;  %s11942_s7 = inlined_call_operand.vmem [shape: f32[1,256], index: 7, kind: input, shape index: {}]   ;;  %s11943_s8 = inlined_call_operand.vmem [shape: f32[1,256], index: 8, kind: input, shape index: {}]   ;;  %s11944_s9 = inlined_call_operand.vmem [shape: bf16[256,48], index: 9, kind: input, shape index: {}]   ;;  %s11945_s10 = inlined_call_operand.vmem [shape: f32[1,16], index: 10, kind: input, shape index: {}]   ;;  %s11946_s11 = inlined_call_operand.vmem [shape: f32[64,8], index: 11, kind: input, shape index: {}]   ;;  %s11947_s12 = inlined_call_operand.vmem [shape: f32[8,64], index: 12, kind: input, shape index: {}]   ;;  %s11948_s13 = inlined_call_operand.vmem [shape: f32[256,8], index: 13, kind: input, shape index: {}]   ;;  %s11949_s14 = inlined_call_operand.vmem [shape: f32[8,256], index: 14, kind: input, shape index: {}]   ;;  %s11950_s15 = inlined_call_operand.vmem [shape: f32[2,2,256,16], index: 15, kind: output, shape index: {}]  }
   0x1 LB: > { %s5450_s19 = sadd.s32 4294967295, %s6326_s18   ;;  %p5454_p0 = scmp.ge.s32.totalorder %s6326_s18, 1  ;;  %s6326_s18 = sphi %s6415_s18, %s25_s18  }
   0x2   : > { %p437_p1 = scmp.lt.s32.totalorder %s6326_s18, 3 }
   0x4   : > { %p438_p2 = pnand %p5454_p0, %p437_p1 }
   0x6   : > { %441 = sbr.rel (%p438_p2) target bundleno = 2693 (0xa85), region = 80 }
   0xd   : > { %v592_v0 = vld [vmem:[%s11936_s1] sm:$0x3]  ;;  %vm690_vm0 = vcmask 1041408   ;;  %p485_p3 = scmp.lt.s32.totalorder %s5450_s19, 1  ;;  %vm593_vm1 = vcmask 31744   ;;  %vm983_vm2 = vcmask 523264  }
   0xe   : > { %5887 = vmatprep.subr.msk.bf16.mxu0 %vm690_vm0, %v592_v0  ;;  %v692_v1 = vsel %vm690_vm0, %v592_v0, 0  ;;  %5888 = vmatprep.subr.msk.bf16.mxu1 %vm690_vm0, %v592_v0  ;;  %vm6329_vm3 = vmmov 0   ;;  %vm1487_vm4 = vcmask 64512   ;;  %s6333_s28 = smov 112   ;;  %s6334_s29 = smov 96   ;;  %vm5330_vm5 = vcmask 130048  }
   0xf   : > { %5684 = vmatpush3.bf16.msra.mxu0 %v692_v1  ;;  %s13483_s19 = smov (!%p485_p3, %s5450_s19), 1  ;;  %5886 = vmatpush3.bf16.msra.mxu1 %v692_v1 }
  0x10   : > { %s5556_s22 = sshll.u32 %s13483_s19, 9 }
  0x11   : > { %s6434_s25 = scalar_lea.vmem %s11935_s0, %s5556_s22  ;;  %s11667_s21 = scalar_lea.vmem %s11950_s15, %s5556_s22 }
  0x12   : > { %v496_v2 = vld [vmem:[%s6434_s25] sm:$0xff]  ;;  %v497_v3 = vld [vmem:[%s6434_s25 + $0x8] sm:$0xff]  ;;  %v498_v4 = vld [vmem:[%s6434_s25 + $0x10] sm:$0xff] }
  0x13   : > { %v560_v5 = vpack.c.bf16 %v497_v3, %v496_v2  ;;  %v499_v6 = vld [vmem:[%s6434_s25 + $0x18] sm:$0xff]  ;;  %v500_v7 = vld [vmem:[%s6434_s25 + $0x20] sm:$0xff]  ;;  %v501_v8 = vld [vmem:[%s6434_s25 + $0x28] sm:$0xff] }
  0x14   : > { %v561_v9 = vpack.c.bf16 %v499_v6, %v498_v4  ;;  %v562_v10 = vpack.c.bf16 %v501_v8, %v500_v7  ;;  %v502_v11 = vld [vmem:[%s6434_s25 + $0x30] sm:$0xff]  ;;  %v503_v12 = vld [vmem:[%s6434_s25 + $0x38] sm:$0xff]  ;;  %v504_v13 = vld [vmem:[%s6434_s25 + $0x40] sm:$0xff] }
  0x15   : > { %5685 = vmatprep.mubr.msk.bf16.mxu0 %vm593_vm1, %v560_v5  ;;  %v505_v14 = vld [vmem:[%s6434_s25 + $0x48] sm:$0xff]  ;;  %v512_v15 = vld [vmem:[%s6434_s25 + $0x80] sm:$0xff]  ;;  %v514_v18 = vld [vmem:[%s6434_s25 + $0x90] sm:$0xff]  ;;  %v563_v23 = vpack.c.bf16 %v503_v12, %v502_v11 }
  0x16   : > { %5686 = vmatmul.mubr.msk.bf16.vlgmr.msra.gmra.mrb[0].mxu0 %vm593_vm1, %v561_v9  ;;  %v513_v16 = vld [vmem:[%s6434_s25 + $0x88] sm:$0xff]  ;;  %v515_v19 = vld [vmem:[%s6434_s25 + $0x98] sm:$0xff]  ;;  %v516_v20 = vld [vmem:[%s6434_s25 + $0xa0] sm:$0xff]  ;;  %v564_v25 = vpack.c.bf16 %v505_v14, %v504_v13 }
  0x17   : > { %5689 = vmatprep.mubr.msk.bf16.mxu0 %vm593_vm1, %v562_v10  ;;  %v568_v17 = vpack.c.bf16 %v513_v16, %v512_v15  ;;  %v569_v21 = vpack.c.bf16 %v515_v19, %v514_v18  ;;  %v517_v22 = vld [vmem:[%s6434_s25 + $0xa8] sm:$0xff]  ;;  %v518_v26 = vld [vmem:[%s6434_s25 + $0xb0] sm:$0xff]  ;;  %v519_v27 = vld [vmem:[%s6434_s25 + $0xb8] sm:$0xff] }
  0x18   : > { %v570_v24 = vpack.c.bf16 %v517_v22, %v516_v20  ;;  %v520_v28 = vld [vmem:[%s6434_s25 + $0xc0] sm:$0xff]  ;;  %v521_v29 = vld [vmem:[%s6434_s25 + $0xc8] sm:$0xff]  ;;  %v506_v30 = vld [vmem:[%s6434_s25 + $0x50] sm:$0xff]  ;;  %v571_v32 = vpack.c.bf16 %v519_v27, %v518_v26 }
  0x19   : > { %5701 = vmatprep.mubr.msk.bf16.mxu1 %vm593_vm1, %v568_v17  ;;  %v507_v31 = vld [vmem:[%s6434_s25 + $0x58] sm:$0xff]  ;;  %v508_v33 = vld [vmem:[%s6434_s25 + $0x60] sm:$0xff]  ;;  %v509_v34 = vld [vmem:[%s6434_s25 + $0x68] sm:$0xff]  ;;  %v572_v35 = vpack.c.bf16 %v521_v29, %v520_v28 }
  0x1a   : > { %5702 = vmatmul.mubr.msk.bf16.vlgmr.msra.gmra.mrb[0].mxu1 %vm593_vm1, %v569_v21  ;;  %v565_v36 = vpack.c.bf16 %v507_v31, %v506_v30  ;;  %v566_v37 = vpack.c.bf16 %v509_v34, %v508_v33  ;;  %v522_v38 = vld [vmem:[%s6434_s25 + $0xd0] sm:$0xff]  ;;  %v523_v39 = vld [vmem:[%s6434_s25 + $0xd8] sm:$0xff]  ;;  %v524_v40 = vld [vmem:[%s6434_s25 + $0xe0] sm:$0xff] }
  0x1b   : > { %5705 = vmatprep.mubr.msk.bf16.mxu1 %vm593_vm1, %v570_v24  ;;  %v525_v41 = vld [vmem:[%s6434_s25 + $0xe8] sm:$0xff]  ;;  %v510_v42 = vld [vmem:[%s6434_s25 + $0x70] sm:$0xff]  ;;  %v511_v43 = vld [vmem:[%s6434_s25 + $0x78] sm:$0xff]  ;;  %v573_v44 = vpack.c.bf16 %v523_v39, %v522_v38 }
  0x1c   : > { %v574_v45 = vpack.c.bf16 %v525_v41, %v524_v40  ;;  %v567_v46 = vpack.c.bf16 %v511_v43, %v510_v42  ;;  %v526_v47 = vld [vmem:[%s6434_s25 + $0xf0] sm:$0xff]  ;;  %v527_v48 = vld [vmem:[%s6434_s25 + $0xf8] sm:$0xff]  ;;  %v528_v49 = vld [vmem:[%s6434_s25 + $0x100] sm:$0xff] }
  0x1d   : > { %v529_v50 = vld [vmem:[%s6434_s25 + $0x108] sm:$0xff]  ;;  %v575_v51 = vpack.c.bf16 %v527_v48, %v526_v47  ;;  %v530_v53 = vld [vmem:[%s6434_s25 + $0x110] sm:$0xff]  ;;  %v531_v54 = vld [vmem:[%s6434_s25 + $0x118] sm:$0xff] }
  0x1e   : > { %5690 = vmatmul.mubr.msk.bf16.gmra.mrb[4].mxu0 %vm593_vm1, %v563_v23  ;;  %v576_v52 = vpack.c.bf16 %v529_v50, %v528_v49  ;;  %v532_v55 = vld [vmem:[%s6434_s25 + $0x120] sm:$0xff]  ;;  %v533_v56 = vld [vmem:[%s6434_s25 + $0x128] sm:$0xff]  ;;  %v577_v57 = vpack.c.bf16 %v531_v54, %v530_v53  ;;  %v534_v59 = vld [vmem:[%s6434_s25 + $0x130] sm:$0xff] }
  0x1f   : > { %5693 = vmatprep.mubr.msk.bf16.mxu0 %vm593_vm1, %v564_v25  ;;  %v578_v58 = vpack.c.bf16 %v533_v56, %v532_v55  ;;  %v535_v60 = vld [vmem:[%s6434_s25 + $0x138] sm:$0xff]  ;;  %v536_v61 = vld [vmem:[%s6434_s25 + $0x140] sm:$0xff]  ;;  %v537_v62 = vld [vmem:[%s6434_s25 + $0x148] sm:$0xff] }
  0x20   : > { %v579_v63 = vpack.c.bf16 %v535_v60, %v534_v59  ;;  %v580_v0 = vpack.c.bf16 %v537_v62, %v536_v61  ;;  %v538_v1 = vld [vmem:[%s6434_s25 + $0x150] sm:$0xff]  ;;  %v539_v2 = vld [vmem:[%s6434_s25 + $0x158] sm:$0xff]  ;;  %v540_v3 = vld [vmem:[%s6434_s25 + $0x160] sm:$0xff] }
  0x21   : > { %v541_v4 = vld [vmem:[%s6434_s25 + $0x168] sm:$0xff]  ;;  %v581_v5 = vpack.c.bf16 %v539_v2, %v538_v1  ;;  %v542_v7 = vld [vmem:[%s6434_s25 + $0x170] sm:$0xff]  ;;  %v543_v8 = vld [vmem:[%s6434_s25 + $0x178] sm:$0xff] }
  0x22   : > { %5706 = vmatmul.mubr.msk.bf16.gmra.mrb[4].mxu1 %vm593_vm1, %v571_v32  ;;  %v582_v6 = vpack.c.bf16 %v541_v4, %v540_v3  ;;  %v544_v9 = vld [vmem:[%s6434_s25 + $0x180] sm:$0xff]  ;;  %v545_v10 = vld [vmem:[%s6434_s25 + $0x188] sm:$0xff]  ;;  %v583_v11 = vpack.c.bf16 %v543_v8, %v542_v7  ;;  %v546_v13 = vld [vmem:[%s6434_s25 + $0x190] sm:$0xff] }
  0x23   : > { %5709 = vmatprep.mubr.msk.bf16.mxu1 %vm593_vm1, %v572_v35  ;;  %v584_v12 = vpack.c.bf16 %v545_v10, %v544_v9  ;;  %v547_v14 = vld [vmem:[%s6434_s25 + $0x198] sm:$0xff]  ;;  %v548_v15 = vld [vmem:[%s6434_s25 + $0x1a0] sm:$0xff]  ;;  %v549_v16 = vld [vmem:[%s6434_s25 + $0x1a8] sm:$0xff] }
  0x24   : > { %v585_v17 = vpack.c.bf16 %v547_v14, %v546_v13  ;;  %v586_v18 = vpack.c.bf16 %v549_v16, %v548_v15  ;;  %v550_v19 = vld [vmem:[%s6434_s25 + $0x1b0] sm:$0xff]  ;;  %v551_v20 = vld [vmem:[%s6434_s25 + $0x1b8] sm:$0xff]  ;;  %v552_v21 = vld [vmem:[%s6434_s25 + $0x1c0] sm:$0xff] }
  0x25   : > { %v553_v22 = vld [vmem:[%s6434_s25 + $0x1c8] sm:$0xff]  ;;  %v587_v23 = vpack.c.bf16 %v551_v20, %v550_v19  ;;  %v554_v25 = vld [vmem:[%s6434_s25 + $0x1d0] sm:$0xff]  ;;  %v555_v26 = vld [vmem:[%s6434_s25 + $0x1d8] sm:$0xff] }
  0x26   : > { %5694 = vmatmul.mubr.msk.bf16.gmra.mrb[8].mxu0 %vm593_vm1, %v565_v36  ;;  %v588_v24 = vpack.c.bf16 %v553_v22, %v552_v21  ;;  %v556_v27 = vld [vmem:[%s6434_s25 + $0x1e0] sm:$0xff]  ;;  %v557_v28 = vld [vmem:[%s6434_s25 + $0x1e8] sm:$0xff]  ;;  %v589_v29 = vpack.c.bf16 %v555_v26, %v554_v25  ;;  %v558_v31 = vld [vmem:[%s6434_s25 + $0x1f0] sm:$0xff]  ;;  %v11951_v36 = vmov 0.0|0.0  }
  0x27   : > { %5697 = vmatprep.mubr.msk.bf16.mxu0 %vm593_vm1, %v566_v37  ;;  %v590_v30 = vpack.c.bf16 %v557_v28, %v556_v27  ;;  %v559_v32 = vld [vmem:[%s6434_s25 + $0x1f8] sm:$0xff]  ;;  %v1315_v34 = vld [vmem:[%s11946_s11] sm:$0xff]  ;;  %v1316_v35 = vld [vmem:[%s11946_s11 + $0x8] sm:$0xff]  ;;  %5797 = vmatprep.subr.bf16.mxu1 %v11951_v36 }
  0x28   : > { %v591_v33 = vpack.c.bf16 %v559_v32, %v558_v31  ;;  %v6539_v37 = vpack.c.bf16 %v1316_v35, %v1315_v34  ;;  %v1317_v38 = vld [vmem:[%s11946_s11 + $0x10] sm:$0xff]  ;;  %v1318_v39 = vld [vmem:[%s11946_s11 + $0x18] sm:$0xff]  ;;  %v1319_v41 = vld [vmem:[%s11946_s11 + $0x20] sm:$0xff] }
  0x29   : > { %v6549_v40 = vpack.c.bf16 %v1318_v39, %v1317_v38  ;;  %v1320_v42 = vld [vmem:[%s11946_s11 + $0x28] sm:$0xff] }
  0x2a   : > { %5710 = vmatmul.mubr.msk.bf16.gmra.mrb[8].mxu1 %vm593_vm1, %v573_v44  ;;  %v6559_v43 = vpack.c.bf16 %v1320_v42, %v1319_v41 }
  0x2b   : > { %5713 = vmatprep.mubr.msk.bf16.mxu1 %vm593_vm1, %v574_v45  ;;  %5799 = vmatpush3.bf16.msra.mxu1 %v6539_v37 }
  0x2c   : > { %5800 = vmatprep.subr.bf16.mxu1 %v11951_v36 }
  0x2e   : > { %5698 = vmatmul.mubr.msk.bf16.gmra.mrb[12].mxu0 %vm593_vm1, %v567_v46 }
  0x2f   : > { %5802 = vmatpush3.bf16.msra.mxu1 %v6549_v40 }
  0x30   : > { %5803 = vmatprep.subr.bf16.mxu1 %v11951_v36 }
  0x32   : > { %5714 = vmatmul.mubr.msk.bf16.gmra.mrb[12].mxu1 %vm593_vm1, %v575_v51 }
  0x33   : > { %5717 = vmatprep.mubr.msk.bf16.mxu1 %vm593_vm1, %v576_v52  ;;  %5805 = vmatpush3.bf16.msra.mxu1 %v6559_v43 }
  0x34   : > { %5806 = vmatprep.subr.bf16.mxu1 %v11951_v36 }
  0x3a   : > { %5718 = vmatmul.mubr.msk.bf16.gmra.mrb[16].mxu1 %vm593_vm1, %v577_v57 }
  0x3b   : > { %5721 = vmatprep.mubr.msk.bf16.mxu1 %vm593_vm1, %v578_v58 }
  0x42   : > { %5722 = vmatmul.mubr.msk.bf16.gmra.mrb[20].mxu1 %vm593_vm1, %v579_v63 }
  0x43   : > { %5725 = vmatprep.mubr.msk.bf16.mxu1 %vm593_vm1, %v580_v0 }
  0x4a   : > { %5726 = vmatmul.mubr.msk.bf16.gmra.mrb[24].mxu1 %vm593_vm1, %v581_v5 }
  0x4b   : > { %5729 = vmatprep.mubr.msk.bf16.mxu1 %vm593_vm1, %v582_v6 }
  0x52   : > { %5730 = vmatmul.mubr.msk.bf16.gmra.mrb[28].mxu1 %vm593_vm1, %v583_v11 }
  0x53   : > { %5733 = vmatprep.mubr.msk.bf16.mxu1 %vm593_vm1, %v584_v12 }
  0x5a   : > { %5734 = vmatmul.mubr.msk.bf16.gmra.mrb[32].mxu1 %vm593_vm1, %v585_v17 }
  0x5b   : > { %5737 = vmatprep.mubr.msk.bf16.mxu1 %vm593_vm1, %v586_v18 }
  0x62   : > { %5738 = vmatmul.mubr.msk.bf16.gmra.mrb[36].mxu1 %vm593_vm1, %v587_v23 }
  0x63   : > { %5741 = vmatprep.mubr.msk.bf16.mxu1 %vm593_vm1, %v588_v24 }
  0x6a   : > { %5742 = vmatmul.mubr.msk.bf16.gmra.mrb[40].mxu1 %vm593_vm1, %v589_v29 }
  0x6b   : > { %5745 = vmatprep.mubr.msk.bf16.mxu1 %vm593_vm1, %v590_v30 }
  0x72   : > { %5746 = vmatmul.mubr.msk.bf16.gmra.mrb[44].mxu1 %vm593_vm1, %v591_v33 }
  0xe9   : > { %v6563_v44 = vpop.f32.mrb[0].mxu0 }
  0xea   : > { %v6565_v45 = vpop.f32.mrb[1].mxu0  ;;  %v1119_v49 = vmul.f32 %v6563_v44, %v6563_v44  ;;  %v987_v55 = vsel %vm983_vm2, %v6563_v44, 0.0 }
  0xeb   : > { %v1117_v46 = vmul.f32 %v6565_v45, %v6565_v45  ;;  %v6569_v47 = vpop.f32.mrb[2].mxu0  ;;  %v984_v50 = vsel %vm983_vm2, %v6565_v45, 0.0 }
  0xec   : > { %v6571_v48 = vpop.f32.mrb[3].mxu0  ;;  %v1120_v57 = vmul.f32 %v6569_v47, %v6569_v47  ;;  %v1184_v63 = vsel %vm983_vm2, %v1119_v49, 0.0  ;;  %v989_v0 = vsel %vm983_vm2, %v6569_v47, 0.0 }
  0xed   : > { %v985_v51 = vsel %vm983_vm2, %v6571_v48, 0.0  ;;  %v1118_v52 = vmul.f32 %v6571_v48, %v6571_v48  ;;  %v6581_v54 = vpop.f32.mrb[0].mxu1  ;;  %v1181_v56 = vsel %vm983_vm2, %v1117_v46, 0.0 }
  0xee   : > { %v986_v53 = vadd.f32 %v985_v51, %v984_v50  ;;  %v6589_v59 = vpop.f32.mrb[1].mxu1  ;;  %v1186_v6 = vsel %vm983_vm2, %v1120_v57, 0.0 }
  0xef   : > { %v1182_v58 = vsel %vm983_vm2, %v1118_v52, 0.0  ;;  %v6591_v62 = vpop.f32.mrb[2].mxu1 }
  0xf0   : > { %v988_v60 = vadd.f32 %v987_v55, %v986_v53  ;;  %v1183_v61 = vadd.f32 %v1182_v58, %v1181_v56  ;;  %v6598_v2 = vpop.f32.mrb[3].mxu1 }
  0xf1   : > { %v6596_v1 = vpop.f32.mrb[4].mxu0 }
  0xf2   : > { %v1185_v3 = vadd.f32 %v1184_v63, %v1183_v61  ;;  %v6600_v4 = vpop.f32.mrb[5].mxu0  ;;  %v990_v5 = vadd.f32 %v989_v0, %v988_v60  ;;  %v1123_v13 = vmul.f32 %v6596_v1, %v6596_v1  ;;  %v995_v20 = vsel %vm983_vm2, %v6596_v1, 0.0 }
  0xf3   : > { %v991_v7 = vsel %vm983_vm2, %v6600_v4, 0.0  ;;  %v1121_v8 = vmul.f32 %v6600_v4, %v6600_v4  ;;  %v6607_v9 = vpop.f32.mrb[6].mxu0 }
  0xf4   : > { %v992_v10 = vadd.f32 %v991_v7, %v990_v5  ;;  %v1187_v11 = vadd.f32 %v1186_v6, %v1185_v3  ;;  %v6609_v12 = vpop.f32.mrb[7].mxu0  ;;  %v1124_v21 = vmul.f32 %v6607_v9, %v6607_v9  ;;  %v1192_v27 = vsel %vm983_vm2, %v1123_v13, 0.0 }
  0xf5   : > { %v1188_v14 = vsel %vm983_vm2, %v1121_v8, 0.0  ;;  %v993_v15 = vsel %vm983_vm2, %v6609_v12, 0.0  ;;  %v1122_v16 = vmul.f32 %v6609_v12, %v6609_v12  ;;  %v6618_v19 = vpop.f32.mrb[4].mxu1  ;;  %v997_v28 = vsel %vm983_vm2, %v6607_v9, 0.0 }
  0xf6   : > { %v1189_v17 = vadd.f32 %v1188_v14, %v1187_v11  ;;  %v994_v18 = vadd.f32 %v993_v15, %v992_v10  ;;  %v6625_v23 = vpop.f32.mrb[5].mxu1  ;;  %v1194_v34 = vsel %vm983_vm2, %v1124_v21, 0.0 }
  0xf7   : > { %v1190_v22 = vsel %vm983_vm2, %v1122_v16, 0.0  ;;  %v6627_v26 = vpop.f32.mrb[6].mxu1 }
  0xf8   : > { %v996_v24 = vadd.f32 %v995_v20, %v994_v18  ;;  %v1191_v25 = vadd.f32 %v1190_v22, %v1189_v17  ;;  %v6634_v30 = vpop.f32.mrb[7].mxu1 }
  0xf9   : > { %v6632_v29 = vpop.f32.mrb[8].mxu0 }
  0xfa   : > { %v1193_v31 = vadd.f32 %v1192_v27, %v1191_v25  ;;  %v6636_v32 = vpop.f32.mrb[9].mxu0  ;;  %v998_v33 = vadd.f32 %v997_v28, %v996_v24  ;;  %v1127_v49 = vmul.f32 %v6632_v29, %v6632_v29  ;;  %v1003_v57 = vsel %vm983_vm2, %v6632_v29, 0.0 }
  0xfb   : > { %v999_v35 = vsel %vm983_vm2, %v6636_v32, 0.0  ;;  %v1125_v38 = vmul.f32 %v6636_v32, %v6636_v32  ;;  %v6643_v39 = vpop.f32.mrb[10].mxu0 }
  0xfc   : > { %v1000_v41 = vadd.f32 %v999_v35, %v998_v33  ;;  %v1195_v42 = vadd.f32 %v1194_v34, %v1193_v31  ;;  %v6645_v46 = vpop.f32.mrb[11].mxu0  ;;  %v1128_v58 = vmul.f32 %v6643_v39, %v6643_v39  ;;  %v1200_v5 = vsel %vm983_vm2, %v1127_v49, 0.0 }
  0xfd   : > { %v1196_v50 = vsel %vm983_vm2, %v1125_v38, 0.0  ;;  %v1001_v51 = vsel %vm983_vm2, %v6645_v46, 0.0  ;;  %v1126_v52 = vmul.f32 %v6645_v46, %v6645_v46  ;;  %v6654_v56 = vpop.f32.mrb[8].mxu1  ;;  %v1005_v6 = vsel %vm983_vm2, %v6643_v39, 0.0 }
  0xfe   : > { %v1197_v53 = vadd.f32 %v1196_v50, %v1195_v42  ;;  %v1002_v55 = vadd.f32 %v1001_v51, %v1000_v41  ;;  %12305 = vst [vmem:[#allocation2_spill] sm:$0xff] %v6654_v56  ;;  %v6661_v61 = vpop.f32.mrb[9].mxu1  ;;  %v1202_v14 = vsel %vm983_vm2, %v1128_v58, 0.0  ;;  %v1133_v41 = vmul.f32 %v6589_v59, %v6589_v59 }
  0xff   : > { %v1198_v60 = vsel %vm983_vm2, %v1126_v52, 0.0  ;;  %v6663_v3 = vpop.f32.mrb[10].mxu1  ;;  %v1321_v52 = vld [vmem:[%s11946_s11 + $0x30] sm:$0xff]  ;;  %v1015_v58 = vsel %vm983_vm2, %v6589_v59, 0.0 }
 0x100   : > { %v1004_v63 = vadd.f32 %v1003_v57, %v1002_v55  ;;  %v1199_v0 = vadd.f32 %v1198_v60, %v1197_v53  ;;  %12306 = vst [vmem:[#allocation3_spill] sm:$0xff] %v6663_v3  ;;  %v6670_v8 = vpop.f32.mrb[11].mxu1  ;;  %v1322_v53 = vld [vmem:[%s11946_s11 + $0x38] sm:$0xff] }
 0x101   : > { %v6668_v7 = vpop.f32.mrb[12].mxu0 }
 0x102   : > { %v1201_v10 = vadd.f32 %v1200_v5, %v1199_v0  ;;  %v6672_v11 = vpop.f32.mrb[13].mxu0  ;;  %v1006_v13 = vadd.f32 %v1005_v6, %v1004_v63  ;;  %v1131_v22 = vmul.f32 %v6668_v7, %v6668_v7  ;;  %v1011_v34 = vsel %vm983_vm2, %v6668_v7, 0.0 }
 0x103   : > { %v1007_v15 = vsel %vm983_vm2, %v6672_v11, 0.0  ;;  %v1129_v16 = vmul.f32 %v6672_v11, %v6672_v11  ;;  %v6679_v17 = vpop.f32.mrb[14].mxu0  ;;  %v1212_v6 = vsel %vm983_vm2, %v1133_v41, 0.0 }
 0x104   : > { %v1008_v18 = vadd.f32 %v1007_v15, %v1006_v13  ;;  %v1203_v20 = vadd.f32 %v1202_v14, %v1201_v10  ;;  %v6681_v21 = vpop.f32.mrb[15].mxu0  ;;  %v1132_v35 = vmul.f32 %v6679_v17, %v6679_v17  ;;  %v1208_v55 = vsel %vm983_vm2, %v1131_v22, 0.0 }
 0x105   : > { %v1204_v24 = vsel %vm983_vm2, %v1129_v16, 0.0  ;;  %v1009_v25 = vsel %vm983_vm2, %v6681_v21, 0.0  ;;  %v1130_v27 = vmul.f32 %v6681_v21, %v6681_v21  ;;  %v6690_v33 = vpop.f32.mrb[12].mxu1  ;;  %v1013_v57 = vsel %vm983_vm2, %v6679_v17, 0.0 }
 0x106   : > { %v1205_v28 = vadd.f32 %v1204_v24, %v1203_v20  ;;  %v1010_v31 = vadd.f32 %v1009_v25, %v1008_v18  ;;  %12307 = vst [vmem:[#allocation4_spill] sm:$0xff] %v6690_v33  ;;  %v6699_v42 = vpop.f32.mrb[13].mxu1  ;;  %v1210_v5 = vsel %vm983_vm2, %v1132_v35, 0.0  ;;  %v1134_v10 = vmul.f32 %v6598_v2, %v6598_v2 }
 0x107   : > { %v1206_v38 = vsel %vm983_vm2, %v1130_v27, 0.0  ;;  %12308 = vst [vmem:[#allocation5_spill] sm:$0xff] %v6699_v42  ;;  %v6701_v51 = vpop.f32.mrb[14].mxu1  ;;  %v6720_v13 = vpack.c.bf16 %v1322_v53, %v1321_v52  ;;  %v1135_v16 = vmul.f32 %v6581_v54, %v6581_v54  ;;  %v1017_v18 = vsel %vm983_vm2, %v6598_v2, 0.0 }
 0x108   : > { %v1012_v49 = vadd.f32 %v1011_v34, %v1010_v31  ;;  %v1207_v50 = vadd.f32 %v1206_v38, %v1205_v28  ;;  %12309 = vst [vmem:[#allocation6_spill] sm:$0xff] %v6701_v51  ;;  %v6714_v60 = vpop.f32.mrb[15].mxu1  ;;  %v11953_v25 = vmov 0.0   ;;  %v1019_v27 = vsel %vm983_vm2, %v6581_v54, 0.0 }
 0x109   : > { %12310 = vst [vmem:[#allocation7_spill] sm:$0xff] %v6714_v60  ;;  %5808 = vmatpush3.bf16.msra.mxu1 %v6720_v13  ;;  %5765 = vmatprep.mubr.msk.f32.mxu1 %vm6329_vm3, %v11953_v25  ;;  %v1136_v28 = vmul.f32 %v6591_v62, %v6591_v62  ;;  %v1214_v31 = vsel %vm983_vm2, %v1134_v10, 0.0  ;;  %v1137_v34 = vmul.f32 %v6625_v23, %v6625_v23  ;;  %v1021_v52 = vsel %vm983_vm2, %v6591_v62, 0.0 }
 0x10a   : > { %v1209_v63 = vadd.f32 %v1208_v55, %v1207_v50  ;;  %v1014_v0 = vadd.f32 %v1013_v57, %v1012_v49  ;;  %5809 = vmatprep.subr.bf16.mxu1 %v11951_v36  ;;  %v1216_v50 = vsel %vm983_vm2, %v1135_v16, 0.0  ;;  %v1023_v53 = vsel %vm983_vm2, %v6625_v23, 0.0 }
 0x10c   : > { %v1016_v14 = vadd.f32 %v1015_v58, %v1014_v0  ;;  %v1211_v15 = vadd.f32 %v1210_v5, %v1209_v63  ;;  %v1218_v63 = vsel %vm983_vm2, %v1136_v28, 0.0  ;;  %v1220_v0 = vsel %vm983_vm2, %v1137_v34, 0.0 }
 0x10d   : > { %v6727_v24 = vpop.f32.mrb[16].mxu1  ;;  %v1138_v5 = vmul.f32 %v6634_v30, %v6634_v30 }
 0x10e   : > { %v1213_v20 = vadd.f32 %v1212_v6, %v1211_v15  ;;  %v1018_v22 = vadd.f32 %v1017_v18, %v1016_v14  ;;  %12311 = vst [vmem:[#allocation8_spill] sm:$0xff] %v6727_v24  ;;  %v6739_v35 = vpop.f32.mrb[17].mxu1  ;;  %v1139_v14 = vmul.f32 %v6618_v19, %v6618_v19  ;;  %v1025_v15 = vsel %vm983_vm2, %v6634_v30, 0.0 }
 0x10f   : > { %12312 = vst [vmem:[#allocation9_spill] sm:$0xff] %v6739_v35  ;;  %v6741_v49 = vpop.f32.mrb[18].mxu1  ;;  %v1222_v28 = vsel %vm983_vm2, %v1138_v5, 0.0 }
 0x110   : > { %v1020_v38 = vadd.f32 %v1019_v27, %v1018_v22  ;;  %v1215_v41 = vadd.f32 %v1214_v31, %v1213_v20  ;;  %12313 = vst [vmem:[#allocation10_spill] sm:$0xff] %v6741_v49  ;;  %v6748_v55 = vpop.f32.mrb[19].mxu1  ;;  %v1027_v22 = vsel %vm983_vm2, %v6618_v19, 0.0  ;;  %v1140_v27 = vmul.f32 %v6627_v26, %v6627_v26 }
 0x111   : > { %12314 = vst [vmem:[#allocation11_spill] sm:$0xff] %v6748_v55  ;;  %v1141_v31 = vmul.f32 %v6661_v61, %v6661_v61 }
 0x112   : > { %v1217_v57 = vadd.f32 %v1216_v50, %v1215_v41  ;;  %v1022_v58 = vadd.f32 %v1021_v52, %v1020_v38  ;;  %v1224_v52 = vsel %vm983_vm2, %v1139_v14, 0.0  ;;  %v1226_v5 = vsel %vm983_vm2, %v1140_v27, 0.0 }
 0x113   : > { %v1143_v14 = vmul.f32 %v6654_v56, %v6654_v56  ;;  %v1035_v27 = vsel %vm983_vm2, %v6654_v56, 0.0 }
 0x114   : > { %v1024_v6 = vadd.f32 %v1023_v53, %v1022_v58  ;;  %v1219_v10 = vadd.f32 %v1218_v63, %v1217_v57  ;;  %v1029_v53 = vsel %vm983_vm2, %v6627_v26, 0.0  ;;  %v1031_v57 = vsel %vm983_vm2, %v6661_v61, 0.0 }
 0x115   : > { %v6758_v20 = vpop.f32.mrb[20].mxu1 }
 0x116   : > { %v1221_v16 = vadd.f32 %v1220_v0, %v1219_v10  ;;  %v1026_v18 = vadd.f32 %v1025_v15, %v1024_v6  ;;  %12315 = vst [vmem:[#allocation12_spill] sm:$0xff] %v6758_v20  ;;  %v6767_v34 = vpop.f32.mrb[21].mxu1  ;;  %v1228_v6 = vsel %vm983_vm2, %v1141_v31, 0.0  ;;  %v1142_v10 = vmul.f32 %v6670_v8, %v6670_v8 }
 0x117   : > { %12316 = vst [vmem:[#allocation13_spill] sm:$0xff] %v6767_v34  ;;  %v6769_v50 = vpop.f32.mrb[22].mxu1  ;;  %v1144_v31 = vmul.f32 %v6663_v3, %v6663_v3 }
 0x118   : > { %v1028_v38 = vadd.f32 %v1027_v22, %v1026_v18  ;;  %v1223_v41 = vadd.f32 %v1222_v28, %v1221_v16  ;;  %12317 = vst [vmem:[#allocation14_spill] sm:$0xff] %v6769_v50  ;;  %v6776_v58 = vpop.f32.mrb[23].mxu1  ;;  %v1033_v18 = vsel %vm983_vm2, %v6670_v8, 0.0 }
 0x119   : > { %12318 = vst [vmem:[#allocation15_spill] sm:$0xff] %v6776_v58 }
 0x11a   : > { %v1225_v63 = vadd.f32 %v1224_v52, %v1223_v41  ;;  %v1030_v0 = vadd.f32 %v1029_v53, %v1028_v38  ;;  %v1230_v38 = vsel %vm983_vm2, %v1142_v10, 0.0  ;;  %v1145_v41 = vmul.f32 %v6699_v42, %v6699_v42 }
 0x11c   : > { %v1032_v15 = vadd.f32 %v1031_v57, %v1030_v0  ;;  %v1227_v16 = vadd.f32 %v1226_v5, %v1225_v63  ;;  %v1232_v0 = vsel %vm983_vm2, %v1143_v14, 0.0  ;;  %v1037_v5 = vsel %vm983_vm2, %v6663_v3, 0.0 }
 0x11d   : > { %v6786_v36 = vpop.f32.mrb[24].mxu1  ;;  %v1236_v25 = vsel %vm983_vm2, %v1145_v41, 0.0  ;;  %v1147_v14 = vmul.f32 %v6690_v33, %v6690_v33  ;;  %v1148_v41 = vmul.f32 %v6701_v51, %v6701_v51 }
 0x11e   : > { %v1229_v22 = vadd.f32 %v1228_v6, %v1227_v16  ;;  %v1034_v28 = vadd.f32 %v1033_v18, %v1032_v15  ;;  %12319 = vst [vmem:[#allocation16_spill] sm:$0xff] %v6786_v36  ;;  %v6795_v52 = vpop.f32.mrb[25].mxu1  ;;  %v1039_v6 = vsel %vm983_vm2, %v6699_v42, 0.0  ;;  %v1234_v18 = vsel %vm983_vm2, %v1144_v31, 0.0 }
 0x11f   : > { %12320 = vst [vmem:[#allocation17_spill] sm:$0xff] %v6795_v52  ;;  %v6797_v63 = vpop.f32.mrb[26].mxu1  ;;  %v1043_v31 = vsel %vm983_vm2, %v6690_v33, 0.0 }
 0x120   : > { %v1036_v53 = vadd.f32 %v1035_v27, %v1034_v28  ;;  %v1231_v57 = vadd.f32 %v1230_v38, %v1229_v22  ;;  %12321 = vst [vmem:[#allocation18_spill] sm:$0xff] %v6797_v63  ;;  %v6804_v15 = vpop.f32.mrb[27].mxu1  ;;  %v1146_v22 = vmul.f32 %v6714_v60, %v6714_v60  ;;  %v1041_v38 = vsel %vm983_vm2, %v6714_v60, 0.0 }
 0x121   : > { %12322 = vst [vmem:[#allocation19_spill] sm:$0xff] %v6804_v15 }
 0x122   : > { %v1233_v10 = vadd.f32 %v1232_v0, %v1231_v57  ;;  %v1038_v16 = vadd.f32 %v1037_v5, %v1036_v53  ;;  %v1238_v53 = vsel %vm983_vm2, %v1146_v22, 0.0  ;;  %v1149_v57 = vmul.f32 %v6739_v35, %v6739_v35 }
 0x124   : > { %v1040_v28 = vadd.f32 %v1039_v6, %v1038_v16  ;;  %v1235_v27 = vadd.f32 %v1234_v18, %v1233_v10  ;;  %v1045_v16 = vsel %vm983_vm2, %v6701_v51, 0.0  ;;  %v1047_v18 = vsel %vm983_vm2, %v6739_v35, 0.0 }
 0x125   : > { %v6814_v56 = vpop.f32.mrb[28].mxu1  ;;  %v1244_v33 = vsel %vm983_vm2, %v1149_v57, 0.0  ;;  %v1152_v57 = vmul.f32 %v6741_v49, %v6741_v49 }
 0x126   : > { %v1237_v42 = vadd.f32 %v1236_v25, %v1235_v27  ;;  %v1042_v3 = vadd.f32 %v1041_v38, %v1040_v28  ;;  %12323 = vst [vmem:[#allocation20_spill] sm:$0xff] %v6814_v56  ;;  %v6823_v0 = vpop.f32.mrb[29].mxu1  ;;  %v1240_v25 = vsel %vm983_vm2, %v1147_v14, 0.0  ;;  %v1242_v38 = vsel %vm983_vm2, %v1148_v41, 0.0 }
 0x127   : > { %12324 = vst [vmem:[#allocation21_spill] sm:$0xff] %v6823_v0  ;;  %v6825_v10 = vpop.f32.mrb[30].mxu1  ;;  %v1151_v14 = vmul.f32 %v6727_v24, %v6727_v24  ;;  %v1051_v41 = vsel %vm983_vm2, %v6727_v24, 0.0 }
 0x128   : > { %v1044_v5 = vadd.f32 %v1043_v31, %v1042_v3  ;;  %v1239_v6 = vadd.f32 %v1238_v53, %v1237_v42  ;;  %12325 = vst [vmem:[#allocation22_spill] sm:$0xff] %v6825_v10  ;;  %v6832_v28 = vpop.f32.mrb[31].mxu1  ;;  %v1150_v3 = vmul.f32 %v6748_v55, %v6748_v55  ;;  %v1049_v53 = vsel %vm983_vm2, %v6748_v55, 0.0 }
 0x12a   : > { %v1241_v22 = vadd.f32 %v1240_v25, %v1239_v6  ;;  %v1046_v27 = vadd.f32 %v1045_v16, %v1044_v5  ;;  %v1246_v5 = vsel %vm983_vm2, %v1150_v3, 0.0  ;;  %v1153_v6 = vmul.f32 %v6767_v34, %v6767_v34 }
 0x12c   : > { %v1048_v42 = vadd.f32 %v1047_v18, %v1046_v27  ;;  %v1243_v31 = vadd.f32 %v1242_v38, %v1241_v22  ;;  %v1053_v27 = vsel %vm983_vm2, %v6741_v49, 0.0  ;;  %v1055_v38 = vsel %vm983_vm2, %v6767_v34, 0.0 }
 0x12d   : > { %v6842_v60 = vpop.f32.mrb[32].mxu1  ;;  %v1252_v24 = vsel %vm983_vm2, %v1153_v6, 0.0  ;;  %v1156_v6 = vmul.f32 %v6769_v50, %v6769_v50 }
 0x12e   : > { %v1245_v35 = vadd.f32 %v1244_v33, %v1243_v31  ;;  %v1050_v51 = vadd.f32 %v1049_v53, %v1048_v42  ;;  %v6851_v25 = vpop.f32.mrb[33].mxu1  ;;  %v1248_v33 = vsel %vm983_vm2, %v1151_v14, 0.0  ;;  %v1250_v53 = vsel %vm983_vm2, %v1152_v57, 0.0 }
 0x12f   : > { %12326 = vst [vmem:[#allocation23_spill] sm:$0xff] %v6851_v25  ;;  %v6853_v22 = vpop.f32.mrb[34].mxu1  ;;  %v1155_v14 = vmul.f32 %v6758_v20, %v6758_v20  ;;  %v1059_v57 = vsel %vm983_vm2, %v6758_v20, 0.0 }
 0x130   : > { %v1052_v16 = vadd.f32 %v1051_v41, %v1050_v51  ;;  %v1247_v18 = vadd.f32 %v1246_v5, %v1245_v35  ;;  %v6860_v42 = vpop.f32.mrb[35].mxu1  ;;  %v1154_v51 = vmul.f32 %v6776_v58, %v6776_v58  ;;  %v1057_v5 = vsel %vm983_vm2, %v6776_v58, 0.0 }
 0x132   : > { %v1249_v3 = vadd.f32 %v1248_v33, %v1247_v18  ;;  %v1054_v31 = vadd.f32 %v1053_v27, %v1052_v16  ;;  %v1254_v16 = vsel %vm983_vm2, %v1154_v51, 0.0  ;;  %v1157_v18 = vmul.f32 %v6795_v52, %v6795_v52 }
 0x134   : > { %v1056_v35 = vadd.f32 %v1055_v38, %v1054_v31  ;;  %v1251_v41 = vadd.f32 %v1250_v53, %v1249_v3  ;;  %v1061_v31 = vsel %vm983_vm2, %v6769_v50, 0.0  ;;  %v1063_v53 = vsel %vm983_vm2, %v6795_v52, 0.0 }
 0x135   : > { %v6870_v55 = vpop.f32.mrb[36].mxu1  ;;  %v1260_v20 = vsel %vm983_vm2, %v1157_v18, 0.0  ;;  %v1160_v18 = vmul.f32 %v6797_v63, %v6797_v63 }
 0x136   : > { %v1253_v34 = vadd.f32 %v1252_v24, %v1251_v41  ;;  %v1058_v49 = vadd.f32 %v1057_v5, %v1056_v35  ;;  %v6879_v33 = vpop.f32.mrb[37].mxu1  ;;  %v1256_v24 = vsel %vm983_vm2, %v1155_v14, 0.0  ;;  %v1258_v5 = vsel %vm983_vm2, %v1156_v6, 0.0 }
 0x137   : > { %v6881_v3 = vpop.f32.mrb[38].mxu1  ;;  %v1159_v14 = vmul.f32 %v6786_v36, %v6786_v36  ;;  %v1067_v6 = vsel %vm983_vm2, %v6786_v36, 0.0 }
 0x138   : > { %v1060_v27 = vadd.f32 %v1059_v57, %v1058_v49  ;;  %v1255_v38 = vadd.f32 %v1254_v16, %v1253_v34  ;;  %v6888_v35 = vpop.f32.mrb[39].mxu1  ;;  %v1158_v49 = vmul.f32 %v6804_v15, %v6804_v15  ;;  %v1065_v16 = vsel %vm983_vm2, %v6804_v15, 0.0 }
 0x13a   : > { %v1257_v51 = vadd.f32 %v1256_v24, %v1255_v38  ;;  %v1062_v41 = vadd.f32 %v1061_v31, %v1060_v27  ;;  %v1262_v27 = vsel %vm983_vm2, %v1158_v49, 0.0  ;;  %v1161_v38 = vmul.f32 %v6823_v0, %v6823_v0 }
 0x13c   : > { %v1064_v34 = vadd.f32 %v1063_v53, %v1062_v41  ;;  %v1259_v57 = vadd.f32 %v1258_v5, %v1257_v51  ;;  %v1069_v41 = vsel %vm983_vm2, %v6797_v63, 0.0  ;;  %v1071_v5 = vsel %vm983_vm2, %v6823_v0, 0.0 }
 0x13d   : > { %v6898_v58 = vpop.f32.mrb[40].mxu1  ;;  %v1268_v36 = vsel %vm983_vm2, %v1161_v38, 0.0  ;;  %v1164_v38 = vmul.f32 %v6825_v10, %v6825_v10 }
 0x13e   : > { %v1261_v52 = vadd.f32 %v1260_v20, %v1259_v57  ;;  %v1066_v50 = vadd.f32 %v1065_v16, %v1064_v34  ;;  %v6907_v24 = vpop.f32.mrb[41].mxu1  ;;  %v1264_v20 = vsel %vm983_vm2, %v1159_v14, 0.0  ;;  %v1266_v16 = vsel %vm983_vm2, %v1160_v18, 0.0 }
 0x13f   : > { %v6909_v51 = vpop.f32.mrb[42].mxu1  ;;  %v1163_v14 = vmul.f32 %v6814_v56, %v6814_v56  ;;  %v1075_v18 = vsel %vm983_vm2, %v6814_v56, 0.0 }
 0x140   : > { %v1068_v31 = vadd.f32 %v1067_v6, %v1066_v50  ;;  %v1263_v53 = vadd.f32 %v1262_v27, %v1261_v52  ;;  %v6916_v34 = vpop.f32.mrb[43].mxu1  ;;  %v1162_v50 = vmul.f32 %v6832_v28, %v6832_v28  ;;  %v1073_v27 = vsel %vm983_vm2, %v6832_v28, 0.0 }
 0x142   : > { %v1265_v49 = vadd.f32 %v1264_v20, %v1263_v53  ;;  %v1070_v57 = vadd.f32 %v1069_v41, %v1068_v31  ;;  %v1270_v31 = vsel %vm983_vm2, %v1162_v50, 0.0  ;;  %v1165_v53 = vmul.f32 %v6851_v25, %v6851_v25 }
 0x144   : > { %v1072_v52 = vadd.f32 %v1071_v5, %v1070_v57  ;;  %v1267_v6 = vadd.f32 %v1266_v16, %v1265_v49  ;;  %v1077_v57 = vsel %vm983_vm2, %v6825_v10, 0.0  ;;  %v1079_v16 = vsel %vm983_vm2, %v6851_v25, 0.0 }
 0x145   : > { %v6926_v15 = vpop.f32.mrb[44].mxu1  ;;  %v1276_v56 = vsel %vm983_vm2, %v1165_v53, 0.0 }
 0x146   : > { %v1269_v0 = vadd.f32 %v1268_v36, %v1267_v6  ;;  %v1074_v63 = vadd.f32 %v1073_v27, %v1072_v52  ;;  %12327 = vst [vmem:[#allocation24_spill] sm:$0xff] %v6926_v15  ;;  %v6935_v20 = vpop.f32.mrb[45].mxu1  ;;  %v1272_v36 = vsel %vm983_vm2, %v1163_v14, 0.0  ;;  %v1274_v27 = vsel %vm983_vm2, %v1164_v38, 0.0 }
 0x147   : > { %v6937_v49 = vpop.f32.mrb[46].mxu1  ;;  %v1167_v14 = vmul.f32 %v6842_v60, %v6842_v60  ;;  %v1168_v38 = vmul.f32 %v6853_v22, %v6853_v22 }
 0x148   : > { %v1076_v41 = vadd.f32 %v1075_v18, %v1074_v63  ;;  %v1271_v5 = vadd.f32 %v1270_v31, %v1269_v0  ;;  %v6944_v52 = vpop.f32.mrb[47].mxu1  ;;  %v1166_v63 = vmul.f32 %v6860_v42, %v6860_v42  ;;  %v1081_v31 = vsel %vm983_vm2, %v6860_v42, 0.0 }
 0x149   : > { %12328 = vst [vmem:[#allocation25_spill] sm:$0xff] %v6944_v52 }
 0x14a   : > { %v1273_v50 = vadd.f32 %v1272_v36, %v1271_v5  ;;  %v1078_v6 = vadd.f32 %v1077_v57, %v1076_v41  ;;  %v1083_v41 = vsel %vm983_vm2, %v6842_v60, 0.0  ;;  %v1278_v53 = vsel %vm983_vm2, %v1166_v63, 0.0 }
 0x14b   : > { %v1169_v5 = vmul.f32 %v6879_v33, %v6879_v33  ;;  %v1170_v63 = vmul.f32 %v6888_v35, %v6888_v35 }
 0x14c   : > { %v1080_v0 = vadd.f32 %v1079_v16, %v1078_v6  ;;  %v1275_v18 = vadd.f32 %v1274_v27, %v1273_v50  ;;  %v1280_v16 = vsel %vm983_vm2, %v1167_v14, 0.0  ;;  %v1085_v50 = vsel %vm983_vm2, %v6853_v22, 0.0 }
 0x14d   : > { %v1089_v14 = vsel %vm983_vm2, %v6888_v35, 0.0 }
 0x14e   : > { %v1277_v25 = vadd.f32 %v1276_v56, %v1275_v18  ;;  %v1082_v10 = vadd.f32 %v1081_v31, %v1080_v0  ;;  %v1087_v56 = vsel %vm983_vm2, %v6879_v33, 0.0  ;;  %v1282_v0 = vsel %vm983_vm2, %v1168_v38, 0.0 }
 0x14f   : > { %v1284_v18 = vsel %vm983_vm2, %v1169_v5, 0.0  ;;  %v1172_v38 = vmul.f32 %v6881_v3, %v6881_v3  ;;  %v1286_v5 = vsel %vm983_vm2, %v1170_v63, 0.0  ;;  %v1174_v63 = vmul.f32 %v6916_v34, %v6916_v34 }
 0x150   : > { %v1084_v36 = vadd.f32 %v1083_v41, %v1082_v10  ;;  %v1279_v57 = vadd.f32 %v1278_v53, %v1277_v25  ;;  %v1171_v25 = vmul.f32 %v6870_v55, %v6870_v55 }
 0x152   : > { %v1281_v6 = vadd.f32 %v1280_v16, %v1279_v57  ;;  %v1086_v27 = vadd.f32 %v1085_v50, %v1084_v36  ;;  %v1091_v36 = vsel %vm983_vm2, %v6870_v55, 0.0  ;;  %v1173_v57 = vmul.f32 %v6907_v24, %v6907_v24 }
 0x154   : > { %v1088_v31 = vadd.f32 %v1087_v56, %v1086_v27  ;;  %v1283_v10 = vadd.f32 %v1282_v0, %v1281_v6  ;;  %v1288_v56 = vsel %vm983_vm2, %v1171_v25, 0.0  ;;  %v1093_v6 = vsel %vm983_vm2, %v6881_v3, 0.0 }
 0x155   : > { %v1095_v27 = vsel %vm983_vm2, %v6907_v24, 0.0  ;;  %v1175_v25 = vmul.f32 %v6898_v58, %v6898_v58 }
 0x156   : > { %v1285_v41 = vadd.f32 %v1284_v18, %v1283_v10  ;;  %v1090_v53 = vadd.f32 %v1089_v14, %v1088_v31  ;;  %v1290_v31 = vsel %vm983_vm2, %v1172_v38, 0.0  ;;  %v1292_v10 = vsel %vm983_vm2, %v1173_v57, 0.0 }
 0x157   : > { %v1176_v38 = vmul.f32 %v6909_v51, %v6909_v51  ;;  %v1294_v57 = vsel %vm983_vm2, %v1174_v63, 0.0  ;;  %v1178_v63 = vmul.f32 %v6944_v52, %v6944_v52 }
 0x158   : > { %v1092_v16 = vadd.f32 %v1091_v36, %v1090_v53  ;;  %v1287_v50 = vadd.f32 %v1286_v5, %v1285_v41  ;;  %v1097_v41 = vsel %vm983_vm2, %v6916_v34, 0.0 }
 0x15a   : > { %v1289_v0 = vadd.f32 %v1288_v56, %v1287_v50  ;;  %v1094_v18 = vadd.f32 %v1093_v6, %v1092_v16  ;;  %v1099_v16 = vsel %vm983_vm2, %v6898_v58, 0.0  ;;  %v1177_v50 = vmul.f32 %v6935_v20, %v6935_v20 }
 0x15c   : > { %v1096_v14 = vadd.f32 %v1095_v27, %v1094_v18  ;;  %v1291_v53 = vadd.f32 %v1290_v31, %v1289_v0  ;;  %v1296_v27 = vsel %vm983_vm2, %v1175_v25, 0.0  ;;  %v1101_v0 = vsel %vm983_vm2, %v6909_v51, 0.0 }
 0x15d   : > { %v1103_v18 = vsel %vm983_vm2, %v6935_v20, 0.0  ;;  %v1179_v25 = vmul.f32 %v6926_v15, %v6926_v15 }
 0x15e   : > { %v1293_v36 = vadd.f32 %v1292_v10, %v1291_v53  ;;  %v1098_v5 = vadd.f32 %v1097_v41, %v1096_v14  ;;  %v1298_v14 = vsel %vm983_vm2, %v1176_v38, 0.0  ;;  %v1300_v53 = vsel %vm983_vm2, %v1177_v50, 0.0 }
 0x15f   : > { %v1180_v38 = vmul.f32 %v6937_v49, %v6937_v49  ;;  %v1302_v50 = vsel %vm983_vm2, %v1178_v63, 0.0  ;;  %v7026_v63 = vld [vmem:[%s11937_s2] sm:$0x1] }
 0x160   : > { %v1100_v56 = vadd.f32 %v1099_v16, %v1098_v5  ;;  %v1295_v6 = vadd.f32 %v1294_v57, %v1293_v36  ;;  %v1105_v36 = vsel %vm983_vm2, %v6944_v52, 0.0 }
 0x162   : > { %v1297_v31 = vadd.f32 %v1296_v27, %v1295_v6  ;;  %v1102_v10 = vadd.f32 %v1101_v0, %v1100_v56  ;;  %v1107_v56 = vsel %vm983_vm2, %v6926_v15, 0.0  ;;  %v1304_v0 = vsel %vm983_vm2, %v1179_v25, 0.0 }
 0x164   : > { %v1104_v41 = vadd.f32 %v1103_v18, %v1102_v10  ;;  %v1299_v5 = vadd.f32 %v1298_v14, %v1297_v31  ;;  %v1109_v18 = vsel %vm983_vm2, %v6937_v49, 0.0  ;;  %v1306_v14 = vsel %vm983_vm2, %v1180_v38, 0.0 }
 0x166   : > { %v1301_v16 = vadd.f32 %v1300_v53, %v1299_v5  ;;  %v1106_v57 = vadd.f32 %v1105_v36, %v1104_v41 }
 0x168   : > { %v1108_v6 = vadd.f32 %v1107_v56, %v1106_v57  ;;  %v1303_v27 = vadd.f32 %v1302_v50, %v1301_v16  ;;  %v1326_v50 = vmul.f32 512.0, %v7026_v63 }
 0x16a   : > { %v1110_v31 = vadd.f32 %v1109_v18, %v1108_v6  ;;  %v1305_v10 = vadd.f32 %v1304_v0, %v1303_v27  ;;  %v1328_v6 = vmul.f32 2.0, %v7026_v63 }
 0x16c   : > { %v1111_v53 = vrot.slane %v1110_v31, 4  ;;  %v1307_v41 = vadd.f32 %v1306_v14, %v1305_v10  ;;  %v12329_v14 = vmov 0.0  }
 0x16e   : > { %v1112_v5 = vadd.f32 %v1111_v53, %v1110_v31  ;;  %v1308_v36 = vrot.slane %v1307_v41, 4 }
 0x170   : > { %v1113_v15 = vrot.slane %v1112_v5, 2  ;;  %v1309_v52 = vadd.f32 %v1308_v36, %v1307_v41 }
 0x172   : > { %v1114_v16 = vadd.f32 %v1113_v15, %v1112_v5  ;;  %v1310_v25 = vrot.slane %v1309_v52, 2  ;;  %v12330_v15 = vmov 0.0|0.0  }
 0x174   : > { %v1115_v57 = vrot.slane %v1114_v16, 1  ;;  %v1311_v56 = vadd.f32 %v1310_v25, %v1309_v52  ;;  %v1331_v52 = vmul.f32 %v7026_v63, %v7026_v63 }
 0x176   : > { %v1116_v38 = vadd.f32 %v1115_v57, %v1114_v16  ;;  %v1312_v27 = vrot.slane %v1311_v56, 1  ;;  %v1332_v53 = vmul.f32 512.0, %v1331_v52  ;;  %v5912_v52 = vld [vmem:[%s11940_s5 + $0x24] ss:$8 sps:$4 sm:$0xff]  }
 0x178   : > { %v1327_v0 = vadd.f32 %v1326_v50, %v1116_v38  ;;  %v1313_v18 = vadd.f32 %v1312_v27, %v1311_v56  ;;  %v1329_v31 = vmul.f32 %v1328_v6, %v1116_v38  ;;  %v5906_v27 = vld [vmem:[%s11940_s5 + $0x4] ss:$8 sps:$4 sm:$0xff]  }
 0x17a   : > { %5766 = vmatmul.mubr.msk.f32.vlgmr.msra.gmra.mrb[48].mxu1 %vm983_vm2, %v1327_v0  ;;  %v1330_v10 = vadd.f32 %v1329_v31, %v1313_v18  ;;  %v5904_v0 = vld [vmem:[%s11940_s5] ss:$8 sps:$4 sm:$0xff]   ;;  %v1638_v18 = vlaneseq  ;;  %v5909_v31 = vld [vmem:[%s11940_s5 + $0x14] ss:$8 sps:$4 sm:$0xff]  }
 0x17b   : > { %5811 = vmatpush3.bf16.msra.mxu1 %v6539_v37  ;;  %5784 = vmatprep.mubr.msk.f32.mxu1 %vm6329_vm3, %v12329_v14 }
 0x17c   : > { %5812 = vmatprep.subr.bf16.mxu1 %v12330_v15  ;;  %v1333_v37 = vadd.f32 %v1332_v53, %v1330_v10  ;;  %v5907_v10 = vld [vmem:[%s11940_s5 + $0x10] ss:$8 sps:$4 sm:$0xff]   ;;  %v1324_v53 = vld [vmem:[%s11938_s3] sm:$0x1] }
 0x17f   : > { %5814 = vmatpush3.bf16.msra.mxu1 %v6549_v40  ;;  %v1323_v40 = vld [vmem:[%s11947_s12] sm:$0xff] }
 0x180   : > { %5815 = vmatprep.subr.bf16.mxu1 %v12330_v15 }
 0x183   : > { %5817 = vmatpush3.bf16.msra.mxu1 %v6559_v43 }
 0x184   : > { %5818 = vmatprep.subr.bf16.mxu1 %v12330_v15  ;;  %v7066_v15 = vshrl.u32 %v1638_v18, 7 }
 0x186   : > { %12331 = vst [vmem:[#allocation26_spill] sm:$0xff] %v7066_v15 }
 0x187   : > { %5820 = vmatpush3.bf16.msra.mxu1 %v6720_v13 }
 0x188   : > { %5787 = vmatprep.subr.mxu1 %v12329_v14 }
 0x18a   : > { %5785 = vmatmul.mubr.msk.f32.vlgmr.msra.gmra.mrb[50].mxu1 %vm983_vm2, %v1333_v37  ;;  %v5910_v37 = vld [vmem:[%s11940_s5 + $0x20] ss:$8 sps:$4 sm:$0xff]  }
 0x18b   : > { %5789 = vmatprep.mubr.msk.f32.mxu1 %vm6329_vm3, %v12329_v14  ;;  %5788 = vmatpush3.msra.mxu1 %v1323_v40 }
 0x18c   : > { %5792 = vmatprep.subr.mxu1 %v12329_v14 }
 0x24d   : > { %v1403_v43 = vpop.f32.mrb[48].mxu1 }
 0x24e   : > { %v1481_v41 = vmul.f32 0.00024414063, %v1403_v43  ;;  %v5767_v5 = vpop.f32.mrb[49].mxu1 }
 0x250   : > { %5790 = vmatmul.mubr.msk.f32.vlgmr.msra.gmra.mrb[52].mxu1 %vm1487_vm4, %v1481_v41  ;;  %v1483_v36 = vmul.f32 %v1481_v41, %v1481_v41 }
 0x251   : > { %5793 = vmatpush3.msra.mxu1 %v1323_v40  ;;  %5794 = vmatprep.mubr.msk.f32.mxu1 %vm6329_vm3, %v12329_v14  ;;  %v7078_v40 = vsub.s32 0, %v7066_v15  ;;  %v12349_v14 = vld [vmem:[#allocation17_spill] sm:$0xff]  ;;  %v12353_v15 = vld [vmem:[#allocation16_spill] sm:$0xff] }
 0x252   : > { %2272 = vmatprep.subr.bf16.mxu1 %v5906_v27 }
 0x253   : > { %12332 = vst [vmem:[#allocation27_spill] sm:$0xff] %v7078_v40 }
 0x25d   : > { %v1476_v13 = vpop.f32.mrb[50].mxu1 }
 0x25e   : > { %v1482_v16 = vmul.f32 0.00024414063, %v1476_v13  ;;  %v5786_v25 = vpop.f32.mrb[51].mxu1 }
 0x25f   : > { %v5913_v25 = vld [vmem:[%s11940_s5 + $0x30] ss:$8 sps:$4 sm:$0xff]  }
 0x260   : > { %v1484_v57 = vsub.f32 %v1482_v16, %v1483_v36  ;;  %v5915_v36 = vld [vmem:[%s11940_s5 + $0x34] ss:$8 sps:$4 sm:$0xff]   ;;  %v1325_v16 = vld [vmem:[%s11939_s4] sm:$0x1] }
 0x262   : > { %v1485_v56 = vadd.f32 1e-05, %v1484_v57 }
 0x264   : > { %5932 = vrsqrt.f32 %v1485_v56 }
 0x26e   : > { %v5933_v50 = vpop.eup %5932 }
 0x26f   : > { %5795 = vmatmul.mubr.msk.f32.vlgmr.msra.gmra.mrb[54].mxu1 %vm1487_vm4, %v5933_v50 }
 0x270   : > { %2273 = vmatpush1.bf16.msra.mxu1 %v5904_v0 }
 0x271   : > { %2274 = vmatprep.subr.bf16.mxu1 %v5909_v31 }
 0x274   : > { %2275 = vmatpush1.bf16.msra.mxu1 %v5907_v10  ;;  %v12333_v10 = vld [vmem:[#allocation2_spill] sm:$0xff] }
 0x275   : > { %2276 = vmatprep.subr.bf16.mxu1 %v5912_v52  ;;  %v12334_v52 = vld [vmem:[#allocation3_spill] sm:$0xff] }
 0x278   : > { %2277 = vmatpush1.bf16.msra.mxu1 %v5910_v37  ;;  %v12336_v37 = vld [vmem:[#allocation7_spill] sm:$0xff] }
 0x279   : > { %2278 = vmatprep.subr.bf16.mxu1 %v5915_v36 }
 0x27c   : > { %2279 = vmatpush1.bf16.msra.mxu1 %v5913_v25 }
 0x323   : > { %v1557_v6 = vpop.f32.mrb[52].mxu1 }
 0x324   : > { %v5791_v38 = vpop.f32.mrb[53].mxu1  ;;  %v1635_v41 = vsub.f32 %v7026_v63, %v1557_v6  ;;  %v11979_v63 = vmov 0  }
 0x325   : > { %2304 = vmatprep.mubr.bf16.mxu1 %v11979_v63  ;;  %v12348_v63 = vld [vmem:[#allocation14_spill] sm:$0xff] }
 0x342   : > { %v1630_v43 = vpop.f32.mrb[54].mxu1 }
 0x343   : > { %v1634_v5 = vmul.f32 %v1630_v43, %v1324_v53  ;;  %v5796_v13 = vpop.f32.mrb[55].mxu1  ;;  %v12335_v53 = vld [vmem:[#allocation5_spill] sm:$0xff]  ;;  %v12337_v43 = vld [vmem:[#allocation4_spill] sm:$0xff] }
 0x344   : > { %v12339_v13 = vld [vmem:[#allocation9_spill] sm:$0xff] }
 0x345   : > { %v1636_v57 = vmul.f32 %v1635_v41, %v1634_v5  ;;  %v7091_v56 = vrot.slane %v1634_v5, %v7078_v40  ;;  %v12338_v41 = vld [vmem:[#allocation6_spill] sm:$0xff] }
 0x347   : > { %v1637_v50 = vadd.f32 %v1636_v57, %v1325_v16  ;;  %v7096_v6 = vmul.f32 %v7091_v56, %v6565_v45  ;;  %v7100_v38 = vmul.f32 %v7091_v56, %v6571_v48  ;;  %v7104_v27 = vmul.f32 %v6563_v44, %v7091_v56  ;;  %v12340_v16 = vld [vmem:[#allocation11_spill] sm:$0xff]  ;;  %v12341_v57 = vld [vmem:[#allocation8_spill] sm:$0xff] }
 0x348   : > { %v7108_v0 = vmul.f32 %v6569_v47, %v7091_v56  ;;  %v7112_v18 = vmul.f32 %v7091_v56, %v6600_v4  ;;  %v7116_v45 = vmul.f32 %v7091_v56, %v6609_v12  ;;  %v7120_v48 = vmul.f32 %v6596_v1, %v7091_v56 }
 0x349   : > { %v7123_v31 = vrot.slane %v1637_v50, %v7078_v40  ;;  %v7127_v44 = vmul.f32 %v6607_v9, %v7091_v56  ;;  %v7131_v47 = vmul.f32 %v7091_v56, %v6636_v32  ;;  %v7135_v4 = vmul.f32 %v7091_v56, %v6645_v46  ;;  %v12351_v40 = vld [vmem:[#allocation19_spill] sm:$0xff] }
 0x34a   : > { %v7139_v12 = vmul.f32 %v6632_v29, %v7091_v56  ;;  %v7143_v1 = vmul.f32 %v6643_v39, %v7091_v56  ;;  %v7147_v9 = vmul.f32 %v7091_v56, %v6672_v11  ;;  %v7151_v32 = vmul.f32 %v7091_v56, %v6681_v21 }
 0x34b   : > { %v7155_v46 = vmul.f32 %v6668_v7, %v7091_v56  ;;  %v7159_v29 = vmul.f32 %v6679_v17, %v7091_v56  ;;  %v7163_v39 = vmul.f32 %v7091_v56, %v6589_v59  ;;  %v7167_v11 = vmul.f32 %v7091_v56, %v6598_v2 }
 0x34c   : > { %v7171_v21 = vmul.f32 %v6581_v54, %v7091_v56  ;;  %v7175_v7 = vmul.f32 %v6591_v62, %v7091_v56  ;;  %v7179_v17 = vmul.f32 %v7091_v56, %v6625_v23  ;;  %v7183_v59 = vmul.f32 %v7091_v56, %v6634_v30 }
 0x34d   : > { %v7187_v2 = vmul.f32 %v6618_v19, %v7091_v56  ;;  %v7191_v54 = vmul.f32 %v6627_v26, %v7091_v56  ;;  %v7195_v62 = vmul.f32 %v7091_v56, %v6661_v61  ;;  %v7199_v23 = vmul.f32 %v7091_v56, %v6670_v8 }
 0x34e   : > { %v7203_v30 = vmul.f32 %v12333_v10, %v7091_v56  ;;  %v7207_v19 = vmul.f32 %v12334_v52, %v7091_v56  ;;  %v7211_v26 = vmul.f32 %v7091_v56, %v12335_v53  ;;  %v7215_v61 = vmul.f32 %v7091_v56, %v12336_v37  ;;  %v12342_v10 = vld [vmem:[#allocation10_spill] sm:$0xff]  ;;  %v12343_v53 = vld [vmem:[#allocation13_spill] sm:$0xff] }
 0x34f   : > { %v7219_v8 = vmul.f32 %v12337_v43, %v7091_v56  ;;  %v7223_v5 = vmul.f32 %v12338_v41, %v7091_v56  ;;  %v7227_v36 = vmul.f32 %v7091_v56, %v12339_v13  ;;  %v7231_v25 = vmul.f32 %v7091_v56, %v12340_v16  ;;  %v12344_v43 = vld [vmem:[#allocation15_spill] sm:$0xff]  ;;  %v12346_v13 = vld [vmem:[#allocation12_spill] sm:$0xff] }
 0x350   : > { %v7235_v50 = vmul.f32 %v12341_v57, %v7091_v56  ;;  %v7239_v52 = vmul.f32 %v12342_v10, %v7091_v56  ;;  %v7243_v37 = vmul.f32 %v7091_v56, %v12343_v53  ;;  %v7247_v41 = vmul.f32 %v7091_v56, %v12344_v43 }
 0x351   : > { %v7251_v16 = vmul.f32 %v12346_v13, %v7091_v56  ;;  %v7255_v57 = vmul.f32 %v12348_v63, %v7091_v56  ;;  %v7259_v10 = vmul.f32 %v7091_v56, %v12349_v14  ;;  %v7263_v53 = vmul.f32 %v7091_v56, %v12351_v40 }
 0x352   : > { %12345 = vst [vmem:[#allocation2_spill] sm:$0xff] %v7247_v41  ;;  %v7267_v43 = vmul.f32 %v12353_v15, %v7091_v56  ;;  %v12355_v41 = vld [vmem:[#allocation18_spill] sm:$0xff]  ;;  %v7279_v14 = vmul.f32 %v7091_v56, %v6832_v28  ;;  %v7299_v28 = vmul.f32 %v6842_v60, %v7091_v56  ;;  %v7319_v60 = vmul.f32 %v6881_v3, %v7091_v56 }
 0x353   : > { %12347 = vst [vmem:[#allocation3_spill] sm:$0xff] %v7251_v16  ;;  %12350 = vst [vmem:[#allocation5_spill] sm:$0xff] %v7259_v10  ;;  %v7271_v13 = vmul.f32 %v12355_v41, %v7091_v56  ;;  %v12356_v16 = vld [vmem:[#allocation21_spill] sm:$0xff]  ;;  %v12357_v10 = vld [vmem:[#allocation20_spill] sm:$0xff]  ;;  %v7339_v3 = vmul.f32 %v7091_v56, %v6935_v20  ;;  %v7359_v20 = vadd.f32 %v7123_v31, %v7100_v38 }
 0x354   : > { %12352 = vst [vmem:[#allocation7_spill] sm:$0xff] %v7263_v53  ;;  %12354 = vst [vmem:[#allocation4_spill] sm:$0xff] %v7267_v43  ;;  %v7275_v63 = vmul.f32 %v7091_v56, %v12356_v16  ;;  %v7283_v40 = vmul.f32 %v12357_v10, %v7091_v56  ;;  %v12358_v53 = vld [vmem:[#allocation22_spill] sm:$0xff]  ;;  %v12359_v43 = vld [vmem:[#allocation23_spill] sm:$0xff]  ;;  %v7295_v16 = vmul.f32 %v7091_v56, %v6860_v42 }
 0x355   : > { %v7287_v15 = vmul.f32 %v12358_v53, %v7091_v56  ;;  %v7291_v41 = vmul.f32 %v7091_v56, %v12359_v43  ;;  %v7303_v10 = vmul.f32 %v6853_v22, %v7091_v56  ;;  %v7307_v53 = vmul.f32 %v7091_v56, %v6879_v33  ;;  %12360 = vst [vmem:[#allocation6_spill] sm:$0xff] %v7319_v60  ;;  %v12362_v60 = vld [vmem:[#allocation25_spill] sm:$0xff] }
 0x356   : > { %v7311_v43 = vmul.f32 %v7091_v56, %v6888_v35  ;;  %v7315_v42 = vmul.f32 %v6870_v55, %v7091_v56  ;;  %v7323_v22 = vmul.f32 %v7091_v56, %v6907_v24  ;;  %v7327_v33 = vmul.f32 %v7091_v56, %v6916_v34  ;;  %12364 = vst [vmem:[#allocation11_spill] sm:$0xff] %v7359_v20 }
 0x357   : > { %v7331_v35 = vmul.f32 %v6898_v58, %v7091_v56  ;;  %v7335_v55 = vmul.f32 %v6909_v51, %v7091_v56  ;;  %v7343_v24 = vmul.f32 %v7091_v56, %v12362_v60  ;;  %v7351_v58 = vmul.f32 %v6937_v49, %v7091_v56 }
 0x358   : > { %12361 = vst [vmem:[#allocation9_spill] sm:$0xff] %v7323_v22  ;;  %v12363_v22 = vld [vmem:[#allocation24_spill] sm:$0xff]  ;;  %v7355_v51 = vadd.f32 %v7123_v31, %v7096_v6  ;;  %v7363_v60 = vadd.f32 %v7123_v31, %v7104_v27  ;;  %v7371_v49 = vadd.f32 %v7123_v31, %v7112_v18  ;;  %v7379_v6 = vadd.f32 %v7123_v31, %v7120_v48 }
 0x359   : > { %v7347_v34 = vmul.f32 %v12363_v22, %v7091_v56  ;;  %v7367_v22 = vadd.f32 %v7123_v31, %v7108_v0  ;;  %v7375_v56 = vadd.f32 %v7123_v31, %v7116_v45  ;;  %v7383_v38 = vadd.f32 %v7123_v31, %v7127_v44 }
 0x35a   : > { %12365 = vst [vmem:[#allocation8_spill] sm:$0xff] %v7363_v60  ;;  %12368 = vst [vmem:[#allocation15_spill] sm:$0xff] %v7379_v6  ;;  %v7387_v27 = vadd.f32 %v7123_v31, %v7131_v47  ;;  %v7391_v0 = vadd.f32 %v7123_v31, %v7135_v4  ;;  %v7395_v18 = vadd.f32 %v7123_v31, %v7139_v12 }
 0x35b   : > { %12366 = vst [vmem:[#allocation10_spill] sm:$0xff] %v7367_v22  ;;  %12367 = vst [vmem:[#allocation13_spill] sm:$0xff] %v7375_v56  ;;  %v7399_v45 = vadd.f32 %v7123_v31, %v7143_v1  ;;  %v7403_v48 = vadd.f32 %v7123_v31, %v7147_v9  ;;  %v7407_v44 = vadd.f32 %v7123_v31, %v7151_v32 }
 0x35c   : > { %12369 = vst [vmem:[#allocation12_spill] sm:$0xff] %v7387_v27  ;;  %12370 = vst [vmem:[#allocation14_spill] sm:$0xff] %v7391_v0  ;;  %v7411_v47 = vadd.f32 %v7123_v31, %v7155_v46  ;;  %v7415_v4 = vadd.f32 %v7123_v31, %v7159_v29  ;;  %v7419_v12 = vadd.f32 %v7123_v31, %v7163_v39 }
 0x35d   : > { %12371 = vst [vmem:[#allocation17_spill] sm:$0xff] %v7399_v45  ;;  %12372 = vst [vmem:[#allocation19_spill] sm:$0xff] %v7403_v48  ;;  %v7423_v1 = vadd.f32 %v7123_v31, %v7167_v11  ;;  %v7427_v9 = vadd.f32 %v7123_v31, %v7171_v21  ;;  %v7431_v32 = vadd.f32 %v7123_v31, %v7175_v7 }
 0x35e   : > { %12373 = vst [vmem:[#allocation16_spill] sm:$0xff] %v7407_v44  ;;  %12374 = vst [vmem:[#allocation18_spill] sm:$0xff] %v7411_v47  ;;  %v7435_v46 = vadd.f32 %v7123_v31, %v7179_v17  ;;  %v7439_v29 = vadd.f32 %v7123_v31, %v7183_v59  ;;  %v7443_v39 = vadd.f32 %v7123_v31, %v7187_v2 }
 0x35f   : > { %12375 = vst [vmem:[#allocation21_spill] sm:$0xff] %v7415_v4  ;;  %12376 = vst [vmem:[#allocation20_spill] sm:$0xff] %v7419_v12  ;;  %v7447_v11 = vadd.f32 %v7123_v31, %v7191_v54  ;;  %v7451_v21 = vadd.f32 %v7123_v31, %v7195_v62  ;;  %v7455_v7 = vadd.f32 %v7123_v31, %v7199_v23 }
 0x360   : > { %12377 = vst [vmem:[#allocation22_spill] sm:$0xff] %v7423_v1  ;;  %12378 = vst [vmem:[#allocation23_spill] sm:$0xff] %v7427_v9  ;;  %v7459_v17 = vadd.f32 %v7123_v31, %v7203_v30  ;;  %v7463_v59 = vadd.f32 %v7123_v31, %v7207_v19  ;;  %v7467_v2 = vadd.f32 %v7123_v31, %v7211_v26 }
 0x361   : > { %12379 = vst [vmem:[#allocation25_spill] sm:$0xff] %v7431_v32  ;;  %12380 = vst [vmem:[#allocation24_spill] sm:$0xff] %v7435_v46  ;;  %v7471_v54 = vadd.f32 %v7123_v31, %v7215_v61  ;;  %v7475_v62 = vadd.f32 %v7123_v31, %v7219_v8  ;;  %v7479_v23 = vadd.f32 %v7123_v31, %v7223_v5  ;;  %v12396_v5 = vld [vmem:[#allocation2_spill] sm:$0xff] }
 0x362   : > { %12381 = vst [vmem:[#allocation28_spill] sm:$0xff] %v7439_v29  ;;  %12382 = vst [vmem:[#allocation29_spill] sm:$0xff] %v7443_v39  ;;  %v7483_v30 = vadd.f32 %v7123_v31, %v7227_v36  ;;  %v7487_v19 = vadd.f32 %v7123_v31, %v7231_v25  ;;  %v7491_v26 = vadd.f32 %v7123_v31, %v7235_v50 }
 0x363   : > { %12383 = vst [vmem:[#allocation30_spill] sm:$0xff] %v7447_v11  ;;  %12384 = vst [vmem:[#allocation31_spill] sm:$0xff] %v7451_v21  ;;  %v7495_v61 = vadd.f32 %v7123_v31, %v7239_v52  ;;  %v7499_v8 = vadd.f32 %v7123_v31, %v7243_v37  ;;  %v7503_v36 = vadd.f32 %v7123_v31, %v12396_v5 }
 0x364   : > { %12385 = vst [vmem:[#allocation32_spill] sm:$0xff] %v7455_v7  ;;  %12386 = vst [vmem:[#allocation33_spill] sm:$0xff] %v7459_v17  ;;  %v7511_v50 = vadd.f32 %v7123_v31, %v7255_v57  ;;  %v7531_v57 = vadd.f32 %v7123_v31, %v7275_v63  ;;  %v7551_v63 = vadd.f32 %v7123_v31, %v7295_v16 }
 0x365   : > { %12387 = vst [vmem:[#allocation34_spill] sm:$0xff] %v7463_v59  ;;  %12388 = vst [vmem:[#allocation35_spill] sm:$0xff] %v7467_v2  ;;  %v7571_v16 = vadd.f32 %v7123_v31, %v7315_v42  ;;  %v7591_v42 = vadd.f32 %v7123_v31, %v7335_v55  ;;  %v1777_v55 = vmul.f32 0.5, %v7359_v20  ;;  %v1787_v20 = vmul.f32 0.5, %v7399_v45 }
 0x366   : > { %12389 = vst [vmem:[#allocation36_spill] sm:$0xff] %v7471_v54  ;;  %12390 = vst [vmem:[#allocation37_spill] sm:$0xff] %v7475_v62  ;;  %v7640_v45 = vmul.f32 0.5, %v7427_v9  ;;  %v7661_v9 = vmul.f32 0.5, %v7455_v7  ;;  %v7679_v7 = vmul.f32 0.5, %v7479_v23 }
 0x367   : > { %12391 = vst [vmem:[#allocation38_spill] sm:$0xff] %v7483_v30  ;;  %12392 = vst [vmem:[#allocation39_spill] sm:$0xff] %v7487_v19  ;;  %v12397_v30 = vld [vmem:[#allocation3_spill] sm:$0xff] }
 0x368   : > { %12393 = vst [vmem:[#allocation40_spill] sm:$0xff] %v7491_v26  ;;  %12394 = vst [vmem:[#allocation41_spill] sm:$0xff] %v7495_v61  ;;  %v7507_v25 = vadd.f32 %v7123_v31, %v12397_v30  ;;  %v12400_v26 = vld [vmem:[#allocation5_spill] sm:$0xff]  ;;  %v12402_v61 = vld [vmem:[#allocation7_spill] sm:$0xff]  ;;  %v7527_v30 = vadd.f32 %v7123_v31, %v7271_v13  ;;  %v7547_v13 = vadd.f32 %v7123_v31, %v7291_v41 }
 0x369   : > { %12395 = vst [vmem:[#allocation42_spill] sm:$0xff] %v7499_v8  ;;  %12399 = vst [vmem:[#allocation3_spill] sm:$0xff] %v7511_v50  ;;  %v7515_v52 = vadd.f32 %v7123_v31, %v12400_v26  ;;  %v7519_v37 = vadd.f32 %v7123_v31, %v12402_v61  ;;  %v12404_v8 = vld [vmem:[#allocation4_spill] sm:$0xff]  ;;  %v7535_v26 = vadd.f32 %v7123_v31, %v7279_v14 }
 0x36a   : > { %12398 = vst [vmem:[#allocation2_spill] sm:$0xff] %v7507_v25  ;;  %v7523_v5 = vadd.f32 %v7123_v31, %v12404_v8  ;;  %12406 = vst [vmem:[#allocation43_spill] sm:$0xff] %v7527_v30  ;;  %v7539_v61 = vadd.f32 %v7123_v31, %v7283_v40  ;;  %v7543_v8 = vadd.f32 %v7123_v31, %v7287_v15 }
 0x36b   : > { %12401 = vst [vmem:[#allocation5_spill] sm:$0xff] %v7515_v52  ;;  %12403 = vst [vmem:[#allocation7_spill] sm:$0xff] %v7519_v37  ;;  %v7555_v14 = vadd.f32 %v7123_v31, %v7299_v28  ;;  %v7559_v40 = vadd.f32 %v7123_v31, %v7303_v10  ;;  %v7563_v15 = vadd.f32 %v7123_v31, %v7307_v53 }
 0x36c   : > { %12405 = vst [vmem:[#allocation4_spill] sm:$0xff] %v7523_v5  ;;  %12407 = vst [vmem:[#allocation44_spill] sm:$0xff] %v7531_v57  ;;  %v7567_v41 = vadd.f32 %v7123_v31, %v7311_v43  ;;  %v7583_v53 = vadd.f32 %v7123_v31, %v7327_v33  ;;  %v7587_v43 = vadd.f32 %v7123_v31, %v7331_v35 }
 0x36d   : > { %12408 = vst [vmem:[#allocation45_spill] sm:$0xff] %v7535_v26  ;;  %12409 = vst [vmem:[#allocation46_spill] sm:$0xff] %v7539_v61  ;;  %v7603_v33 = vadd.f32 %v7123_v31, %v7347_v34  ;;  %v7607_v35 = vadd.f32 %v7123_v31, %v7351_v58  ;;  %v1783_v34 = vmul.f32 0.5, %v7383_v38  ;;  %v1786_v58 = vmul.f32 0.5, %v7395_v18 }
 0x36e   : > { %12410 = vst [vmem:[#allocation47_spill] sm:$0xff] %v7543_v8  ;;  %12411 = vst [vmem:[#allocation48_spill] sm:$0xff] %v7547_v13 }
 0x36f   : > { %12412 = vst [vmem:[#allocation49_spill] sm:$0xff] %v7551_v63  ;;  %12413 = vst [vmem:[#allocation50_spill] sm:$0xff] %v7555_v14  ;;  %v12418_v63 = vld [vmem:[#allocation6_spill] sm:$0xff]  ;;  %v12420_v14 = vld [vmem:[#allocation9_spill] sm:$0xff] }
 0x370   : > { %12414 = vst [vmem:[#allocation51_spill] sm:$0xff] %v7559_v40  ;;  %12415 = vst [vmem:[#allocation52_spill] sm:$0xff] %v7563_v15  ;;  %v7575_v28 = vadd.f32 %v7123_v31, %v12418_v63  ;;  %v7579_v10 = vadd.f32 %v7123_v31, %v12420_v14  ;;  %v7595_v63 = vadd.f32 %v7123_v31, %v7339_v3  ;;  %v1779_v3 = vmul.f32 0.5, %v7367_v22 }
 0x371   : > { %12416 = vst [vmem:[#allocation53_spill] sm:$0xff] %v7567_v41  ;;  %12417 = vst [vmem:[#allocation54_spill] sm:$0xff] %v7571_v16  ;;  %v7599_v14 = vadd.f32 %v7123_v31, %v7343_v24  ;;  %v1781_v24 = vmul.f32 0.5, %v7375_v56  ;;  %v1785_v31 = vmul.f32 0.5, %v7391_v0  ;;  %v7625_v22 = vmul.f32 0.5, %v7407_v44 }
 0x372   : > { %12419 = vst [vmem:[#allocation6_spill] sm:$0xff] %v7575_v28  ;;  %12421 = vst [vmem:[#allocation9_spill] sm:$0xff] %v7579_v10  ;;  %v7628_v56 = vmul.f32 0.5, %v7411_v47  ;;  %v7637_v0 = vmul.f32 0.5, %v7423_v1  ;;  %v7646_v44 = vmul.f32 0.5, %v7435_v46  ;;  %v7649_v47 = vmul.f32 0.5, %v7439_v29 }
 0x373   : > { %12422 = vst [vmem:[#allocation55_spill] sm:$0xff] %v7583_v53  ;;  %12423 = vst [vmem:[#allocation56_spill] sm:$0xff] %v7587_v43  ;;  %v1776_v43 = vmul.f32 0.5, %v7355_v51  ;;  %v7658_v1 = vmul.f32 0.5, %v7451_v21  ;;  %v7667_v46 = vmul.f32 0.5, %v7463_v59  ;;  %v7670_v29 = vmul.f32 0.5, %v7467_v2 }
 0x374   : > { %12424 = vst [vmem:[#allocation57_spill] sm:$0xff] %v7591_v42  ;;  %12425 = vst [vmem:[#allocation58_spill] sm:$0xff] %v7595_v63  ;;  %v1778_v42 = vmul.f32 0.5, %v7363_v60  ;;  %v1780_v63 = vmul.f32 0.5, %v7371_v49  ;;  %v7622_v60 = vmul.f32 0.5, %v7403_v48  ;;  %v7643_v48 = vmul.f32 0.5, %v7431_v32 }
 0x375   : > { %12426 = vst [vmem:[#allocation59_spill] sm:$0xff] %v7599_v14  ;;  %12427 = vst [vmem:[#allocation60_spill] sm:$0xff] %v7603_v33  ;;  %v1782_v14 = vmul.f32 0.5, %v7379_v6  ;;  %v1784_v33 = vmul.f32 0.5, %v7387_v27  ;;  %v7631_v6 = vmul.f32 0.5, %v7415_v4  ;;  %v7634_v27 = vmul.f32 0.5, %v7419_v12 }
 0x376   : > { %12428 = vst [vmem:[#allocation61_spill] sm:$0xff] %v7607_v35  ;;  %v7652_v4 = vmul.f32 0.5, %v7443_v39  ;;  %v7655_v12 = vmul.f32 0.5, %v7447_v11  ;;  %v7664_v32 = vmul.f32 0.5, %v7459_v17  ;;  %5934 = vtanh.f32 %v1776_v43  ;;  %12429 = vst [vmem:[#allocation62_spill] sm:$0xff] %v7670_v29  ;;  %v12431_v21 = vld [vmem:[#allocation38_spill] sm:$0xff] }
 0x377   : > { %v7673_v39 = vmul.f32 0.5, %v7471_v54  ;;  %v7676_v11 = vmul.f32 0.5, %v7475_v62  ;;  %5936 = vtanh.f32 %v1777_v55  ;;  %v7682_v17 = vmul.f32 0.5, %v12431_v21  ;;  %v12432_v43 = vld [vmem:[#allocation40_spill] sm:$0xff]  ;;  %v12433_v29 = vld [vmem:[#allocation41_spill] sm:$0xff] }
 0x378   : > { %v7685_v59 = vmul.f32 0.5, %v7487_v19  ;;  %5938 = vtanh.f32 %v1778_v42  ;;  %v7688_v2 = vmul.f32 0.5, %v12432_v43  ;;  %v7691_v54 = vmul.f32 0.5, %v12433_v29 }
 0x379   : > { %12430 = vst [vmem:[#allocation63_spill] sm:$0xff] %v7673_v39  ;;  %v12434_v39 = vld [vmem:[#allocation42_spill] sm:$0xff]  ;;  %5940 = vtanh.f32 %v1779_v3  ;;  %v7697_v55 = vmul.f32 0.5, %v7503_v36  ;;  %v7700_v21 = vmul.f32 0.5, %v7507_v25  ;;  %v7703_v19 = vmul.f32 0.5, %v7511_v50 }
 0x37a   : > { %v7694_v62 = vmul.f32 0.5, %v12434_v39  ;;  %5942 = vtanh.f32 %v1780_v63  ;;  %v7706_v42 = vmul.f32 0.5, %v7515_v52  ;;  %v7709_v29 = vmul.f32 0.5, %v7519_v37  ;;  %v12436_v52 = vld [vmem:[#allocation50_spill] sm:$0xff] }
 0x37b   : > { %v7712_v39 = vmul.f32 0.5, %v7523_v5  ;;  %5944 = vtanh.f32 %v1781_v24  ;;  %v7715_v3 = vmul.f32 0.5, %v7527_v30  ;;  %v7718_v25 = vmul.f32 0.5, %v7531_v57  ;;  %v12435_v24 = vld [vmem:[#allocation49_spill] sm:$0xff] }
 0x37c   : > { %v7721_v50 = vmul.f32 0.5, %v7535_v26  ;;  %5946 = vtanh.f32 %v1782_v14  ;;  %v7724_v63 = vmul.f32 0.5, %v7539_v61  ;;  %v7727_v37 = vmul.f32 0.5, %v7543_v8 }
 0x37d   : > { %v7730_v5 = vmul.f32 0.5, %v7547_v13  ;;  %5948 = vtanh.f32 %v1783_v34  ;;  %v7733_v30 = vmul.f32 0.5, %v12435_v24  ;;  %v7736_v57 = vmul.f32 0.5, %v12436_v52 }
 0x37e   : > { %v7739_v26 = vmul.f32 0.5, %v7559_v40  ;;  %5950 = vtanh.f32 %v1784_v33  ;;  %v7742_v14 = vmul.f32 0.5, %v7563_v15  ;;  %v7745_v8 = vmul.f32 0.5, %v7567_v41  ;;  %v12442_v15 = vld [vmem:[#allocation56_spill] sm:$0xff]  ;;  %v12443_v41 = vld [vmem:[#allocation57_spill] sm:$0xff] }
 0x37f   : > { %v7748_v13 = vmul.f32 0.5, %v7571_v16  ;;  %5952 = vtanh.f32 %v1785_v31  ;;  %v7751_v24 = vmul.f32 0.5, %v7575_v28  ;;  %v7754_v52 = vmul.f32 0.5, %v7579_v10 }
 0x380   : > { %12437 = vst [vmem:[#allocation40_spill] sm:$0xff] %v7745_v8  ;;  %v5935_v34 = vpop.eup %5934  ;;  %v7757_v40 = vmul.f32 0.5, %v7583_v53  ;;  %5954 = vtanh.f32 %v1786_v58  ;;  %v7760_v61 = vmul.f32 0.5, %v12442_v15  ;;  %v7763_v8 = vmul.f32 0.5, %v12443_v41 }
 0x381   : > { %12438 = vst [vmem:[#allocation64_spill] sm:$0xff] %v7748_v13  ;;  %12439 = vst [vmem:[#allocation65_spill] sm:$0xff] %v7751_v24  ;;  %v5937_v33 = vpop.eup %5936  ;;  %5956 = vtanh.f32 %v1787_v20  ;;  %v1904_v31 = vadd.f32 1.0, %v5935_v34  ;;  %v12444_v13 = vld [vmem:[#allocation58_spill] sm:$0xff]  ;;  %v12445_v24 = vld [vmem:[#allocation59_spill] sm:$0xff]  ;;  %v7777_v34 = vmul.f32 0.5, %v7607_v35 }
 0x382   : > { %12440 = vst [vmem:[#allocation66_spill] sm:$0xff] %v7754_v52  ;;  %12441 = vst [vmem:[#allocation67_spill] sm:$0xff] %v7757_v40  ;;  %v5939_v16 = vpop.eup %5938  ;;  %v7766_v28 = vmul.f32 0.5, %v12444_v13  ;;  %v7769_v10 = vmul.f32 0.5, %v12445_v24  ;;  %5958 = vtanh.f32 %v7622_v60  ;;  %v1905_v53 = vadd.f32 1.0, %v5937_v33  ;;  %v12447_v40 = vld [vmem:[#allocation60_spill] sm:$0xff] }
 0x383   : > { %v5941_v58 = vpop.eup %5940  ;;  %v7773_v52 = vmul.f32 0.5, %v12447_v40  ;;  %5960 = vtanh.f32 %v7625_v22  ;;  %v1906_v41 = vadd.f32 1.0, %v5939_v16  ;;  %v1968_v15 = vmul.f32 0.5, %v1904_v31  ;;  %12449 = vst [vmem:[#allocation70_spill] sm:$0xff] %v7777_v34  ;;  %v12450_v31 = vld [vmem:[#allocation11_spill] sm:$0xff] }
 0x384   : > { %12446 = vst [vmem:[#allocation68_spill] sm:$0xff] %v7769_v10  ;;  %v5943_v20 = vpop.eup %5942  ;;  %5962 = vtanh.f32 %v7628_v56  ;;  %v1907_v13 = vadd.f32 1.0, %v5941_v58  ;;  %v1969_v24 = vmul.f32 0.5, %v1905_v53  ;;  %v12451_v58 = vld [vmem:[#allocation8_spill] sm:$0xff] }
 0x385   : > { %12448 = vst [vmem:[#allocation69_spill] sm:$0xff] %v7773_v52  ;;  %v5945_v10 = vpop.eup %5944  ;;  %5964 = vtanh.f32 %v7631_v6  ;;  %v1908_v60 = vadd.f32 1.0, %v5943_v20  ;;  %v1970_v33 = vmul.f32 0.5, %v1906_v41  ;;  %v7782_v40 = vmul.f32 %v1968_v15, %v7355_v51  ;;  %v12452_v20 = vld [vmem:[#allocation10_spill] sm:$0xff] }
 0x386   : > { %v5947_v52 = vpop.eup %5946  ;;  %5966 = vtanh.f32 %v7634_v27  ;;  %v1909_v22 = vadd.f32 1.0, %v5945_v10  ;;  %v1971_v16 = vmul.f32 0.5, %v1907_v13  ;;  %v7786_v35 = vmul.f32 %v1969_v24, %v12450_v31  ;;  %v12453_v31 = vld [vmem:[#allocation13_spill] sm:$0xff] }
 0x387   : > { %v5949_v34 = vpop.eup %5948  ;;  %5968 = vtanh.f32 %v7637_v0  ;;  %v1910_v56 = vadd.f32 1.0, %v5947_v52  ;;  %v1972_v53 = vmul.f32 0.5, %v1908_v60  ;;  %v7790_v6 = vmul.f32 %v1970_v33, %v12451_v58  ;;  %v12454_v58 = vld [vmem:[#allocation15_spill] sm:$0xff] }
 0x388   : > { %v5951_v41 = vpop.eup %5950  ;;  %5970 = vtanh.f32 %v7640_v45  ;;  %v1911_v51 = vadd.f32 1.0, %v5949_v34  ;;  %v1973_v15 = vmul.f32 0.5, %v1909_v22  ;;  %v7794_v27 = vmul.f32 %v1971_v16, %v12452_v20  ;;  %v12456_v20 = vld [vmem:[#allocation12_spill] sm:$0xff] }
 0x389   : > { %v5953_v13 = vpop.eup %5952  ;;  %5972 = vtanh.f32 %v7643_v48  ;;  %v1912_v10 = vadd.f32 1.0, %v5951_v41  ;;  %v1974_v24 = vmul.f32 0.5, %v1910_v56  ;;  %v7798_v0 = vmul.f32 %v1972_v53, %v7371_v49 }
 0x38a   : > { %v5955_v52 = vpop.eup %5954  ;;  %5974 = vtanh.f32 %v7646_v44  ;;  %v1913_v60 = vadd.f32 1.0, %v5953_v13  ;;  %v1975_v33 = vmul.f32 0.5, %v1911_v51  ;;  %v7802_v45 = vmul.f32 %v1973_v15, %v12453_v31 }
 0x38b   : > { %v5957_v34 = vpop.eup %5956  ;;  %5976 = vtanh.f32 %v7649_v47  ;;  %v1914_v22 = vadd.f32 1.0, %v5955_v52  ;;  %v1976_v16 = vmul.f32 0.5, %v1912_v10  ;;  %v7806_v48 = vmul.f32 %v1974_v24, %v12454_v58  ;;  %v12458_v52 = vld [vmem:[#allocation14_spill] sm:$0xff] }
 0x38c   : > { %v5959_v56 = vpop.eup %5958  ;;  %5978 = vtanh.f32 %v7652_v4  ;;  %v1915_v49 = vadd.f32 1.0, %v5957_v34  ;;  %v1977_v53 = vmul.f32 0.5, %v1913_v60  ;;  %v7810_v44 = vmul.f32 %v1975_v33, %v7383_v38 }
 0x38d   : > { %12455 = vst [vmem:[#allocation11_spill] sm:$0xff] %v7806_v48  ;;  %v5961_v41 = vpop.eup %5960  ;;  %5980 = vtanh.f32 %v7655_v12  ;;  %v1916_v51 = vadd.f32 1.0, %v5959_v56  ;;  %v1978_v15 = vmul.f32 0.5, %v1914_v22  ;;  %v7814_v47 = vmul.f32 %v1976_v16, %v12456_v20  ;;  %v12459_v16 = vld [vmem:[#allocation17_spill] sm:$0xff]  ;;  %v12462_v20 = vld [vmem:[#allocation16_spill] sm:$0xff] }
 0x38e   : > { %v5963_v13 = vpop.eup %5962  ;;  %5982 = vtanh.f32 %v7658_v1  ;;  %v1917_v10 = vadd.f32 1.0, %v5961_v41  ;;  %v1979_v24 = vmul.f32 0.5, %v1915_v49  ;;  %v7818_v4 = vmul.f32 %v1977_v53, %v12458_v52  ;;  %v12460_v53 = vld [vmem:[#allocation19_spill] sm:$0xff] }
 0x38f   : > { %12457 = vst [vmem:[#allocation8_spill] sm:$0xff] %v7814_v47  ;;  %v5965_v60 = vpop.eup %5964  ;;  %5984 = vtanh.f32 %v7661_v9  ;;  %v1918_v38 = vadd.f32 1.0, %v5963_v13  ;;  %v1980_v33 = vmul.f32 0.5, %v1916_v51  ;;  %v7822_v12 = vmul.f32 %v1978_v15, %v7395_v18  ;;  %v12461_v51 = vld [vmem:[#allocation62_spill] sm:$0xff] }
 0x390   : > { %v5967_v31 = vpop.eup %5966  ;;  %5986 = vtanh.f32 %v7664_v32  ;;  %v1919_v34 = vadd.f32 1.0, %v5965_v60  ;;  %v1981_v22 = vmul.f32 0.5, %v1917_v10  ;;  %v7826_v1 = vmul.f32 %v1979_v24, %v12459_v16  ;;  %v12463_v10 = vld [vmem:[#allocation63_spill] sm:$0xff]  ;;  %v12464_v60 = vld [vmem:[#allocation18_spill] sm:$0xff]  ;;  %v12465_v16 = vld [vmem:[#allocation21_spill] sm:$0xff] }
 0x391   : > { %v5969_v58 = vpop.eup %5968  ;;  %5988 = vtanh.f32 %v7667_v46  ;;  %v1920_v56 = vadd.f32 1.0, %v5967_v31  ;;  %v1982_v49 = vmul.f32 0.5, %v1918_v38  ;;  %v7830_v9 = vmul.f32 %v1980_v33, %v12460_v53 }
 0x392   : > { %v5971_v41 = vpop.eup %5970  ;;  %5990 = vtanh.f32 %v12461_v51  ;;  %v1921_v18 = vadd.f32 1.0, %v5969_v58  ;;  %v1983_v15 = vmul.f32 0.5, %v1919_v34  ;;  %v7834_v32 = vmul.f32 %v1981_v22, %v12462_v20  ;;  %v12466_v51 = vld [vmem:[#allocation20_spill] sm:$0xff] }
 0x393   : > { %v5973_v13 = vpop.eup %5972  ;;  %5992 = vtanh.f32 %v12463_v10  ;;  %v1922_v24 = vadd.f32 1.0, %v5971_v41  ;;  %v1984_v52 = vmul.f32 0.5, %v1920_v56  ;;  %v7838_v46 = vmul.f32 %v1982_v49, %v12464_v60  ;;  %v12467_v10 = vld [vmem:[#allocation22_spill] sm:$0xff]  ;;  %v12468_v60 = vld [vmem:[#allocation23_spill] sm:$0xff] }
 0x394   : > { %v5975_v38 = vpop.eup %5974  ;;  %5994 = vtanh.f32 %v7676_v11  ;;  %v1923_v33 = vadd.f32 1.0, %v5973_v13  ;;  %v1985_v31 = vmul.f32 0.5, %v1921_v18  ;;  %v7842_v53 = vmul.f32 %v1983_v15, %v12465_v16  ;;  %v12469_v16 = vld [vmem:[#allocation25_spill] sm:$0xff] }
 0x395   : > { %v5977_v34 = vpop.eup %5976  ;;  %5996 = vtanh.f32 %v7679_v7  ;;  %v1924_v22 = vadd.f32 1.0, %v5975_v38  ;;  %v1986_v58 = vmul.f32 0.5, %v1922_v24  ;;  %v7846_v20 = vmul.f32 %v1984_v52, %v12466_v51  ;;  %v12470_v51 = vld [vmem:[#allocation24_spill] sm:$0xff] }
 0x396   : > { %v5979_v56 = vpop.eup %5978  ;;  %5998 = vtanh.f32 %v7682_v17  ;;  %v1925_v49 = vadd.f32 1.0, %v5977_v34  ;;  %v1987_v41 = vmul.f32 0.5, %v1923_v33  ;;  %v7850_v11 = vmul.f32 %v1985_v31, %v12467_v10  ;;  %v12471_v10 = vld [vmem:[#allocation28_spill] sm:$0xff] }
 0x397   : > { %v5981_v18 = vpop.eup %5980  ;;  %6000 = vtanh.f32 %v7685_v59  ;;  %v1926_v15 = vadd.f32 1.0, %v5979_v56  ;;  %v1988_v13 = vmul.f32 0.5, %v1924_v22  ;;  %v7854_v7 = vmul.f32 %v1986_v58, %v12468_v60  ;;  %v12472_v60 = vld [vmem:[#allocation29_spill] sm:$0xff] }
 0x398   : > { %v5983_v24 = vpop.eup %5982  ;;  %6002 = vtanh.f32 %v7688_v2  ;;  %v1927_v52 = vadd.f32 1.0, %v5981_v18  ;;  %v1989_v38 = vmul.f32 0.5, %v1925_v49  ;;  %v7858_v17 = vmul.f32 %v1987_v41, %v12469_v16  ;;  %v12473_v16 = vld [vmem:[#allocation30_spill] sm:$0xff] }
 0x399   : > { %v5985_v33 = vpop.eup %5984  ;;  %6004 = vtanh.f32 %v7691_v54  ;;  %v1928_v31 = vadd.f32 1.0, %v5983_v24  ;;  %v1990_v34 = vmul.f32 0.5, %v1926_v15  ;;  %v7862_v59 = vmul.f32 %v1988_v13, %v12470_v51  ;;  %v12474_v51 = vld [vmem:[#allocation31_spill] sm:$0xff] }
 0x39a   : > { %v5987_v22 = vpop.eup %5986  ;;  %6006 = vtanh.f32 %v7694_v62  ;;  %v1929_v58 = vadd.f32 1.0, %v5985_v33  ;;  %v1991_v56 = vmul.f32 0.5, %v1927_v52  ;;  %v7866_v2 = vmul.f32 %v1989_v38, %v12471_v10  ;;  %v12475_v10 = vld [vmem:[#allocation32_spill] sm:$0xff] }
 0x39b   : > { %v5989_v49 = vpop.eup %5988  ;;  %6008 = vtanh.f32 %v7697_v55  ;;  %v1930_v41 = vadd.f32 1.0, %v5987_v22  ;;  %v1992_v18 = vmul.f32 0.5, %v1928_v31  ;;  %v7870_v54 = vmul.f32 %v1990_v34, %v12472_v60  ;;  %v12476_v60 = vld [vmem:[#allocation33_spill] sm:$0xff] }
 0x39c   : > { %v5991_v15 = vpop.eup %5990  ;;  %6010 = vtanh.f32 %v7700_v21  ;;  %v1931_v13 = vadd.f32 1.0, %v5989_v49  ;;  %v1993_v24 = vmul.f32 0.5, %v1929_v58  ;;  %v7874_v62 = vmul.f32 %v1991_v56, %v12473_v16  ;;  %v12477_v16 = vld [vmem:[#allocation34_spill] sm:$0xff] }
 0x39d   : > { %v5993_v52 = vpop.eup %5992  ;;  %6012 = vtanh.f32 %v7703_v19  ;;  %v1932_v38 = vadd.f32 1.0, %v5991_v15  ;;  %v1994_v33 = vmul.f32 0.5, %v1930_v41  ;;  %v7878_v55 = vmul.f32 %v1992_v18, %v12474_v51  ;;  %v12478_v51 = vld [vmem:[#allocation35_spill] sm:$0xff] }
 0x39e   : > { %v5995_v31 = vpop.eup %5994  ;;  %6014 = vtanh.f32 %v7706_v42  ;;  %v1933_v34 = vadd.f32 1.0, %v5993_v52  ;;  %v1995_v22 = vmul.f32 0.5, %v1931_v13  ;;  %v7882_v21 = vmul.f32 %v1993_v24, %v12475_v10  ;;  %v12479_v10 = vld [vmem:[#allocation36_spill] sm:$0xff] }
 0x39f   : > { %v5997_v58 = vpop.eup %5996  ;;  %6016 = vtanh.f32 %v7709_v29  ;;  %v1934_v56 = vadd.f32 1.0, %v5995_v31  ;;  %v1996_v49 = vmul.f32 0.5, %v1932_v38  ;;  %v7886_v19 = vmul.f32 %v1994_v33, %v12476_v60  ;;  %v12480_v60 = vld [vmem:[#allocation37_spill] sm:$0xff] }
 0x3a0   : > { %v5999_v41 = vpop.eup %5998  ;;  %6018 = vtanh.f32 %v7712_v39  ;;  %v1935_v18 = vadd.f32 1.0, %v5997_v58  ;;  %v1997_v15 = vmul.f32 0.5, %v1933_v34  ;;  %v7890_v42 = vmul.f32 %v1995_v22, %v12477_v16 }
 0x3a1   : > { %v6001_v13 = vpop.eup %6000  ;;  %6020 = vtanh.f32 %v7715_v3  ;;  %v1936_v24 = vadd.f32 1.0, %v5999_v41  ;;  %v1998_v52 = vmul.f32 0.5, %v1934_v56  ;;  %v7894_v29 = vmul.f32 %v1996_v49, %v12478_v51 }
 0x3a2   : > { %v6003_v38 = vpop.eup %6002  ;;  %6022 = vtanh.f32 %v7718_v25  ;;  %v1937_v33 = vadd.f32 1.0, %v6001_v13  ;;  %v1999_v31 = vmul.f32 0.5, %v1935_v18  ;;  %v7898_v39 = vmul.f32 %v1997_v15, %v12479_v10  ;;  %v12481_v13 = vld [vmem:[#allocation38_spill] sm:$0xff] }
 0x3a3   : > { %v6005_v34 = vpop.eup %6004  ;;  %6024 = vtanh.f32 %v7721_v50  ;;  %v1938_v22 = vadd.f32 1.0, %v6003_v38  ;;  %v2000_v58 = vmul.f32 0.5, %v1936_v24  ;;  %v7902_v3 = vmul.f32 %v1998_v52, %v12480_v60  ;;  %v12482_v38 = vld [vmem:[#allocation39_spill] sm:$0xff] }
 0x3a4   : > { %v6007_v56 = vpop.eup %6006  ;;  %6026 = vtanh.f32 %v7724_v63  ;;  %v1939_v49 = vadd.f32 1.0, %v6005_v34  ;;  %v2001_v41 = vmul.f32 0.5, %v1937_v33  ;;  %v7906_v25 = vmul.f32 %v1999_v31, %v7479_v23 }
 0x3a5   : > { %v6009_v18 = vpop.eup %6008  ;;  %6028 = vtanh.f32 %v7727_v37  ;;  %v1940_v15 = vadd.f32 1.0, %v6007_v56  ;;  %v2002_v16 = vmul.f32 0.5, %v1938_v22  ;;  %v7910_v50 = vmul.f32 %v2000_v58, %v12481_v13  ;;  %v12483_v58 = vld [vmem:[#allocation41_spill] sm:$0xff]  ;;  %v12485_v13 = vld [vmem:[#allocation40_spill] sm:$0xff] }
 0x3a6   : > { %v6011_v24 = vpop.eup %6010  ;;  %6030 = vtanh.f32 %v7730_v5  ;;  %v1941_v52 = vadd.f32 1.0, %v6009_v18  ;;  %v2003_v51 = vmul.f32 0.5, %v1939_v49  ;;  %v7914_v63 = vmul.f32 %v2001_v41, %v12482_v38  ;;  %v12484_v41 = vld [vmem:[#allocation42_spill] sm:$0xff] }
 0x3a7   : > { %v6013_v33 = vpop.eup %6012  ;;  %6032 = vtanh.f32 %v7733_v30  ;;  %v1942_v23 = vadd.f32 1.0, %v6011_v24  ;;  %v2004_v31 = vmul.f32 0.5, %v1940_v15  ;;  %v7918_v37 = vmul.f32 %v2002_v16, %v12432_v43 }
 0x3a8   : > { %v6015_v10 = vpop.eup %6014  ;;  %6034 = vtanh.f32 %v7736_v57  ;;  %v1943_v34 = vadd.f32 1.0, %v6013_v33  ;;  %v2005_v22 = vmul.f32 0.5, %v1941_v52  ;;  %v7922_v5 = vmul.f32 %v2003_v51, %v12483_v58  ;;  %v12486_v51 = vld [vmem:[#allocation2_spill] sm:$0xff]  ;;  %v12487_v33 = vld [vmem:[#allocation64_spill] sm:$0xff]  ;;  %v12490_v58 = vld [vmem:[#allocation65_spill] sm:$0xff] }
 0x3a9   : > { %v6017_v60 = vpop.eup %6016  ;;  %6036 = vtanh.f32 %v7739_v26  ;;  %v1944_v56 = vadd.f32 1.0, %v6015_v10  ;;  %v2006_v49 = vmul.f32 0.5, %v1942_v23  ;;  %v7926_v30 = vmul.f32 %v2004_v31, %v12484_v41  ;;  %v12488_v10 = vld [vmem:[#allocation3_spill] sm:$0xff] }
 0x3aa   : > { %v6019_v18 = vpop.eup %6018  ;;  %6038 = vtanh.f32 %v7742_v14  ;;  %v1945_v43 = vadd.f32 1.0, %v6017_v60  ;;  %v2007_v15 = vmul.f32 0.5, %v1943_v34  ;;  %v7930_v57 = vmul.f32 %v2005_v22, %v7503_v36  ;;  %v12491_v60 = vld [vmem:[#allocation5_spill] sm:$0xff] }
 0x3ab   : > { %v6021_v16 = vpop.eup %6020  ;;  %6040 = vtanh.f32 %v12485_v13  ;;  %v1946_v24 = vadd.f32 1.0, %v6019_v18  ;;  %v2008_v52 = vmul.f32 0.5, %v1944_v56  ;;  %v7934_v26 = vmul.f32 %v2006_v49, %v12486_v51  ;;  %v12492_v18 = vld [vmem:[#allocation66_spill] sm:$0xff]  ;;  %v12493_v51 = vld [vmem:[#allocation7_spill] sm:$0xff] }
 0x3ac   : > { %v6023_v38 = vpop.eup %6022  ;;  %6042 = vtanh.f32 %v12487_v33  ;;  %v1947_v23 = vadd.f32 1.0, %v6021_v16  ;;  %v2009_v31 = vmul.f32 0.5, %v1945_v43  ;;  %v7938_v14 = vmul.f32 %v2007_v15, %v12488_v10  ;;  %v12494_v16 = vld [vmem:[#allocation67_spill] sm:$0xff] }
 0x3ad   : > { %v6025_v34 = vpop.eup %6024  ;;  %6044 = vtanh.f32 %v12490_v58  ;;  %v1948_v36 = vadd.f32 1.0, %v6023_v38  ;;  %v2010_v22 = vmul.f32 0.5, %v1946_v24  ;;  %v7942_v41 = vmul.f32 %v2008_v52, %v12491_v60  ;;  %v12496_v60 = vld [vmem:[#allocation43_spill] sm:$0xff] }
 0x3ae   : > { %12489 = vst [vmem:[#allocation10_spill] sm:$0xff] %v7938_v14  ;;  %v6027_v56 = vpop.eup %6026  ;;  %6046 = vtanh.f32 %v12492_v18  ;;  %v1949_v49 = vadd.f32 1.0, %v6025_v34  ;;  %v2011_v13 = vmul.f32 0.5, %v1947_v23  ;;  %v7946_v33 = vmul.f32 %v2009_v31, %v12493_v51  ;;  %v12495_v14 = vld [vmem:[#allocation4_spill] sm:$0xff] }
 0x3af   : > { %v6029_v43 = vpop.eup %6028  ;;  %6048 = vtanh.f32 %v12494_v16  ;;  %v1950_v15 = vadd.f32 1.0, %v6027_v56  ;;  %v2012_v10 = vmul.f32 0.5, %v1948_v36  ;;  %v7950_v58 = vmul.f32 %v2010_v22, %v12495_v14  ;;  %v12498_v51 = vld [vmem:[#allocation44_spill] sm:$0xff]  ;;  %v12500_v56 = vld [vmem:[#allocation45_spill] sm:$0xff] }
 0x3b0   : > { %v6031_v24 = vpop.eup %6030  ;;  %6050 = vtanh.f32 %v7760_v61  ;;  %v1951_v52 = vadd.f32 1.0, %v6029_v43  ;;  %v2013_v38 = vmul.f32 0.5, %v1949_v49  ;;  %v7954_v18 = vmul.f32 %v2011_v13, %v12496_v60  ;;  %v12502_v43 = vld [vmem:[#allocation68_spill] sm:$0xff] }
 0x3b1   : > { %v6033_v23 = vpop.eup %6032  ;;  %6052 = vtanh.f32 %v7763_v8  ;;  %v1952_v31 = vadd.f32 1.0, %v6031_v24  ;;  %v2014_v34 = vmul.f32 0.5, %v1950_v15  ;;  %v7958_v16 = vmul.f32 %v2012_v10, %v12498_v51  ;;  %v12505_v24 = vld [vmem:[#allocation69_spill] sm:$0xff] }
 0x3b2   : > { %12497 = vst [vmem:[#allocation13_spill] sm:$0xff] %v7954_v18  ;;  %v6035_v36 = vpop.eup %6034  ;;  %6054 = vtanh.f32 %v7766_v28  ;;  %v1953_v14 = vadd.f32 1.0, %v6033_v23  ;;  %v2015_v22 = vmul.f32 0.5, %v1951_v52  ;;  %v7962_v61 = vmul.f32 %v2013_v38, %v12500_v56  ;;  %v12503_v18 = vld [vmem:[#allocation46_spill] sm:$0xff] }
 0x3b3   : > { %12499 = vst [vmem:[#allocation15_spill] sm:$0xff] %v7958_v16  ;;  %v6037_v49 = vpop.eup %6036  ;;  %6056 = vtanh.f32 %v12502_v43  ;;  %v1954_v13 = vadd.f32 1.0, %v6035_v36  ;;  %v2016_v60 = vmul.f32 0.5, %v1952_v31  ;;  %v7966_v8 = vmul.f32 %v2014_v34, %v12503_v18  ;;  %v12506_v16 = vld [vmem:[#allocation47_spill] sm:$0xff]  ;;  %v12508_v23 = vld [vmem:[#allocation70_spill] sm:$0xff]  ;;  %v12510_v34 = vld [vmem:[#allocation49_spill] sm:$0xff] }
 0x3b4   : > { %12501 = vst [vmem:[#allocation12_spill] sm:$0xff] %v7962_v61  ;;  %v6039_v15 = vpop.eup %6038  ;;  %6058 = vtanh.f32 %v12505_v24  ;;  %v1955_v10 = vadd.f32 1.0, %v6037_v49  ;;  %v2017_v51 = vmul.f32 0.5, %v1953_v14  ;;  %v7970_v28 = vmul.f32 %v2015_v22, %v12506_v16  ;;  %v12509_v61 = vld [vmem:[#allocation48_spill] sm:$0xff]  ;;  %v12511_v24 = vld [vmem:[#allocation50_spill] sm:$0xff] }
 0x3b5   : > { %12504 = vst [vmem:[#allocation14_spill] sm:$0xff] %v7966_v8  ;;  %v6041_v52 = vpop.eup %6040  ;;  %6060 = vtanh.f32 %v12508_v23  ;;  %v1956_v38 = vadd.f32 1.0, %v6039_v15  ;;  %v2018_v56 = vmul.f32 0.5, %v1954_v13  ;;  %v7974_v43 = vmul.f32 %v2016_v60, %v12509_v61 }
 0x3b6   : > { %12507 = vst [vmem:[#allocation17_spill] sm:$0xff] %v7970_v28  ;;  %v6043_v31 = vpop.eup %6042  ;;  %v1957_v36 = vadd.f32 1.0, %v6041_v52  ;;  %v2019_v18 = vmul.f32 0.5, %v1955_v10  ;;  %v7977_v8 = vmul.f32 %v2017_v51, %v12510_v34  ;;  %v2096_v14 = vpack.c.bf16 %v7786_v35, %v7782_v40  ;;  %v12512_v52 = vld [vmem:[#allocation51_spill] sm:$0xff]  ;;  %v12515_v34 = vld [vmem:[#allocation53_spill] sm:$0xff] }
 0x3b7   : > { %v6045_v49 = vpop.eup %6044  ;;  %v1958_v16 = vadd.f32 1.0, %v6043_v31  ;;  %v2020_v22 = vmul.f32 0.5, %v1956_v38  ;;  %v7982_v28 = vmul.f32 %v2018_v56, %v12511_v24  ;;  %v2097_v13 = vpack.c.bf16 %v7794_v27, %v7790_v6  ;;  %v12513_v38 = vld [vmem:[#allocation52_spill] sm:$0xff] }
 0x3b8   : > { %v6047_v61 = vpop.eup %6046  ;;  %v1959_v60 = vadd.f32 1.0, %v6045_v49  ;;  %v2021_v15 = vmul.f32 0.5, %v1957_v36  ;;  %v7987_v10 = vmul.f32 %v2019_v18, %v12512_v52  ;;  %5503 = vmatmul.mubr.msk.bf16.vlgmr.msra.gmra.mrb[56].mxu1 %vm983_vm2, %v2096_v14  ;;  %v12514_v31 = vmov 0   ;;  %v12516_v52 = vld [vmem:[#allocation54_spill] sm:$0xff] }
 0x3b9   : > { %v6049_v35 = vpop.eup %6048  ;;  %v1960_v51 = vadd.f32 1.0, %v6047_v61  ;;  %v2022_v23 = vmul.f32 0.5, %v1958_v16  ;;  %v7993_v56 = vmul.f32 %v2020_v22, %v12513_v38  ;;  %2314 = vmatprep.mubr.bf16.mxu1 %v12514_v31  ;;  %v2101_v38 = vpack.c.bf16 %v7826_v1, %v7822_v12 }
 0x3ba   : > { %v6051_v27 = vpop.eup %6050  ;;  %v1961_v36 = vadd.f32 1.0, %v6049_v35  ;;  %v2023_v18 = vmul.f32 0.5, %v1959_v60  ;;  %v7999_v49 = vmul.f32 %v2021_v15, %v12515_v34  ;;  %v12517_v35 = vld [vmem:[#allocation6_spill] sm:$0xff]  ;;  %v2102_v15 = vpack.c.bf16 %v7834_v32, %v7830_v9 }
 0x3bb   : > { %v6053_v24 = vpop.eup %6052  ;;  %v1962_v61 = vadd.f32 1.0, %v6051_v27  ;;  %v2024_v16 = vmul.f32 0.5, %v1960_v51  ;;  %v8004_v22 = vmul.f32 %v2022_v23, %v12516_v52  ;;  %v12518_v27 = vld [vmem:[#allocation9_spill] sm:$0xff]  ;;  %v2103_v23 = vpack.c.bf16 %v7842_v53, %v7838_v46 }
 0x3bc   : > { %v6055_v40 = vpop.eup %6054  ;;  %v1963_v6 = vadd.f32 1.0, %v6053_v24  ;;  %v2025_v48 = vmul.f32 0.5, %v1961_v36  ;;  %v8009_v60 = vmul.f32 %v2023_v18, %v12517_v35  ;;  %v12519_v24 = vld [vmem:[#allocation55_spill] sm:$0xff]  ;;  %v2104_v18 = vpack.c.bf16 %v7850_v11, %v7846_v20  ;;  %v12521_v53 = vld [vmem:[#allocation57_spill] sm:$0xff]  ;;  %v12522_v11 = vld [vmem:[#allocation58_spill] sm:$0xff] }
 0x3bd   : > { %v6057_v34 = vpop.eup %6056  ;;  %v1964_v14 = vadd.f32 1.0, %v6055_v40  ;;  %v2026_v47 = vmul.f32 0.5, %v1962_v61  ;;  %v8014_v51 = vmul.f32 %v2024_v16, %v12518_v27  ;;  %v12520_v40 = vld [vmem:[#allocation56_spill] sm:$0xff]  ;;  %v2105_v16 = vpack.c.bf16 %v7858_v17, %v7854_v7 }
 0x3be   : > { %v6059_v52 = vpop.eup %6058  ;;  %v1965_v12 = vadd.f32 1.0, %v6057_v34  ;;  %v2027_v1 = vmul.f32 0.5, %v1963_v6  ;;  %v8019_v36 = vmul.f32 %v2025_v48, %v12519_v24  ;;  %v2106_v48 = vpack.c.bf16 %v7866_v2, %v7862_v59  ;;  %v12524_v2 = vld [vmem:[#allocation60_spill] sm:$0xff]  ;;  %v12528_v24 = vld [vmem:[#allocation15_spill] sm:$0xff] }
 0x3bf   : > { %v6061_v35 = vpop.eup %6060  ;;  %v1966_v9 = vadd.f32 1.0, %v6059_v52  ;;  %v2028_v32 = vmul.f32 0.5, %v1964_v14  ;;  %v8024_v61 = vmul.f32 %v2026_v47, %v12520_v40  ;;  %v2107_v47 = vpack.c.bf16 %v7874_v62, %v7870_v54  ;;  %v12523_v14 = vld [vmem:[#allocation59_spill] sm:$0xff] }
 0x3c0   : > { %v1967_v27 = vadd.f32 1.0, %v6061_v35  ;;  %v2029_v46 = vmul.f32 0.5, %v1965_v12  ;;  %v8029_v34 = vmul.f32 %v2027_v1, %v12521_v53  ;;  %5504 = vmatmul.mubr.msk.bf16.gmra.mrb[60].mxu1 %vm983_vm2, %v2097_v13  ;;  %v2108_v7 = vpack.c.bf16 %v7882_v21, %v7878_v55  ;;  %v12525_v55 = vld [vmem:[#allocation61_spill] sm:$0xff]  ;;  %v12530_v35 = vld [vmem:[#allocation14_spill] sm:$0xff] }
 0x3c1   : > { %v2030_v20 = vmul.f32 0.5, %v1966_v9  ;;  %v8035_v6 = vmul.f32 %v2028_v32, %v12522_v11  ;;  %2324 = vmatprep.mubr.bf16.mxu1 %v12514_v31  ;;  %v2109_v13 = vpack.c.bf16 %v7890_v42, %v7886_v19  ;;  %v2110_v59 = vpack.c.bf16 %v7898_v39, %v7894_v29  ;;  %v12526_v42 = vld [vmem:[#allocation10_spill] sm:$0xff] }
 0x3c2   : > { %v2031_v17 = vmul.f32 0.5, %v1967_v27  ;;  %v8043_v52 = vmul.f32 %v2029_v46, %v12523_v14  ;;  %v2111_v1 = vpack.c.bf16 %v7906_v25, %v7902_v3  ;;  %v2112_v54 = vpack.c.bf16 %v7914_v63, %v7910_v50  ;;  %v12527_v3 = vld [vmem:[#allocation13_spill] sm:$0xff]  ;;  %v12529_v50 = vld [vmem:[#allocation12_spill] sm:$0xff] }
 0x3c3   : > { %v8050_v12 = vmul.f32 %v2030_v20, %v12524_v2  ;;  %v2113_v62 = vpack.c.bf16 %v7922_v5, %v7918_v37  ;;  %v2114_v19 = vpack.c.bf16 %v7930_v57, %v7926_v30  ;;  %v2115_v29 = vpack.c.bf16 %v12526_v42, %v7934_v26  ;;  %v12531_v37 = vld [vmem:[#allocation17_spill] sm:$0xff] }
 0x3c4   : > { %v8059_v21 = vmul.f32 %v2031_v17, %v12525_v55  ;;  %v2116_v39 = vpack.c.bf16 %v7946_v33, %v7942_v41  ;;  %v2117_v25 = vpack.c.bf16 %v12527_v3, %v7950_v58  ;;  %v2118_v63 = vpack.c.bf16 %v12529_v50, %v12528_v24 }
 0x3c5   : > { %v2119_v5 = vpack.c.bf16 %v12531_v37, %v12530_v35  ;;  %v2120_v9 = vpack.c.bf16 %v7977_v8, %v7974_v43  ;;  %v2121_v30 = vpack.c.bf16 %v7987_v10, %v7982_v28  ;;  %v2122_v57 = vpack.c.bf16 %v7999_v49, %v7993_v56  ;;  %v12533_v43 = vld [vmem:[#allocation11_spill] sm:$0xff]  ;;  %v12535_v56 = vld [vmem:[#allocation8_spill] sm:$0xff] }
 0x3c6   : > { %v2123_v26 = vpack.c.bf16 %v8009_v60, %v8004_v22  ;;  %v2124_v41 = vpack.c.bf16 %v8019_v36, %v8014_v51  ;;  %v2125_v33 = vpack.c.bf16 %v8029_v34, %v8024_v61  ;;  %v2126_v58 = vpack.c.bf16 %v8043_v52, %v8035_v6 }
 0x3c7   : > { %v2127_v8 = vpack.c.bf16 %v8059_v21, %v8050_v12  ;;  %v12532_v28 = vpack.c.bf16 %v7802_v45, %v7798_v0  ;;  %v12534_v10 = vpack.c.bf16 %v7810_v44, %v12533_v43  ;;  %v12536_v49 = vpack.c.bf16 %v7818_v4, %v12535_v56 }
 0x3c9   : > { %5505 = vmatmul.mubr.msk.bf16.gmra.mrb[64].mxu1 %vm983_vm2, %v12532_v28 }
 0x3ca   : > { %2334 = vmatprep.mubr.bf16.mxu1 %v12514_v31 }
 0x3d1   : > { %5506 = vmatmul.mubr.msk.bf16.gmra.mrb[68].mxu1 %vm983_vm2, %v12534_v10 }
 0x3d2   : > { %2344 = vmatprep.mubr.bf16.mxu1 %v12514_v31 }
 0x3d9   : > { %5507 = vmatmul.mubr.msk.bf16.gmra.mrb[72].mxu1 %vm983_vm2, %v12536_v49 }
 0x3da   : > { %2354 = vmatprep.mubr.bf16.mxu1 %v12514_v31 }
 0x3e1   : > { %5508 = vmatmul.mubr.msk.bf16.gmra.mrb[76].mxu1 %vm983_vm2, %v2101_v38 }
 0x3e2   : > { %2364 = vmatprep.mubr.bf16.mxu1 %v12514_v31 }
 0x3e9   : > { %5509 = vmatmul.mubr.msk.bf16.gmra.mrb[80].mxu1 %vm983_vm2, %v2102_v15 }
 0x3ea   : > { %2374 = vmatprep.mubr.bf16.mxu1 %v12514_v31 }
 0x3f1   : > { %5510 = vmatmul.mubr.msk.bf16.gmra.mrb[84].mxu1 %vm983_vm2, %v2103_v23 }
 0x3f2   : > { %2384 = vmatprep.mubr.bf16.mxu1 %v12514_v31 }
 0x3f9   : > { %5511 = vmatmul.mubr.msk.bf16.gmra.mrb[88].mxu1 %vm983_vm2, %v2104_v18 }
 0x3fa   : > { %2394 = vmatprep.mubr.bf16.mxu1 %v12514_v31 }
 0x401   : > { %5512 = vmatmul.mubr.msk.bf16.gmra.mrb[92].mxu1 %vm983_vm2, %v2105_v16 }
 0x402   : > { %2404 = vmatprep.mubr.bf16.mxu1 %v12514_v31 }
 0x409   : > { %5513 = vmatmul.mubr.msk.bf16.gmra.mrb[96].mxu1 %vm983_vm2, %v2106_v48 }
 0x40a   : > { %2414 = vmatprep.mubr.bf16.mxu1 %v12514_v31 }
 0x411   : > { %5514 = vmatmul.mubr.msk.bf16.gmra.mrb[100].mxu1 %vm983_vm2, %v2107_v47 }
 0x412   : > { %2424 = vmatprep.mubr.bf16.mxu1 %v12514_v31 }
 0x419   : > { %5515 = vmatmul.mubr.msk.bf16.gmra.mrb[104].mxu1 %vm983_vm2, %v2108_v7 }
 0x41a   : > { %2434 = vmatprep.mubr.bf16.mxu1 %v12514_v31 }
 0x421   : > { %5516 = vmatmul.mubr.msk.bf16.gmra.mrb[108].mxu1 %vm983_vm2, %v2109_v13 }
 0x422   : > { %2444 = vmatprep.mubr.bf16.mxu1 %v12514_v31 }
 0x429   : > { %5517 = vmatmul.mubr.msk.bf16.gmra.mrb[112].mxu1 %vm983_vm2, %v2110_v59 }
 0x42a   : > { %2454 = vmatprep.mubr.bf16.mxu1 %v12514_v31 }
 0x431   : > { %5518 = vmatmul.mubr.msk.bf16.gmra.mrb[116].mxu1 %vm983_vm2, %v2111_v1 }
 0x432   : > { %2464 = vmatprep.mubr.bf16.mxu1 %v12514_v31 }
 0x439   : > { %5519 = vmatmul.mubr.msk.bf16.gmra.mrb[120].mxu1 %vm983_vm2, %v2112_v54 }
 0x43a   : > { %2474 = vmatprep.mubr.bf16.mxu1 %v12514_v31 }
 0x441   : > { %5520 = vmatmul.mubr.msk.bf16.gmra.mrb[124].mxu1 %vm983_vm2, %v2113_v62 }
 0x442   : > { %2484 = vmatprep.mubr.bf16.mxu1 %v12514_v31 }
 0x449   : > { %5521 = vmatmul.mubr.msk.bf16.gmra.mrb[128].mxu1 %vm983_vm2, %v2114_v19 }
 0x44a   : > { %2494 = vmatprep.mubr.bf16.mxu1 %v12514_v31 }
 0x451   : > { %5522 = vmatmul.mubr.msk.bf16.gmra.mrb[132].mxu1 %vm983_vm2, %v2115_v29 }
 0x452   : > { %2504 = vmatprep.mubr.bf16.mxu1 %v12514_v31 }
 0x459   : > { %5523 = vmatmul.mubr.msk.bf16.gmra.mrb[136].mxu1 %vm983_vm2, %v2116_v39 }
 0x45a   : > { %2514 = vmatprep.mubr.bf16.mxu1 %v12514_v31 }
 0x461   : > { %5524 = vmatmul.mubr.msk.bf16.gmra.mrb[140].mxu1 %vm983_vm2, %v2117_v25 }
 0x462   : > { %2524 = vmatprep.mubr.bf16.mxu1 %v12514_v31 }
 0x469   : > { %5525 = vmatmul.mubr.msk.bf16.gmra.mrb[144].mxu1 %vm983_vm2, %v2118_v63 }
 0x46a   : > { %2534 = vmatprep.mubr.bf16.mxu1 %v12514_v31 }
 0x471   : > { %5526 = vmatmul.mubr.msk.bf16.gmra.mrb[148].mxu1 %vm983_vm2, %v2119_v5 }
 0x472   : > { %2544 = vmatprep.mubr.bf16.mxu1 %v12514_v31 }
 0x479   : > { %5527 = vmatmul.mubr.msk.bf16.gmra.mrb[152].mxu1 %vm983_vm2, %v2120_v9 }
 0x47a   : > { %2554 = vmatprep.mubr.bf16.mxu1 %v12514_v31 }
 0x481   : > { %5528 = vmatmul.mubr.msk.bf16.gmra.mrb[156].mxu1 %vm983_vm2, %v2121_v30 }
 0x482   : > { %2564 = vmatprep.mubr.bf16.mxu1 %v12514_v31 }
 0x489   : > { %5529 = vmatmul.mubr.msk.bf16.gmra.mrb[160].mxu1 %vm983_vm2, %v2122_v57 }
 0x48a   : > { %2574 = vmatprep.mubr.bf16.mxu1 %v12514_v31 }
 0x48b   : > { %v8148_v0 = vpop.f32.mrb[56].mxu1 }
 0x48c   : > { %v8150_v45 = vpop.f32.mrb[57].mxu1  ;;  %v2763_v4 = vmul.f32 %v8148_v0, %v8148_v0 }
 0x48d   : > { %12537 = vst [vmem:[#allocation19_spill] sm:$0xff] %v8150_v45  ;;  %v8152_v44 = vpop.f32.mrb[58].mxu1  ;;  %v2764_v18 = vmul.f32 %v8150_v45, %v8150_v45 }
 0x48e   : > { %v2625_v38 = vadd.f32 %v8152_v44, %v8148_v0  ;;  %v2765_v15 = vmul.f32 %v8152_v44, %v8152_v44  ;;  %v8160_v23 = vpop.f32.mrb[59].mxu1 }
 0x48f   : > { %12538 = vst [vmem:[#allocation62_spill] sm:$0xff] %v8160_v23  ;;  %v2694_v32 = vadd.f32 %v8160_v23, %v8150_v45  ;;  %v2766_v40 = vmul.f32 %v8160_v23, %v8160_v23 }
 0x490   : > { %v2891_v16 = vadd.f32 %v2765_v15, %v2763_v4 }
 0x491   : > { %5530 = vmatmul.mubr.msk.bf16.gmra.mrb[164].mxu1 %vm983_vm2, %v2123_v26  ;;  %v2960_v27 = vadd.f32 %v2766_v40, %v2764_v18 }
 0x492   : > { %2584 = vmatprep.mubr.bf16.mxu1 %v12514_v31 }
 0x493   : > { %v8173_v46 = vpop.f32.mrb[60].mxu1 }
 0x494   : > { %v2626_v53 = vadd.f32 %v2625_v38, %v8173_v46  ;;  %v2767_v48 = vmul.f32 %v8173_v46, %v8173_v46  ;;  %v8178_v20 = vpop.f32.mrb[61].mxu1 }
 0x495   : > { %12539 = vst [vmem:[#allocation16_spill] sm:$0xff] %v8178_v20  ;;  %v2695_v11 = vadd.f32 %v2694_v32, %v8178_v20  ;;  %v2768_v47 = vmul.f32 %v8178_v20, %v8178_v20  ;;  %v8183_v22 = vpop.f32.mrb[62].mxu1  ;;  %v3041_v20 = vld [vmem:[%s11948_s13 + $0x58] sm:$0xff] }
 0x496   : > { %v2892_v60 = vadd.f32 %v2891_v16, %v2767_v48  ;;  %v2627_v7 = vadd.f32 %v2626_v53, %v8183_v22  ;;  %v2769_v17 = vmul.f32 %v8183_v22, %v8183_v22  ;;  %v8188_v14 = vpop.f32.mrb[63].mxu1 }
 0x497   : > { %12540 = vst [vmem:[#allocation63_spill] sm:$0xff] %v8188_v14  ;;  %v2961_v13 = vadd.f32 %v2960_v27, %v2768_v47  ;;  %v2696_v59 = vadd.f32 %v2695_v11, %v8188_v14  ;;  %v2770_v2 = vmul.f32 %v8188_v14, %v8188_v14  ;;  %v3040_v14 = vld [vmem:[%s11948_s13 + $0x50] sm:$0xff] }
 0x498   : > { %v2893_v1 = vadd.f32 %v2892_v60, %v2769_v17 }
 0x499   : > { %5531 = vmatmul.mubr.msk.bf16.gmra.mrb[168].mxu1 %vm983_vm2, %v2124_v41  ;;  %v2962_v54 = vadd.f32 %v2961_v13, %v2770_v2 }
 0x49a   : > { %2594 = vmatprep.mubr.bf16.mxu1 %v12514_v31 }
 0x49c   : > { %v8198_v62 = vpop.f32.mrb[64].mxu1 }
 0x49d   : > { %v2628_v55 = vadd.f32 %v2627_v7, %v8198_v62  ;;  %v2771_v19 = vmul.f32 %v8198_v62, %v8198_v62  ;;  %v8203_v42 = vpop.f32.mrb[65].mxu1 }
 0x49e   : > { %12541 = vst [vmem:[#allocation18_spill] sm:$0xff] %v8203_v42  ;;  %v2697_v29 = vadd.f32 %v2696_v59, %v8203_v42  ;;  %v2772_v39 = vmul.f32 %v8203_v42, %v8203_v42  ;;  %v8208_v51 = vpop.f32.mrb[66].mxu1 }
 0x49f   : > { %v2894_v36 = vadd.f32 %v2893_v1, %v2771_v19  ;;  %v2629_v3 = vadd.f32 %v2628_v55, %v8208_v51  ;;  %v2773_v25 = vmul.f32 %v8208_v51, %v8208_v51  ;;  %v8213_v24 = vpop.f32.mrb[67].mxu1 }
 0x4a0   : > { %12542 = vst [vmem:[#allocation21_spill] sm:$0xff] %v8213_v24  ;;  %v2963_v50 = vadd.f32 %v2962_v54, %v2772_v39  ;;  %v2698_v63 = vadd.f32 %v2697_v29, %v8213_v24  ;;  %v2774_v35 = vmul.f32 %v8213_v24, %v8213_v24 }
 0x4a1   : > { %v2895_v37 = vadd.f32 %v2894_v36, %v2773_v25  ;;  %5532 = vmatmul.mubr.msk.bf16.gmra.mrb[172].mxu1 %vm983_vm2, %v2125_v33 }
 0x4a2   : > { %v2964_v5 = vadd.f32 %v2963_v50, %v2774_v35  ;;  %2604 = vmatprep.mubr.bf16.mxu1 %v12514_v31 }
 0x4a4   : > { %v8223_v9 = vpop.f32.mrb[68].mxu1 }
 0x4a5   : > { %v2630_v30 = vadd.f32 %v2629_v3, %v8223_v9  ;;  %v2775_v57 = vmul.f32 %v8223_v9, %v8223_v9  ;;  %v8228_v26 = vpop.f32.mrb[69].mxu1 }
 0x4a6   : > { %12543 = vst [vmem:[#allocation20_spill] sm:$0xff] %v8228_v26  ;;  %v2699_v41 = vadd.f32 %v2698_v63, %v8228_v26  ;;  %v2776_v28 = vmul.f32 %v8228_v26, %v8228_v26  ;;  %v8233_v61 = vpop.f32.mrb[70].mxu1 }
 0x4a7   : > { %v2896_v34 = vadd.f32 %v2895_v37, %v2775_v57  ;;  %v2631_v33 = vadd.f32 %v2630_v30, %v8233_v61  ;;  %v2777_v43 = vmul.f32 %v8233_v61, %v8233_v61  ;;  %v8238_v10 = vpop.f32.mrb[71].mxu1 }
 0x4a8   : > { %12544 = vst [vmem:[#allocation22_spill] sm:$0xff] %v8238_v10  ;;  %v2965_v56 = vadd.f32 %v2964_v5, %v2776_v28  ;;  %v2700_v49 = vadd.f32 %v2699_v41, %v8238_v10  ;;  %v2778_v4 = vmul.f32 %v8238_v10, %v8238_v10 }
 0x4a9   : > { %v2897_v38 = vadd.f32 %v2896_v34, %v2777_v43  ;;  %5533 = vmatmul.mubr.msk.bf16.gmra.mrb[176].mxu1 %vm983_vm2, %v2126_v58 }
 0x4aa   : > { %v2966_v15 = vadd.f32 %v2965_v56, %v2778_v4  ;;  %2614 = vmatprep.mubr.bf16.mxu1 %v12514_v31 }
 0x4ac   : > { %v8248_v18 = vpop.f32.mrb[72].mxu1 }
 0x4ad   : > { %v2632_v32 = vadd.f32 %v2631_v33, %v8248_v18  ;;  %v2779_v40 = vmul.f32 %v8248_v18, %v8248_v18  ;;  %v8253_v16 = vpop.f32.mrb[73].mxu1 }
 0x4ae   : > { %12545 = vst [vmem:[#allocation23_spill] sm:$0xff] %v8253_v16  ;;  %v2701_v27 = vadd.f32 %v2700_v49, %v8253_v16  ;;  %v2780_v53 = vmul.f32 %v8253_v16, %v8253_v16  ;;  %v8258_v6 = vpop.f32.mrb[74].mxu1 }
 0x4af   : > { %v2898_v52 = vadd.f32 %v2897_v38, %v2779_v40  ;;  %v2633_v58 = vadd.f32 %v2632_v32, %v8258_v6  ;;  %v2781_v48 = vmul.f32 %v8258_v6, %v8258_v6  ;;  %v8263_v11 = vpop.f32.mrb[75].mxu1 }
 0x4b0   : > { %12546 = vst [vmem:[#allocation25_spill] sm:$0xff] %v8263_v11  ;;  %v2967_v47 = vadd.f32 %v2966_v15, %v2780_v53  ;;  %v2702_v60 = vadd.f32 %v2701_v27, %v8263_v11  ;;  %v2782_v7 = vmul.f32 %v8263_v11, %v8263_v11 }
 0x4b1   : > { %v2899_v17 = vadd.f32 %v2898_v52, %v2781_v48  ;;  %5534 = vmatmul.mubr.msk.bf16.gmra.mrb[180].mxu1 %vm983_vm2, %v2127_v8 }
 0x4b2   : > { %v2968_v13 = vadd.f32 %v2967_v47, %v2782_v7 }
 0x4b4   : > { %v8272_v59 = vpop.f32.mrb[76].mxu1 }
 0x4b5   : > { %v2634_v2 = vadd.f32 %v2633_v58, %v8272_v59  ;;  %v2783_v1 = vmul.f32 %v8272_v59, %v8272_v59  ;;  %v8277_v54 = vpop.f32.mrb[77].mxu1 }
 0x4b6   : > { %12547 = vst [vmem:[#allocation24_spill] sm:$0xff] %v8277_v54  ;;  %v2703_v55 = vadd.f32 %v2702_v60, %v8277_v54  ;;  %v2784_v19 = vmul.f32 %v8277_v54, %v8277_v54  ;;  %v8282_v29 = vpop.f32.mrb[78].mxu1  ;;  %v3037_v54 = vld [vmem:[%s11948_s13 + $0x38] sm:$0xff] }
 0x4b7   : > { %v2900_v12 = vadd.f32 %v2899_v17, %v2783_v1  ;;  %v2635_v21 = vadd.f32 %v2634_v2, %v8282_v29  ;;  %v2785_v8 = vmul.f32 %v8282_v29, %v8282_v29  ;;  %v8287_v39 = vpop.f32.mrb[79].mxu1 }
 0x4b8   : > { %12548 = vst [vmem:[#allocation28_spill] sm:$0xff] %v8287_v39  ;;  %v2969_v36 = vadd.f32 %v2968_v13, %v2784_v19  ;;  %v2704_v3 = vadd.f32 %v2703_v55, %v8287_v39  ;;  %v2786_v25 = vmul.f32 %v8287_v39, %v8287_v39  ;;  %v3036_v39 = vld [vmem:[%s11948_s13 + $0x30] sm:$0xff] }
 0x4b9   : > { %v2901_v50 = vadd.f32 %v2900_v12, %v2785_v8  ;;  %v8560_v16 = vpack.c.bf16 %v3037_v54, %v3036_v39 }
 0x4ba   : > { %v2970_v63 = vadd.f32 %v2969_v36, %v2786_v25 }
 0x4bc   : > { %v8292_v35 = vpop.f32.mrb[80].mxu1 }
 0x4bd   : > { %v2636_v37 = vadd.f32 %v2635_v21, %v8292_v35  ;;  %v2787_v5 = vmul.f32 %v8292_v35, %v8292_v35  ;;  %v8297_v30 = vpop.f32.mrb[81].mxu1 }
 0x4be   : > { %12549 = vst [vmem:[#allocation29_spill] sm:$0xff] %v8297_v30  ;;  %v2705_v57 = vadd.f32 %v2704_v3, %v8297_v30  ;;  %v2788_v41 = vmul.f32 %v8297_v30, %v8297_v30  ;;  %v8302_v28 = vpop.f32.mrb[82].mxu1  ;;  %v3052_v30 = vld [vmem:[%s11948_s13 + $0xb0] sm:$0xff] }
 0x4bf   : > { %v2902_v34 = vadd.f32 %v2901_v50, %v2787_v5  ;;  %v2637_v33 = vadd.f32 %v2636_v37, %v8302_v28  ;;  %v2789_v43 = vmul.f32 %v8302_v28, %v8302_v28  ;;  %v8307_v56 = vpop.f32.mrb[83].mxu1 }
 0x4c0   : > { %12550 = vst [vmem:[#allocation30_spill] sm:$0xff] %v8307_v56  ;;  %v2971_v49 = vadd.f32 %v2970_v63, %v2788_v41  ;;  %v2706_v4 = vadd.f32 %v2705_v57, %v8307_v56  ;;  %v2790_v38 = vmul.f32 %v8307_v56, %v8307_v56 }
 0x4c1   : > { %v2903_v15 = vadd.f32 %v2902_v34, %v2789_v43 }
 0x4c2   : > { %v2972_v32 = vadd.f32 %v2971_v49, %v2790_v38 }
 0x4c4   : > { %v8312_v40 = vpop.f32.mrb[84].mxu1 }
 0x4c5   : > { %v2638_v27 = vadd.f32 %v2637_v33, %v8312_v40  ;;  %v2791_v53 = vmul.f32 %v8312_v40, %v8312_v40  ;;  %v8317_v52 = vpop.f32.mrb[85].mxu1 }
 0x4c6   : > { %12551 = vst [vmem:[#allocation31_spill] sm:$0xff] %v8317_v52  ;;  %v2707_v58 = vadd.f32 %v2706_v4, %v8317_v52  ;;  %v2792_v48 = vmul.f32 %v8317_v52, %v8317_v52  ;;  %v8322_v47 = vpop.f32.mrb[86].mxu1 }
 0x4c7   : > { %v2904_v60 = vadd.f32 %v2903_v15, %v2791_v53  ;;  %v2639_v7 = vadd.f32 %v2638_v27, %v8322_v47  ;;  %v2793_v17 = vmul.f32 %v8322_v47, %v8322_v47  ;;  %v8327_v13 = vpop.f32.mrb[87].mxu1 }
 0x4c8   : > { %12552 = vst [vmem:[#allocation32_spill] sm:$0xff] %v8327_v13  ;;  %v2973_v2 = vadd.f32 %v2972_v32, %v2792_v48  ;;  %v2708_v1 = vadd.f32 %v2707_v58, %v8327_v13  ;;  %v2794_v55 = vmul.f32 %v8327_v13, %v8327_v13 }
 0x4c9   : > { %v2905_v19 = vadd.f32 %v2904_v60, %v2793_v17 }
 0x4ca   : > { %v2974_v12 = vadd.f32 %v2973_v2, %v2794_v55 }
 0x4cc   : > { %v8332_v21 = vpop.f32.mrb[88].mxu1 }
 0x4cd   : > { %v2640_v8 = vadd.f32 %v2639_v7, %v8332_v21  ;;  %v2795_v36 = vmul.f32 %v8332_v21, %v8332_v21  ;;  %v8337_v3 = vpop.f32.mrb[89].mxu1 }
 0x4ce   : > { %12553 = vst [vmem:[#allocation33_spill] sm:$0xff] %v8337_v3  ;;  %v2709_v25 = vadd.f32 %v2708_v1, %v8337_v3  ;;  %v2796_v50 = vmul.f32 %v8337_v3, %v8337_v3  ;;  %v8342_v63 = vpop.f32.mrb[90].mxu1  ;;  %v3033_v3 = vld [vmem:[%s11948_s13 + $0x18] sm:$0xff] }
 0x4cf   : > { %v2906_v37 = vadd.f32 %v2905_v19, %v2795_v36  ;;  %v2641_v5 = vadd.f32 %v2640_v8, %v8342_v63  ;;  %v2797_v57 = vmul.f32 %v8342_v63, %v8342_v63  ;;  %v8347_v41 = vpop.f32.mrb[91].mxu1 }
 0x4d0   : > { %12554 = vst [vmem:[#allocation34_spill] sm:$0xff] %v8347_v41  ;;  %v2975_v34 = vadd.f32 %v2974_v12, %v2796_v50  ;;  %v2710_v33 = vadd.f32 %v2709_v25, %v8347_v41  ;;  %v2798_v43 = vmul.f32 %v8347_v41, %v8347_v41 }
 0x4d1   : > { %v2907_v49 = vadd.f32 %v2906_v37, %v2797_v57 }
 0x4d2   : > { %v2976_v4 = vadd.f32 %v2975_v34, %v2798_v43 }
 0x4d4   : > { %v8352_v38 = vpop.f32.mrb[92].mxu1 }
 0x4d5   : > { %v2642_v15 = vadd.f32 %v2641_v5, %v8352_v38  ;;  %v2799_v32 = vmul.f32 %v8352_v38, %v8352_v38  ;;  %v8357_v27 = vpop.f32.mrb[93].mxu1 }
 0x4d6   : > { %12555 = vst [vmem:[#allocation35_spill] sm:$0xff] %v8357_v27  ;;  %v2711_v53 = vadd.f32 %v2710_v33, %v8357_v27  ;;  %v2800_v58 = vmul.f32 %v8357_v27, %v8357_v27  ;;  %v8362_v48 = vpop.f32.mrb[94].mxu1  ;;  %v3048_v27 = vld [vmem:[%s11948_s13 + $0x90] sm:$0xff] }
 0x4d7   : > { %v2908_v60 = vadd.f32 %v2907_v49, %v2799_v32  ;;  %v2643_v7 = vadd.f32 %v2642_v15, %v8362_v48  ;;  %v2801_v17 = vmul.f32 %v8362_v48, %v8362_v48  ;;  %v8367_v2 = vpop.f32.mrb[95].mxu1 }
 0x4d8   : > { %12556 = vst [vmem:[#allocation36_spill] sm:$0xff] %v8367_v2  ;;  %v2977_v1 = vadd.f32 %v2976_v4, %v2800_v58  ;;  %v2712_v55 = vadd.f32 %v2711_v53, %v8367_v2  ;;  %v2802_v19 = vmul.f32 %v8367_v2, %v8367_v2 }
 0x4d9   : > { %v2909_v12 = vadd.f32 %v2908_v60, %v2801_v17 }
 0x4da   : > { %v2978_v8 = vadd.f32 %v2977_v1, %v2802_v19 }
 0x4dc   : > { %v8372_v36 = vpop.f32.mrb[96].mxu1 }
 0x4dd   : > { %12557 = vst [vmem:[#allocation37_spill] sm:$0xff] %v8372_v36  ;;  %v2644_v25 = vadd.f32 %v2643_v7, %v8372_v36  ;;  %v2803_v50 = vmul.f32 %v8372_v36, %v8372_v36  ;;  %v8377_v37 = vpop.f32.mrb[97].mxu1 }
 0x4de   : > { %12558 = vst [vmem:[#allocation38_spill] sm:$0xff] %v8377_v37  ;;  %v2713_v5 = vadd.f32 %v2712_v55, %v8377_v37  ;;  %v2804_v57 = vmul.f32 %v8377_v37, %v8377_v37  ;;  %v8382_v34 = vpop.f32.mrb[98].mxu1 }
 0x4df   : > { %12559 = vst [vmem:[#allocation39_spill] sm:$0xff] %v8382_v34  ;;  %v2910_v33 = vadd.f32 %v2909_v12, %v2803_v50  ;;  %v2645_v43 = vadd.f32 %v2644_v25, %v8382_v34  ;;  %v2805_v49 = vmul.f32 %v8382_v34, %v8382_v34  ;;  %v8387_v4 = vpop.f32.mrb[99].mxu1 }
 0x4e0   : > { %12560 = vst [vmem:[#allocation41_spill] sm:$0xff] %v8387_v4  ;;  %v2979_v15 = vadd.f32 %v2978_v8, %v2804_v57  ;;  %v2714_v32 = vadd.f32 %v2713_v5, %v8387_v4  ;;  %v2806_v53 = vmul.f32 %v8387_v4, %v8387_v4 }
 0x4e1   : > { %v2911_v58 = vadd.f32 %v2910_v33, %v2805_v49 }
 0x4e2   : > { %v2980_v60 = vadd.f32 %v2979_v15, %v2806_v53 }
 0x4e4   : > { %v8392_v7 = vpop.f32.mrb[100].mxu1 }
 0x4e5   : > { %12561 = vst [vmem:[#allocation42_spill] sm:$0xff] %v8392_v7  ;;  %v2646_v17 = vadd.f32 %v2645_v43, %v8392_v7  ;;  %v2807_v1 = vmul.f32 %v8392_v7, %v8392_v7  ;;  %v8397_v55 = vpop.f32.mrb[101].mxu1 }
 0x4e6   : > { %12562 = vst [vmem:[#allocation40_spill] sm:$0xff] %v8397_v55  ;;  %v2715_v19 = vadd.f32 %v2714_v32, %v8397_v55  ;;  %v2808_v12 = vmul.f32 %v8397_v55, %v8397_v55  ;;  %v8402_v8 = vpop.f32.mrb[102].mxu1 }
 0x4e7   : > { %12563 = vst [vmem:[#allocation2_spill] sm:$0xff] %v8402_v8  ;;  %v2912_v25 = vadd.f32 %v2911_v58, %v2807_v1  ;;  %v2647_v50 = vadd.f32 %v2646_v17, %v8402_v8  ;;  %v2809_v5 = vmul.f32 %v8402_v8, %v8402_v8  ;;  %v8407_v57 = vpop.f32.mrb[103].mxu1 }
 0x4e8   : > { %12564 = vst [vmem:[#allocation64_spill] sm:$0xff] %v8407_v57  ;;  %v2981_v33 = vadd.f32 %v2980_v60, %v2808_v12  ;;  %v2716_v43 = vadd.f32 %v2715_v19, %v8407_v57  ;;  %v2810_v49 = vmul.f32 %v8407_v57, %v8407_v57 }
 0x4e9   : > { %v2913_v15 = vadd.f32 %v2912_v25, %v2809_v5 }
 0x4ea   : > { %v2982_v32 = vadd.f32 %v2981_v33, %v2810_v49 }
 0x4ec   : > { %v8412_v53 = vpop.f32.mrb[104].mxu1 }
 0x4ed   : > { %12565 = vst [vmem:[#allocation3_spill] sm:$0xff] %v8412_v53  ;;  %v2648_v55 = vadd.f32 %v2647_v50, %v8412_v53  ;;  %v2811_v58 = vmul.f32 %v8412_v53, %v8412_v53  ;;  %v8417_v17 = vpop.f32.mrb[105].mxu1 }
 0x4ee   : > { %12566 = vst [vmem:[#allocation65_spill] sm:$0xff] %v8417_v17  ;;  %v2717_v1 = vadd.f32 %v2716_v43, %v8417_v17  ;;  %v2812_v60 = vmul.f32 %v8417_v17, %v8417_v17  ;;  %v8422_v19 = vpop.f32.mrb[106].mxu1 }
 0x4ef   : > { %12567 = vst [vmem:[#allocation5_spill] sm:$0xff] %v8422_v19  ;;  %v2914_v12 = vadd.f32 %v2913_v15, %v2811_v58  ;;  %v2649_v25 = vadd.f32 %v2648_v55, %v8422_v19  ;;  %v2813_v5 = vmul.f32 %v8422_v19, %v8422_v19  ;;  %v8427_v33 = vpop.f32.mrb[107].mxu1 }
 0x4f0   : > { %12568 = vst [vmem:[#allocation66_spill] sm:$0xff] %v8427_v33  ;;  %v2983_v50 = vadd.f32 %v2982_v32, %v2812_v60  ;;  %v2718_v49 = vadd.f32 %v2717_v1, %v8427_v33  ;;  %v2814_v57 = vmul.f32 %v8427_v33, %v8427_v33 }
 0x4f1   : > { %v2915_v43 = vadd.f32 %v2914_v12, %v2813_v5 }
 0x4f2   : > { %v2984_v4 = vadd.f32 %v2983_v50, %v2814_v57 }
 0x4f4   : > { %v8432_v37 = vpop.f32.mrb[108].mxu1 }
 0x4f5   : > { %12569 = vst [vmem:[#allocation7_spill] sm:$0xff] %v8432_v37  ;;  %v2650_v17 = vadd.f32 %v2649_v25, %v8432_v37  ;;  %v2815_v55 = vmul.f32 %v8432_v37, %v8432_v37  ;;  %v8437_v15 = vpop.f32.mrb[109].mxu1 }
 0x4f6   : > { %12570 = vst [vmem:[#allocation67_spill] sm:$0xff] %v8437_v15  ;;  %v2719_v58 = vadd.f32 %v2718_v49, %v8437_v15  ;;  %v2816_v32 = vmul.f32 %v8437_v15, %v8437_v15  ;;  %v8442_v1 = vpop.f32.mrb[110].mxu1  ;;  %v3046_v15 = vld [vmem:[%s11948_s13 + $0x80] sm:$0xff] }
 0x4f7   : > { %12571 = vst [vmem:[#allocation4_spill] sm:$0xff] %v8442_v1  ;;  %v2916_v60 = vadd.f32 %v2915_v43, %v2815_v55  ;;  %v2651_v12 = vadd.f32 %v2650_v17, %v8442_v1  ;;  %v2817_v57 = vmul.f32 %v8442_v1, %v8442_v1  ;;  %v8447_v5 = vpop.f32.mrb[111].mxu1  ;;  %v3047_v17 = vld [vmem:[%s11948_s13 + $0x88] sm:$0xff]  ;;  %v3030_v43 = vld [vmem:[%s11948_s13] sm:$0xff] }
 0x4f8   : > { %12572 = vst [vmem:[#allocation43_spill] sm:$0xff] %v8447_v5  ;;  %v2985_v25 = vadd.f32 %v2984_v4, %v2816_v32  ;;  %v2720_v50 = vadd.f32 %v2719_v58, %v8447_v5  ;;  %v2818_v33 = vmul.f32 %v8447_v5, %v8447_v5  ;;  %v8461_v4 = vpack.c.bf16 %v3047_v17, %v3046_v15  ;;  %v3031_v55 = vld [vmem:[%s11948_s13 + $0x8] sm:$0xff] }
 0x4f9   : > { %v2917_v49 = vadd.f32 %v2916_v60, %v2817_v57 }
 0x4fa   : > { %v2986_v2 = vadd.f32 %v2985_v25, %v2818_v33  ;;  %v8468_v33 = vpack.c.bf16 %v3031_v55, %v3030_v43  ;;  %5822 = vmatprep.subr.bf16.mxu0 %v8461_v4 }
 0x4fc   : > { %v8466_v58 = vpop.f32.mrb[112].mxu1  ;;  %5824 = vmatpush3.bf16.msra.mxu0 %v8468_v33 }
 0x4fd   : > { %12573 = vst [vmem:[#allocation44_spill] sm:$0xff] %v8466_v58  ;;  %v2652_v32 = vadd.f32 %v2651_v12, %v8466_v58  ;;  %v2819_v60 = vmul.f32 %v8466_v58, %v8466_v58  ;;  %v8473_v57 = vpop.f32.mrb[113].mxu1 }
 0x4fe   : > { %12574 = vst [vmem:[#allocation45_spill] sm:$0xff] %v8473_v57  ;;  %v2721_v15 = vadd.f32 %v2720_v50, %v8473_v57  ;;  %v2820_v25 = vmul.f32 %v8473_v57, %v8473_v57  ;;  %v8479_v17 = vpop.f32.mrb[114].mxu1  ;;  %v3049_v50 = vld [vmem:[%s11948_s13 + $0x98] sm:$0xff] }
 0x4ff   : > { %12575 = vst [vmem:[#allocation68_spill] sm:$0xff] %v8479_v17  ;;  %v2918_v43 = vadd.f32 %v2917_v49, %v2819_v60  ;;  %v2653_v55 = vadd.f32 %v2652_v32, %v8479_v17  ;;  %v2821_v12 = vmul.f32 %v8479_v17, %v8479_v17  ;;  %v8485_v5 = vpop.f32.mrb[115].mxu1  ;;  %v8496_v32 = vpack.c.bf16 %v3049_v50, %v3048_v27  ;;  %v3032_v60 = vld [vmem:[%s11948_s13 + $0x10] sm:$0xff]  ;;  %v3051_v27 = vld [vmem:[%s11948_s13 + $0xa8] sm:$0xff] }
 0x500   : > { %12576 = vst [vmem:[#allocation46_spill] sm:$0xff] %v8485_v5  ;;  %v2987_v57 = vadd.f32 %v2986_v2, %v2820_v25  ;;  %v2722_v41 = vadd.f32 %v2721_v15, %v8485_v5  ;;  %v2822_v49 = vmul.f32 %v8485_v5, %v8485_v5  ;;  %v8504_v52 = vpack.c.bf16 %v3033_v3, %v3032_v60  ;;  %v3050_v2 = vld [vmem:[%s11948_s13 + $0xa0] sm:$0xff]  ;;  %v3035_v3 = vld [vmem:[%s11948_s13 + $0x28] sm:$0xff] }
 0x501   : > { %v2919_v13 = vadd.f32 %v2918_v43, %v2821_v12  ;;  %5826 = vmatprep.subr.bf16.mxu0 %v8496_v32  ;;  %v3034_v15 = vld [vmem:[%s11948_s13 + $0x20] sm:$0xff]  ;;  %v8517_v25 = vpack.c.bf16 %v3051_v27, %v3050_v2 }
 0x502   : > { %v2988_v56 = vadd.f32 %v2987_v57, %v2822_v49  ;;  %5828 = vmatpush3.bf16.msra.mxu0 %v8504_v52  ;;  %v8524_v43 = vpack.c.bf16 %v3035_v3, %v3034_v15 }
 0x503   : > { %5830 = vmatprep.subr.bf16.mxu0 %v8517_v25 }
 0x504   : > { %v8522_v57 = vpop.f32.mrb[116].mxu1 }
 0x505   : > { %12577 = vst [vmem:[#allocation69_spill] sm:$0xff] %v8522_v57  ;;  %v2654_v12 = vadd.f32 %v2653_v55, %v8522_v57  ;;  %v2823_v50 = vmul.f32 %v8522_v57, %v8522_v57  ;;  %v8529_v49 = vpop.f32.mrb[117].mxu1 }
 0x506   : > { %12578 = vst [vmem:[#allocation47_spill] sm:$0xff] %v8529_v49  ;;  %v2723_v60 = vadd.f32 %v2722_v41, %v8529_v49  ;;  %v2824_v2 = vmul.f32 %v8529_v49, %v8529_v49  ;;  %v8535_v27 = vpop.f32.mrb[118].mxu1  ;;  %5832 = vmatpush3.bf16.msra.mxu0 %v8524_v43  ;;  %v3053_v41 = vld [vmem:[%s11948_s13 + $0xb8] sm:$0xff] }
 0x507   : > { %12579 = vst [vmem:[#allocation70_spill] sm:$0xff] %v8535_v27  ;;  %v2920_v5 = vadd.f32 %v2919_v13, %v2823_v50  ;;  %v2655_v15 = vadd.f32 %v2654_v12, %v8535_v27  ;;  %v2825_v55 = vmul.f32 %v8535_v27, %v8535_v27  ;;  %v8540_v3 = vpop.f32.mrb[119].mxu1  ;;  %v8552_v50 = vpack.c.bf16 %v3053_v41, %v3052_v30 }
 0x508   : > { %12580 = vst [vmem:[#allocation48_spill] sm:$0xff] %v8540_v3  ;;  %v2989_v49 = vadd.f32 %v2988_v56, %v2824_v2  ;;  %v2724_v13 = vadd.f32 %v2723_v60, %v8540_v3  ;;  %v2826_v12 = vmul.f32 %v8540_v3, %v8540_v3 }
 0x509   : > { %v2921_v11 = vadd.f32 %v2920_v5, %v2825_v55  ;;  %5834 = vmatprep.subr.bf16.mxu0 %v8552_v50 }
 0x50a   : > { %v2990_v10 = vadd.f32 %v2989_v49, %v2826_v12  ;;  %5836 = vmatpush3.bf16.msra.mxu0 %v8560_v16 }
 0x50c   : > { %v8564_v56 = vpop.f32.mrb[120].mxu1 }
 0x50d   : > { %12581 = vst [vmem:[#allocation49_spill] sm:$0xff] %v8564_v56  ;;  %v2656_v30 = vadd.f32 %v2655_v15, %v8564_v56  ;;  %v2827_v60 = vmul.f32 %v8564_v56, %v8564_v56  ;;  %v8569_v2 = vpop.f32.mrb[121].mxu1 }
 0x50e   : > { %12582 = vst [vmem:[#allocation50_spill] sm:$0xff] %v8569_v2  ;;  %v2725_v41 = vadd.f32 %v2724_v13, %v8569_v2  ;;  %v2828_v54 = vmul.f32 %v8569_v2, %v8569_v2  ;;  %v8574_v39 = vpop.f32.mrb[122].mxu1 }
 0x50f   : > { %12583 = vst [vmem:[#allocation51_spill] sm:$0xff] %v8574_v39  ;;  %v2922_v5 = vadd.f32 %v2921_v11, %v2827_v60  ;;  %v2657_v49 = vadd.f32 %v2656_v30, %v8574_v39  ;;  %v2829_v55 = vmul.f32 %v8574_v39, %v8574_v39  ;;  %v8579_v12 = vpop.f32.mrb[123].mxu1  ;;  %v3054_v11 = vld [vmem:[%s11948_s13 + $0xc0] sm:$0xff]  ;;  %v3055_v30 = vld [vmem:[%s11948_s13 + $0xc8] sm:$0xff] }
 0x510   : > { %12584 = vst [vmem:[#allocation52_spill] sm:$0xff] %v8579_v12  ;;  %v2991_v15 = vadd.f32 %v2990_v10, %v2828_v54  ;;  %v2726_v3 = vadd.f32 %v2725_v41, %v8579_v12  ;;  %v2830_v26 = vmul.f32 %v8579_v12, %v8579_v12  ;;  %v3038_v10 = vld [vmem:[%s11948_s13 + $0x40] sm:$0xff]  ;;  %v8600_v54 = vpack.c.bf16 %v3055_v30, %v3054_v11 }
 0x511   : > { %v2923_v13 = vadd.f32 %v2922_v5, %v2829_v55  ;;  %v3039_v5 = vld [vmem:[%s11948_s13 + $0x48] sm:$0xff]  ;;  %v3056_v55 = vld [vmem:[%s11948_s13 + $0xd0] sm:$0xff] }
 0x512   : > { %v2992_v24 = vadd.f32 %v2991_v15, %v2830_v26  ;;  %v3057_v15 = vld [vmem:[%s11948_s13 + $0xd8] sm:$0xff]  ;;  %v8616_v11 = vpack.c.bf16 %v3039_v5, %v3038_v10  ;;  %5838 = vmatprep.subr.bf16.mxu0 %v8600_v54 }
 0x513   : > { %v8618_v30 = vpack.c.bf16 %v3057_v15, %v3056_v55  ;;  %v3059_v55 = vld [vmem:[%s11948_s13 + $0xe8] sm:$0xff] }
 0x514   : > { %v8584_v42 = vpop.f32.mrb[124].mxu1  ;;  %5840 = vmatpush3.bf16.msra.mxu0 %v8616_v11 }
 0x515   : > { %12585 = vst [vmem:[#allocation53_spill] sm:$0xff] %v8584_v42  ;;  %v2658_v60 = vadd.f32 %v2657_v49, %v8584_v42  ;;  %v2831_v41 = vmul.f32 %v8584_v42, %v8584_v42  ;;  %v8598_v26 = vpop.f32.mrb[125].mxu1  ;;  %5842 = vmatprep.subr.bf16.mxu0 %v8618_v30 }
 0x516   : > { %12586 = vst [vmem:[#allocation54_spill] sm:$0xff] %v8598_v26  ;;  %v2727_v49 = vadd.f32 %v2726_v3, %v8598_v26  ;;  %v2832_v12 = vmul.f32 %v8598_v26, %v8598_v26  ;;  %v8614_v2 = vpop.f32.mrb[126].mxu1  ;;  %v3058_v3 = vld [vmem:[%s11948_s13 + $0xe0] sm:$0xff] }
 0x517   : > { %12587 = vst [vmem:[#allocation6_spill] sm:$0xff] %v8614_v2  ;;  %v2924_v23 = vadd.f32 %v2923_v13, %v2831_v41  ;;  %v2659_v26 = vadd.f32 %v2658_v60, %v8614_v2  ;;  %v2833_v10 = vmul.f32 %v8614_v2, %v8614_v2  ;;  %v8632_v5 = vpop.f32.mrb[127].mxu1  ;;  %v8642_v13 = vpack.c.bf16 %v3041_v20, %v3040_v14  ;;  %v3042_v2 = vld [vmem:[%s11948_s13 + $0x60] sm:$0xff] }
 0x518   : > { %12588 = vst [vmem:[#allocation9_spill] sm:$0xff] %v8632_v5  ;;  %v2993_v15 = vadd.f32 %v2992_v24, %v2832_v12  ;;  %v2728_v45 = vadd.f32 %v2727_v49, %v8632_v5  ;;  %v2834_v42 = vmul.f32 %v8632_v5, %v8632_v5  ;;  %v8645_v41 = vpack.c.bf16 %v3059_v55, %v3058_v3  ;;  %v3043_v24 = vld [vmem:[%s11948_s13 + $0x68] sm:$0xff]  ;;  %v3060_v49 = vld [vmem:[%s11948_s13 + $0xf0] sm:$0xff] }
 0x519   : > { %v2925_v60 = vadd.f32 %v2924_v23, %v2833_v10  ;;  %v3061_v23 = vld [vmem:[%s11948_s13 + $0xf8] sm:$0xff]  ;;  %5844 = vmatpush3.bf16.msra.mxu0 %v8642_v13  ;;  %v8662_v14 = vpack.c.bf16 %v3043_v24, %v3042_v2 }
 0x51a   : > { %v2994_v12 = vadd.f32 %v2993_v15, %v2834_v42  ;;  %5846 = vmatprep.subr.bf16.mxu0 %v8645_v41  ;;  %v8670_v55 = vpack.c.bf16 %v3061_v23, %v3060_v49  ;;  %v3044_v15 = vld [vmem:[%s11948_s13 + $0x70] sm:$0xff]  ;;  %v3045_v2 = vld [vmem:[%s11948_s13 + $0x78] sm:$0xff] }
 0x51c   : > { %v8659_v20 = vpop.f32.mrb[128].mxu1 }
 0x51d   : > { %12589 = vst [vmem:[#allocation55_spill] sm:$0xff] %v8659_v20  ;;  %v2660_v3 = vadd.f32 %v2659_v26, %v8659_v20  ;;  %v2835_v10 = vmul.f32 %v8659_v20, %v8659_v20  ;;  %v8667_v42 = vpop.f32.mrb[129].mxu1  ;;  %5848 = vmatpush3.bf16.msra.mxu0 %v8662_v14 }
 0x51e   : > { %12590 = vst [vmem:[#allocation56_spill] sm:$0xff] %v8667_v42  ;;  %v2729_v24 = vadd.f32 %v2728_v45, %v8667_v42  ;;  %v2836_v26 = vmul.f32 %v8667_v42, %v8667_v42  ;;  %v8681_v5 = vpop.f32.mrb[130].mxu1  ;;  %v8692_v45 = vpack.c.bf16 %v3045_v2, %v3044_v15  ;;  %5850 = vmatprep.subr.bf16.mxu0 %v8670_v55 }
 0x51f   : > { %12591 = vst [vmem:[#allocation57_spill] sm:$0xff] %v8681_v5  ;;  %v2926_v20 = vadd.f32 %v2925_v60, %v2835_v10  ;;  %v2661_v39 = vadd.f32 %v2660_v3, %v8681_v5  ;;  %v2837_v49 = vmul.f32 %v8681_v5, %v8681_v5  ;;  %v8686_v23 = vpop.f32.mrb[131].mxu1 }
 0x520   : > { %12592 = vst [vmem:[#allocation58_spill] sm:$0xff] %v8686_v23  ;;  %v2995_v56 = vadd.f32 %v2994_v12, %v2836_v26  ;;  %v2730_v27 = vadd.f32 %v2729_v24, %v8686_v23  ;;  %v2838_v57 = vmul.f32 %v8686_v23, %v8686_v23 }
 0x521   : > { %v2927_v42 = vadd.f32 %v2926_v20, %v2837_v49  ;;  %5852 = vmatpush3.bf16.msra.mxu0 %v8692_v45 }
 0x522   : > { %v2996_v60 = vadd.f32 %v2995_v56, %v2838_v57  ;;  %5854 = vmatprep.subr.bf16.mxu0 %v8461_v4 }
 0x524   : > { %v8695_v3 = vpop.f32.mrb[132].mxu1 }
 0x525   : > { %12593 = vst [vmem:[#allocation59_spill] sm:$0xff] %v8695_v3  ;;  %v2662_v10 = vadd.f32 %v2661_v39, %v8695_v3  ;;  %v2839_v12 = vmul.f32 %v8695_v3, %v8695_v3  ;;  %v8701_v24 = vpop.f32.mrb[133].mxu1 }
 0x526   : > { %12594 = vst [vmem:[#allocation60_spill] sm:$0xff] %v8701_v24  ;;  %v2731_v15 = vadd.f32 %v2730_v27, %v8701_v24  ;;  %v2840_v20 = vmul.f32 %v8701_v24, %v8701_v24  ;;  %v8707_v2 = vpop.f32.mrb[134].mxu1 }
 0x527   : > { %12595 = vst [vmem:[#allocation61_spill] sm:$0xff] %v8707_v2  ;;  %v2928_v57 = vadd.f32 %v2927_v42, %v2839_v12  ;;  %v2663_v56 = vadd.f32 %v2662_v10, %v8707_v2  ;;  %v2841_v39 = vmul.f32 %v8707_v2, %v8707_v2  ;;  %v8712_v26 = vpop.f32.mrb[135].mxu1 }
 0x528   : > { %12596 = vst [vmem:[#allocation10_spill] sm:$0xff] %v8712_v26  ;;  %v2997_v49 = vadd.f32 %v2996_v60, %v2840_v20  ;;  %v2732_v23 = vadd.f32 %v2731_v15, %v8712_v26  ;;  %v2842_v4 = vmul.f32 %v8712_v26, %v8712_v26 }
 0x529   : > { %v2929_v27 = vadd.f32 %v2928_v57, %v2841_v39 }
 0x52a   : > { %v2998_v3 = vadd.f32 %v2997_v49, %v2842_v4 }
 0x52c   : > { %v8717_v5 = vpop.f32.mrb[136].mxu1 }
 0x52d   : > { %12597 = vst [vmem:[#allocation13_spill] sm:$0xff] %v8717_v5  ;;  %v2664_v24 = vadd.f32 %v2663_v56, %v8717_v5  ;;  %v2843_v42 = vmul.f32 %v8717_v5, %v8717_v5  ;;  %v8722_v10 = vpop.f32.mrb[137].mxu1 }
 0x52e   : > { %12598 = vst [vmem:[#allocation15_spill] sm:$0xff] %v8722_v10  ;;  %v2733_v12 = vadd.f32 %v2732_v23, %v8722_v10  ;;  %v2844_v60 = vmul.f32 %v8722_v10, %v8722_v10  ;;  %v8727_v15 = vpop.f32.mrb[138].mxu1 }
 0x52f   : > { %12599 = vst [vmem:[#allocation12_spill] sm:$0xff] %v8727_v15  ;;  %v2930_v20 = vadd.f32 %v2929_v27, %v2843_v42  ;;  %v2665_v57 = vadd.f32 %v2664_v24, %v8727_v15  ;;  %v2845_v39 = vmul.f32 %v8727_v15, %v8727_v15  ;;  %v8732_v49 = vpop.f32.mrb[139].mxu1 }
 0x530   : > { %12600 = vst [vmem:[#allocation14_spill] sm:$0xff] %v8732_v49  ;;  %v2999_v56 = vadd.f32 %v2998_v3, %v2844_v60  ;;  %v2734_v4 = vadd.f32 %v2733_v12, %v8732_v49  ;;  %v2846_v26 = vmul.f32 %v8732_v49, %v8732_v49 }
 0x531   : > { %v2931_v23 = vadd.f32 %v2930_v20, %v2845_v39 }
 0x532   : > { %v3000_v5 = vadd.f32 %v2999_v56, %v2846_v26 }
 0x534   : > { %v8737_v2 = vpop.f32.mrb[140].mxu1 }
 0x535   : > { %12601 = vst [vmem:[#allocation17_spill] sm:$0xff] %v8737_v2  ;;  %v2666_v10 = vadd.f32 %v2665_v57, %v8737_v2  ;;  %v2847_v24 = vmul.f32 %v8737_v2, %v8737_v2  ;;  %v8742_v27 = vpop.f32.mrb[141].mxu1 }
 0x536   : > { %12602 = vst [vmem:[#allocation11_spill] sm:$0xff] %v8742_v27  ;;  %v2735_v42 = vadd.f32 %v2734_v4, %v8742_v27  ;;  %v2848_v3 = vmul.f32 %v8742_v27, %v8742_v27  ;;  %v8747_v12 = vpop.f32.mrb[142].mxu1 }
 0x537   : > { %12603 = vst [vmem:[#allocation8_spill] sm:$0xff] %v8747_v12  ;;  %v2932_v60 = vadd.f32 %v2931_v23, %v2847_v24  ;;  %v2667_v20 = vadd.f32 %v2666_v10, %v8747_v12  ;;  %v2849_v26 = vmul.f32 %v8747_v12, %v8747_v12  ;;  %v8752_v39 = vpop.f32.mrb[143].mxu1 }
 0x538   : > { %12604 = vst [vmem:[#allocation71_spill] sm:$0xff] %v8752_v39  ;;  %v3001_v57 = vadd.f32 %v3000_v5, %v2848_v3  ;;  %v2736_v56 = vadd.f32 %v2735_v42, %v8752_v39  ;;  %v2850_v49 = vmul.f32 %v8752_v39, %v8752_v39 }
 0x539   : > { %v2933_v4 = vadd.f32 %v2932_v60, %v2849_v26 }
 0x53a   : > { %v3002_v2 = vadd.f32 %v3001_v57, %v2850_v49 }
 0x53c   : > { %v8757_v15 = vpop.f32.mrb[144].mxu1 }
 0x53d   : > { %12605 = vst [vmem:[#allocation72_spill] sm:$0xff] %v8757_v15  ;;  %v2668_v27 = vadd.f32 %v2667_v20, %v8757_v15  ;;  %v2851_v10 = vmul.f32 %v8757_v15, %v8757_v15  ;;  %v8762_v23 = vpop.f32.mrb[145].mxu1 }
 0x53e   : > { %12606 = vst [vmem:[#allocation73_spill] sm:$0xff] %v8762_v23  ;;  %v2737_v24 = vadd.f32 %v2736_v56, %v8762_v23  ;;  %v2852_v5 = vmul.f32 %v8762_v23, %v8762_v23  ;;  %v8767_v42 = vpop.f32.mrb[146].mxu1 }
 0x53f   : > { %12607 = vst [vmem:[#allocation74_spill] sm:$0xff] %v8767_v42  ;;  %v2934_v3 = vadd.f32 %v2933_v4, %v2851_v10  ;;  %v2669_v60 = vadd.f32 %v2668_v27, %v8767_v42  ;;  %v2853_v49 = vmul.f32 %v8767_v42, %v8767_v42  ;;  %v8772_v26 = vpop.f32.mrb[147].mxu1 }
 0x540   : > { %12608 = vst [vmem:[#allocation75_spill] sm:$0xff] %v8772_v26  ;;  %v3003_v20 = vadd.f32 %v3002_v2, %v2852_v5  ;;  %v2738_v57 = vadd.f32 %v2737_v24, %v8772_v26  ;;  %v2854_v39 = vmul.f32 %v8772_v26, %v8772_v26 }
 0x541   : > { %v2935_v56 = vadd.f32 %v2934_v3, %v2853_v49 }
 0x542   : > { %v3004_v15 = vadd.f32 %v3003_v20, %v2854_v39 }
 0x544   : > { %v8777_v12 = vpop.f32.mrb[148].mxu1 }
 0x545   : > { %12609 = vst [vmem:[#allocation76_spill] sm:$0xff] %v8777_v12  ;;  %v2670_v23 = vadd.f32 %v2669_v60, %v8777_v12  ;;  %v2855_v27 = vmul.f32 %v8777_v12, %v8777_v12  ;;  %v8782_v4 = vpop.f32.mrb[149].mxu1 }
 0x546   : > { %12610 = vst [vmem:[#allocation77_spill] sm:$0xff] %v8782_v4  ;;  %v2739_v10 = vadd.f32 %v2738_v57, %v8782_v4  ;;  %v2856_v2 = vmul.f32 %v8782_v4, %v8782_v4  ;;  %v8787_v24 = vpop.f32.mrb[150].mxu1 }
 0x547   : > { %12611 = vst [vmem:[#allocation78_spill] sm:$0xff] %v8787_v24  ;;  %v2936_v5 = vadd.f32 %v2935_v56, %v2855_v27  ;;  %v2671_v3 = vadd.f32 %v2670_v23, %v8787_v24  ;;  %v2857_v39 = vmul.f32 %v8787_v24, %v8787_v24  ;;  %v8792_v49 = vpop.f32.mrb[151].mxu1 }
 0x548   : > { %12612 = vst [vmem:[#allocation79_spill] sm:$0xff] %v8792_v49  ;;  %v3005_v60 = vadd.f32 %v3004_v15, %v2856_v2  ;;  %v2740_v20 = vadd.f32 %v2739_v10, %v8792_v49  ;;  %v2858_v26 = vmul.f32 %v8792_v49, %v8792_v49 }
 0x549   : > { %v2937_v57 = vadd.f32 %v2936_v5, %v2857_v39 }
 0x54a   : > { %v3006_v12 = vadd.f32 %v3005_v60, %v2858_v26 }
 0x54c   : > { %v8797_v42 = vpop.f32.mrb[152].mxu1 }
 0x54d   : > { %12613 = vst [vmem:[#allocation80_spill] sm:$0xff] %v8797_v42  ;;  %v2672_v4 = vadd.f32 %v2671_v3, %v8797_v42  ;;  %v2859_v23 = vmul.f32 %v8797_v42, %v8797_v42  ;;  %v8802_v56 = vpop.f32.mrb[153].mxu1 }
 0x54e   : > { %12614 = vst [vmem:[#allocation81_spill] sm:$0xff] %v8802_v56  ;;  %v2741_v27 = vadd.f32 %v2740_v20, %v8802_v56  ;;  %v2860_v15 = vmul.f32 %v8802_v56, %v8802_v56  ;;  %v8807_v10 = vpop.f32.mrb[154].mxu1 }
 0x54f   : > { %12615 = vst [vmem:[#allocation82_spill] sm:$0xff] %v8807_v10  ;;  %v2938_v2 = vadd.f32 %v2937_v57, %v2859_v23  ;;  %v2673_v5 = vadd.f32 %v2672_v4, %v8807_v10  ;;  %v2861_v26 = vmul.f32 %v8807_v10, %v8807_v10  ;;  %v8812_v39 = vpop.f32.mrb[155].mxu1 }
 0x550   : > { %12616 = vst [vmem:[#allocation83_spill] sm:$0xff] %v8812_v39  ;;  %v3007_v3 = vadd.f32 %v3006_v12, %v2860_v15  ;;  %v2742_v60 = vadd.f32 %v2741_v27, %v8812_v39  ;;  %v2862_v49 = vmul.f32 %v8812_v39, %v8812_v39 }
 0x551   : > { %v2939_v20 = vadd.f32 %v2938_v2, %v2861_v26 }
 0x552   : > { %v3008_v42 = vadd.f32 %v3007_v3, %v2862_v49 }
 0x554   : > { %v8817_v24 = vpop.f32.mrb[156].mxu1 }
 0x555   : > { %12617 = vst [vmem:[#allocation84_spill] sm:$0xff] %v8817_v24  ;;  %v2674_v56 = vadd.f32 %v2673_v5, %v8817_v24  ;;  %v2863_v4 = vmul.f32 %v8817_v24, %v8817_v24  ;;  %v8822_v57 = vpop.f32.mrb[157].mxu1 }
 0x556   : > { %12618 = vst [vmem:[#allocation85_spill] sm:$0xff] %v8822_v57  ;;  %v2743_v23 = vadd.f32 %v2742_v60, %v8822_v57  ;;  %v2864_v12 = vmul.f32 %v8822_v57, %v8822_v57  ;;  %v8827_v27 = vpop.f32.mrb[158].mxu1 }
 0x557   : > { %12619 = vst [vmem:[#allocation86_spill] sm:$0xff] %v8827_v27  ;;  %v2940_v15 = vadd.f32 %v2939_v20, %v2863_v4  ;;  %v2675_v2 = vadd.f32 %v2674_v56, %v8827_v27  ;;  %v2865_v49 = vmul.f32 %v8827_v27, %v8827_v27  ;;  %v8832_v26 = vpop.f32.mrb[159].mxu1 }
 0x558   : > { %12620 = vst [vmem:[#allocation87_spill] sm:$0xff] %v8832_v26  ;;  %v3009_v5 = vadd.f32 %v3008_v42, %v2864_v12  ;;  %v2744_v3 = vadd.f32 %v2743_v23, %v8832_v26  ;;  %v2866_v39 = vmul.f32 %v8832_v26, %v8832_v26 }
 0x559   : > { %v2941_v60 = vadd.f32 %v2940_v15, %v2865_v49 }
 0x55a   : > { %v3010_v24 = vadd.f32 %v3009_v5, %v2866_v39 }
 0x55c   : > { %v8837_v10 = vpop.f32.mrb[160].mxu1 }
 0x55d   : > { %12621 = vst [vmem:[#allocation88_spill] sm:$0xff] %v8837_v10  ;;  %v2676_v57 = vadd.f32 %v2675_v2, %v8837_v10  ;;  %v2867_v56 = vmul.f32 %v8837_v10, %v8837_v10  ;;  %v8842_v20 = vpop.f32.mrb[161].mxu1 }
 0x55e   : > { %12622 = vst [vmem:[#allocation89_spill] sm:$0xff] %v8842_v20  ;;  %v2745_v4 = vadd.f32 %v2744_v3, %v8842_v20  ;;  %v2868_v42 = vmul.f32 %v8842_v20, %v8842_v20  ;;  %v8847_v23 = vpop.f32.mrb[162].mxu1 }
 0x55f   : > { %12623 = vst [vmem:[#allocation90_spill] sm:$0xff] %v8847_v23  ;;  %v2942_v12 = vadd.f32 %v2941_v60, %v2867_v56  ;;  %v2677_v15 = vadd.f32 %v2676_v57, %v8847_v23  ;;  %v2869_v39 = vmul.f32 %v8847_v23, %v8847_v23  ;;  %v8852_v49 = vpop.f32.mrb[163].mxu1 }
 0x560   : > { %12624 = vst [vmem:[#allocation91_spill] sm:$0xff] %v8852_v49  ;;  %v3011_v2 = vadd.f32 %v3010_v24, %v2868_v42  ;;  %v2746_v5 = vadd.f32 %v2745_v4, %v8852_v49  ;;  %v2870_v26 = vmul.f32 %v8852_v49, %v8852_v49 }
 0x561   : > { %v2943_v3 = vadd.f32 %v2942_v12, %v2869_v39 }
 0x562   : > { %v3012_v10 = vadd.f32 %v3011_v2, %v2870_v26 }
 0x564   : > { %v8857_v27 = vpop.f32.mrb[164].mxu1 }
 0x565   : > { %12625 = vst [vmem:[#allocation92_spill] sm:$0xff] %v8857_v27  ;;  %v2678_v20 = vadd.f32 %v2677_v15, %v8857_v27  ;;  %v2871_v57 = vmul.f32 %v8857_v27, %v8857_v27  ;;  %v8862_v60 = vpop.f32.mrb[165].mxu1 }
 0x566   : > { %12626 = vst [vmem:[#allocation93_spill] sm:$0xff] %v8862_v60  ;;  %v2747_v56 = vadd.f32 %v2746_v5, %v8862_v60  ;;  %v2872_v24 = vmul.f32 %v8862_v60, %v8862_v60  ;;  %v8867_v4 = vpop.f32.mrb[166].mxu1 }
 0x567   : > { %12627 = vst [vmem:[#allocation94_spill] sm:$0xff] %v8867_v4  ;;  %v2944_v42 = vadd.f32 %v2943_v3, %v2871_v57  ;;  %v2679_v12 = vadd.f32 %v2678_v20, %v8867_v4  ;;  %v2873_v26 = vmul.f32 %v8867_v4, %v8867_v4  ;;  %v8872_v39 = vpop.f32.mrb[167].mxu1 }
 0x568   : > { %12628 = vst [vmem:[#allocation95_spill] sm:$0xff] %v8872_v39  ;;  %v3013_v15 = vadd.f32 %v3012_v10, %v2872_v24  ;;  %v2748_v2 = vadd.f32 %v2747_v56, %v8872_v39  ;;  %v2874_v49 = vmul.f32 %v8872_v39, %v8872_v39 }
 0x569   : > { %v2945_v5 = vadd.f32 %v2944_v42, %v2873_v26 }
 0x56a   : > { %v3014_v27 = vadd.f32 %v3013_v15, %v2874_v49 }
 0x56c   : > { %v8877_v23 = vpop.f32.mrb[168].mxu1 }
 0x56d   : > { %12629 = vst [vmem:[#allocation96_spill] sm:$0xff] %v8877_v23  ;;  %v2680_v60 = vadd.f32 %v2679_v12, %v8877_v23  ;;  %v2875_v20 = vmul.f32 %v8877_v23, %v8877_v23  ;;  %v8882_v3 = vpop.f32.mrb[169].mxu1 }
 0x56e   : > { %12630 = vst [vmem:[#allocation97_spill] sm:$0xff] %v8882_v3  ;;  %v2749_v57 = vadd.f32 %v2748_v2, %v8882_v3  ;;  %v2876_v10 = vmul.f32 %v8882_v3, %v8882_v3  ;;  %v8887_v56 = vpop.f32.mrb[170].mxu1 }
 0x56f   : > { %12631 = vst [vmem:[#allocation98_spill] sm:$0xff] %v8887_v56  ;;  %v2946_v24 = vadd.f32 %v2945_v5, %v2875_v20  ;;  %v2681_v42 = vadd.f32 %v2680_v60, %v8887_v56  ;;  %v2877_v49 = vmul.f32 %v8887_v56, %v8887_v56  ;;  %v8892_v26 = vpop.f32.mrb[171].mxu1 }
 0x570   : > { %12632 = vst [vmem:[#allocation99_spill] sm:$0xff] %v8892_v26  ;;  %v3015_v12 = vadd.f32 %v3014_v27, %v2876_v10  ;;  %v2750_v15 = vadd.f32 %v2749_v57, %v8892_v26  ;;  %v2878_v39 = vmul.f32 %v8892_v26, %v8892_v26 }
 0x571   : > { %v2947_v2 = vadd.f32 %v2946_v24, %v2877_v49 }
 0x572   : > { %v3016_v23 = vadd.f32 %v3015_v12, %v2878_v39 }
 0x574   : > { %v8897_v4 = vpop.f32.mrb[172].mxu1 }
 0x575   : > { %12633 = vst [vmem:[#allocation100_spill] sm:$0xff] %v8897_v4  ;;  %v2682_v3 = vadd.f32 %v2681_v42, %v8897_v4  ;;  %v2879_v60 = vmul.f32 %v8897_v4, %v8897_v4  ;;  %v8902_v5 = vpop.f32.mrb[173].mxu1 }
 0x576   : > { %12634 = vst [vmem:[#allocation101_spill] sm:$0xff] %v8902_v5  ;;  %v2751_v20 = vadd.f32 %v2750_v15, %v8902_v5  ;;  %v2880_v27 = vmul.f32 %v8902_v5, %v8902_v5  ;;  %v8907_v57 = vpop.f32.mrb[174].mxu1 }
 0x577   : > { %12635 = vst [vmem:[#allocation102_spill] sm:$0xff] %v8907_v57  ;;  %v2948_v10 = vadd.f32 %v2947_v2, %v2879_v60  ;;  %v2683_v24 = vadd.f32 %v2682_v3, %v8907_v57  ;;  %v2881_v39 = vmul.f32 %v8907_v57, %v8907_v57  ;;  %v8912_v49 = vpop.f32.mrb[175].mxu1 }
 0x578   : > { %12636 = vst [vmem:[#allocation103_spill] sm:$0xff] %v8912_v49  ;;  %v3017_v42 = vadd.f32 %v3016_v23, %v2880_v27  ;;  %v2752_v12 = vadd.f32 %v2751_v20, %v8912_v49  ;;  %v2882_v26 = vmul.f32 %v8912_v49, %v8912_v49 }
 0x579   : > { %v2949_v15 = vadd.f32 %v2948_v10, %v2881_v39 }
 0x57a   : > { %v3018_v4 = vadd.f32 %v3017_v42, %v2882_v26 }
 0x57c   : > { %v8917_v56 = vpop.f32.mrb[176].mxu1 }
 0x57d   : > { %12637 = vst [vmem:[#allocation104_spill] sm:$0xff] %v8917_v56  ;;  %v2684_v5 = vadd.f32 %v2683_v24, %v8917_v56  ;;  %v2883_v3 = vmul.f32 %v8917_v56, %v8917_v56  ;;  %v8922_v2 = vpop.f32.mrb[177].mxu1 }
 0x57e   : > { %12638 = vst [vmem:[#allocation105_spill] sm:$0xff] %v8922_v2  ;;  %v2753_v60 = vadd.f32 %v2752_v12, %v8922_v2  ;;  %v2884_v23 = vmul.f32 %v8922_v2, %v8922_v2  ;;  %v8927_v20 = vpop.f32.mrb[178].mxu1 }
 0x57f   : > { %12639 = vst [vmem:[#allocation106_spill] sm:$0xff] %v8927_v20  ;;  %v2950_v27 = vadd.f32 %v2949_v15, %v2883_v3  ;;  %v2685_v10 = vadd.f32 %v2684_v5, %v8927_v20  ;;  %v2885_v26 = vmul.f32 %v8927_v20, %v8927_v20  ;;  %v8932_v39 = vpop.f32.mrb[179].mxu1 }
 0x580   : > { %12640 = vst [vmem:[#allocation107_spill] sm:$0xff] %v8932_v39  ;;  %v3019_v24 = vadd.f32 %v3018_v4, %v2884_v23  ;;  %v2754_v42 = vadd.f32 %v2753_v60, %v8932_v39  ;;  %v2886_v49 = vmul.f32 %v8932_v39, %v8932_v39 }
 0x581   : > { %v2951_v12 = vadd.f32 %v2950_v27, %v2885_v26 }
 0x582   : > { %v3020_v56 = vadd.f32 %v3019_v24, %v2886_v49 }
 0x584   : > { %v8937_v57 = vpop.f32.mrb[180].mxu1 }
 0x585   : > { %12641 = vst [vmem:[#allocation108_spill] sm:$0xff] %v8937_v57  ;;  %v2686_v2 = vadd.f32 %v2685_v10, %v8937_v57  ;;  %v2887_v5 = vmul.f32 %v8937_v57, %v8937_v57  ;;  %v8942_v15 = vpop.f32.mrb[181].mxu1 }
 0x586   : > { %12642 = vst [vmem:[#allocation109_spill] sm:$0xff] %v8942_v15  ;;  %v2755_v3 = vadd.f32 %v2754_v42, %v8942_v15  ;;  %v2888_v4 = vmul.f32 %v8942_v15, %v8942_v15  ;;  %v8947_v60 = vpop.f32.mrb[182].mxu1 }
 0x587   : > { %12643 = vst [vmem:[#allocation110_spill] sm:$0xff] %v8947_v60  ;;  %v2952_v23 = vadd.f32 %v2951_v12, %v2887_v5  ;;  %v2687_v27 = vadd.f32 %v2686_v2, %v8947_v60  ;;  %v2889_v49 = vmul.f32 %v8947_v60, %v8947_v60  ;;  %v8952_v26 = vpop.f32.mrb[183].mxu1  ;;  %v8960_v2 = vld [vmem:[%s11941_s6] sm:$0x3]  ;;  %v6332_v60 = vmov 1966171168  }
 0x588   : > { %12644 = vst [vmem:[#allocation111_spill] sm:$0xff] %v8952_v26  ;;  %v3021_v10 = vadd.f32 %v3020_v56, %v2888_v4  ;;  %v2756_v24 = vadd.f32 %v2755_v3, %v8952_v26  ;;  %v2890_v39 = vmul.f32 %v8952_v26, %v8952_v26  ;;  %v3085_v56 = vunpack.c.l.s4 %v6332_v60  ;;  %v12645_v3 = vld [vmem:[#allocation26_spill] sm:$0xff]  ;;  %v12646_v60 = vld [vmem:[#allocation27_spill] sm:$0xff] }
 0x589   : > { %v2688_v42 = vrot.slane %v2687_v27, 4  ;;  %v2953_v57 = vadd.f32 %v2952_v23, %v2889_v49  ;;  %v8963_v1 = vsub.s32 1, %v12645_v3 }
 0x58a   : > { %v2757_v20 = vrot.slane %v2756_v24, 4  ;;  %v3022_v15 = vadd.f32 %v3021_v10, %v2890_v39  ;;  %v3066_v39 = vmul.f32 512.0, %v8960_v2  ;;  %v3086_v10 = vunpack.c.0.s8 %v3085_v56 }
 0x58b   : > { %v2689_v17 = vadd.f32 %v2688_v42, %v2687_v27  ;;  %v2954_v58 = vrot.slane %v2953_v57, 4  ;;  %v3080_v56 = vmul.f32 2.0, %v8960_v2 }
 0x58c   : > { %v2758_v12 = vadd.f32 %v2757_v20, %v2756_v24  ;;  %v3023_v5 = vrot.slane %v3022_v15, 4  ;;  %v3075_v20 = vrot.slane %v3066_v39, %v8963_v1  ;;  %v3071_v7 = vrot.slane %v3066_v39, %v12646_v60 }
 0x58d   : > { %v2690_v4 = vrot.slane %v2689_v17, 2  ;;  %v2955_v26 = vadd.f32 %v2954_v58, %v2953_v57  ;;  %v8969_v36 = vsub.s32 %v3086_v10, %v12645_v3  ;;  %v3113_v58 = vmul.f32 %v8960_v2, %v8960_v2 }
 0x58e   : > { %v2759_v37 = vrot.slane %v2758_v12, 2  ;;  %v3024_v23 = vadd.f32 %v3023_v5, %v3022_v15 }
 0x58f   : > { %v2691_v27 = vadd.f32 %v2690_v4, %v2689_v17  ;;  %v2956_v19 = vrot.slane %v2955_v26, 2  ;;  %v3114_v4 = vmul.f32 512.0, %v3113_v58  ;;  %v5917_v58 = vld [vmem:[%s11944_s9 + $0x8] sm:$0xff]  }
 0x590   : > { %v2760_v49 = vadd.f32 %v2759_v37, %v2758_v12  ;;  %v3025_v8 = vrot.slane %v3024_v23, 2 }
 0x591   : > { %v2692_v42 = vrot.slane %v2691_v27, 1  ;;  %v2957_v57 = vadd.f32 %v2956_v19, %v2955_v26 }
 0x592   : > { %v2761_v53 = vrot.slane %v2760_v49, 1  ;;  %v3026_v17 = vadd.f32 %v3025_v8, %v3024_v23  ;;  %v3123_v8 = vrot.slane %v3114_v4, %v8963_v1 }
 0x593   : > { %v2693_v24 = vadd.f32 %v2692_v42, %v2691_v27  ;;  %v2958_v39 = vrot.slane %v2957_v57, 1 }
 0x594   : > { %v2762_v34 = vadd.f32 %v2761_v53, %v2760_v49  ;;  %v3027_v53 = vrot.slane %v3026_v17, 1 }
 0x595   : > { %v3078_v12 = vadd.f32 %v3071_v7, %v2693_v24  ;;  %v2959_v26 = vadd.f32 %v2958_v39, %v2957_v57  ;;  %v5918_v57 = vld [vmem:[%s11944_s9 + $0x10] sm:$0xff]  }
 0x596   : > { %v3079_v37 = vadd.f32 %v3075_v20, %v2762_v34  ;;  %v3083_v15 = vcombine.low %v2693_v24, %v2762_v34  ;;  %v3028_v34 = vadd.f32 %v3027_v53, %v3026_v17  ;;  %v5916_v24 = vld [vmem:[%s11944_s9] sm:$0xff]   ;;  %v5919_v17 = vld [vmem:[%s11944_s9 + $0x18] sm:$0xff]  }
 0x598   : > { %v3090_v5 = vrot.slane %v3083_v15, %v8969_v36  ;;  %3192 = vmatprep.mubr.f32.mxu0 %v3079_v37  ;;  %v5920_v37 = vld [vmem:[%s11944_s9 + $0x20] sm:$0xff]   ;;  %v5921_v15 = vld [vmem:[%s11944_s9 + $0x28] sm:$0xff]  }
 0x599   : > { %3193 = vmatmul.mubr.f32.vlgmr.msra.gmra.mrb[16].mxu0 %v3078_v12 }
 0x59a   : > { %5856 = vmatpush3.bf16.msra.mxu0 %v8468_v33  ;;  %v3097_v3 = vrot.slane %v3090_v5, %v8969_v36 }
 0x59b   : > { %5858 = vmatprep.subr.bf16.mxu0 %v8496_v32 }
 0x59c   : > { %v3099_v19 = vmul.f32 %v3097_v3, %v3080_v56 }
 0x59e   : > { %5860 = vmatpush3.bf16.msra.mxu0 %v8504_v52  ;;  %v3108_v7 = vrot.slane %v3099_v19, %v8963_v1  ;;  %v3104_v23 = vrot.slane %v3099_v19, %v12646_v60  ;;  %v3119_v52 = vrot.slane %v3114_v4, %v12646_v60  ;;  %v3064_v4 = vld [vmem:[%s11942_s7] sm:$0x3] }
 0x59f   : > { %5862 = vmatprep.subr.bf16.mxu0 %v8517_v25  ;;  %v3063_v25 = vld [vmem:[%s11949_s14 + $0x8] sm:$0xff]  ;;  %v3427_v53 = vrot.slane %v3064_v4, %v12646_v60  ;;  %v3431_v3 = vrot.slane %v3064_v4, %v8963_v1 }
 0x5a0   : > { %v3112_v27 = vadd.f32 %v3108_v7, %v3028_v34  ;;  %v3111_v49 = vadd.f32 %v3104_v23, %v2959_v26  ;;  %v12661_v4 = vld [vmem:[#allocation51_spill] sm:$0xff] }
 0x5a2   : > { %5864 = vmatpush3.bf16.msra.mxu0 %v8524_v43  ;;  %v3127_v33 = vadd.f32 %v3123_v8, %v3112_v27  ;;  %v3126_v32 = vadd.f32 %v3119_v52, %v3111_v49  ;;  %v3062_v43 = vld [vmem:[%s11949_s14] sm:$0xff]  ;;  %v12679_v49 = vld [vmem:[#allocation80_spill] sm:$0xff] }
 0x5a3   : > { %5866 = vmatprep.subr.bf16.mxu0 %v8552_v50 }
 0x5a4   : > { %3262 = vmatprep.mubr.f32.mxu0 %v3127_v33 }
 0x5a6   : > { %5868 = vmatpush3.bf16.msra.mxu0 %v8560_v16  ;;  %v12647_v16 = vmov 0.0  }
 0x5a7   : > { %5870 = vmatprep.subr.bf16.mxu0 %v8600_v54 }
 0x5aa   : > { %5872 = vmatpush3.bf16.msra.mxu0 %v8616_v11 }
 0x5ab   : > { %5874 = vmatprep.subr.bf16.mxu0 %v8618_v30 }
 0x5ae   : > { %5876 = vmatpush3.bf16.msra.mxu0 %v8642_v13 }
 0x5af   : > { %5878 = vmatprep.subr.bf16.mxu0 %v8645_v41 }
 0x5b2   : > { %5880 = vmatpush3.bf16.msra.mxu0 %v8662_v14 }
 0x5b3   : > { %5882 = vmatprep.subr.bf16.mxu0 %v8670_v55 }
 0x5b6   : > { %5884 = vmatpush3.bf16.msra.mxu0 %v8692_v45 }
 0x5b7   : > { %3278 = vmatprep.subr.mxu0 %v3063_v25 }
 0x5b9   : > { %3263 = vmatmul.mubr.f32.vlgmr.msra.gmra.mrb[18].mxu0 %v3126_v32 }
 0x5ba   : > { %3342 = vmatprep.mubr.f32.mxu0 %v12647_v16  ;;  %3279 = vmatpush1.msra.mxu0 %v3062_v43 }
 0x5bb   : > { %3352 = vmatprep.subr.mxu0 %v3063_v25 }
 0x66c   : > { %v5645_v50 = vpop.f32.mrb[16].mxu0 }
 0x66d   : > { %v5646_v54 = vpop.f32.mrb[17].mxu0 }
 0x66e   : > { %v5647_v11 = vadd.f32 %v5646_v54, %v5645_v50  ;;  %v12648_v50 = vld [vmem:[#allocation37_spill] sm:$0xff]  ;;  %v12649_v54 = vld [vmem:[#allocation39_spill] sm:$0xff] }
 0x670   : > { %v3269_v30 = vmul.f32 6.1035156e-05, %v5647_v11  ;;  %v12650_v11 = vld [vmem:[#allocation42_spill] sm:$0xff] }
 0x672   : > { %5535 = vmatmul.mubr.msk.f32.vlgmr.msra.gmra.mrb[20].mxu0 %vm1487_vm4, %v3269_v30  ;;  %v3271_v55 = vmul.f32 %v3269_v30, %v3269_v30  ;;  %v12651_v30 = vld [vmem:[#allocation2_spill] sm:$0xff] }
 0x673   : > { %3353 = vmatpush1.msra.mxu0 %v3062_v43  ;;  %3416 = vmatprep.mubr.f32.mxu0 %v12647_v16  ;;  %v12681_v16 = vld [vmem:[#allocation82_spill] sm:$0xff] }
 0x674   : > { %4583 = vmatprep.subr.bf16.mxu0 %v12514_v31 }
 0x68c   : > { %v5680_v13 = vpop.f32.mrb[18].mxu0 }
 0x68d   : > { %v5681_v41 = vpop.f32.mrb[19].mxu0 }
 0x68e   : > { %v5682_v14 = vadd.f32 %v5681_v41, %v5680_v13  ;;  %v12652_v13 = vld [vmem:[#allocation3_spill] sm:$0xff]  ;;  %v12653_v41 = vld [vmem:[#allocation5_spill] sm:$0xff] }
 0x690   : > { %v3270_v45 = vmul.f32 6.1035156e-05, %v5682_v14 }
 0x692   : > { %v3272_v10 = vsub.f32 %v3270_v45, %v3271_v55  ;;  %v12654_v55 = vld [vmem:[#allocation7_spill] sm:$0xff] }
 0x694   : > { %v3273_v42 = vadd.f32 1e-05, %v3272_v10  ;;  %v12655_v10 = vld [vmem:[#allocation4_spill] sm:$0xff] }
 0x696   : > { %6062 = vrsqrt.f32 %v3273_v42 }
 0x6a0   : > { %v6063_v20 = vpop.eup %6062 }
 0x6a1   : > { %5536 = vmatmul.mubr.msk.f32.vlgmr.msra.gmra.mrb[22].mxu0 %vm1487_vm4, %v6063_v20  ;;  %v12656_v20 = vld [vmem:[#allocation44_spill] sm:$0xff] }
 0x6a2   : > { %4584 = vmatpush1.bf16.msra.mxu0 %v5916_v24 }
 0x6a3   : > { %4585 = vmatprep.subr.bf16.mxu0 %v12514_v31 }
 0x6a6   : > { %4586 = vmatpush1.bf16.msra.mxu0 %v5917_v58  ;;  %v12657_v58 = vld [vmem:[#allocation68_spill] sm:$0xff] }
 0x6a7   : > { %4587 = vmatprep.subr.bf16.mxu0 %v12514_v31 }
 0x6aa   : > { %4588 = vmatpush1.bf16.msra.mxu0 %v5918_v57 }
 0x6ab   : > { %4589 = vmatprep.subr.bf16.mxu0 %v12514_v31 }
 0x6ae   : > { %4590 = vmatpush1.bf16.msra.mxu0 %v5919_v17  ;;  %v12658_v17 = vld [vmem:[#allocation69_spill] sm:$0xff] }
 0x6af   : > { %4591 = vmatprep.subr.bf16.mxu0 %v12514_v31 }
 0x6b2   : > { %4592 = vmatpush1.bf16.msra.mxu0 %v5920_v37 }
 0x6b3   : > { %4593 = vmatprep.subr.bf16.mxu0 %v12514_v31 }
 0x6b6   : > { %4594 = vmatpush1.bf16.msra.mxu0 %v5921_v15  ;;  %v12659_v15 = vld [vmem:[#allocation70_spill] sm:$0xff] }
 0x6b7   : > { %4595 = vmatprep.subr.bf16.mxu0 %v12514_v31  ;;  %v12683_v31 = vld [vmem:[#allocation84_spill] sm:$0xff] }
 0x745   : > { %v3344_v12 = vpop.f32.mrb[20].mxu0 }
 0x746   : > { %v3346_v5 = vpop.f32.mrb[21].mxu0 }
 0x747   : > { %v3438_v56 = vcombine.low %v3344_v12, %v3346_v5  ;;  %v12660_v5 = vld [vmem:[#allocation49_spill] sm:$0xff] }
 0x749   : > { %v3445_v39 = vrot.slane %v3438_v56, %v8969_v36 }
 0x74b   : > { %v3452_v19 = vrot.slane %v3445_v39, %v8969_v36 }
 0x74d   : > { %v9046_v27 = vsub.f32 %v8960_v2, %v3452_v19  ;;  %v12663_v19 = vld [vmem:[#allocation6_spill] sm:$0xff] }
 0x774   : > { %v3418_v8 = vpop.f32.mrb[22].mxu0 }
 0x775   : > { %v9037_v34 = vmul.f32 %v3427_v53, %v3418_v8  ;;  %v3420_v7 = vpop.f32.mrb[23].mxu0  ;;  %v12662_v53 = vld [vmem:[#allocation53_spill] sm:$0xff] }
 0x776   : > { %v9039_v26 = vmul.f32 %v3431_v3, %v3420_v7  ;;  %v12664_v7 = vld [vmem:[#allocation55_spill] sm:$0xff] }
 0x777   : > { %v9043_v23 = vrot.slane %v9037_v34, %v12646_v60 }
 0x778   : > { %v9052_v33 = vrot.slane %v9039_v26, %v12646_v60 }
 0x779   : > { %v9056_v52 = vmul.f32 %v9043_v23, %v8148_v0  ;;  %v9060_v32 = vmul.f32 %v9043_v23, %v8152_v44  ;;  %v9064_v25 = vmul.f32 %v9043_v23, %v8173_v46  ;;  %v9068_v2 = vmul.f32 %v9043_v23, %v8183_v22 }
 0x77a   : > { %v9072_v43 = vmul.f32 %v9043_v23, %v8198_v62  ;;  %v9076_v0 = vmul.f32 %v9043_v23, %v8208_v51  ;;  %v9080_v44 = vmul.f32 %v9043_v23, %v8223_v9  ;;  %v9084_v46 = vmul.f32 %v9043_v23, %v8233_v61 }
 0x77b   : > { %v9088_v22 = vmul.f32 %v9043_v23, %v8248_v18  ;;  %v9092_v62 = vmul.f32 %v9043_v23, %v8258_v6  ;;  %v9096_v51 = vmul.f32 %v9043_v23, %v8272_v59  ;;  %v9100_v9 = vmul.f32 %v9043_v23, %v8282_v29 }
 0x77c   : > { %v9104_v61 = vmul.f32 %v9043_v23, %v8292_v35  ;;  %v9108_v18 = vmul.f32 %v9043_v23, %v8302_v28  ;;  %v9112_v6 = vmul.f32 %v9043_v23, %v8312_v40  ;;  %v9116_v59 = vmul.f32 %v9043_v23, %v8322_v47 }
 0x77d   : > { %v9120_v29 = vmul.f32 %v9043_v23, %v8332_v21  ;;  %v9124_v35 = vmul.f32 %v9043_v23, %v8342_v63  ;;  %v9128_v28 = vmul.f32 %v9043_v23, %v8352_v38  ;;  %v9132_v40 = vmul.f32 %v9043_v23, %v8362_v48 }
 0x77e   : > { %v9136_v47 = vmul.f32 %v9043_v23, %v12648_v50  ;;  %v9140_v21 = vmul.f32 %v9043_v23, %v12649_v54  ;;  %v9144_v63 = vmul.f32 %v9043_v23, %v12650_v11  ;;  %v9148_v38 = vmul.f32 %v9043_v23, %v12651_v30  ;;  %v12665_v54 = vld [vmem:[#allocation57_spill] sm:$0xff]  ;;  %v12666_v30 = vld [vmem:[#allocation59_spill] sm:$0xff] }
 0x77f   : > { %v9152_v48 = vmul.f32 %v9043_v23, %v12652_v13  ;;  %v9156_v14 = vmul.f32 %v9043_v23, %v12653_v41  ;;  %v9160_v45 = vmul.f32 %v9043_v23, %v12654_v55  ;;  %v9164_v42 = vmul.f32 %v9043_v23, %v12655_v10  ;;  %v12667_v41 = vld [vmem:[#allocation61_spill] sm:$0xff] }
 0x780   : > { %v9168_v24 = vmul.f32 %v9043_v23, %v12656_v20  ;;  %v9172_v57 = vmul.f32 %v9043_v23, %v12657_v58  ;;  %v9176_v37 = vmul.f32 %v9043_v23, %v12658_v17  ;;  %v9180_v12 = vmul.f32 %v9043_v23, %v12659_v15  ;;  %v12668_v10 = vld [vmem:[#allocation13_spill] sm:$0xff]  ;;  %v12669_v58 = vld [vmem:[#allocation12_spill] sm:$0xff] }
 0x781   : > { %v9184_v56 = vmul.f32 %v9043_v23, %v12660_v5  ;;  %v9188_v39 = vmul.f32 %v9043_v23, %v12661_v4  ;;  %v9192_v3 = vmul.f32 %v9043_v23, %v12662_v53  ;;  %v9196_v8 = vmul.f32 %v9043_v23, %v12663_v19  ;;  %v12670_v15 = vld [vmem:[#allocation17_spill] sm:$0xff]  ;;  %v12671_v4 = vld [vmem:[#allocation8_spill] sm:$0xff] }
 0x782   : > { %v9200_v50 = vmul.f32 %v9043_v23, %v12664_v7  ;;  %v9204_v11 = vmul.f32 %v9043_v23, %v12665_v54  ;;  %v9208_v13 = vmul.f32 %v9043_v23, %v12666_v30  ;;  %v9212_v55 = vmul.f32 %v9043_v23, %v12667_v41  ;;  %v12672_v19 = vld [vmem:[#allocation72_spill] sm:$0xff]  ;;  %v12673_v54 = vld [vmem:[#allocation74_spill] sm:$0xff] }
 0x783   : > { %v9216_v20 = vmul.f32 %v9043_v23, %v12668_v10  ;;  %v9220_v17 = vmul.f32 %v9043_v23, %v12669_v58  ;;  %v9224_v5 = vmul.f32 %v9043_v23, %v12670_v15  ;;  %v9228_v53 = vmul.f32 %v9043_v23, %v12671_v4  ;;  %v12675_v41 = vld [vmem:[#allocation76_spill] sm:$0xff]  ;;  %v12677_v58 = vld [vmem:[#allocation78_spill] sm:$0xff] }
 0x784   : > { %v9232_v7 = vmul.f32 %v9043_v23, %v12672_v19  ;;  %v9236_v30 = vmul.f32 %v9043_v23, %v12673_v54  ;;  %v9240_v10 = vmul.f32 %v9043_v23, %v12675_v41  ;;  %v9244_v15 = vmul.f32 %v9043_v23, %v12677_v58 }
 0x785   : > { %v9248_v4 = vmul.f32 %v9043_v23, %v12679_v49  ;;  %v9252_v19 = vmul.f32 %v9043_v23, %v12681_v16  ;;  %v9256_v54 = vmul.f32 %v9043_v23, %v12683_v31 }
 0x786   : > { %12674 = vst [vmem:[#allocation26_spill] sm:$0xff] %v9236_v30  ;;  %12676 = vst [vmem:[#allocation27_spill] sm:$0xff] %v9240_v10  ;;  %v12685_v30 = vld [vmem:[#allocation86_spill] sm:$0xff]  ;;  %v12687_v10 = vld [vmem:[#allocation88_spill] sm:$0xff] }
 0x787   : > { %12678 = vst [vmem:[#allocation37_spill] sm:$0xff] %v9244_v15  ;;  %12680 = vst [vmem:[#allocation39_spill] sm:$0xff] %v9248_v4  ;;  %v9260_v41 = vmul.f32 %v9043_v23, %v12685_v30  ;;  %v9264_v58 = vmul.f32 %v9043_v23, %v12687_v10  ;;  %v12689_v15 = vld [vmem:[#allocation90_spill] sm:$0xff]  ;;  %v12691_v4 = vld [vmem:[#allocation92_spill] sm:$0xff] }
 0x788   : > { %12682 = vst [vmem:[#allocation42_spill] sm:$0xff] %v9252_v19  ;;  %12684 = vst [vmem:[#allocation2_spill] sm:$0xff] %v9256_v54  ;;  %v9268_v49 = vmul.f32 %v9043_v23, %v12689_v15  ;;  %v9272_v16 = vmul.f32 %v9043_v23, %v12691_v4  ;;  %v12693_v19 = vld [vmem:[#allocation94_spill] sm:$0xff]  ;;  %v12695_v54 = vld [vmem:[#allocation96_spill] sm:$0xff] }
 0x789   : > { %12686 = vst [vmem:[#allocation3_spill] sm:$0xff] %v9260_v41  ;;  %12688 = vst [vmem:[#allocation5_spill] sm:$0xff] %v9264_v58  ;;  %v9276_v31 = vmul.f32 %v9043_v23, %v12693_v19  ;;  %v9280_v30 = vmul.f32 %v9043_v23, %v12695_v54  ;;  %v12697_v41 = vld [vmem:[#allocation98_spill] sm:$0xff]  ;;  %v12699_v58 = vld [vmem:[#allocation100_spill] sm:$0xff] }
 0x78a   : > { %12690 = vst [vmem:[#allocation7_spill] sm:$0xff] %v9268_v49  ;;  %12692 = vst [vmem:[#allocation4_spill] sm:$0xff] %v9272_v16  ;;  %v9284_v10 = vmul.f32 %v9043_v23, %v12697_v41  ;;  %v9288_v15 = vmul.f32 %v9043_v23, %v12699_v58  ;;  %v12701_v49 = vld [vmem:[#allocation102_spill] sm:$0xff]  ;;  %v12703_v16 = vld [vmem:[#allocation104_spill] sm:$0xff] }
 0x78b   : > { %12694 = vst [vmem:[#allocation44_spill] sm:$0xff] %v9276_v31  ;;  %12696 = vst [vmem:[#allocation68_spill] sm:$0xff] %v9280_v30  ;;  %v9292_v4 = vmul.f32 %v9043_v23, %v12701_v49  ;;  %v9296_v19 = vmul.f32 %v9043_v23, %v12703_v16  ;;  %v12705_v31 = vld [vmem:[#allocation106_spill] sm:$0xff]  ;;  %v12707_v30 = vld [vmem:[#allocation108_spill] sm:$0xff]  ;;  %v12710_v49 = vcombine.low %v9037_v34, %v9039_v26 }
 0x78c   : > { %12698 = vst [vmem:[#allocation69_spill] sm:$0xff] %v9284_v10  ;;  %12700 = vst [vmem:[#allocation70_spill] sm:$0xff] %v9288_v15  ;;  %v9300_v54 = vmul.f32 %v9043_v23, %v12705_v31  ;;  %v9304_v41 = vmul.f32 %v9043_v23, %v12707_v30  ;;  %v12709_v10 = vld [vmem:[#allocation110_spill] sm:$0xff]  ;;  %v12711_v15 = vld [vmem:[#allocation19_spill] sm:$0xff] }
 0x78d   : > { %12702 = vst [vmem:[#allocation49_spill] sm:$0xff] %v9292_v4  ;;  %12704 = vst [vmem:[#allocation51_spill] sm:$0xff] %v9296_v19  ;;  %v9308_v58 = vmul.f32 %v9043_v23, %v12709_v10  ;;  %v3464_v4 = vrot.slane %v12710_v49, %v8969_v36  ;;  %v9316_v16 = vmul.f32 %v9052_v33, %v12711_v15  ;;  %v12712_v19 = vld [vmem:[#allocation62_spill] sm:$0xff]  ;;  %v12720_v26 = vld [vmem:[#allocation21_spill] sm:$0xff] }
 0x78e   : > { %12706 = vst [vmem:[#allocation53_spill] sm:$0xff] %v9300_v54  ;;  %12708 = vst [vmem:[#allocation6_spill] sm:$0xff] %v9304_v41  ;;  %v9320_v31 = vmul.f32 %v9052_v33, %v12712_v19  ;;  %v12714_v54 = vld [vmem:[#allocation16_spill] sm:$0xff]  ;;  %v12716_v41 = vld [vmem:[#allocation63_spill] sm:$0xff]  ;;  %v9336_v15 = vmul.f32 %v9052_v33, %v12720_v26 }
 0x78f   : > { %v9324_v30 = vmul.f32 %v9052_v33, %v12714_v54  ;;  %v9328_v23 = vmul.f32 %v9052_v33, %v12716_v41  ;;  %v12718_v10 = vld [vmem:[#allocation18_spill] sm:$0xff]  ;;  %v12722_v49 = vld [vmem:[#allocation20_spill] sm:$0xff]  ;;  %v12726_v41 = vld [vmem:[#allocation23_spill] sm:$0xff] }
 0x790   : > { %12713 = vst [vmem:[#allocation55_spill] sm:$0xff] %v9320_v31  ;;  %v9332_v34 = vmul.f32 %v9052_v33, %v12718_v10  ;;  %12721 = vst [vmem:[#allocation13_spill] sm:$0xff] %v9336_v15  ;;  %v9340_v19 = vmul.f32 %v9052_v33, %v12722_v49  ;;  %v3471_v31 = vrot.slane %v3464_v4, %v8969_v36  ;;  %v12724_v54 = vld [vmem:[#allocation22_spill] sm:$0xff]  ;;  %v12728_v10 = vld [vmem:[#allocation25_spill] sm:$0xff] }
 0x791   : > { %12715 = vst [vmem:[#allocation57_spill] sm:$0xff] %v9324_v30  ;;  %12717 = vst [vmem:[#allocation59_spill] sm:$0xff] %v9328_v23  ;;  %v9345_v30 = vmul.f32 %v9052_v33, %v12724_v54  ;;  %v9349_v23 = vmul.f32 %v9052_v33, %v12726_v41  ;;  %v3065_v26 = vld [vmem:[%s11943_s8] sm:$0x3]  ;;  %v12730_v49 = vld [vmem:[#allocation24_spill] sm:$0xff] }
 0x792   : > { %12719 = vst [vmem:[#allocation61_spill] sm:$0xff] %v9332_v34  ;;  %12723 = vst [vmem:[#allocation12_spill] sm:$0xff] %v9340_v19  ;;  %v9353_v34 = vmul.f32 %v9052_v33, %v12728_v10  ;;  %v9360_v19 = vmul.f32 %v9052_v33, %v12730_v49  ;;  %v12732_v36 = vld [vmem:[#allocation28_spill] sm:$0xff]  ;;  %v12734_v54 = vld [vmem:[#allocation29_spill] sm:$0xff] }
 0x793   : > { %12725 = vst [vmem:[#allocation17_spill] sm:$0xff] %v9345_v30  ;;  %12727 = vst [vmem:[#allocation8_spill] sm:$0xff] %v9349_v23  ;;  %v9364_v4 = vmul.f32 %v9052_v33, %v12732_v36  ;;  %v9368_v41 = vmul.f32 %v9052_v33, %v12734_v54  ;;  %v12736_v23 = vld [vmem:[#allocation30_spill] sm:$0xff]  ;;  %v12738_v30 = vld [vmem:[#allocation31_spill] sm:$0xff] }
 0x794   : > { %12729 = vst [vmem:[#allocation72_spill] sm:$0xff] %v9353_v34  ;;  %12731 = vst [vmem:[#allocation74_spill] sm:$0xff] %v9360_v19  ;;  %v9372_v10 = vmul.f32 %v9052_v33, %v12736_v23  ;;  %v3473_v34 = vmul.f32 %v3471_v31, %v9046_v27  ;;  %v9377_v15 = vmul.f32 %v9052_v33, %v12738_v30  ;;  %v12740_v49 = vld [vmem:[#allocation32_spill] sm:$0xff]  ;;  %v12742_v36 = vld [vmem:[#allocation33_spill] sm:$0xff] }
 0x795   : > { %12733 = vst [vmem:[#allocation76_spill] sm:$0xff] %v9364_v4  ;;  %12735 = vst [vmem:[#allocation78_spill] sm:$0xff] %v9368_v41  ;;  %v9381_v19 = vmul.f32 %v9052_v33, %v12740_v49  ;;  %v9385_v4 = vmul.f32 %v9052_v33, %v12742_v36  ;;  %v12744_v54 = vld [vmem:[#allocation34_spill] sm:$0xff]  ;;  %v12746_v23 = vld [vmem:[#allocation35_spill] sm:$0xff] }
 0x796   : > { %12737 = vst [vmem:[#allocation80_spill] sm:$0xff] %v9372_v10  ;;  %12739 = vst [vmem:[#allocation82_spill] sm:$0xff] %v9377_v15  ;;  %v9389_v41 = vmul.f32 %v9052_v33, %v12744_v54  ;;  %v9393_v10 = vmul.f32 %v9052_v33, %v12746_v23  ;;  %v12748_v27 = vld [vmem:[#allocation36_spill] sm:$0xff]  ;;  %v12750_v30 = vld [vmem:[#allocation38_spill] sm:$0xff] }
 0x797   : > { %12741 = vst [vmem:[#allocation84_spill] sm:$0xff] %v9381_v19  ;;  %12743 = vst [vmem:[#allocation86_spill] sm:$0xff] %v9385_v4  ;;  %v9397_v31 = vmul.f32 %v9052_v33, %v12748_v27  ;;  %v9401_v49 = vmul.f32 %v9052_v33, %v12750_v30  ;;  %v3474_v19 = vadd.f32 %v3473_v34, %v3065_v26  ;;  %v12751_v15 = vld [vmem:[#allocation41_spill] sm:$0xff]  ;;  %v12752_v4 = vld [vmem:[#allocation40_spill] sm:$0xff] }
 0x798   : > { %12745 = vst [vmem:[#allocation88_spill] sm:$0xff] %v9389_v41  ;;  %12747 = vst [vmem:[#allocation90_spill] sm:$0xff] %v9393_v10  ;;  %v9405_v36 = vmul.f32 %v9052_v33, %v12751_v15  ;;  %v9409_v54 = vmul.f32 %v9052_v33, %v12752_v4  ;;  %v12754_v41 = vld [vmem:[#allocation64_spill] sm:$0xff]  ;;  %v12755_v10 = vld [vmem:[#allocation65_spill] sm:$0xff] }
 0x799   : > { %12749 = vst [vmem:[#allocation92_spill] sm:$0xff] %v9397_v31  ;;  %v9413_v23 = vmul.f32 %v9052_v33, %v12754_v41  ;;  %v9417_v27 = vmul.f32 %v9052_v33, %v12755_v10  ;;  %v12757_v31 = vld [vmem:[#allocation66_spill] sm:$0xff]  ;;  %v12759_v34 = vld [vmem:[#allocation67_spill] sm:$0xff]  ;;  %v9435_v41 = vrot.slane %v3474_v19, %v8963_v1  ;;  %v12763_v10 = vld [vmem:[#allocation45_spill] sm:$0xff] }
 0x79a   : > { %12753 = vst [vmem:[#allocation94_spill] sm:$0xff] %v9409_v54  ;;  %v9421_v30 = vmul.f32 %v9052_v33, %v12757_v31  ;;  %v9425_v15 = vmul.f32 %v9052_v33, %v12759_v34  ;;  %v12761_v26 = vld [vmem:[#allocation43_spill] sm:$0xff]  ;;  %v9432_v54 = vrot.slane %v3474_v19, %v12646_v60  ;;  %v12765_v31 = vld [vmem:[#allocation46_spill] sm:$0xff]  ;;  %v12773_v19 = vld [vmem:[#allocation52_spill] sm:$0xff] }
 0x79b   : > { %12756 = vst [vmem:[#allocation96_spill] sm:$0xff] %v9417_v27  ;;  %v9429_v4 = vmul.f32 %v9052_v33, %v12761_v26  ;;  %v9439_v27 = vmul.f32 %v9052_v33, %v12763_v10  ;;  %v12767_v34 = vld [vmem:[#allocation47_spill] sm:$0xff]  ;;  %v12769_v26 = vld [vmem:[#allocation48_spill] sm:$0xff]  ;;  %v12771_v60 = vld [vmem:[#allocation50_spill] sm:$0xff]  ;;  %v9459_v10 = vmul.f32 %v9052_v33, %v12773_v19 }
 0x79c   : > { %12758 = vst [vmem:[#allocation98_spill] sm:$0xff] %v9421_v30  ;;  %12760 = vst [vmem:[#allocation100_spill] sm:$0xff] %v9425_v15  ;;  %v9443_v30 = vmul.f32 %v9052_v33, %v12765_v31  ;;  %v9447_v15 = vmul.f32 %v9052_v33, %v12767_v34  ;;  %v9455_v1 = vmul.f32 %v9052_v33, %v12771_v60 }
 0x79d   : > { %12762 = vst [vmem:[#allocation102_spill] sm:$0xff] %v9429_v4  ;;  %12764 = vst [vmem:[#allocation104_spill] sm:$0xff] %v9439_v27  ;;  %v9451_v4 = vmul.f32 %v9052_v33, %v12769_v26  ;;  %v12775_v27 = vld [vmem:[#allocation54_spill] sm:$0xff] }
 0x79e   : > { %12766 = vst [vmem:[#allocation106_spill] sm:$0xff] %v9443_v30  ;;  %12768 = vst [vmem:[#allocation108_spill] sm:$0xff] %v9447_v15  ;;  %v9463_v31 = vmul.f32 %v9052_v33, %v12775_v27  ;;  %v12777_v30 = vld [vmem:[#allocation9_spill] sm:$0xff]  ;;  %v12779_v15 = vld [vmem:[#allocation56_spill] sm:$0xff] }
 0x79f   : > { %12770 = vst [vmem:[#allocation110_spill] sm:$0xff] %v9451_v4  ;;  %12772 = vst [vmem:[#allocation19_spill] sm:$0xff] %v9455_v1  ;;  %v9467_v34 = vmul.f32 %v9052_v33, %v12777_v30  ;;  %v9471_v26 = vmul.f32 %v9052_v33, %v12779_v15  ;;  %v12781_v4 = vld [vmem:[#allocation58_spill] sm:$0xff]  ;;  %v12783_v1 = vld [vmem:[#allocation60_spill] sm:$0xff] }
 0x7a0   : > { %12774 = vst [vmem:[#allocation62_spill] sm:$0xff] %v9459_v10  ;;  %12776 = vst [vmem:[#allocation16_spill] sm:$0xff] %v9463_v31  ;;  %v9475_v60 = vmul.f32 %v9052_v33, %v12781_v4  ;;  %v9479_v19 = vmul.f32 %v9052_v33, %v12783_v1  ;;  %v12785_v10 = vld [vmem:[#allocation10_spill] sm:$0xff]  ;;  %v12787_v31 = vld [vmem:[#allocation15_spill] sm:$0xff] }
 0x7a1   : > { %12778 = vst [vmem:[#allocation63_spill] sm:$0xff] %v9467_v34  ;;  %12780 = vst [vmem:[#allocation18_spill] sm:$0xff] %v9471_v26  ;;  %v9483_v27 = vmul.f32 %v9052_v33, %v12785_v10  ;;  %v9487_v30 = vmul.f32 %v9052_v33, %v12787_v31  ;;  %v12789_v34 = vld [vmem:[#allocation14_spill] sm:$0xff]  ;;  %v12791_v26 = vld [vmem:[#allocation11_spill] sm:$0xff] }
 0x7a2   : > { %12782 = vst [vmem:[#allocation21_spill] sm:$0xff] %v9475_v60  ;;  %12784 = vst [vmem:[#allocation20_spill] sm:$0xff] %v9479_v19  ;;  %v9491_v15 = vmul.f32 %v9052_v33, %v12789_v34  ;;  %v9495_v4 = vmul.f32 %v9052_v33, %v12791_v26  ;;  %v12793_v60 = vld [vmem:[#allocation71_spill] sm:$0xff]  ;;  %v12795_v19 = vld [vmem:[#allocation73_spill] sm:$0xff] }
 0x7a3   : > { %12786 = vst [vmem:[#allocation22_spill] sm:$0xff] %v9483_v27  ;;  %12788 = vst [vmem:[#allocation23_spill] sm:$0xff] %v9487_v30  ;;  %v9499_v1 = vmul.f32 %v9052_v33, %v12793_v60  ;;  %v9503_v10 = vmul.f32 %v9052_v33, %v12795_v19  ;;  %v12797_v27 = vld [vmem:[#allocation75_spill] sm:$0xff]  ;;  %v12799_v30 = vld [vmem:[#allocation77_spill] sm:$0xff] }
 0x7a4   : > { %12790 = vst [vmem:[#allocation25_spill] sm:$0xff] %v9491_v15  ;;  %12792 = vst [vmem:[#allocation24_spill] sm:$0xff] %v9495_v4  ;;  %v9507_v31 = vmul.f32 %v9052_v33, %v12797_v27  ;;  %v9511_v34 = vmul.f32 %v9052_v33, %v12799_v30  ;;  %v12801_v15 = vld [vmem:[#allocation79_spill] sm:$0xff]  ;;  %v12803_v4 = vld [vmem:[#allocation81_spill] sm:$0xff] }
 0x7a5   : > { %12794 = vst [vmem:[#allocation28_spill] sm:$0xff] %v9499_v1  ;;  %12796 = vst [vmem:[#allocation29_spill] sm:$0xff] %v9503_v10  ;;  %v9515_v26 = vmul.f32 %v9052_v33, %v12801_v15  ;;  %v9519_v60 = vmul.f32 %v9052_v33, %v12803_v4  ;;  %v12805_v1 = vld [vmem:[#allocation83_spill] sm:$0xff]  ;;  %v12807_v10 = vld [vmem:[#allocation85_spill] sm:$0xff] }
 0x7a6   : > { %12798 = vst [vmem:[#allocation30_spill] sm:$0xff] %v9507_v31  ;;  %12800 = vst [vmem:[#allocation31_spill] sm:$0xff] %v9511_v34  ;;  %v9523_v19 = vmul.f32 %v9052_v33, %v12805_v1  ;;  %v9527_v27 = vmul.f32 %v9052_v33, %v12807_v10  ;;  %v12809_v31 = vld [vmem:[#allocation87_spill] sm:$0xff]  ;;  %v12811_v34 = vld [vmem:[#allocation89_spill] sm:$0xff] }
 0x7a7   : > { %12802 = vst [vmem:[#allocation32_spill] sm:$0xff] %v9515_v26  ;;  %12804 = vst [vmem:[#allocation33_spill] sm:$0xff] %v9519_v60  ;;  %v9531_v30 = vmul.f32 %v9052_v33, %v12809_v31  ;;  %v9535_v15 = vmul.f32 %v9052_v33, %v12811_v34  ;;  %v12813_v26 = vld [vmem:[#allocation91_spill] sm:$0xff]  ;;  %v12815_v60 = vld [vmem:[#allocation93_spill] sm:$0xff] }
 0x7a8   : > { %12806 = vst [vmem:[#allocation34_spill] sm:$0xff] %v9523_v19  ;;  %12808 = vst [vmem:[#allocation35_spill] sm:$0xff] %v9527_v27  ;;  %v9539_v4 = vmul.f32 %v9052_v33, %v12813_v26  ;;  %v9543_v1 = vmul.f32 %v9052_v33, %v12815_v60  ;;  %v12817_v19 = vld [vmem:[#allocation95_spill] sm:$0xff]  ;;  %v12819_v27 = vld [vmem:[#allocation97_spill] sm:$0xff] }
 0x7a9   : > { %12810 = vst [vmem:[#allocation36_spill] sm:$0xff] %v9531_v30  ;;  %12812 = vst [vmem:[#allocation38_spill] sm:$0xff] %v9535_v15  ;;  %v9547_v10 = vmul.f32 %v9052_v33, %v12817_v19  ;;  %v9551_v31 = vmul.f32 %v9052_v33, %v12819_v27  ;;  %v12821_v30 = vld [vmem:[#allocation99_spill] sm:$0xff]  ;;  %v12823_v15 = vld [vmem:[#allocation101_spill] sm:$0xff] }
 0x7aa   : > { %12814 = vst [vmem:[#allocation41_spill] sm:$0xff] %v9539_v4  ;;  %12816 = vst [vmem:[#allocation40_spill] sm:$0xff] %v9543_v1  ;;  %v9555_v34 = vmul.f32 %v9052_v33, %v12821_v30  ;;  %v9559_v26 = vmul.f32 %v9052_v33, %v12823_v15  ;;  %v12824_v4 = vld [vmem:[#allocation103_spill] sm:$0xff]  ;;  %v12825_v1 = vld [vmem:[#allocation105_spill] sm:$0xff] }
 0x7ab   : > { %12818 = vst [vmem:[#allocation64_spill] sm:$0xff] %v9547_v10  ;;  %12820 = vst [vmem:[#allocation65_spill] sm:$0xff] %v9551_v31  ;;  %v9563_v60 = vmul.f32 %v9052_v33, %v12824_v4  ;;  %v9567_v19 = vmul.f32 %v9052_v33, %v12825_v1  ;;  %v12826_v10 = vld [vmem:[#allocation107_spill] sm:$0xff]  ;;  %v12827_v31 = vld [vmem:[#allocation109_spill] sm:$0xff]  ;;  %v9583_v4 = vadd.f32 %v9432_v54, %v9056_v52 }
 0x7ac   : > { %12822 = vst [vmem:[#allocation66_spill] sm:$0xff] %v9555_v34  ;;  %v9571_v27 = vmul.f32 %v9052_v33, %v12826_v10  ;;  %v9575_v30 = vmul.f32 %v9052_v33, %v12827_v31  ;;  %v12828_v34 = vld [vmem:[#allocation111_spill] sm:$0xff]  ;;  %v9587_v1 = vadd.f32 %v9432_v54, %v9060_v32  ;;  %v9591_v10 = vadd.f32 %v9432_v54, %v9064_v25 }
 0x7ad   : > { %v9579_v15 = vmul.f32 %v9052_v33, %v12828_v34  ;;  %12829 = vst [vmem:[#allocation67_spill] sm:$0xff] %v9583_v4  ;;  %v9595_v31 = vadd.f32 %v9432_v54, %v9068_v2  ;;  %v9599_v33 = vadd.f32 %v9432_v54, %v9072_v43  ;;  %v9603_v52 = vadd.f32 %v9432_v54, %v9076_v0  ;;  %v12874_v34 = vld [vmem:[#allocation26_spill] sm:$0xff] }
 0x7ae   : > { %12830 = vst [vmem:[#allocation43_spill] sm:$0xff] %v9587_v1  ;;  %12831 = vst [vmem:[#allocation45_spill] sm:$0xff] %v9591_v10  ;;  %v9607_v32 = vadd.f32 %v9432_v54, %v9080_v44  ;;  %v9611_v25 = vadd.f32 %v9432_v54, %v9084_v46  ;;  %v9615_v2 = vadd.f32 %v9432_v54, %v9088_v22 }
 0x7af   : > { %12832 = vst [vmem:[#allocation46_spill] sm:$0xff] %v9595_v31  ;;  %12833 = vst [vmem:[#allocation47_spill] sm:$0xff] %v9599_v33  ;;  %v9619_v43 = vadd.f32 %v9432_v54, %v9092_v62  ;;  %v9623_v0 = vadd.f32 %v9432_v54, %v9096_v51  ;;  %v9627_v44 = vadd.f32 %v9432_v54, %v9100_v9 }
 0x7b0   : > { %12834 = vst [vmem:[#allocation48_spill] sm:$0xff] %v9603_v52  ;;  %12835 = vst [vmem:[#allocation50_spill] sm:$0xff] %v9607_v32  ;;  %v9631_v46 = vadd.f32 %v9432_v54, %v9104_v61  ;;  %v9635_v22 = vadd.f32 %v9432_v54, %v9108_v18  ;;  %v9639_v62 = vadd.f32 %v9432_v54, %v9112_v6 }
 0x7b1   : > { %12836 = vst [vmem:[#allocation52_spill] sm:$0xff] %v9611_v25  ;;  %12837 = vst [vmem:[#allocation54_spill] sm:$0xff] %v9615_v2  ;;  %v9643_v51 = vadd.f32 %v9432_v54, %v9116_v59  ;;  %v9647_v9 = vadd.f32 %v9432_v54, %v9120_v29  ;;  %v9651_v61 = vadd.f32 %v9432_v54, %v9124_v35 }
 0x7b2   : > { %12838 = vst [vmem:[#allocation9_spill] sm:$0xff] %v9619_v43  ;;  %12839 = vst [vmem:[#allocation56_spill] sm:$0xff] %v9623_v0  ;;  %v9655_v18 = vadd.f32 %v9432_v54, %v9128_v28  ;;  %v9659_v6 = vadd.f32 %v9432_v54, %v9132_v40  ;;  %v9663_v59 = vadd.f32 %v9432_v54, %v9136_v47 }
 0x7b3   : > { %12840 = vst [vmem:[#allocation58_spill] sm:$0xff] %v9627_v44  ;;  %12841 = vst [vmem:[#allocation60_spill] sm:$0xff] %v9631_v46  ;;  %v9667_v29 = vadd.f32 %v9432_v54, %v9140_v21  ;;  %v9671_v35 = vadd.f32 %v9432_v54, %v9144_v63  ;;  %v9675_v28 = vadd.f32 %v9432_v54, %v9148_v38 }
 0x7b4   : > { %12842 = vst [vmem:[#allocation10_spill] sm:$0xff] %v9635_v22  ;;  %12843 = vst [vmem:[#allocation15_spill] sm:$0xff] %v9639_v62  ;;  %v9679_v40 = vadd.f32 %v9432_v54, %v9152_v48  ;;  %v9683_v47 = vadd.f32 %v9432_v54, %v9156_v14  ;;  %v9687_v21 = vadd.f32 %v9432_v54, %v9160_v45 }
 0x7b5   : > { %12844 = vst [vmem:[#allocation14_spill] sm:$0xff] %v9643_v51  ;;  %12845 = vst [vmem:[#allocation11_spill] sm:$0xff] %v9647_v9  ;;  %v9691_v63 = vadd.f32 %v9432_v54, %v9164_v42  ;;  %v9695_v38 = vadd.f32 %v9432_v54, %v9168_v24  ;;  %v9699_v48 = vadd.f32 %v9432_v54, %v9172_v57 }
 0x7b6   : > { %12846 = vst [vmem:[#allocation71_spill] sm:$0xff] %v9651_v61  ;;  %12847 = vst [vmem:[#allocation73_spill] sm:$0xff] %v9655_v18  ;;  %v9703_v14 = vadd.f32 %v9432_v54, %v9176_v37  ;;  %v9707_v45 = vadd.f32 %v9432_v54, %v9180_v12  ;;  %v9711_v42 = vadd.f32 %v9432_v54, %v9184_v56 }
 0x7b7   : > { %12848 = vst [vmem:[#allocation75_spill] sm:$0xff] %v9659_v6  ;;  %12849 = vst [vmem:[#allocation77_spill] sm:$0xff] %v9663_v59  ;;  %v9715_v24 = vadd.f32 %v9432_v54, %v9188_v39  ;;  %v9719_v57 = vadd.f32 %v9432_v54, %v9192_v3  ;;  %v9723_v37 = vadd.f32 %v9432_v54, %v9196_v8 }
 0x7b8   : > { %12850 = vst [vmem:[#allocation79_spill] sm:$0xff] %v9667_v29  ;;  %12851 = vst [vmem:[#allocation81_spill] sm:$0xff] %v9671_v35  ;;  %v9727_v12 = vadd.f32 %v9432_v54, %v9200_v50  ;;  %v9731_v56 = vadd.f32 %v9432_v54, %v9204_v11  ;;  %v9735_v39 = vadd.f32 %v9432_v54, %v9208_v13 }
 0x7b9   : > { %12852 = vst [vmem:[#allocation83_spill] sm:$0xff] %v9675_v28  ;;  %12853 = vst [vmem:[#allocation85_spill] sm:$0xff] %v9679_v40  ;;  %v9739_v3 = vadd.f32 %v9432_v54, %v9212_v55  ;;  %v9743_v8 = vadd.f32 %v9432_v54, %v9216_v20  ;;  %v9747_v50 = vadd.f32 %v9432_v54, %v9220_v17  ;;  %v12961_v40 = vld [vmem:[#allocation102_spill] sm:$0xff]  ;;  %v12963_v28 = vld [vmem:[#allocation104_spill] sm:$0xff] }
 0x7ba   : > { %12854 = vst [vmem:[#allocation87_spill] sm:$0xff] %v9683_v47  ;;  %12855 = vst [vmem:[#allocation89_spill] sm:$0xff] %v9687_v21  ;;  %v9751_v11 = vadd.f32 %v9432_v54, %v9224_v5  ;;  %v9755_v13 = vadd.f32 %v9432_v54, %v9228_v53  ;;  %v9759_v55 = vadd.f32 %v9432_v54, %v9232_v7  ;;  %v12957_v21 = vld [vmem:[#allocation98_spill] sm:$0xff]  ;;  %v12959_v47 = vld [vmem:[#allocation100_spill] sm:$0xff] }
 0x7bb   : > { %12856 = vst [vmem:[#allocation91_spill] sm:$0xff] %v9691_v63  ;;  %12857 = vst [vmem:[#allocation93_spill] sm:$0xff] %v9695_v38  ;;  %v9763_v20 = vadd.f32 %v9432_v54, %v12874_v34  ;;  %v12952_v38 = vld [vmem:[#allocation94_spill] sm:$0xff]  ;;  %v12955_v63 = vld [vmem:[#allocation96_spill] sm:$0xff] }
 0x7bc   : > { %12858 = vst [vmem:[#allocation95_spill] sm:$0xff] %v9699_v48  ;;  %12859 = vst [vmem:[#allocation97_spill] sm:$0xff] %v9703_v14  ;;  %v12946_v14 = vld [vmem:[#allocation90_spill] sm:$0xff]  ;;  %v12948_v48 = vld [vmem:[#allocation92_spill] sm:$0xff] }
 0x7bd   : > { %12860 = vst [vmem:[#allocation99_spill] sm:$0xff] %v9707_v45  ;;  %12861 = vst [vmem:[#allocation101_spill] sm:$0xff] %v9711_v42  ;;  %v12942_v42 = vld [vmem:[#allocation86_spill] sm:$0xff]  ;;  %v12944_v45 = vld [vmem:[#allocation88_spill] sm:$0xff] }
 0x7be   : > { %12862 = vst [vmem:[#allocation103_spill] sm:$0xff] %v9715_v24  ;;  %12863 = vst [vmem:[#allocation105_spill] sm:$0xff] %v9719_v57  ;;  %v12938_v57 = vld [vmem:[#allocation82_spill] sm:$0xff]  ;;  %v12940_v24 = vld [vmem:[#allocation84_spill] sm:$0xff] }
 0x7bf   : > { %12864 = vst [vmem:[#allocation107_spill] sm:$0xff] %v9723_v37  ;;  %12865 = vst [vmem:[#allocation109_spill] sm:$0xff] %v9727_v12  ;;  %v12934_v12 = vld [vmem:[#allocation78_spill] sm:$0xff]  ;;  %v12936_v37 = vld [vmem:[#allocation80_spill] sm:$0xff] }
 0x7c0   : > { %12866 = vst [vmem:[#allocation111_spill] sm:$0xff] %v9731_v56  ;;  %12867 = vst [vmem:[#allocation112_spill] sm:$0xff] %v9735_v39  ;;  %v12930_v39 = vld [vmem:[#allocation74_spill] sm:$0xff]  ;;  %v12932_v56 = vld [vmem:[#allocation76_spill] sm:$0xff] }
 0x7c1   : > { %12868 = vst [vmem:[#allocation113_spill] sm:$0xff] %v9739_v3  ;;  %12869 = vst [vmem:[#allocation114_spill] sm:$0xff] %v9743_v8  ;;  %v12876_v8 = vld [vmem:[#allocation27_spill] sm:$0xff]  ;;  %v12928_v3 = vld [vmem:[#allocation72_spill] sm:$0xff] }
 0x7c2   : > { %12870 = vst [vmem:[#allocation115_spill] sm:$0xff] %v9747_v50  ;;  %12871 = vst [vmem:[#allocation116_spill] sm:$0xff] %v9751_v11  ;;  %v9767_v17 = vadd.f32 %v9432_v54, %v12876_v8  ;;  %v12878_v50 = vld [vmem:[#allocation37_spill] sm:$0xff]  ;;  %v12880_v11 = vld [vmem:[#allocation39_spill] sm:$0xff] }
 0x7c3   : > { %12872 = vst [vmem:[#allocation117_spill] sm:$0xff] %v9755_v13  ;;  %12873 = vst [vmem:[#allocation118_spill] sm:$0xff] %v9759_v55  ;;  %v9771_v5 = vadd.f32 %v9432_v54, %v12878_v50  ;;  %v9775_v53 = vadd.f32 %v9432_v54, %v12880_v11  ;;  %v12882_v13 = vld [vmem:[#allocation42_spill] sm:$0xff] }
 0x7c4   : > { %12875 = vst [vmem:[#allocation26_spill] sm:$0xff] %v9763_v20  ;;  %12877 = vst [vmem:[#allocation27_spill] sm:$0xff] %v9767_v17  ;;  %v9779_v7 = vadd.f32 %v9432_v54, %v12882_v13  ;;  %v12884_v55 = vld [vmem:[#allocation2_spill] sm:$0xff]  ;;  %v12886_v20 = vld [vmem:[#allocation3_spill] sm:$0xff] }
 0x7c5   : > { %12879 = vst [vmem:[#allocation37_spill] sm:$0xff] %v9771_v5  ;;  %12881 = vst [vmem:[#allocation39_spill] sm:$0xff] %v9775_v53  ;;  %v9783_v34 = vadd.f32 %v9432_v54, %v12884_v55  ;;  %v9787_v8 = vadd.f32 %v9432_v54, %v12886_v20  ;;  %v12888_v17 = vld [vmem:[#allocation5_spill] sm:$0xff]  ;;  %v12890_v5 = vld [vmem:[#allocation7_spill] sm:$0xff] }
 0x7c6   : > { %12883 = vst [vmem:[#allocation42_spill] sm:$0xff] %v9779_v7  ;;  %v9791_v50 = vadd.f32 %v9432_v54, %v12888_v17  ;;  %v9795_v11 = vadd.f32 %v9432_v54, %v12890_v5  ;;  %v12892_v53 = vld [vmem:[#allocation4_spill] sm:$0xff] }
 0x7c7   : > { %12885 = vst [vmem:[#allocation2_spill] sm:$0xff] %v9783_v34  ;;  %12887 = vst [vmem:[#allocation3_spill] sm:$0xff] %v9787_v8  ;;  %v9799_v13 = vadd.f32 %v9432_v54, %v12892_v53  ;;  %v12894_v7 = vld [vmem:[#allocation44_spill] sm:$0xff]  ;;  %v12898_v8 = vld [vmem:[#allocation69_spill] sm:$0xff] }
 0x7c8   : > { %12889 = vst [vmem:[#allocation5_spill] sm:$0xff] %v9791_v50  ;;  %12891 = vst [vmem:[#allocation7_spill] sm:$0xff] %v9795_v11  ;;  %v9803_v55 = vadd.f32 %v9432_v54, %v12894_v7  ;;  %v12896_v34 = vld [vmem:[#allocation68_spill] sm:$0xff]  ;;  %v9811_v17 = vadd.f32 %v9432_v54, %v12898_v8  ;;  %v12900_v50 = vld [vmem:[#allocation70_spill] sm:$0xff] }
 0x7c9   : > { %12893 = vst [vmem:[#allocation4_spill] sm:$0xff] %v9799_v13  ;;  %v9807_v20 = vadd.f32 %v9432_v54, %v12896_v34  ;;  %v9815_v5 = vadd.f32 %v9432_v54, %v12900_v50  ;;  %v12902_v11 = vld [vmem:[#allocation49_spill] sm:$0xff]  ;;  %v12904_v13 = vld [vmem:[#allocation51_spill] sm:$0xff]  ;;  %v9835_v50 = vadd.f32 %v9432_v54, %v9308_v58 }
 0x7ca   : > { %12895 = vst [vmem:[#allocation44_spill] sm:$0xff] %v9803_v55  ;;  %12899 = vst [vmem:[#allocation69_spill] sm:$0xff] %v9811_v17  ;;  %v9819_v53 = vadd.f32 %v9432_v54, %v12902_v11  ;;  %v9823_v7 = vadd.f32 %v9432_v54, %v12904_v13  ;;  %v12906_v55 = vld [vmem:[#allocation53_spill] sm:$0xff]  ;;  %v9839_v11 = vadd.f32 %v9435_v41, %v9316_v16  ;;  %v12926_v17 = vld [vmem:[#allocation8_spill] sm:$0xff] }
 0x7cb   : > { %12897 = vst [vmem:[#allocation68_spill] sm:$0xff] %v9807_v20  ;;  %12901 = vst [vmem:[#allocation70_spill] sm:$0xff] %v9815_v5  ;;  %v9827_v34 = vadd.f32 %v9432_v54, %v12906_v55  ;;  %v12908_v20 = vld [vmem:[#allocation6_spill] sm:$0xff]  ;;  %v12924_v5 = vld [vmem:[#allocation17_spill] sm:$0xff] }
 0x7cc   : > { %12903 = vst [vmem:[#allocation49_spill] sm:$0xff] %v9819_v53  ;;  %12905 = vst [vmem:[#allocation51_spill] sm:$0xff] %v9823_v7  ;;  %v9831_v8 = vadd.f32 %v9432_v54, %v12908_v20  ;;  %v12912_v53 = vld [vmem:[#allocation55_spill] sm:$0xff]  ;;  %v12914_v7 = vld [vmem:[#allocation57_spill] sm:$0xff] }
 0x7cd   : > { %12907 = vst [vmem:[#allocation53_spill] sm:$0xff] %v9827_v34  ;;  %12910 = vst [vmem:[#allocation119_spill] sm:$0xff] %v9835_v50  ;;  %v9843_v13 = vadd.f32 %v9435_v41, %v12912_v53  ;;  %v9847_v55 = vadd.f32 %v9435_v41, %v12914_v7  ;;  %v12916_v34 = vld [vmem:[#allocation59_spill] sm:$0xff]  ;;  %v12920_v54 = vld [vmem:[#allocation13_spill] sm:$0xff]  ;;  %v9867_v7 = vadd.f32 %v9435_v41, %v12924_v5 }
 0x7ce   : > { %12909 = vst [vmem:[#allocation6_spill] sm:$0xff] %v9831_v8  ;;  %12911 = vst [vmem:[#allocation120_spill] sm:$0xff] %v9839_v11  ;;  %v9851_v20 = vadd.f32 %v9435_v41, %v12916_v34  ;;  %v12918_v8 = vld [vmem:[#allocation61_spill] sm:$0xff]  ;;  %v9859_v16 = vadd.f32 %v9435_v41, %v12920_v54  ;;  %v12922_v50 = vld [vmem:[#allocation12_spill] sm:$0xff]  ;;  %v9871_v34 = vadd.f32 %v9435_v41, %v12926_v17 }
 0x7cf   : > { %12913 = vst [vmem:[#allocation55_spill] sm:$0xff] %v9843_v13  ;;  %12915 = vst [vmem:[#allocation57_spill] sm:$0xff] %v9847_v55  ;;  %v9855_v58 = vadd.f32 %v9435_v41, %v12918_v8  ;;  %v9863_v53 = vadd.f32 %v9435_v41, %v12922_v50  ;;  %v9875_v8 = vadd.f32 %v9435_v41, %v12928_v3 }
 0x7d0   : > { %12917 = vst [vmem:[#allocation59_spill] sm:$0xff] %v9851_v20  ;;  %12921 = vst [vmem:[#allocation13_spill] sm:$0xff] %v9859_v16  ;;  %v9879_v54 = vadd.f32 %v9435_v41, %v12930_v39  ;;  %v9883_v50 = vadd.f32 %v9435_v41, %v12932_v56  ;;  %v9887_v5 = vadd.f32 %v9435_v41, %v12934_v12 }
 0x7d1   : > { %12919 = vst [vmem:[#allocation61_spill] sm:$0xff] %v9855_v58  ;;  %12923 = vst [vmem:[#allocation12_spill] sm:$0xff] %v9863_v53  ;;  %v9891_v17 = vadd.f32 %v9435_v41, %v12936_v37  ;;  %v9895_v3 = vadd.f32 %v9435_v41, %v12938_v57  ;;  %v9899_v39 = vadd.f32 %v9435_v41, %v12940_v24 }
 0x7d2   : > { %12925 = vst [vmem:[#allocation17_spill] sm:$0xff] %v9867_v7  ;;  %12927 = vst [vmem:[#allocation8_spill] sm:$0xff] %v9871_v34  ;;  %v9903_v56 = vadd.f32 %v9435_v41, %v12942_v42  ;;  %v9907_v12 = vadd.f32 %v9435_v41, %v12944_v45  ;;  %v9911_v37 = vadd.f32 %v9435_v41, %v12946_v14 }
 0x7d3   : > { %12929 = vst [vmem:[#allocation72_spill] sm:$0xff] %v9875_v8  ;;  %12931 = vst [vmem:[#allocation74_spill] sm:$0xff] %v9879_v54  ;;  %v9915_v57 = vadd.f32 %v9435_v41, %v12948_v48  ;;  %v9919_v24 = vadd.f32 %v9435_v41, %v9401_v49  ;;  %v9923_v42 = vadd.f32 %v9435_v41, %v9405_v36 }
 0x7d4   : > { %12933 = vst [vmem:[#allocation76_spill] sm:$0xff] %v9883_v50  ;;  %12935 = vst [vmem:[#allocation78_spill] sm:$0xff] %v9887_v5  ;;  %v9927_v45 = vadd.f32 %v9435_v41, %v12952_v38  ;;  %v9931_v14 = vadd.f32 %v9435_v41, %v9413_v23  ;;  %v9935_v48 = vadd.f32 %v9435_v41, %v12955_v63 }
 0x7d5   : > { %12937 = vst [vmem:[#allocation80_spill] sm:$0xff] %v9891_v17  ;;  %12939 = vst [vmem:[#allocation82_spill] sm:$0xff] %v9895_v3  ;;  %v9939_v49 = vadd.f32 %v9435_v41, %v12957_v21  ;;  %v9943_v36 = vadd.f32 %v9435_v41, %v12959_v47  ;;  %v9947_v38 = vadd.f32 %v9435_v41, %v12961_v40 }
 0x7d6   : > { %12941 = vst [vmem:[#allocation84_spill] sm:$0xff] %v9899_v39  ;;  %12943 = vst [vmem:[#allocation86_spill] sm:$0xff] %v9903_v56  ;;  %v9951_v23 = vadd.f32 %v9435_v41, %v12963_v28 }
 0x7d7   : > { %12945 = vst [vmem:[#allocation88_spill] sm:$0xff] %v9907_v12  ;;  %12947 = vst [vmem:[#allocation90_spill] sm:$0xff] %v9911_v37 }
 0x7d8   : > { %12949 = vst [vmem:[#allocation92_spill] sm:$0xff] %v9915_v57  ;;  %12950 = vst [vmem:[#allocation121_spill] sm:$0xff] %v9919_v24 }
 0x7d9   : > { %12951 = vst [vmem:[#allocation122_spill] sm:$0xff] %v9923_v42  ;;  %12953 = vst [vmem:[#allocation94_spill] sm:$0xff] %v9927_v45 }
 0x7da   : > { %12954 = vst [vmem:[#allocation123_spill] sm:$0xff] %v9931_v14  ;;  %12956 = vst [vmem:[#allocation96_spill] sm:$0xff] %v9935_v48  ;;  %v12965_v14 = vld [vmem:[#allocation106_spill] sm:$0xff]  ;;  %v12967_v48 = vld [vmem:[#allocation108_spill] sm:$0xff] }
 0x7db   : > { %12958 = vst [vmem:[#allocation98_spill] sm:$0xff] %v9939_v49  ;;  %12960 = vst [vmem:[#allocation100_spill] sm:$0xff] %v9943_v36  ;;  %v9955_v63 = vadd.f32 %v9435_v41, %v12965_v14  ;;  %v9959_v21 = vadd.f32 %v9435_v41, %v12967_v48  ;;  %v12969_v49 = vld [vmem:[#allocation110_spill] sm:$0xff]  ;;  %v12971_v36 = vld [vmem:[#allocation19_spill] sm:$0xff] }
 0x7dc   : > { %12962 = vst [vmem:[#allocation102_spill] sm:$0xff] %v9947_v38  ;;  %12964 = vst [vmem:[#allocation104_spill] sm:$0xff] %v9951_v23  ;;  %v9963_v47 = vadd.f32 %v9435_v41, %v12969_v49  ;;  %v9967_v40 = vadd.f32 %v9435_v41, %v12971_v36  ;;  %v12973_v38 = vld [vmem:[#allocation62_spill] sm:$0xff]  ;;  %v12975_v23 = vld [vmem:[#allocation16_spill] sm:$0xff] }
 0x7dd   : > { %12966 = vst [vmem:[#allocation106_spill] sm:$0xff] %v9955_v63  ;;  %12968 = vst [vmem:[#allocation108_spill] sm:$0xff] %v9959_v21  ;;  %v9971_v28 = vadd.f32 %v9435_v41, %v12973_v38  ;;  %v9975_v14 = vadd.f32 %v9435_v41, %v12975_v23  ;;  %v12977_v63 = vld [vmem:[#allocation63_spill] sm:$0xff]  ;;  %v12979_v21 = vld [vmem:[#allocation18_spill] sm:$0xff] }
 0x7de   : > { %12970 = vst [vmem:[#allocation110_spill] sm:$0xff] %v9963_v47  ;;  %12972 = vst [vmem:[#allocation19_spill] sm:$0xff] %v9967_v40  ;;  %v9979_v48 = vadd.f32 %v9435_v41, %v12977_v63  ;;  %v9983_v49 = vadd.f32 %v9435_v41, %v12979_v21  ;;  %v12981_v47 = vld [vmem:[#allocation21_spill] sm:$0xff]  ;;  %v12983_v40 = vld [vmem:[#allocation20_spill] sm:$0xff] }
 0x7df   : > { %12974 = vst [vmem:[#allocation62_spill] sm:$0xff] %v9971_v28  ;;  %12976 = vst [vmem:[#allocation16_spill] sm:$0xff] %v9975_v14  ;;  %v9987_v36 = vadd.f32 %v9435_v41, %v12981_v47  ;;  %v9991_v38 = vadd.f32 %v9435_v41, %v12983_v40  ;;  %v12985_v28 = vld [vmem:[#allocation22_spill] sm:$0xff]  ;;  %v12987_v14 = vld [vmem:[#allocation23_spill] sm:$0xff] }
 0x7e0   : > { %12978 = vst [vmem:[#allocation63_spill] sm:$0xff] %v9979_v48  ;;  %12980 = vst [vmem:[#allocation18_spill] sm:$0xff] %v9983_v49  ;;  %v9995_v23 = vadd.f32 %v9435_v41, %v12985_v28  ;;  %v9999_v63 = vadd.f32 %v9435_v41, %v12987_v14  ;;  %v12989_v48 = vld [vmem:[#allocation25_spill] sm:$0xff]  ;;  %v12991_v49 = vld [vmem:[#allocation24_spill] sm:$0xff] }
 0x7e1   : > { %12982 = vst [vmem:[#allocation21_spill] sm:$0xff] %v9987_v36  ;;  %12984 = vst [vmem:[#allocation20_spill] sm:$0xff] %v9991_v38  ;;  %v10003_v21 = vadd.f32 %v9435_v41, %v12989_v48  ;;  %v10007_v47 = vadd.f32 %v9435_v41, %v12991_v49  ;;  %v12993_v36 = vld [vmem:[#allocation28_spill] sm:$0xff]  ;;  %v12995_v38 = vld [vmem:[#allocation29_spill] sm:$0xff] }
 0x7e2   : > { %12986 = vst [vmem:[#allocation22_spill] sm:$0xff] %v9995_v23  ;;  %12988 = vst [vmem:[#allocation23_spill] sm:$0xff] %v9999_v63  ;;  %v10011_v40 = vadd.f32 %v9435_v41, %v12993_v36  ;;  %v10015_v28 = vadd.f32 %v9435_v41, %v12995_v38  ;;  %v12997_v23 = vld [vmem:[#allocation30_spill] sm:$0xff]  ;;  %v12999_v63 = vld [vmem:[#allocation31_spill] sm:$0xff] }
 0x7e3   : > { %12990 = vst [vmem:[#allocation25_spill] sm:$0xff] %v10003_v21  ;;  %12992 = vst [vmem:[#allocation24_spill] sm:$0xff] %v10007_v47  ;;  %v10019_v14 = vadd.f32 %v9435_v41, %v12997_v23  ;;  %v10023_v48 = vadd.f32 %v9435_v41, %v12999_v63  ;;  %v13001_v21 = vld [vmem:[#allocation32_spill] sm:$0xff]  ;;  %v13003_v47 = vld [vmem:[#allocation33_spill] sm:$0xff] }
 0x7e4   : > { %12994 = vst [vmem:[#allocation28_spill] sm:$0xff] %v10011_v40  ;;  %12996 = vst [vmem:[#allocation29_spill] sm:$0xff] %v10015_v28  ;;  %v10027_v49 = vadd.f32 %v9435_v41, %v13001_v21  ;;  %v10031_v36 = vadd.f32 %v9435_v41, %v13003_v47  ;;  %v13005_v40 = vld [vmem:[#allocation34_spill] sm:$0xff]  ;;  %v13007_v28 = vld [vmem:[#allocation35_spill] sm:$0xff] }
 0x7e5   : > { %12998 = vst [vmem:[#allocation30_spill] sm:$0xff] %v10019_v14  ;;  %13000 = vst [vmem:[#allocation31_spill] sm:$0xff] %v10023_v48  ;;  %v10035_v38 = vadd.f32 %v9435_v41, %v13005_v40  ;;  %v10039_v23 = vadd.f32 %v9435_v41, %v13007_v28  ;;  %v13009_v14 = vld [vmem:[#allocation36_spill] sm:$0xff]  ;;  %v13011_v48 = vld [vmem:[#allocation38_spill] sm:$0xff] }
 0x7e6   : > { %13002 = vst [vmem:[#allocation32_spill] sm:$0xff] %v10027_v49  ;;  %13004 = vst [vmem:[#allocation33_spill] sm:$0xff] %v10031_v36  ;;  %v10043_v63 = vadd.f32 %v9435_v41, %v13009_v14  ;;  %v10047_v21 = vadd.f32 %v9435_v41, %v13011_v48  ;;  %v13013_v49 = vld [vmem:[#allocation41_spill] sm:$0xff]  ;;  %v13015_v36 = vld [vmem:[#allocation40_spill] sm:$0xff] }
 0x7e7   : > { %13006 = vst [vmem:[#allocation34_spill] sm:$0xff] %v10035_v38  ;;  %13008 = vst [vmem:[#allocation35_spill] sm:$0xff] %v10039_v23  ;;  %v10051_v47 = vadd.f32 %v9435_v41, %v13013_v49  ;;  %v10055_v40 = vadd.f32 %v9435_v41, %v13015_v36  ;;  %v13017_v38 = vld [vmem:[#allocation64_spill] sm:$0xff]  ;;  %v13019_v23 = vld [vmem:[#allocation65_spill] sm:$0xff]  ;;  %v10071_v49 = vadd.f32 %v9435_v41, %v9559_v26 }
 0x7e8   : > { %13010 = vst [vmem:[#allocation36_spill] sm:$0xff] %v10043_v63  ;;  %13012 = vst [vmem:[#allocation38_spill] sm:$0xff] %v10047_v21  ;;  %v10059_v28 = vadd.f32 %v9435_v41, %v13017_v38  ;;  %v10063_v14 = vadd.f32 %v9435_v41, %v13019_v23  ;;  %v13021_v63 = vld [vmem:[#allocation66_spill] sm:$0xff]  ;;  %v10075_v36 = vadd.f32 %v9435_v41, %v9563_v60  ;;  %v10097_v60 = vmul.f32 0.5, %v9839_v11 }
 0x7e9   : > { %13014 = vst [vmem:[#allocation41_spill] sm:$0xff] %v10051_v47  ;;  %13016 = vst [vmem:[#allocation40_spill] sm:$0xff] %v10055_v40  ;;  %v10067_v48 = vadd.f32 %v9435_v41, %v13021_v63  ;;  %v10079_v38 = vadd.f32 %v9435_v41, %v9567_v19  ;;  %v10083_v23 = vadd.f32 %v9435_v41, %v9571_v27  ;;  %v10100_v19 = vmul.f32 0.5, %v9587_v1 }
 0x7ea   : > { %13018 = vst [vmem:[#allocation64_spill] sm:$0xff] %v10059_v28  ;;  %13020 = vst [vmem:[#allocation65_spill] sm:$0xff] %v10063_v14  ;;  %v10087_v63 = vadd.f32 %v9435_v41, %v9575_v30  ;;  %v10091_v26 = vadd.f32 %v9435_v41, %v9579_v15  ;;  %v10103_v27 = vmul.f32 0.5, %v9843_v13  ;;  %v5922_v41 = vld [vmem:[%s11944_s9 + $0x30] sm:$0xff]   ;;  %v10112_v30 = vmul.f32 0.5, %v9847_v55 }
 0x7eb   : > { %13022 = vst [vmem:[#allocation66_spill] sm:$0xff] %v10067_v48  ;;  %13023 = vst [vmem:[#allocation124_spill] sm:$0xff] %v10071_v49  ;;  %v10094_v49 = vmul.f32 0.5, %v9583_v4  ;;  %v10115_v15 = vmul.f32 0.5, %v9595_v31  ;;  %v10118_v11 = vmul.f32 0.5, %v9851_v20  ;;  %v10121_v1 = vmul.f32 0.5, %v9599_v33  ;;  %4596 = vmatpush1.bf16.msra.mxu0 %v5922_v41 }
 0x7ec   : > { %13024 = vst [vmem:[#allocation125_spill] sm:$0xff] %v10075_v36  ;;  %13025 = vst [vmem:[#allocation126_spill] sm:$0xff] %v10079_v38  ;;  %v10124_v13 = vmul.f32 0.5, %v9855_v58  ;;  %v10130_v4 = vmul.f32 0.5, %v9859_v16  ;;  %v10133_v55 = vmul.f32 0.5, %v9607_v32  ;;  %v10136_v31 = vmul.f32 0.5, %v9863_v53 }
 0x7ed   : > { %13026 = vst [vmem:[#allocation127_spill] sm:$0xff] %v10083_v23  ;;  %13027 = vst [vmem:[#allocation128_spill] sm:$0xff] %v10087_v63  ;;  %v10106_v23 = vmul.f32 0.5, %v9591_v10  ;;  %v10127_v10 = vmul.f32 0.5, %v9603_v52  ;;  %v10139_v20 = vmul.f32 0.5, %v9611_v25  ;;  %v10142_v33 = vmul.f32 0.5, %v9867_v7 }
 0x7ee   : > { %13028 = vst [vmem:[#allocation129_spill] sm:$0xff] %v10091_v26  ;;  %v10145_v58 = vmul.f32 0.5, %v9615_v2  ;;  %v13029_v52 = vmov 0   ;;  %v10149_v16 = vmul.f32 0.5, %v9871_v34  ;;  %v10152_v32 = vmul.f32 0.5, %v9619_v43  ;;  %v5923_v7 = vld [vmem:[%s11944_s9 + $0x38] sm:$0xff]  }
 0x7ef   : > { %4597 = vmatprep.subr.bf16.mxu0 %v13029_v52  ;;  %v10155_v41 = vmul.f32 0.5, %v9875_v8  ;;  %v10158_v25 = vmul.f32 0.5, %v9623_v0  ;;  %v10164_v2 = vmul.f32 0.5, %v9879_v54  ;;  %v10167_v53 = vmul.f32 0.5, %v9627_v44 }
 0x7f0   : > { %v10170_v34 = vmul.f32 0.5, %v9883_v50  ;;  %v10173_v43 = vmul.f32 0.5, %v9631_v46  ;;  %v10176_v8 = vmul.f32 0.5, %v9887_v5  ;;  %v10179_v0 = vmul.f32 0.5, %v9635_v22  ;;  %4598 = vmatpush1.bf16.msra.mxu0 %v5923_v7 }
 0x7f1   : > { %13030 = vst [vmem:[#allocation130_spill] sm:$0xff] %v10158_v25  ;;  %v10182_v25 = vmul.f32 0.5, %v9891_v17  ;;  %v10185_v54 = vmul.f32 0.5, %v9639_v62  ;;  %v10188_v44 = vmul.f32 0.5, %v9895_v3  ;;  %v10191_v50 = vmul.f32 0.5, %v9643_v51  ;;  %4599 = vmatprep.subr.bf16.mxu0 %v13029_v52 }
 0x7f2   : > { %v10194_v46 = vmul.f32 0.5, %v9899_v39  ;;  %v10197_v5 = vmul.f32 0.5, %v9647_v9  ;;  %v10201_v22 = vmul.f32 0.5, %v9903_v56  ;;  %v10204_v62 = vmul.f32 0.5, %v9651_v61  ;;  %v5924_v39 = vld [vmem:[%s11944_s9 + $0x40] sm:$0xff]  }
 0x7f3   : > { %v10207_v7 = vmul.f32 0.5, %v9907_v12  ;;  %v10210_v51 = vmul.f32 0.5, %v9655_v18  ;;  %v10216_v9 = vmul.f32 0.5, %v9911_v37  ;;  %v10219_v3 = vmul.f32 0.5, %v9659_v6 }
 0x7f4   : > { %v10222_v56 = vmul.f32 0.5, %v9915_v57  ;;  %v10225_v61 = vmul.f32 0.5, %v9663_v59  ;;  %v10228_v12 = vmul.f32 0.5, %v9919_v24  ;;  %v10231_v18 = vmul.f32 0.5, %v9667_v29  ;;  %4600 = vmatpush1.bf16.msra.mxu0 %v5924_v39  ;;  %v13038_v57 = vld [vmem:[#allocation83_spill] sm:$0xff]  ;;  %v13042_v24 = vld [vmem:[#allocation85_spill] sm:$0xff] }
 0x7f5   : > { %v10234_v17 = vmul.f32 0.5, %v9923_v42  ;;  %v10237_v37 = vmul.f32 0.5, %v9671_v35  ;;  %v10240_v6 = vmul.f32 0.5, %v9927_v45  ;;  %v13040_v59 = vld [vmem:[#allocation123_spill] sm:$0xff]  ;;  %4601 = vmatprep.subr.bf16.mxu0 %v13029_v52  ;;  %v13044_v29 = vld [vmem:[#allocation96_spill] sm:$0xff]  ;;  %v13048_v39 = vld [vmem:[#allocation98_spill] sm:$0xff]  ;;  %6064 = vtanh.f32 %v10094_v49 }
 0x7f6   : > { %13031 = vst [vmem:[#allocation131_spill] sm:$0xff] %v10222_v56  ;;  %13032 = vst [vmem:[#allocation132_spill] sm:$0xff] %v10225_v61  ;;  %v10243_v56 = vmul.f32 0.5, %v13038_v57  ;;  %v10246_v61 = vmul.f32 0.5, %v13040_v59  ;;  %v10253_v42 = vmul.f32 0.5, %v13044_v29  ;;  %v13046_v35 = vld [vmem:[#allocation87_spill] sm:$0xff]  ;;  %6066 = vtanh.f32 %v10097_v60 }
 0x7f7   : > { %13033 = vst [vmem:[#allocation133_spill] sm:$0xff] %v10228_v12  ;;  %13034 = vst [vmem:[#allocation134_spill] sm:$0xff] %v10231_v18  ;;  %v10249_v12 = vmul.f32 0.5, %v13042_v24  ;;  %v10259_v45 = vmul.f32 0.5, %v13048_v39  ;;  %v5925_v59 = vld [vmem:[%s11944_s9 + $0x48] sm:$0xff]   ;;  %v13052_v24 = vld [vmem:[#allocation100_spill] sm:$0xff]  ;;  %6068 = vtanh.f32 %v10100_v19 }
 0x7f8   : > { %13035 = vst [vmem:[#allocation135_spill] sm:$0xff] %v10234_v17  ;;  %13036 = vst [vmem:[#allocation136_spill] sm:$0xff] %v10237_v37  ;;  %v10256_v37 = vmul.f32 0.5, %v13046_v35  ;;  %v13056_v29 = vld [vmem:[#allocation102_spill] sm:$0xff]  ;;  %v13058_v35 = vld [vmem:[#allocation93_spill] sm:$0xff]  ;;  %4602 = vmatpush1.bf16.msra.mxu0 %v5925_v59  ;;  %6070 = vtanh.f32 %v10103_v27 }
 0x7f9   : > { %13037 = vst [vmem:[#allocation137_spill] sm:$0xff] %v10240_v6  ;;  %13039 = vst [vmem:[#allocation138_spill] sm:$0xff] %v10243_v56  ;;  %v13050_v6 = vld [vmem:[#allocation89_spill] sm:$0xff]  ;;  %v13060_v39 = vld [vmem:[#allocation104_spill] sm:$0xff]  ;;  %4603 = vmatprep.subr.bf16.mxu0 %v13029_v52  ;;  %6072 = vtanh.f32 %v10106_v23  ;;  %v10455_v23 = vmul.f32 0.5, %v10055_v40 }
 0x7fa   : > { %13041 = vst [vmem:[#allocation139_spill] sm:$0xff] %v10246_v61  ;;  %13043 = vst [vmem:[#allocation140_spill] sm:$0xff] %v10249_v12  ;;  %v10262_v57 = vmul.f32 0.5, %v13050_v6  ;;  %v10268_v12 = vmul.f32 0.5, %v13052_v24  ;;  %v13054_v61 = vld [vmem:[#allocation91_spill] sm:$0xff]  ;;  %v13064_v17 = vld [vmem:[#allocation106_spill] sm:$0xff]  ;;  %6074 = vtanh.f32 %v10112_v30 }
 0x7fb   : > { %13045 = vst [vmem:[#allocation141_spill] sm:$0xff] %v10253_v42  ;;  %13047 = vst [vmem:[#allocation142_spill] sm:$0xff] %v10256_v37  ;;  %v10271_v56 = vmul.f32 0.5, %v13054_v61  ;;  %v10274_v42 = vmul.f32 0.5, %v13056_v29  ;;  %v10277_v37 = vmul.f32 0.5, %v13058_v35  ;;  %v13062_v6 = vld [vmem:[#allocation95_spill] sm:$0xff]  ;;  %6076 = vtanh.f32 %v10115_v15 }
 0x7fc   : > { %13049 = vst [vmem:[#allocation143_spill] sm:$0xff] %v10259_v45  ;;  %13051 = vst [vmem:[#allocation144_spill] sm:$0xff] %v10262_v57  ;;  %v10280_v45 = vmul.f32 0.5, %v13060_v39  ;;  %v10283_v57 = vmul.f32 0.5, %v13062_v6  ;;  %v10286_v18 = vmul.f32 0.5, %v13064_v17  ;;  %v13066_v24 = vld [vmem:[#allocation97_spill] sm:$0xff]  ;;  %6078 = vtanh.f32 %v10118_v11 }
 0x7fd   : > { %13053 = vst [vmem:[#allocation145_spill] sm:$0xff] %v10268_v12  ;;  %13055 = vst [vmem:[#allocation146_spill] sm:$0xff] %v10271_v56  ;;  %v10289_v12 = vmul.f32 0.5, %v13066_v24  ;;  %v13068_v61 = vld [vmem:[#allocation108_spill] sm:$0xff]  ;;  %v13070_v29 = vld [vmem:[#allocation99_spill] sm:$0xff]  ;;  %v10465_v30 = vmul.f32 0.5, %v10059_v28  ;;  %6080 = vtanh.f32 %v10121_v1 }
 0x7fe   : > { %13057 = vst [vmem:[#allocation147_spill] sm:$0xff] %v10274_v42  ;;  %13059 = vst [vmem:[#allocation148_spill] sm:$0xff] %v10277_v37  ;;  %v10292_v56 = vmul.f32 0.5, %v13068_v61  ;;  %v10295_v42 = vmul.f32 0.5, %v13070_v29  ;;  %v13072_v35 = vld [vmem:[#allocation110_spill] sm:$0xff]  ;;  %v13074_v39 = vld [vmem:[#allocation101_spill] sm:$0xff]  ;;  %6082 = vtanh.f32 %v10124_v13 }
 0x7ff   : > { %13061 = vst [vmem:[#allocation149_spill] sm:$0xff] %v10280_v45  ;;  %13063 = vst [vmem:[#allocation150_spill] sm:$0xff] %v10283_v57  ;;  %v10298_v37 = vmul.f32 0.5, %v13072_v35  ;;  %v10301_v45 = vmul.f32 0.5, %v13074_v39  ;;  %v13076_v6 = vld [vmem:[#allocation19_spill] sm:$0xff]  ;;  %v13080_v59 = vld [vmem:[#allocation62_spill] sm:$0xff]  ;;  %6084 = vtanh.f32 %v10127_v10 }
 0x800   : > { %13065 = vst [vmem:[#allocation151_spill] sm:$0xff] %v10286_v18  ;;  %13067 = vst [vmem:[#allocation152_spill] sm:$0xff] %v10289_v12  ;;  %v10305_v17 = vmul.f32 0.5, %v13076_v6  ;;  %v13078_v24 = vld [vmem:[#allocation103_spill] sm:$0xff]  ;;  %v10311_v61 = vmul.f32 0.5, %v13080_v59  ;;  %v5926_v35 = vld [vmem:[%s11944_s9 + $0x50] sm:$0xff]   ;;  %6086 = vtanh.f32 %v10130_v4 }
 0x801   : > { %13069 = vst [vmem:[#allocation153_spill] sm:$0xff] %v10292_v56  ;;  %13071 = vst [vmem:[#allocation154_spill] sm:$0xff] %v10295_v42  ;;  %v10308_v12 = vmul.f32 0.5, %v13078_v24  ;;  %v13082_v56 = vld [vmem:[#allocation105_spill] sm:$0xff]  ;;  %v13084_v39 = vld [vmem:[#allocation16_spill] sm:$0xff]  ;;  %4604 = vmatpush1.bf16.msra.mxu0 %v5926_v35  ;;  %v10516_v10 = vmul.f32 0.5, %v10087_v63  ;;  %6088 = vtanh.f32 %v10133_v55 }
 0x802   : > { %13073 = vst [vmem:[#allocation155_spill] sm:$0xff] %v10298_v37  ;;  %13075 = vst [vmem:[#allocation156_spill] sm:$0xff] %v10301_v45  ;;  %v10314_v29 = vmul.f32 0.5, %v13082_v56  ;;  %v10320_v45 = vmul.f32 0.5, %v13084_v39  ;;  %v13086_v37 = vld [vmem:[#allocation107_spill] sm:$0xff]  ;;  %v13090_v24 = vld [vmem:[#allocation109_spill] sm:$0xff]  ;;  %4605 = vmatprep.subr.bf16.mxu0 %v13029_v52  ;;  %6090 = vtanh.f32 %v10136_v31 }
 0x803   : > { %13077 = vst [vmem:[#allocation157_spill] sm:$0xff] %v10305_v17  ;;  %13079 = vst [vmem:[#allocation158_spill] sm:$0xff] %v10308_v12  ;;  %v10323_v42 = vmul.f32 0.5, %v13086_v37  ;;  %v13088_v6 = vld [vmem:[#allocation63_spill] sm:$0xff]  ;;  %v10329_v12 = vmul.f32 0.5, %v13090_v24  ;;  %v13092_v59 = vld [vmem:[#allocation18_spill] sm:$0xff]  ;;  %6092 = vtanh.f32 %v10139_v20 }
 0x804   : > { %13081 = vst [vmem:[#allocation159_spill] sm:$0xff] %v10311_v61  ;;  %13083 = vst [vmem:[#allocation160_spill] sm:$0xff] %v10314_v29  ;;  %v10326_v17 = vmul.f32 0.5, %v13088_v6  ;;  %v10332_v61 = vmul.f32 0.5, %v13092_v59  ;;  %v13094_v56 = vld [vmem:[#allocation111_spill] sm:$0xff]  ;;  %v13096_v18 = vld [vmem:[#allocation21_spill] sm:$0xff]  ;;  %6094 = vtanh.f32 %v10142_v33 }
 0x805   : > { %13085 = vst [vmem:[#allocation161_spill] sm:$0xff] %v10320_v45  ;;  %13087 = vst [vmem:[#allocation162_spill] sm:$0xff] %v10323_v42  ;;  %v10335_v29 = vmul.f32 0.5, %v13094_v56  ;;  %v10338_v57 = vmul.f32 0.5, %v13096_v18  ;;  %v13098_v39 = vld [vmem:[#allocation112_spill] sm:$0xff]  ;;  %v13102_v6 = vld [vmem:[#allocation113_spill] sm:$0xff] }
 0x806   : > { %13089 = vst [vmem:[#allocation163_spill] sm:$0xff] %v10326_v17  ;;  %13091 = vst [vmem:[#allocation164_spill] sm:$0xff] %v10329_v12  ;;  %v10341_v45 = vmul.f32 0.5, %v13098_v39  ;;  %v13100_v37 = vld [vmem:[#allocation20_spill] sm:$0xff]  ;;  %v10347_v17 = vmul.f32 0.5, %v13102_v6  ;;  %v13104_v24 = vld [vmem:[#allocation22_spill] sm:$0xff] }
 0x807   : > { %13093 = vst [vmem:[#allocation165_spill] sm:$0xff] %v10332_v61  ;;  %13095 = vst [vmem:[#allocation166_spill] sm:$0xff] %v10335_v29  ;;  %v10344_v42 = vmul.f32 0.5, %v13100_v37  ;;  %v10350_v12 = vmul.f32 0.5, %v13104_v24  ;;  %v13106_v59 = vld [vmem:[#allocation114_spill] sm:$0xff]  ;;  %v13108_v56 = vld [vmem:[#allocation23_spill] sm:$0xff] }
 0x808   : > { %13097 = vst [vmem:[#allocation167_spill] sm:$0xff] %v10338_v57  ;;  %13099 = vst [vmem:[#allocation168_spill] sm:$0xff] %v10341_v45  ;;  %v10353_v61 = vmul.f32 0.5, %v13106_v59  ;;  %v10357_v18 = vmul.f32 0.5, %v13108_v56  ;;  %v13110_v39 = vld [vmem:[#allocation115_spill] sm:$0xff]  ;;  %v13112_v35 = vld [vmem:[#allocation25_spill] sm:$0xff] }
 0x809   : > { %13101 = vst [vmem:[#allocation169_spill] sm:$0xff] %v10344_v42  ;;  %13103 = vst [vmem:[#allocation170_spill] sm:$0xff] %v10347_v17  ;;  %v10360_v45 = vmul.f32 0.5, %v13110_v39  ;;  %v10363_v37 = vmul.f32 0.5, %v13112_v35  ;;  %v13114_v42 = vld [vmem:[#allocation116_spill] sm:$0xff]  ;;  %v5927_v24 = vld [vmem:[%s11944_s9 + $0x58] sm:$0xff]  }
 0x80a   : > { %13105 = vst [vmem:[#allocation171_spill] sm:$0xff] %v10350_v12  ;;  %13107 = vst [vmem:[#allocation172_spill] sm:$0xff] %v10353_v61  ;;  %v10366_v6 = vmul.f32 0.5, %v13114_v42  ;;  %v13116_v59 = vld [vmem:[#allocation24_spill] sm:$0xff]  ;;  %v13117_v12 = vld [vmem:[#allocation117_spill] sm:$0xff]  ;;  %4606 = vmatpush1.bf16.msra.mxu0 %v5927_v24 }
 0x80b   : > { %13109 = vst [vmem:[#allocation173_spill] sm:$0xff] %v10357_v18  ;;  %13111 = vst [vmem:[#allocation174_spill] sm:$0xff] %v10360_v45  ;;  %v10372_v61 = vmul.f32 0.5, %v13116_v59  ;;  %v10375_v17 = vmul.f32 0.5, %v13117_v12  ;;  %v13118_v56 = vld [vmem:[#allocation28_spill] sm:$0xff]  ;;  %v13120_v39 = vld [vmem:[#allocation118_spill] sm:$0xff]  ;;  %4607 = vmatprep.subr.bf16.mxu0 %v13029_v52 }
 0x80c   : > { %13113 = vst [vmem:[#allocation175_spill] sm:$0xff] %v10363_v37  ;;  %13115 = vst [vmem:[#allocation176_spill] sm:$0xff] %v10366_v6  ;;  %v10378_v18 = vmul.f32 0.5, %v13118_v56  ;;  %v10381_v45 = vmul.f32 0.5, %v13120_v39  ;;  %v13122_v35 = vld [vmem:[#allocation29_spill] sm:$0xff]  ;;  %v13123_v42 = vld [vmem:[#allocation26_spill] sm:$0xff] }
 0x80d   : > { %v10384_v37 = vmul.f32 0.5, %v13122_v35  ;;  %v10387_v6 = vmul.f32 0.5, %v13123_v42  ;;  %v13124_v57 = vld [vmem:[#allocation30_spill] sm:$0xff]  ;;  %v13126_v12 = vld [vmem:[#allocation27_spill] sm:$0xff]  ;;  %v13129_v39 = vld [vmem:[#allocation37_spill] sm:$0xff]  ;;  %13147 = vst [vmem:[#allocation186_spill] sm:$0xff] %v10455_v23 }
 0x80e   : > { %13119 = vst [vmem:[#allocation177_spill] sm:$0xff] %v10378_v18  ;;  %13121 = vst [vmem:[#allocation178_spill] sm:$0xff] %v10381_v45  ;;  %v10390_v29 = vmul.f32 0.5, %v13124_v57  ;;  %v10394_v59 = vmul.f32 0.5, %v13126_v12  ;;  %v13127_v56 = vld [vmem:[#allocation31_spill] sm:$0xff]  ;;  %v10400_v45 = vmul.f32 0.5, %v13129_v39 }
 0x80f   : > { %v10397_v18 = vmul.f32 0.5, %v13127_v56  ;;  %v13131_v42 = vld [vmem:[#allocation32_spill] sm:$0xff]  ;;  %v13133_v57 = vld [vmem:[#allocation39_spill] sm:$0xff]  ;;  %v13135_v24 = vld [vmem:[#allocation33_spill] sm:$0xff]  ;;  %13149 = vst [vmem:[#allocation187_spill] sm:$0xff] %v10465_v30  ;;  %v10478_v23 = vmul.f32 0.5, %v10067_v48 }
 0x810   : > { %13125 = vst [vmem:[#allocation179_spill] sm:$0xff] %v10390_v29  ;;  %13130 = vst [vmem:[#allocation181_spill] sm:$0xff] %v10400_v45  ;;  %v10405_v35 = vmul.f32 0.5, %v13131_v42  ;;  %v10408_v29 = vmul.f32 0.5, %v13133_v57  ;;  %v10411_v49 = vmul.f32 0.5, %v13135_v24  ;;  %v5928_v39 = vld [vmem:[%s11944_s9 + $0x60] sm:$0xff]  }
 0x811   : > { %13128 = vst [vmem:[#allocation180_spill] sm:$0xff] %v10397_v18  ;;  %v13137_v12 = vld [vmem:[#allocation42_spill] sm:$0xff]  ;;  %v13141_v57 = vld [vmem:[#allocation35_spill] sm:$0xff]  ;;  %4608 = vmatpush1.bf16.msra.mxu0 %v5928_v39  ;;  %v13153_v40 = vld [vmem:[#allocation69_spill] sm:$0xff]  ;;  %v10493_v48 = vmul.f32 0.5, %v10075_v36 }
 0x812   : > { %13132 = vst [vmem:[#allocation182_spill] sm:$0xff] %v10405_v35  ;;  %13134 = vst [vmem:[#allocation183_spill] sm:$0xff] %v10408_v29  ;;  %v10418_v56 = vmul.f32 0.5, %v13137_v12  ;;  %v13138_v60 = vld [vmem:[#allocation34_spill] sm:$0xff]  ;;  %v10428_v24 = vmul.f32 0.5, %v13141_v57  ;;  %v13143_v29 = vld [vmem:[#allocation36_spill] sm:$0xff]  ;;  %4609 = vmatprep.subr.bf16.mxu0 %v13029_v52 }
 0x813   : > { %13136 = vst [vmem:[#allocation184_spill] sm:$0xff] %v10411_v49  ;;  %v10421_v45 = vmul.f32 0.5, %v13138_v60  ;;  %v13139_v42 = vld [vmem:[#allocation2_spill] sm:$0xff]  ;;  %v13142_v49 = vld [vmem:[#allocation3_spill] sm:$0xff]  ;;  %v10434_v18 = vmul.f32 0.5, %v13143_v29  ;;  %v13144_v12 = vld [vmem:[#allocation5_spill] sm:$0xff] }
 0x814   : > { %v10424_v35 = vmul.f32 0.5, %v13139_v42  ;;  %v10431_v19 = vmul.f32 0.5, %v13142_v49  ;;  %v10438_v60 = vmul.f32 0.5, %v13144_v12  ;;  %v10441_v42 = vmul.f32 0.5, %v10047_v21  ;;  %v13146_v29 = vld [vmem:[#allocation4_spill] sm:$0xff]  ;;  %v5929_v39 = vld [vmem:[%s11944_s9 + $0x68] sm:$0xff]  }
 0x815   : > { %v10449_v49 = vmul.f32 0.5, %v10051_v47  ;;  %v10452_v57 = vmul.f32 0.5, %v13146_v29  ;;  %v13150_v47 = vld [vmem:[#allocation68_spill] sm:$0xff]  ;;  %v10472_v29 = vmul.f32 0.5, %v10063_v14  ;;  %v10475_v15 = vmul.f32 0.5, %v13153_v40  ;;  %13155 = vst [vmem:[#allocation191_spill] sm:$0xff] %v10478_v23  ;;  %4610 = vmatpush1.bf16.msra.mxu0 %v5929_v39  ;;  %v6065_v40 = vpop.eup %6064 }
 0x816   : > { %13140 = vst [vmem:[#allocation185_spill] sm:$0xff] %v10424_v35  ;;  %v13145_v35 = vld [vmem:[#allocation7_spill] sm:$0xff]  ;;  %v10468_v21 = vmul.f32 0.5, %v13150_v47  ;;  %v13158_v30 = vld [vmem:[#allocation124_spill] sm:$0xff]  ;;  %4611 = vmatprep.subr.bf16.mxu0 %v13029_v52  ;;  %13162 = vst [vmem:[#allocation195_spill] sm:$0xff] %v10493_v48  ;;  %v10499_v39 = vmul.f32 0.5, %v10079_v38  ;;  %6096 = vtanh.f32 %v10145_v58 }
 0x817   : > { %v10444_v27 = vmul.f32 0.5, %v13145_v35  ;;  %v13148_v35 = vld [vmem:[#allocation44_spill] sm:$0xff]  ;;  %13152 = vst [vmem:[#allocation189_spill] sm:$0xff] %v10472_v29  ;;  %13154 = vst [vmem:[#allocation190_spill] sm:$0xff] %v10475_v15  ;;  %v10485_v47 = vmul.f32 0.5, %v13158_v30  ;;  %v13163_v14 = vld [vmem:[#allocation51_spill] sm:$0xff] }
 0x818   : > { %v10462_v12 = vmul.f32 0.5, %v13148_v35  ;;  %13151 = vst [vmem:[#allocation188_spill] sm:$0xff] %v10468_v21  ;;  %v13156_v35 = vld [vmem:[#allocation70_spill] sm:$0xff]  ;;  %v13160_v21 = vld [vmem:[#allocation49_spill] sm:$0xff]  ;;  %v10496_v1 = vmul.f32 0.5, %v13163_v14  ;;  %13165 = vst [vmem:[#allocation197_spill] sm:$0xff] %v10499_v39 }
 0x819   : > { %v10482_v28 = vmul.f32 0.5, %v13156_v35  ;;  %13159 = vst [vmem:[#allocation193_spill] sm:$0xff] %v10485_v47  ;;  %v10488_v11 = vmul.f32 0.5, %v13160_v21  ;;  %v5930_v21 = vld [vmem:[%s11944_s9 + $0x70] sm:$0xff]   ;;  %v6067_v35 = vpop.eup %6066  ;;  %v13166_v13 = vld [vmem:[#allocation53_spill] sm:$0xff]  ;;  %v4006_v14 = vadd.f32 1.0, %v6065_v40  ;;  %6098 = vtanh.f32 %v10149_v16 }
 0x81a   : > { %13164 = vst [vmem:[#allocation196_spill] sm:$0xff] %v10496_v1  ;;  %v10506_v30 = vmul.f32 0.5, %v13166_v13  ;;  %v6069_v36 = vpop.eup %6068  ;;  %v13170_v1 = vld [vmem:[#allocation6_spill] sm:$0xff]  ;;  %13172 = vst [vmem:[#allocation201_spill] sm:$0xff] %v10516_v10  ;;  %4612 = vmatpush1.bf16.msra.mxu0 %v5930_v21  ;;  %v4007_v39 = vadd.f32 1.0, %v6067_v35  ;;  %v13173_v13 = vld [vmem:[#allocation119_spill] sm:$0xff]  ;;  %6100 = vtanh.f32 %v10152_v32 }
 0x81b   : > { %13157 = vst [vmem:[#allocation192_spill] sm:$0xff] %v10482_v28  ;;  %13161 = vst [vmem:[#allocation194_spill] sm:$0xff] %v10488_v11  ;;  %v13168_v11 = vld [vmem:[#allocation127_spill] sm:$0xff]  ;;  %v10513_v38 = vmul.f32 0.5, %v13170_v1  ;;  %v6071_v48 = vpop.eup %6070  ;;  %v4134_v4 = vmul.f32 0.5, %v4006_v14  ;;  %4613 = vmatprep.subr.bf16.mxu0 %v13029_v52  ;;  %v10525_v1 = vmul.f32 0.5, %v10091_v26  ;;  %6102 = vtanh.f32 %v10155_v41 }
 0x81c   : > { %13167 = vst [vmem:[#allocation198_spill] sm:$0xff] %v10506_v30  ;;  %v10509_v47 = vmul.f32 0.5, %v13168_v11  ;;  %v10520_v30 = vmul.f32 0.5, %v13173_v13  ;;  %v4008_v11 = vadd.f32 1.0, %v6069_v36  ;;  %v6073_v40 = vpop.eup %6072  ;;  %v5931_v55 = vld [vmem:[%s11944_s9 + $0x78] sm:$0xff]   ;;  %v4009_v21 = vadd.f32 1.0, %v6071_v48 }
 0x81d   : > { %13171 = vst [vmem:[#allocation200_spill] sm:$0xff] %v10513_v38  ;;  %13175 = vst [vmem:[#allocation203_spill] sm:$0xff] %v10525_v1  ;;  %v4135_v35 = vmul.f32 0.5, %v4007_v39  ;;  %v6075_v13 = vpop.eup %6074  ;;  %v13176_v36 = vld [vmem:[#allocation67_spill] sm:$0xff]  ;;  %v4010_v63 = vadd.f32 1.0, %v6073_v40  ;;  %v13177_v1 = vld [vmem:[#allocation120_spill] sm:$0xff] }
 0x81e   : > { %13169 = vst [vmem:[#allocation199_spill] sm:$0xff] %v10509_v47  ;;  %13174 = vst [vmem:[#allocation202_spill] sm:$0xff] %v10520_v30  ;;  %v4136_v31 = vmul.f32 0.5, %v4008_v11  ;;  %v4262_v14 = vmul.f32 %v4134_v4, %v13176_v36  ;;  %v6077_v52 = vpop.eup %6076  ;;  %4614 = vmatpush1.bf16.msra.mxu0 %v5931_v55  ;;  %v4137_v26 = vmul.f32 0.5, %v4009_v21  ;;  %v4011_v30 = vadd.f32 1.0, %v6075_v13  ;;  %v13178_v48 = vld [vmem:[#allocation43_spill] sm:$0xff] }
 0x81f   : > { %v4263_v20 = vmul.f32 %v4135_v35, %v13177_v1  ;;  %v6079_v10 = vpop.eup %6078  ;;  %v4012_v38 = vadd.f32 1.0, %v6077_v52  ;;  %v4138_v47 = vmul.f32 0.5, %v4010_v63  ;;  %v13179_v11 = vld [vmem:[#allocation55_spill] sm:$0xff]  ;;  %v13180_v13 = vld [vmem:[#allocation45_spill] sm:$0xff]  ;;  %v13181_v16 = vld [vmem:[#allocation130_spill] sm:$0xff] }
 0x820   : > { %v4264_v39 = vmul.f32 %v4136_v31, %v13178_v48  ;;  %v6081_v33 = vpop.eup %6080  ;;  %v4265_v4 = vmul.f32 %v4137_v26, %v13179_v11  ;;  %v4013_v40 = vadd.f32 1.0, %v6079_v10  ;;  %v4139_v36 = vmul.f32 0.5, %v4011_v30  ;;  %v13182_v63 = vld [vmem:[#allocation57_spill] sm:$0xff]  ;;  %v13183_v32 = vld [vmem:[#allocation46_spill] sm:$0xff]  ;;  %v13255_v23 = vld [vmem:[#allocation83_spill] sm:$0xff] }
 0x821   : > { %v6083_v58 = vpop.eup %6082  ;;  %v4140_v1 = vmul.f32 0.5, %v4012_v38  ;;  %v4266_v21 = vmul.f32 %v4138_v47, %v13180_v13  ;;  %6104 = vtanh.f32 %v13181_v16  ;;  %v4014_v10 = vadd.f32 1.0, %v6081_v33  ;;  %v13184_v38 = vld [vmem:[#allocation59_spill] sm:$0xff]  ;;  %v13257_v15 = vld [vmem:[#allocation96_spill] sm:$0xff] }
 0x822   : > { %v4390_v55 = vpack.c.bf16 %v4264_v39, %v4262_v14  ;;  %v6085_v35 = vpop.eup %6084  ;;  %v4391_v31 = vpack.c.bf16 %v4265_v4, %v4263_v20  ;;  %v4141_v52 = vmul.f32 0.5, %v4013_v40  ;;  %v4267_v48 = vmul.f32 %v4139_v36, %v13182_v63 }
 0x823   : > { %v6087_v28 = vpop.eup %6086  ;;  %6106 = vtanh.f32 %v10164_v2  ;;  %v4268_v26 = vmul.f32 %v4140_v1, %v13183_v32  ;;  %v4015_v30 = vadd.f32 1.0, %v6083_v58  ;;  %v4016_v14 = vadd.f32 1.0, %v6085_v35 }
 0x824   : > { %v6089_v11 = vpop.eup %6088  ;;  %6108 = vtanh.f32 %v10167_v53  ;;  %4615 = vmatprep.mubr.bf16.mxu0 %v4391_v31  ;;  %v4269_v47 = vmul.f32 %v4141_v52, %v13184_v38  ;;  %v4017_v41 = vadd.f32 1.0, %v6087_v28  ;;  %v4142_v40 = vmul.f32 0.5, %v4014_v10  ;;  %v13185_v53 = vld [vmem:[#allocation61_spill] sm:$0xff]  ;;  %v13186_v28 = vld [vmem:[#allocation47_spill] sm:$0xff]  ;;  %v13188_v31 = vld [vmem:[#allocation48_spill] sm:$0xff] }
 0x825   : > { %v6091_v39 = vpop.eup %6090  ;;  %6110 = vtanh.f32 %v10170_v34  ;;  %4616 = vmatmul.mubr.bf16.vlgmr.msra.gmra.mrb[24].mxu0 %v4390_v55  ;;  %v4392_v20 = vpack.c.bf16 %v4268_v26, %v4266_v21  ;;  %v4143_v4 = vmul.f32 0.5, %v4015_v30  ;;  %v4144_v58 = vmul.f32 0.5, %v4016_v14  ;;  %v13187_v55 = vld [vmem:[#allocation13_spill] sm:$0xff] }
 0x826   : > { %v6093_v2 = vpop.eup %6092  ;;  %6112 = vtanh.f32 %v10173_v43  ;;  %v4393_v36 = vpack.c.bf16 %v4269_v47, %v4267_v48  ;;  %v4145_v33 = vmul.f32 0.5, %v4017_v41  ;;  %v10552_v35 = vmul.f32 %v4142_v40, %v13186_v28  ;;  %v13189_v47 = vld [vmem:[#allocation12_spill] sm:$0xff] }
 0x827   : > { %v6095_v1 = vpop.eup %6094  ;;  %6114 = vtanh.f32 %v10176_v8  ;;  %v4271_v13 = vmul.f32 %v4143_v4, %v13185_v53  ;;  %v4019_v16 = vadd.f32 1.0, %v6091_v39  ;;  %v10557_v43 = vmul.f32 %v4144_v58, %v13188_v31  ;;  %v13192_v58 = vld [vmem:[#allocation52_spill] sm:$0xff] }
 0x828   : > { %v6097_v34 = vpop.eup %6096  ;;  %6116 = vtanh.f32 %v10179_v0  ;;  %4623 = vmatprep.mubr.bf16.mxu0 %v4393_v36  ;;  %v4273_v21 = vmul.f32 %v4145_v33, %v13187_v55  ;;  %v4021_v52 = vadd.f32 1.0, %v6095_v1  ;;  %v4018_v48 = vadd.f32 1.0, %v6089_v11  ;;  %v13191_v36 = vld [vmem:[#allocation50_spill] sm:$0xff]  ;;  %v13194_v31 = vld [vmem:[#allocation72_spill] sm:$0xff] }
 0x829   : > { %v6099_v63 = vpop.eup %6098  ;;  %6118 = vtanh.f32 %v10182_v25  ;;  %v4147_v8 = vmul.f32 0.5, %v4019_v16  ;;  %v4020_v32 = vadd.f32 1.0, %v6093_v2  ;;  %v4394_v0 = vpack.c.bf16 %v10557_v43, %v10552_v35  ;;  %v13190_v25 = vld [vmem:[#allocation17_spill] sm:$0xff] }
 0x82a   : > { %v6101_v26 = vpop.eup %6100  ;;  %6120 = vtanh.f32 %v10185_v54  ;;  %v4395_v30 = vpack.c.bf16 %v4273_v21, %v4271_v13  ;;  %v4149_v10 = vmul.f32 0.5, %v4021_v52  ;;  %v4146_v14 = vmul.f32 0.5, %v4018_v48  ;;  %v13193_v21 = vld [vmem:[#allocation8_spill] sm:$0xff] }
 0x82b   : > { %v6103_v38 = vpop.eup %6102  ;;  %6122 = vtanh.f32 %v10188_v44  ;;  %v4275_v41 = vmul.f32 %v4147_v8, %v13189_v47  ;;  %v4148_v39 = vmul.f32 0.5, %v4020_v32  ;;  %v4023_v40 = vadd.f32 1.0, %v6099_v63 }
 0x82c   : > { %v6105_v4 = vpop.eup %6104  ;;  %6124 = vtanh.f32 %v10191_v50  ;;  %v4277_v11 = vmul.f32 %v4149_v10, %v13190_v25  ;;  %v4025_v2 = vadd.f32 1.0, %v6103_v38  ;;  %v10569_v33 = vmul.f32 %v4146_v14, %v13191_v36  ;;  %v13196_v38 = vld [vmem:[#allocation9_spill] sm:$0xff] }
 0x82d   : > { %v6107_v54 = vpop.eup %6106  ;;  %6126 = vtanh.f32 %v10194_v46  ;;  %4624 = vmatmul.mubr.bf16.gmra.mrb[28].mxu0 %v4392_v20  ;;  %v10572_v44 = vmul.f32 %v4148_v39, %v13192_v58  ;;  %v4022_v1 = vadd.f32 1.0, %v6097_v34  ;;  %v4151_v13 = vmul.f32 0.5, %v4023_v40  ;;  %v13197_v39 = vld [vmem:[#allocation74_spill] sm:$0xff] }
 0x82e   : > { %v6109_v53 = vpop.eup %6108  ;;  %6128 = vtanh.f32 %v10197_v5  ;;  %4631 = vmatprep.mubr.bf16.mxu0 %v4395_v30  ;;  %v4397_v50 = vpack.c.bf16 %v4277_v11, %v4275_v41  ;;  %v4153_v28 = vmul.f32 0.5, %v4025_v2  ;;  %v4024_v20 = vadd.f32 1.0, %v6101_v26  ;;  %v13198_v2 = vld [vmem:[#allocation131_spill] sm:$0xff] }
 0x82f   : > { %v6111_v35 = vpop.eup %6110  ;;  %6130 = vtanh.f32 %v10201_v22  ;;  %v4396_v46 = vpack.c.bf16 %v10572_v44, %v10569_v33  ;;  %v4150_v16 = vmul.f32 0.5, %v4022_v1  ;;  %v10580_v34 = vmul.f32 %v4151_v13, %v13193_v21  ;;  %v13195_v22 = vld [vmem:[#allocation54_spill] sm:$0xff]  ;;  %v13200_v1 = vld [vmem:[#allocation132_spill] sm:$0xff]  ;;  %v13218_v44 = vld [vmem:[#allocation15_spill] sm:$0xff] }
 0x830   : > { %v6113_v55 = vpop.eup %6112  ;;  %6132 = vtanh.f32 %v10204_v62  ;;  %v10583_v5 = vmul.f32 %v4153_v28, %v13194_v31  ;;  %v4027_v43 = vadd.f32 1.0, %v6107_v54  ;;  %v4152_v63 = vmul.f32 0.5, %v4024_v20  ;;  %v13202_v20 = vld [vmem:[#allocation133_spill] sm:$0xff] }
 0x831   : > { %v6115_v52 = vpop.eup %6114  ;;  %6134 = vtanh.f32 %v10207_v7  ;;  %v10587_v8 = vmul.f32 %v4150_v16, %v13195_v22  ;;  %v4029_v48 = vadd.f32 1.0, %v6111_v35  ;;  %v4026_v30 = vadd.f32 1.0, %v6105_v4  ;;  %v13199_v4 = vld [vmem:[#allocation76_spill] sm:$0xff]  ;;  %v13203_v16 = vld [vmem:[#allocation58_spill] sm:$0xff] }
 0x832   : > { %v6117_v32 = vpop.eup %6116  ;;  %6136 = vtanh.f32 %v10210_v51  ;;  %v4399_v62 = vpack.c.bf16 %v10583_v5, %v10580_v34  ;;  %v4155_v26 = vmul.f32 0.5, %v4027_v43  ;;  %v10594_v47 = vmul.f32 %v4152_v63, %v13196_v38  ;;  %v13204_v5 = vld [vmem:[#allocation134_spill] sm:$0xff] }
 0x833   : > { %v6119_v10 = vpop.eup %6118  ;;  %6138 = vtanh.f32 %v10216_v9  ;;  %v4157_v7 = vmul.f32 0.5, %v4029_v48  ;;  %v4028_v41 = vadd.f32 1.0, %v6109_v53  ;;  %v4154_v51 = vmul.f32 0.5, %v4026_v30  ;;  %v13206_v48 = vld [vmem:[#allocation135_spill] sm:$0xff] }
 0x834   : > { %v6121_v14 = vpop.eup %6120  ;;  %6140 = vtanh.f32 %v10219_v3  ;;  %v10598_v25 = vmul.f32 %v4155_v26, %v13197_v39  ;;  %v4031_v11 = vadd.f32 1.0, %v6115_v52  ;;  %v4398_v9 = vpack.c.bf16 %v10594_v47, %v10587_v8  ;;  %v13201_v3 = vld [vmem:[#allocation56_spill] sm:$0xff] }
 0x835   : > { %v6123_v40 = vpop.eup %6122  ;;  %6142 = vtanh.f32 %v13198_v2  ;;  %4632 = vmatmul.mubr.bf16.gmra.mrb[32].mxu0 %v4394_v0  ;;  %v10604_v54 = vmul.f32 %v4157_v7, %v13199_v4  ;;  %v4156_v36 = vmul.f32 0.5, %v4028_v41  ;;  %v10608_v53 = vmul.f32 %v4154_v51, %v13201_v3  ;;  %v13207_v7 = vld [vmem:[#allocation136_spill] sm:$0xff]  ;;  %v13209_v2 = vld [vmem:[#allocation137_spill] sm:$0xff] }
 0x836   : > { %v6125_v58 = vpop.eup %6124  ;;  %6144 = vtanh.f32 %v13200_v1  ;;  %4639 = vmatprep.mubr.bf16.mxu0 %v4397_v50  ;;  %v4033_v13 = vadd.f32 1.0, %v6119_v10  ;;  %v4159_v28 = vmul.f32 0.5, %v4031_v11  ;;  %v4030_v34 = vadd.f32 1.0, %v6113_v55  ;;  %v13205_v50 = vld [vmem:[#allocation78_spill] sm:$0xff]  ;;  %v13208_v55 = vld [vmem:[#allocation80_spill] sm:$0xff] }
 0x837   : > { %v6127_v35 = vpop.eup %6126  ;;  %6146 = vtanh.f32 %v13202_v20  ;;  %v4401_v0 = vpack.c.bf16 %v10604_v54, %v10598_v25  ;;  %v10614_v21 = vmul.f32 %v4156_v36, %v13203_v16  ;;  %v4032_v63 = vadd.f32 1.0, %v6117_v32  ;;  %v13210_v32 = vld [vmem:[#allocation60_spill] sm:$0xff] }
 0x838   : > { %v6129_v31 = vpop.eup %6128  ;;  %6148 = vtanh.f32 %v13204_v5  ;;  %v4161_v43 = vmul.f32 0.5, %v4033_v13  ;;  %v10618_v52 = vmul.f32 %v4159_v28, %v13205_v50  ;;  %v4158_v30 = vmul.f32 0.5, %v4030_v34  ;;  %v13211_v13 = vld [vmem:[#allocation138_spill] sm:$0xff] }
 0x839   : > { %v6131_v22 = vpop.eup %6130  ;;  %6150 = vtanh.f32 %v13206_v48  ;;  %v4400_v26 = vpack.c.bf16 %v10614_v21, %v10608_v53  ;;  %v4035_v10 = vadd.f32 1.0, %v6123_v40  ;;  %v4160_v39 = vmul.f32 0.5, %v4032_v63  ;;  %v13212_v28 = vld [vmem:[#allocation10_spill] sm:$0xff]  ;;  %v13215_v48 = vld [vmem:[#allocation140_spill] sm:$0xff]  ;;  %v13246_v53 = vld [vmem:[#allocation157_spill] sm:$0xff] }
 0x83a   : > { %v6133_v38 = vpop.eup %6132  ;;  %6152 = vtanh.f32 %v13207_v7  ;;  %v10625_v41 = vmul.f32 %v4161_v43, %v13208_v55  ;;  %v4037_v51 = vadd.f32 1.0, %v6127_v35  ;;  %v10629_v4 = vmul.f32 %v4158_v30, %v13210_v32  ;;  %v13213_v35 = vld [vmem:[#allocation139_spill] sm:$0xff]  ;;  %v13214_v5 = vld [vmem:[#allocation82_spill] sm:$0xff] }
 0x83b   : > { %v6135_v11 = vpop.eup %6134  ;;  %6154 = vtanh.f32 %v13209_v2  ;;  %v4163_v36 = vmul.f32 0.5, %v4035_v10  ;;  %v4034_v1 = vadd.f32 1.0, %v6121_v14  ;;  %v10635_v20 = vmul.f32 %v4160_v39, %v13212_v28  ;;  %v13216_v10 = vld [vmem:[#allocation84_spill] sm:$0xff]  ;;  %v13219_v32 = vld [vmem:[#allocation142_spill] sm:$0xff]  ;;  %v13220_v28 = vld [vmem:[#allocation143_spill] sm:$0xff] }
 0x83c   : > { %v6137_v3 = vpop.eup %6136  ;;  %6156 = vtanh.f32 %v13211_v13  ;;  %v4403_v40 = vpack.c.bf16 %v10625_v41, %v10618_v52  ;;  %v4165_v16 = vmul.f32 0.5, %v4037_v51  ;;  %v4036_v14 = vadd.f32 1.0, %v6125_v58  ;;  %v13217_v51 = vld [vmem:[#allocation141_spill] sm:$0xff]  ;;  %v13242_v30 = vld [vmem:[#allocation122_spill] sm:$0xff]  ;;  %v13247_v21 = vld [vmem:[#allocation79_spill] sm:$0xff] }
 0x83d   : > { %v6139_v34 = vpop.eup %6138  ;;  %6158 = vtanh.f32 %v13213_v35  ;;  %4640 = vmatmul.mubr.bf16.gmra.mrb[36].mxu0 %v4396_v46  ;;  %v10642_v43 = vmul.f32 %v4163_v36, %v13214_v5  ;;  %v4162_v50 = vmul.f32 0.5, %v4034_v1  ;;  %v4039_v55 = vadd.f32 1.0, %v6131_v22  ;;  %v13221_v22 = vld [vmem:[#allocation14_spill] sm:$0xff] }
 0x83e   : > { %v6141_v63 = vpop.eup %6140  ;;  %6160 = vtanh.f32 %v13215_v48  ;;  %4647 = vmatprep.mubr.bf16.mxu0 %v4399_v62  ;;  %v10648_v7 = vmul.f32 %v4165_v16, %v13216_v10  ;;  %v4164_v33 = vmul.f32 0.5, %v4036_v14  ;;  %v4041_v58 = vadd.f32 1.0, %v6135_v11  ;;  %v13223_v11 = vld [vmem:[#allocation86_spill] sm:$0xff] }
 0x83f   : > { %v6143_v39 = vpop.eup %6142  ;;  %6162 = vtanh.f32 %v13217_v51  ;;  %v10652_v46 = vmul.f32 %v4162_v50, %v13218_v44  ;;  %v4167_v36 = vmul.f32 0.5, %v4039_v55  ;;  %v4038_v1 = vadd.f32 1.0, %v6129_v31  ;;  %v13222_v50 = vld [vmem:[#allocation144_spill] sm:$0xff] }
 0x840   : > { %v6145_v2 = vpop.eup %6144  ;;  %6164 = vtanh.f32 %v13219_v32  ;;  %v10659_v16 = vmul.f32 %v4164_v33, %v13221_v22  ;;  %v4169_v35 = vmul.f32 0.5, %v4041_v58  ;;  %v4040_v5 = vadd.f32 1.0, %v6133_v38  ;;  %v13224_v32 = vld [vmem:[#allocation145_spill] sm:$0xff]  ;;  %v13225_v55 = vld [vmem:[#allocation88_spill] sm:$0xff]  ;;  %v13226_v38 = vld [vmem:[#allocation146_spill] sm:$0xff] }
 0x841   : > { %v6147_v13 = vpop.eup %6146  ;;  %6166 = vtanh.f32 %v13220_v28  ;;  %v10663_v48 = vmul.f32 %v4167_v36, %v13223_v11  ;;  %v4166_v10 = vmul.f32 0.5, %v4038_v1  ;;  %v4043_v51 = vadd.f32 1.0, %v6139_v34  ;;  %v13227_v22 = vld [vmem:[#allocation11_spill] sm:$0xff]  ;;  %v13230_v31 = vld [vmem:[#allocation148_spill] sm:$0xff] }
 0x842   : > { %v6149_v14 = vpop.eup %6148  ;;  %6168 = vtanh.f32 %v13222_v50  ;;  %v10669_v28 = vmul.f32 %v4169_v35, %v13225_v55  ;;  %v4168_v33 = vmul.f32 0.5, %v4040_v5  ;;  %v4045_v36 = vadd.f32 1.0, %v6143_v39  ;;  %v13228_v34 = vld [vmem:[#allocation147_spill] sm:$0xff] }
 0x843   : > { %v6151_v44 = vpop.eup %6150  ;;  %6170 = vtanh.f32 %v13224_v32  ;;  %v10673_v50 = vmul.f32 %v4166_v10, %v13227_v22  ;;  %v4171_v11 = vmul.f32 0.5, %v4043_v51  ;;  %v13229_v32 = vld [vmem:[#allocation71_spill] sm:$0xff]  ;;  %v4042_v55 = vadd.f32 1.0, %v6137_v3  ;;  %v13231_v10 = vld [vmem:[#allocation90_spill] sm:$0xff] }
 0x844   : > { %v6153_v58 = vpop.eup %6152  ;;  %6172 = vtanh.f32 %v13226_v38  ;;  %v10682_v5 = vmul.f32 %v4168_v33, %v13229_v32  ;;  %v4173_v39 = vmul.f32 0.5, %v4045_v36  ;;  %v4044_v8 = vadd.f32 1.0, %v6141_v63  ;;  %v13233_v32 = vld [vmem:[#allocation150_spill] sm:$0xff]  ;;  %v13235_v36 = vld [vmem:[#allocation151_spill] sm:$0xff]  ;;  %v13236_v63 = vld [vmem:[#allocation73_spill] sm:$0xff] }
 0x845   : > { %v6155_v1 = vpop.eup %6154  ;;  %6174 = vtanh.f32 %v13228_v34  ;;  %4648 = vmatmul.mubr.bf16.gmra.mrb[40].mxu0 %v4398_v9  ;;  %v10689_v51 = vmul.f32 %v4171_v11, %v13231_v10  ;;  %v13232_v9 = vld [vmem:[#allocation149_spill] sm:$0xff]  ;;  %v4170_v22 = vmul.f32 0.5, %v4042_v55  ;;  %v4047_v3 = vadd.f32 1.0, %v6147_v13  ;;  %v13237_v33 = vld [vmem:[#allocation152_spill] sm:$0xff]  ;;  %v13238_v55 = vld [vmem:[#allocation75_spill] sm:$0xff] }
 0x846   : > { %v6157_v38 = vpop.eup %6156  ;;  %6176 = vtanh.f32 %v13230_v31  ;;  %4655 = vmatprep.mubr.bf16.mxu0 %v4401_v0  ;;  %v13234_v31 = vld [vmem:[#allocation92_spill] sm:$0xff]  ;;  %v4172_v25 = vmul.f32 0.5, %v4044_v8  ;;  %v4049_v54 = vadd.f32 1.0, %v6151_v44  ;;  %v13239_v44 = vld [vmem:[#allocation153_spill] sm:$0xff] }
 0x847   : > { %v6159_v47 = vpop.eup %6158  ;;  %6178 = vtanh.f32 %v13232_v9  ;;  %v10696_v35 = vmul.f32 %v4173_v39, %v13234_v31  ;;  %v10700_v11 = vmul.f32 %v4170_v22, %v13236_v63  ;;  %v4175_v10 = vmul.f32 0.5, %v4047_v3  ;;  %v13240_v31 = vld [vmem:[#allocation121_spill] sm:$0xff] }
 0x848   : > { %v6161_v34 = vpop.eup %6160  ;;  %6180 = vtanh.f32 %v13233_v32  ;;  %v4046_v9 = vadd.f32 1.0, %v6145_v2  ;;  %v10706_v32 = vmul.f32 %v4172_v25, %v13238_v55  ;;  %v4177_v39 = vmul.f32 0.5, %v4049_v54  ;;  %v13241_v2 = vld [vmem:[#allocation154_spill] sm:$0xff]  ;;  %v13243_v54 = vld [vmem:[#allocation155_spill] sm:$0xff] }
 0x849   : > { %v6163_v0 = vpop.eup %6162  ;;  %6182 = vtanh.f32 %v13235_v36  ;;  %v10710_v36 = vmul.f32 %v4175_v10, %v13240_v31  ;;  %v4048_v22 = vadd.f32 1.0, %v6149_v14  ;;  %v4051_v25 = vadd.f32 1.0, %v6155_v1  ;;  %v13244_v14 = vld [vmem:[#allocation77_spill] sm:$0xff] }
 0x84a   : > { %v6165_v62 = vpop.eup %6164  ;;  %6184 = vtanh.f32 %v13237_v33  ;;  %v4174_v63 = vmul.f32 0.5, %v4046_v9  ;;  %v10716_v13 = vmul.f32 %v4177_v39, %v13242_v30  ;;  %v4050_v39 = vadd.f32 1.0, %v6153_v58  ;;  %v13253_v33 = vld [vmem:[#allocation81_spill] sm:$0xff] }
 0x84b   : > { %v6167_v8 = vpop.eup %6166  ;;  %6186 = vtanh.f32 %v13239_v44  ;;  %v4176_v10 = vmul.f32 0.5, %v4048_v22  ;;  %v4053_v44 = vadd.f32 1.0, %v6159_v47  ;;  %v4179_v1 = vmul.f32 0.5, %v4051_v25  ;;  %v13250_v25 = vld [vmem:[#allocation159_spill] sm:$0xff] }
 0x84c   : > { %v6169_v3 = vpop.eup %6168  ;;  %6188 = vtanh.f32 %v13241_v2  ;;  %v10723_v9 = vmul.f32 %v4174_v63, %v13244_v14  ;;  %v13245_v2 = vld [vmem:[#allocation156_spill] sm:$0xff]  ;;  %v4052_v47 = vadd.f32 1.0, %v6157_v38  ;;  %v13248_v14 = vld [vmem:[#allocation158_spill] sm:$0xff]  ;;  %v4178_v41 = vmul.f32 0.5, %v4050_v39 }
 0x84d   : > { %v6171_v55 = vpop.eup %6170  ;;  %6190 = vtanh.f32 %v13243_v54  ;;  %4656 = vmatmul.mubr.bf16.gmra.mrb[44].mxu0 %v4400_v26  ;;  %v10733_v26 = vmul.f32 %v4176_v10, %v13247_v21  ;;  %v4181_v22 = vmul.f32 0.5, %v4053_v44  ;;  %v13252_v21 = vld [vmem:[#allocation160_spill] sm:$0xff] }
 0x84e   : > { %v6173_v31 = vpop.eup %6172  ;;  %6192 = vtanh.f32 %v13245_v2  ;;  %4663 = vmatprep.mubr.bf16.mxu0 %v4403_v40  ;;  %v13249_v2 = vld [vmem:[#allocation94_spill] sm:$0xff]  ;;  %v4055_v40 = vadd.f32 1.0, %v6163_v0  ;;  %v4180_v44 = vmul.f32 0.5, %v4052_v47  ;;  %v13254_v0 = vld [vmem:[#allocation161_spill] sm:$0xff] }
 0x84f   : > { %v6175_v54 = vpop.eup %6174  ;;  %6194 = vtanh.f32 %v13246_v53  ;;  %v10739_v52 = vmul.f32 %v4179_v1, %v13249_v2  ;;  %v13251_v53 = vld [vmem:[#allocation123_spill] sm:$0xff]  ;;  %v4057_v1 = vadd.f32 1.0, %v6167_v8  ;;  %v13256_v47 = vld [vmem:[#allocation162_spill] sm:$0xff]  ;;  %v4056_v8 = vadd.f32 1.0, %v6165_v62 }
 0x850   : > { %v10735_v63 = vpop.eup %6176  ;;  %6196 = vtanh.f32 %v13248_v14  ;;  %v10745_v10 = vmul.f32 %v4181_v22, %v13251_v53  ;;  %v10749_v14 = vmul.f32 %v4178_v41, %v13253_v33  ;;  %v4183_v2 = vmul.f32 0.5, %v4055_v40  ;;  %v13259_v40 = vld [vmem:[#allocation163_spill] sm:$0xff]  ;;  %v13263_v62 = vld [vmem:[#allocation98_spill] sm:$0xff] }
 0x851   : > { %v6179_v30 = vpop.eup %6178  ;;  %6198 = vtanh.f32 %v13250_v25  ;;  %v10755_v58 = vmul.f32 %v4180_v44, %v13255_v23  ;;  %v4054_v22 = vadd.f32 1.0, %v6161_v34  ;;  %v4059_v44 = vadd.f32 1.0, %v6171_v55 }
 0x852   : > { %v6181_v38 = vpop.eup %6180  ;;  %6200 = vtanh.f32 %v13252_v21  ;;  %v4185_v21 = vmul.f32 0.5, %v4057_v1  ;;  %v10761_v33 = vmul.f32 %v4183_v2, %v13257_v15  ;;  %v13262_v15 = vpack.c.bf16 %v10648_v7, %v10642_v43  ;;  %v13269_v7 = vld [vmem:[#allocation87_spill] sm:$0xff]  ;;  %v13274_v43 = vld [vmem:[#allocation102_spill] sm:$0xff] }
 0x853   : > { %v6183_v39 = vpop.eup %6182  ;;  %6202 = vtanh.f32 %v13254_v0  ;;  %v13260_v0 = vpack.c.bf16 %v10635_v20, %v10629_v4  ;;  %v4182_v34 = vmul.f32 0.5, %v4054_v22  ;;  %v4184_v2 = vmul.f32 0.5, %v4056_v8  ;;  %v13265_v20 = vld [vmem:[#allocation165_spill] sm:$0xff] }
 0x854   : > { %v10757_v53 = vpop.eup %6184  ;;  %6204 = vtanh.f32 %v13256_v47  ;;  %13258 = vst [vmem:[#allocation67_spill] sm:$0xff] %v10761_v33  ;;  %v13261_v47 = vld [vmem:[#allocation164_spill] sm:$0xff]  ;;  %v10776_v1 = vmul.f32 %v4185_v21, %v13263_v62  ;;  %v4187_v55 = vmul.f32 0.5, %v4059_v44  ;;  %v4058_v22 = vadd.f32 1.0, %v6169_v3 }
 0x855   : > { %v6187_v41 = vpop.eup %6186  ;;  %6206 = vtanh.f32 %v13259_v40  ;;  %4664 = vmatmul.mubr.bf16.gmra.mrb[48].mxu0 %v13260_v0  ;;  %v4061_v40 = vadd.f32 1.0, %v6175_v54  ;;  %v13266_v0 = vld [vmem:[#allocation85_spill] sm:$0xff]  ;;  %v10788_v21 = vmul.f32 %v4184_v2, %v13269_v7  ;;  %v13271_v62 = vld [vmem:[#allocation100_spill] sm:$0xff]  ;;  %v4063_v2 = vadd.f32 1.0, %v6179_v30  ;;  %v13278_v30 = vld [vmem:[#allocation171_spill] sm:$0xff] }
 0x856   : > { %v10769_v25 = vpop.eup %6188  ;;  %6208 = vtanh.f32 %v13261_v47  ;;  %4671 = vmatprep.mubr.bf16.mxu0 %v13262_v15  ;;  %13264 = vst [vmem:[#allocation120_spill] sm:$0xff] %v10776_v1  ;;  %v10780_v23 = vmul.f32 %v4182_v34, %v13266_v0  ;;  %v13268_v47 = vld [vmem:[#allocation166_spill] sm:$0xff]  ;;  %v13270_v15 = vld [vmem:[#allocation167_spill] sm:$0xff]  ;;  %v4060_v34 = vadd.f32 1.0, %v6173_v31  ;;  %v4186_v44 = vmul.f32 0.5, %v4058_v22  ;;  %v13273_v0 = vld [vmem:[#allocation168_spill] sm:$0xff] }
 0x857   : > { %v6191_v4 = vpop.eup %6190  ;;  %6210 = vtanh.f32 %v13265_v20  ;;  %v4189_v8 = vmul.f32 0.5, %v4061_v40  ;;  %v10792_v20 = vmul.f32 %v4187_v55, %v13271_v62  ;;  %v13275_v7 = vld [vmem:[#allocation169_spill] sm:$0xff]  ;;  %v4065_v31 = vadd.f32 1.0, %v6183_v39  ;;  %v13277_v62 = vld [vmem:[#allocation170_spill] sm:$0xff] }
 0x858   : > { %13267 = vst [vmem:[#allocation43_spill] sm:$0xff] %v10780_v23  ;;  %v10782_v29 = vpop.eup %6192  ;;  %6212 = vtanh.f32 %v13268_v47  ;;  %v13276_v1 = vld [vmem:[#allocation89_spill] sm:$0xff]  ;;  %v4191_v47 = vmul.f32 0.5, %v4063_v2  ;;  %v13281_v23 = vld [vmem:[#allocation172_spill] sm:$0xff] }
 0x859   : > { %v6195_v54 = vpop.eup %6194  ;;  %6214 = vtanh.f32 %v13270_v15  ;;  %13272 = vst [vmem:[#allocation55_spill] sm:$0xff] %v10792_v20  ;;  %v10800_v33 = vmul.f32 %v4189_v8, %v13274_v43  ;;  %v4188_v15 = vmul.f32 0.5, %v4060_v34  ;;  %v10804_v55 = vmul.f32 %v4186_v44, %v13276_v1  ;;  %v13280_v1 = vld [vmem:[#allocation91_spill] sm:$0xff]  ;;  %v13283_v2 = vld [vmem:[#allocation104_spill] sm:$0xff] }
 0x85a   : > { %v10794_v3 = vpop.eup %6196  ;;  %6216 = vtanh.f32 %v13273_v0  ;;  %v4062_v43 = vadd.f32 1.0, %v10735_v63  ;;  %v13279_v34 = vpack.c.bf16 %v10659_v16, %v10652_v46  ;;  %v4193_v44 = vmul.f32 0.5, %v4065_v31  ;;  %v13284_v16 = vld [vmem:[#allocation173_spill] sm:$0xff] }
 0x85b   : > { %v6199_v40 = vpop.eup %6198  ;;  %6218 = vtanh.f32 %v13275_v7  ;;  %v10819_v39 = vmul.f32 %v4188_v15, %v13280_v1  ;;  %v4064_v7 = vadd.f32 1.0, %v6181_v38  ;;  %v13282_v63 = vpack.c.bf16 %v10669_v28, %v10663_v48  ;;  %v13285_v38 = vld [vmem:[#allocation106_spill] sm:$0xff]  ;;  %v13287_v48 = vld [vmem:[#allocation93_spill] sm:$0xff] }
 0x85c   : > { %v10806_v22 = vpop.eup %6200  ;;  %6220 = vtanh.f32 %v13277_v62  ;;  %v10828_v0 = vmul.f32 %v4191_v47, %v13283_v2  ;;  %v4067_v20 = vadd.f32 1.0, %v6187_v41  ;;  %v10834_v31 = vmul.f32 %v4193_v44, %v13285_v38  ;;  %v13286_v1 = vld [vmem:[#allocation174_spill] sm:$0xff]  ;;  %v13291_v38 = vld [vmem:[#allocation176_spill] sm:$0xff] }
 0x85d   : > { %v10812_v8 = vpop.eup %6202  ;;  %6222 = vtanh.f32 %v13278_v30  ;;  %4672 = vmatmul.mubr.bf16.gmra.mrb[52].mxu0 %v13279_v34  ;;  %v4190_v30 = vmul.f32 0.5, %v4062_v43  ;;  %v4192_v34 = vmul.f32 0.5, %v4064_v7  ;;  %v4069_v47 = vadd.f32 1.0, %v6191_v4 }
 0x85e   : > { %v10821_v62 = vpop.eup %6204  ;;  %6224 = vtanh.f32 %v13281_v23  ;;  %4679 = vmatprep.mubr.bf16.mxu0 %v13282_v63  ;;  %v4195_v43 = vmul.f32 0.5, %v4067_v20  ;;  %v13289_v63 = vld [vmem:[#allocation175_spill] sm:$0xff]  ;;  %v4066_v44 = vadd.f32 1.0, %v10757_v53  ;;  %v4068_v4 = vadd.f32 1.0, %v10769_v25  ;;  %v13293_v53 = vld [vmem:[#allocation110_spill] sm:$0xff]  ;;  %v13294_v25 = vld [vmem:[#allocation177_spill] sm:$0xff] }
 0x85f   : > { %v6207_v46 = vpop.eup %6206  ;;  %6226 = vtanh.f32 %v13284_v16  ;;  %v10840_v28 = vmul.f32 %v4190_v30, %v13287_v48  ;;  %v13290_v16 = vld [vmem:[#allocation95_spill] sm:$0xff]  ;;  %v13292_v30 = vld [vmem:[#allocation108_spill] sm:$0xff] }
 0x860   : > { %v10836_v23 = vpop.eup %6208  ;;  %6228 = vtanh.f32 %v13286_v1  ;;  %v10846_v15 = vmul.f32 %v4192_v34, %v13290_v16  ;;  %v4197_v1 = vmul.f32 0.5, %v4069_v47  ;;  %v10853_v48 = vmul.f32 %v4195_v43, %v13292_v30 }
 0x861   : > { %13288 = vst [vmem:[#allocation45_spill] sm:$0xff] %v10840_v28  ;;  %v6211_v41 = vpop.eup %6210  ;;  %6230 = vtanh.f32 %v13289_v63  ;;  %v4194_v34 = vmul.f32 0.5, %v4066_v44  ;;  %v4071_v16 = vadd.f32 1.0, %v6195_v54  ;;  %v4196_v47 = vmul.f32 0.5, %v4068_v4  ;;  %v13296_v63 = vld [vmem:[#allocation97_spill] sm:$0xff] }
 0x862   : > { %v10849_v7 = vpop.eup %6212  ;;  %6232 = vtanh.f32 %v13291_v38  ;;  %v10863_v38 = vmul.f32 %v4197_v1, %v13293_v53  ;;  %v4073_v43 = vadd.f32 1.0, %v6199_v40  ;;  %v4070_v28 = vadd.f32 1.0, %v10782_v29  ;;  %v13297_v1 = vld [vmem:[#allocation178_spill] sm:$0xff]  ;;  %v13299_v53 = vld [vmem:[#allocation99_spill] sm:$0xff] }
 0x863   : > { %v6215_v20 = vpop.eup %6214  ;;  %6234 = vtanh.f32 %v10372_v61  ;;  %v13295_v61 = vpack.c.bf16 %v10682_v5, %v10673_v50  ;;  %v10872_v44 = vmul.f32 %v4194_v34, %v13296_v63  ;;  %v4199_v54 = vmul.f32 0.5, %v4071_v16  ;;  %v13300_v34 = vld [vmem:[#allocation19_spill] sm:$0xff] }
 0x864   : > { %v10859_v2 = vpop.eup %6216  ;;  %6236 = vtanh.f32 %v10375_v17  ;;  %v13298_v40 = vpack.c.bf16 %v10696_v35, %v10689_v51  ;;  %v10884_v50 = vmul.f32 %v4196_v47, %v13299_v53  ;;  %v4201_v5 = vmul.f32 0.5, %v4073_v43  ;;  %v13302_v51 = vld [vmem:[#allocation62_spill] sm:$0xff]  ;;  %v13307_v35 = vld [vmem:[#allocation181_spill] sm:$0xff] }
 0x865   : > { %v10865_v30 = vpop.eup %6218  ;;  %6238 = vtanh.f32 %v13294_v25  ;;  %4680 = vmatmul.mubr.bf16.gmra.mrb[56].mxu0 %v13295_v61  ;;  %v10888_v29 = vmul.f32 %v4199_v54, %v13300_v34  ;;  %v4072_v16 = vadd.f32 1.0, %v10794_v3  ;;  %v4198_v25 = vmul.f32 0.5, %v4070_v28 }
 0x866   : > { %v10875_v17 = vpop.eup %6220  ;;  %6240 = vtanh.f32 %v13297_v1  ;;  %4687 = vmatprep.mubr.bf16.mxu0 %v13298_v40  ;;  %v10897_v47 = vmul.f32 %v4201_v5, %v13302_v51  ;;  %v4075_v43 = vadd.f32 1.0, %v10812_v8  ;;  %v13304_v40 = vld [vmem:[#allocation101_spill] sm:$0xff]  ;;  %v4077_v28 = vadd.f32 1.0, %v6207_v46  ;;  %v13305_v51 = vld [vmem:[#allocation180_spill] sm:$0xff] }
 0x867   : > { %v6223_v63 = vpop.eup %6222  ;;  %6242 = vtanh.f32 %v10384_v37  ;;  %13301 = vst [vmem:[#allocation130_spill] sm:$0xff] %v10888_v29  ;;  %v13303_v37 = vld [vmem:[#allocation179_spill] sm:$0xff]  ;;  %v4200_v54 = vmul.f32 0.5, %v4072_v16  ;;  %v10904_v3 = vmul.f32 %v4198_v25, %v13304_v40  ;;  %v4074_v34 = vadd.f32 1.0, %v10806_v22  ;;  %v13309_v29 = vld [vmem:[#allocation182_spill] sm:$0xff] }
 0x868   : > { %v10891_v61 = vpop.eup %6224  ;;  %6244 = vtanh.f32 %v10387_v6  ;;  %v4203_v5 = vmul.f32 0.5, %v4075_v43  ;;  %v4205_v25 = vmul.f32 0.5, %v4077_v28  ;;  %v4076_v46 = vadd.f32 1.0, %v10821_v62  ;;  %v13311_v28 = vld [vmem:[#allocation63_spill] sm:$0xff] }
 0x869   : > { %v10900_v1 = vpop.eup %6226  ;;  %6246 = vtanh.f32 %v13303_v37  ;;  %v13306_v37 = vld [vmem:[#allocation103_spill] sm:$0xff]  ;;  %v4202_v43 = vmul.f32 0.5, %v4074_v34  ;;  %v4079_v6 = vadd.f32 1.0, %v6211_v41  ;;  %v13313_v41 = vpack.c.bf16 %v10716_v13, %v10710_v36  ;;  %v13317_v36 = vld [vmem:[#allocation18_spill] sm:$0xff] }
 0x86a   : > { %v10906_v53 = vpop.eup %6228  ;;  %6248 = vtanh.f32 %v10394_v59  ;;  %v10916_v16 = vmul.f32 %v4200_v54, %v13306_v37  ;;  %v13308_v59 = vld [vmem:[#allocation16_spill] sm:$0xff]  ;;  %v13310_v54 = vpack.c.bf16 %v10706_v32, %v10700_v11  ;;  %v4081_v11 = vadd.f32 1.0, %v6215_v20 }
 0x86b   : > { %v10912_v8 = vpop.eup %6230  ;;  %6250 = vtanh.f32 %v13305_v51  ;;  %v10923_v4 = vmul.f32 %v4203_v5, %v13308_v59  ;;  %v10934_v51 = vmul.f32 %v4205_v25, %v13311_v28  ;;  %v13312_v5 = vld [vmem:[#allocation183_spill] sm:$0xff]  ;;  %v4207_v32 = vmul.f32 0.5, %v4079_v6  ;;  %v13349_v25 = vld [vmem:[#allocation192_spill] sm:$0xff] }
 0x86c   : > { %v10919_v40 = vpop.eup %6232  ;;  %6252 = vtanh.f32 %v13307_v35  ;;  %v4204_v35 = vmul.f32 0.5, %v4076_v46  ;;  %v13316_v46 = vld [vmem:[#allocation107_spill] sm:$0xff]  ;;  %v4209_v13 = vmul.f32 0.5, %v4081_v11  ;;  %v4080_v6 = vadd.f32 1.0, %v10849_v7 }
 0x86d   : > { %v10925_v22 = vpop.eup %6234  ;;  %6254 = vtanh.f32 %v13309_v29  ;;  %4688 = vmatmul.mubr.bf16.gmra.mrb[60].mxu0 %v13310_v54  ;;  %v13314_v29 = vld [vmem:[#allocation105_spill] sm:$0xff]  ;;  %v13315_v54 = vld [vmem:[#allocation184_spill] sm:$0xff]  ;;  %v10958_v20 = vmul.f32 %v4207_v32, %v13317_v36 }
 0x86e   : > { %v10936_v37 = vpop.eup %6236  ;;  %6256 = vtanh.f32 %v13312_v5  ;;  %4695 = vmatprep.mubr.bf16.mxu0 %v13313_v41  ;;  %v10943_v34 = vmul.f32 %v4202_v43, %v13314_v29  ;;  %v10951_v28 = vmul.f32 %v4204_v35, %v13316_v46  ;;  %v4078_v5 = vadd.f32 1.0, %v10836_v23 }
 0x86f   : > { %v10945_v59 = vpop.eup %6238  ;;  %6258 = vtanh.f32 %v13315_v54  ;;  %v4083_v23 = vadd.f32 1.0, %v10865_v30  ;;  %v13318_v54 = vld [vmem:[#allocation185_spill] sm:$0xff]  ;;  %v4208_v32 = vmul.f32 0.5, %v4080_v6  ;;  %v4085_v46 = vadd.f32 1.0, %v6223_v63 }
 0x870   : > { %v10954_v62 = vpop.eup %6240  ;;  %6260 = vtanh.f32 %v10418_v56  ;;  %v4206_v41 = vmul.f32 0.5, %v4078_v5  ;;  %v13319_v56 = vld [vmem:[#allocation21_spill] sm:$0xff]  ;;  %v4082_v5 = vadd.f32 1.0, %v10859_v2  ;;  %v13323_v2 = vld [vmem:[#allocation20_spill] sm:$0xff] }
 0x871   : > { %v10961_v43 = vpop.eup %6242  ;;  %6262 = vtanh.f32 %v10421_v45  ;;  %v10971_v11 = vmul.f32 %v4209_v13, %v13319_v56  ;;  %v13320_v45 = vld [vmem:[#allocation109_spill] sm:$0xff]  ;;  %v4211_v35 = vmul.f32 0.5, %v4083_v23  ;;  %v4213_v63 = vmul.f32 0.5, %v4085_v46  ;;  %v13325_v46 = vld [vmem:[#allocation22_spill] sm:$0xff] }
 0x872   : > { %v10967_v29 = vpop.eup %6244  ;;  %6264 = vtanh.f32 %v13318_v54  ;;  %v10977_v36 = vmul.f32 %v4206_v41, %v13320_v45  ;;  %v13321_v54 = vld [vmem:[#allocation111_spill] sm:$0xff]  ;;  %v4210_v23 = vmul.f32 0.5, %v4082_v5  ;;  %v13326_v5 = vld [vmem:[#allocation112_spill] sm:$0xff] }
 0x873   : > { %v10973_v7 = vpop.eup %6246  ;;  %6266 = vtanh.f32 %v10428_v24  ;;  %v10986_v6 = vmul.f32 %v4208_v32, %v13321_v54  ;;  %v13322_v24 = vpack.c.bf16 %v10733_v26, %v10723_v9  ;;  %v10995_v41 = vmul.f32 %v4211_v35, %v13323_v2 }
 0x874   : > { %v10980_v30 = vpop.eup %6248  ;;  %6268 = vtanh.f32 %v10431_v19  ;;  %v4084_v19 = vadd.f32 1.0, %v10875_v17  ;;  %v13324_v32 = vpack.c.bf16 %v10745_v10, %v10739_v52  ;;  %v11007_v9 = vmul.f32 %v4213_v63, %v13325_v46 }
 0x875   : > { %v10988_v56 = vpop.eup %6250  ;;  %6270 = vtanh.f32 %v10434_v18  ;;  %4696 = vmatmul.mubr.bf16.gmra.mrb[64].mxu0 %v13322_v24  ;;  %v4087_v26 = vadd.f32 1.0, %v10900_v1  ;;  %v11014_v54 = vmul.f32 %v4210_v23, %v13326_v5  ;;  %v4086_v1 = vadd.f32 1.0, %v10891_v61  ;;  %v13329_v5 = vld [vmem:[#allocation186_spill] sm:$0xff]  ;;  %v13340_v18 = vld [vmem:[#allocation24_spill] sm:$0xff] }
 0x876   : > { %v10998_v45 = vpop.eup %6252  ;;  %6272 = vtanh.f32 %v10438_v60  ;;  %4703 = vmatprep.mubr.bf16.mxu0 %v13324_v32  ;;  %v4212_v17 = vmul.f32 0.5, %v4084_v19  ;;  %v4089_v60 = vadd.f32 1.0, %v10912_v8  ;;  %v4088_v8 = vadd.f32 1.0, %v10906_v53 }
 0x877   : > { %v11010_v35 = vpop.eup %6254  ;;  %6274 = vtanh.f32 %v10441_v42  ;;  %v4215_v63 = vmul.f32 0.5, %v4087_v26  ;;  %v13327_v42 = vld [vmem:[#allocation113_spill] sm:$0xff]  ;;  %v4214_v46 = vmul.f32 0.5, %v4086_v1  ;;  %v4091_v61 = vadd.f32 1.0, %v10925_v22 }
 0x878   : > { %v11017_v52 = vpop.eup %6256  ;;  %6276 = vtanh.f32 %v10444_v27  ;;  %v11027_v2 = vmul.f32 %v4212_v17, %v13327_v42  ;;  %v4217_v19 = vmul.f32 0.5, %v4089_v60  ;;  %v13328_v27 = vld [vmem:[#allocation23_spill] sm:$0xff]  ;;  %v13330_v17 = vld [vmem:[#allocation25_spill] sm:$0xff]  ;;  %v4216_v53 = vmul.f32 0.5, %v4088_v8 }
 0x879   : > { %v11023_v24 = vpop.eup %6258  ;;  %6278 = vtanh.f32 %v10449_v49  ;;  %v11034_v32 = vmul.f32 %v4215_v63, %v13328_v27  ;;  %v4093_v22 = vadd.f32 1.0, %v10945_v59  ;;  %v4219_v1 = vmul.f32 0.5, %v4091_v61  ;;  %v13335_v8 = vld [vmem:[#allocation115_spill] sm:$0xff]  ;;  %v13336_v59 = vld [vmem:[#allocation188_spill] sm:$0xff] }
 0x87a   : > { %v11030_v23 = vpop.eup %6260  ;;  %6280 = vtanh.f32 %v10452_v57  ;;  %v11043_v60 = vmul.f32 %v4217_v19, %v13330_v17  ;;  %v13331_v57 = vld [vmem:[#allocation114_spill] sm:$0xff]  ;;  %v13334_v49 = vpack.c.bf16 %v10755_v58, %v10749_v14  ;;  %v11061_v17 = vmul.f32 %v4216_v53, %v13335_v8  ;;  %v13337_v61 = vld [vmem:[#allocation120_spill] sm:$0xff]  ;;  %v13342_v53 = vld [vmem:[#allocation189_spill] sm:$0xff] }
 0x87b   : > { %v11037_v26 = vpop.eup %6262  ;;  %6282 = vtanh.f32 %v13329_v5  ;;  %v11049_v63 = vmul.f32 %v4214_v46, %v13331_v57  ;;  %v13333_v5 = vld [vmem:[#allocation187_spill] sm:$0xff]  ;;  %v11071_v58 = vmul.f32 %v4219_v1, %v13340_v18  ;;  %v4092_v14 = vadd.f32 1.0, %v10936_v37 }
 0x87c   : > { %v11045_v42 = vpop.eup %6264  ;;  %6284 = vtanh.f32 %v10462_v12  ;;  %v4090_v12 = vadd.f32 1.0, %v10919_v40  ;;  %v13338_v57 = vld [vmem:[#allocation67_spill] sm:$0xff]  ;;  %v4097_v37 = vadd.f32 1.0, %v10973_v7 }
 0x87d   : > { %13332 = vst [vmem:[#allocation57_spill] sm:$0xff] %v11049_v63  ;;  %v11052_v27 = vpop.eup %6266  ;;  %6286 = vtanh.f32 %v13333_v5  ;;  %4704 = vmatmul.mubr.bf16.gmra.mrb[68].mxu0 %v13334_v49  ;;  %v13339_v10 = vpack.c.bf16 %v13337_v61, %v13338_v57  ;;  %v4221_v5 = vmul.f32 0.5, %v4093_v22  ;;  %13341 = vst [vmem:[#allocation46_spill] sm:$0xff] %v11071_v58  ;;  %v13343_v61 = vld [vmem:[#allocation190_spill] sm:$0xff]  ;;  %v4220_v18 = vmul.f32 0.5, %v4092_v14  ;;  %v13346_v57 = vld [vmem:[#allocation191_spill] sm:$0xff] }
 0x87e   : > { %v11064_v46 = vpop.eup %6268  ;;  %6288 = vtanh.f32 %v13336_v59  ;;  %v4218_v8 = vmul.f32 0.5, %v4090_v12  ;;  %v4095_v59 = vadd.f32 1.0, %v10961_v43  ;;  %v4094_v43 = vadd.f32 1.0, %v10954_v62  ;;  %v13350_v14 = vld [vmem:[#allocation117_spill] sm:$0xff] }
 0x87f   : > { %4711 = vmatprep.mubr.bf16.mxu0 %v13339_v10  ;;  %v11074_v49 = vpop.eup %6270  ;;  %6290 = vtanh.f32 %v13342_v53  ;;  %v13344_v10 = vld [vmem:[#allocation28_spill] sm:$0xff]  ;;  %v4225_v7 = vmul.f32 0.5, %v4097_v37  ;;  %v4096_v62 = vadd.f32 1.0, %v10967_v29  ;;  %v4099_v37 = vadd.f32 1.0, %v10988_v56  ;;  %v13363_v56 = vld [vmem:[#allocation55_spill] sm:$0xff] }
 0x880   : > { %v11080_v19 = vpop.eup %6272  ;;  %6292 = vtanh.f32 %v13343_v61  ;;  %v11084_v22 = vmul.f32 %v4221_v5, %v13344_v10  ;;  %v13347_v53 = vld [vmem:[#allocation116_spill] sm:$0xff]  ;;  %v4223_v12 = vmul.f32 0.5, %v4095_v59  ;;  %v11100_v61 = vmul.f32 %v4220_v18, %v13350_v14  ;;  %v13355_v18 = vld [vmem:[#allocation30_spill] sm:$0xff] }
 0x881   : > { %v11087_v1 = vpop.eup %6274  ;;  %6294 = vtanh.f32 %v13346_v57  ;;  %v11091_v13 = vmul.f32 %v4218_v8, %v13347_v53  ;;  %v13351_v57 = vld [vmem:[#allocation193_spill] sm:$0xff]  ;;  %v4222_v59 = vmul.f32 0.5, %v4094_v43  ;;  %v11115_v14 = vmul.f32 %v4225_v7, %v13355_v18  ;;  %v13362_v7 = vld [vmem:[#allocation196_spill] sm:$0xff] }
 0x882   : > { %13345 = vst [vmem:[#allocation59_spill] sm:$0xff] %v11084_v22  ;;  %v11094_v40 = vpop.eup %6276  ;;  %6296 = vtanh.f32 %v13349_v25  ;;  %v13352_v8 = vld [vmem:[#allocation29_spill] sm:$0xff]  ;;  %v13354_v25 = vld [vmem:[#allocation194_spill] sm:$0xff]  ;;  %v4224_v43 = vmul.f32 0.5, %v4096_v62  ;;  %v13364_v18 = vpack.c.bf16 %v10800_v33, %v13363_v56  ;;  %v13369_v56 = vld [vmem:[#allocation31_spill] sm:$0xff] }
 0x883   : > { %13348 = vst [vmem:[#allocation61_spill] sm:$0xff] %v11091_v13  ;;  %v11102_v10 = vpop.eup %6278  ;;  %6298 = vtanh.f32 %v13351_v57  ;;  %v11106_v53 = vmul.f32 %v4223_v12, %v13352_v8  ;;  %13356 = vst [vmem:[#allocation13_spill] sm:$0xff] %v11115_v14  ;;  %v13357_v57 = vld [vmem:[#allocation195_spill] sm:$0xff]  ;;  %v13360_v8 = vld [vmem:[#allocation118_spill] sm:$0xff]  ;;  %v4227_v13 = vmul.f32 0.5, %v4099_v37 }
 0x884   : > { %v11109_v63 = vpop.eup %6280  ;;  %6300 = vtanh.f32 %v13354_v25  ;;  %v13358_v12 = vld [vmem:[#allocation43_spill] sm:$0xff]  ;;  %v11125_v22 = vmul.f32 %v4222_v59, %v13360_v8  ;;  %v4101_v25 = vadd.f32 1.0, %v11010_v35  ;;  %v13365_v59 = vld [vmem:[#allocation197_spill] sm:$0xff]  ;;  %v4100_v8 = vadd.f32 1.0, %v10998_v45  ;;  %v13368_v33 = vld [vmem:[#allocation198_spill] sm:$0xff] }
 0x885   : > { %13353 = vst [vmem:[#allocation47_spill] sm:$0xff] %v11106_v53  ;;  %v11118_v58 = vpop.eup %6282  ;;  %6302 = vtanh.f32 %v13357_v57  ;;  %v13359_v29 = vpack.c.bf16 %v10788_v21, %v13358_v12  ;;  %v4098_v21 = vadd.f32 1.0, %v10980_v30  ;;  %v13366_v12 = vld [vmem:[#allocation26_spill] sm:$0xff]  ;;  %v4103_v30 = vadd.f32 1.0, %v11023_v24  ;;  %v13371_v53 = vld [vmem:[#allocation199_spill] sm:$0xff] }
 0x886   : > { %13361 = vst [vmem:[#allocation48_spill] sm:$0xff] %v11125_v22  ;;  %v11128_v5 = vpop.eup %6284  ;;  %6304 = vtanh.f32 %v13362_v7  ;;  %v11141_v35 = vmul.f32 %v4224_v43, %v13366_v12  ;;  %v4228_v45 = vmul.f32 0.5, %v4100_v8  ;;  %v4105_v24 = vadd.f32 1.0, %v11037_v26 }
 0x887   : > { %4712 = vmatmul.mubr.bf16.gmra.mrb[72].mxu0 %v13359_v29  ;;  %v11137_v62 = vpop.eup %6286  ;;  %6306 = vtanh.f32 %v13365_v59  ;;  %v4229_v29 = vmul.f32 0.5, %v4101_v25  ;;  %v4226_v37 = vmul.f32 0.5, %v4098_v21  ;;  %v13372_v25 = vld [vmem:[#allocation32_spill] sm:$0xff]  ;;  %v4231_v21 = vmul.f32 0.5, %v4103_v30 }
 0x888   : > { %4719 = vmatprep.mubr.bf16.mxu0 %v13364_v18  ;;  %13367 = vst [vmem:[#allocation12_spill] sm:$0xff] %v11141_v35  ;;  %v11144_v7 = vpop.eup %6288  ;;  %6308 = vtanh.f32 %v13368_v33  ;;  %v11148_v18 = vmul.f32 %v4227_v13, %v13369_v56  ;;  %v13373_v33 = vld [vmem:[#allocation200_spill] sm:$0xff]  ;;  %v13374_v13 = vld [vmem:[#allocation27_spill] sm:$0xff]  ;;  %v4102_v8 = vadd.f32 1.0, %v11017_v52  ;;  %v4104_v30 = vadd.f32 1.0, %v11030_v23  ;;  %v13385_v23 = vld [vmem:[#allocation34_spill] sm:$0xff] }
 0x889   : > { %v11151_v57 = vpop.eup %6290  ;;  %6310 = vtanh.f32 %v13371_v53  ;;  %v11157_v59 = vmul.f32 %v4229_v29, %v13372_v25  ;;  %v11163_v56 = vmul.f32 %v4226_v37, %v13374_v13  ;;  %v13376_v53 = vld [vmem:[#allocation201_spill] sm:$0xff]  ;;  %v4233_v37 = vmul.f32 0.5, %v4105_v24 }
 0x88a   : > { %13370 = vst [vmem:[#allocation17_spill] sm:$0xff] %v11148_v18  ;;  %v11159_v12 = vpop.eup %6292  ;;  %6312 = vtanh.f32 %v13373_v33  ;;  %v13377_v29 = vld [vmem:[#allocation37_spill] sm:$0xff]  ;;  %v13379_v33 = vld [vmem:[#allocation202_spill] sm:$0xff]  ;;  %v4109_v43 = vadd.f32 1.0, %v11074_v49  ;;  %v4108_v52 = vadd.f32 1.0, %v11064_v46  ;;  %v4113_v46 = vadd.f32 1.0, %v11102_v10 }
 0x88b   : > { %13375 = vst [vmem:[#allocation50_spill] sm:$0xff] %v11163_v56  ;;  %v11166_v14 = vpop.eup %6294  ;;  %6314 = vtanh.f32 %v13376_v53  ;;  %v11172_v25 = vmul.f32 %v4228_v45, %v13377_v29  ;;  %v13380_v13 = vld [vmem:[#allocation33_spill] sm:$0xff]  ;;  %v13382_v53 = vld [vmem:[#allocation203_spill] sm:$0xff]  ;;  %v13383_v45 = vpack.c.bf16 %v10819_v39, %v10804_v55  ;;  %v4230_v29 = vmul.f32 0.5, %v4102_v8  ;;  %v13395_v10 = vld [vmem:[#allocation38_spill] sm:$0xff] }
 0x88c   : > { %v11175_v22 = vpop.eup %6296  ;;  %6316 = vtanh.f32 %v13379_v33  ;;  %v11179_v26 = vmul.f32 %v4231_v21, %v13380_v13  ;;  %v4107_v33 = vadd.f32 1.0, %v11052_v27  ;;  %v13384_v21 = vpack.c.bf16 %v10834_v31, %v10828_v0  ;;  %v13390_v31 = vld [vmem:[#allocation36_spill] sm:$0xff] }
 0x88d   : > { %13378 = vst [vmem:[#allocation52_spill] sm:$0xff] %v11172_v25  ;;  %v11182_v35 = vpop.eup %6298  ;;  %6318 = vtanh.f32 %v13382_v53  ;;  %v11197_v13 = vmul.f32 %v4233_v37, %v13385_v23  ;;  %v4232_v53 = vmul.f32 0.5, %v4104_v30  ;;  %v4106_v55 = vadd.f32 1.0, %v11045_v42  ;;  %v13388_v37 = vld [vmem:[#allocation42_spill] sm:$0xff]  ;;  %v13389_v23 = vld [vmem:[#allocation35_spill] sm:$0xff] }
 0x88e   : > { %13381 = vst [vmem:[#allocation8_spill] sm:$0xff] %v11179_v26  ;;  %v11191_v24 = vpop.eup %6300  ;;  %v4235_v27 = vmul.f32 0.5, %v4107_v33  ;;  %v4111_v56 = vadd.f32 1.0, %v11087_v1  ;;  %v4237_v49 = vmul.f32 0.5, %v4109_v43  ;;  %v4236_v33 = vmul.f32 0.5, %v4108_v52 }
 0x88f   : > { %4720 = vmatmul.mubr.bf16.gmra.mrb[76].mxu0 %v13383_v45  ;;  %13386 = vst [vmem:[#allocation72_spill] sm:$0xff] %v11197_v13  ;;  %v11201_v39 = vpop.eup %6302  ;;  %v13387_v45 = vld [vmem:[#allocation39_spill] sm:$0xff]  ;;  %v11213_v30 = vmul.f32 %v4232_v53, %v13388_v37  ;;  %v4234_v42 = vmul.f32 0.5, %v4106_v55  ;;  %v13391_v53 = vld [vmem:[#allocation2_spill] sm:$0xff]  ;;  %v4110_v55 = vadd.f32 1.0, %v11080_v19  ;;  %v4241_v52 = vmul.f32 0.5, %v4113_v46 }
 0x890   : > { %4727 = vmatprep.mubr.bf16.mxu0 %v13384_v21  ;;  %v11204_v8 = vmul.f32 %v4230_v29, %v13387_v45  ;;  %v11208_v0 = vpop.eup %6304  ;;  %v11218_v29 = vmul.f32 %v4235_v27, %v13389_v23  ;;  %v4239_v45 = vmul.f32 0.5, %v4111_v56  ;;  %v11226_v26 = vmul.f32 %v4237_v49, %v13390_v31  ;;  %v13393_v27 = vld [vmem:[#allocation3_spill] sm:$0xff] }
 0x891   : > { %v11215_v21 = vpop.eup %6306  ;;  %v11229_v43 = vmul.f32 %v4234_v42, %v13391_v53  ;;  %v11233_v23 = vmul.f32 %v4236_v33, %v13393_v27  ;;  %v4112_v13 = vadd.f32 1.0, %v11094_v40  ;;  %v4238_v49 = vmul.f32 0.5, %v4110_v55  ;;  %v13396_v33 = vld [vmem:[#allocation45_spill] sm:$0xff] }
 0x892   : > { %v11221_v1 = vpop.eup %6308  ;;  %v11236_v56 = vmul.f32 %v4239_v45, %v13395_v10  ;;  %v4115_v42 = vadd.f32 1.0, %v11118_v58  ;;  %v4117_v19 = vadd.f32 1.0, %v11137_v62  ;;  %v13397_v46 = vpack.c.bf16 %v10846_v15, %v13396_v33  ;;  %v13398_v40 = vld [vmem:[#allocation41_spill] sm:$0xff] }
 0x893   : > { %13392 = vst [vmem:[#allocation54_spill] sm:$0xff] %v11229_v43  ;;  %v6311_v37 = vpop.eup %6310  ;;  %13394 = vst [vmem:[#allocation9_spill] sm:$0xff] %v11233_v23  ;;  %v11253_v27 = vmul.f32 %v4241_v52, %v13398_v40  ;;  %v4240_v10 = vmul.f32 0.5, %v4112_v13  ;;  %v4114_v31 = vadd.f32 1.0, %v11109_v63  ;;  %v13399_v58 = vpack.c.bf16 %v10863_v38, %v10853_v48  ;;  %v13400_v62 = vld [vmem:[#allocation5_spill] sm:$0xff]  ;;  %v13401_v13 = vld [vmem:[#allocation7_spill] sm:$0xff] }
 0x894   : > { %v11239_v18 = vpop.eup %6312  ;;  %v11262_v25 = vmul.f32 %v4238_v49, %v13400_v62  ;;  %v4243_v15 = vmul.f32 0.5, %v4115_v42  ;;  %v4245_v33 = vmul.f32 0.5, %v4117_v19  ;;  %v4119_v43 = vadd.f32 1.0, %v11151_v57  ;;  %v13402_v48 = vld [vmem:[#allocation40_spill] sm:$0xff] }
 0x895   : > { %v11245_v53 = vpop.eup %6314  ;;  %v4443_v52 = vpack.c.bf16 %v11253_v27, %v11236_v56  ;;  %v11268_v40 = vmul.f32 %v4240_v10, %v13401_v13  ;;  %v4242_v63 = vmul.f32 0.5, %v4114_v31  ;;  %v13403_v49 = vld [vmem:[#allocation64_spill] sm:$0xff]  ;;  %v4121_v10 = vadd.f32 1.0, %v11166_v14 }
 0x896   : > { %v11256_v55 = vpop.eup %6316  ;;  %v11272_v38 = vmul.f32 %v4243_v15, %v13402_v48  ;;  %v13404_v19 = vld [vmem:[#allocation4_spill] sm:$0xff]  ;;  %v4247_v13 = vmul.f32 0.5, %v4119_v43  ;;  %v4118_v15 = vadd.f32 1.0, %v11144_v7  ;;  %v13406_v48 = vld [vmem:[#allocation65_spill] sm:$0xff]  ;;  %v4125_v57 = vadd.f32 1.0, %v11201_v39  ;;  %v13408_v7 = vld [vmem:[#allocation66_spill] sm:$0xff] }
 0x897   : > { %4728 = vmatmul.mubr.bf16.gmra.mrb[80].mxu0 %v13397_v46  ;;  %v4116_v46 = vadd.f32 1.0, %v11128_v5  ;;  %v6319_v45 = vpop.eup %6318  ;;  %v4442_v5 = vpack.c.bf16 %v11268_v40, %v11262_v25  ;;  %v11280_v62 = vmul.f32 %v4242_v63, %v13404_v19  ;;  %v13405_v31 = vld [vmem:[#allocation44_spill] sm:$0xff]  ;;  %v4123_v63 = vadd.f32 1.0, %v11182_v35  ;;  %v13409_v35 = vld [vmem:[#allocation130_spill] sm:$0xff] }
 0x898   : > { %4735 = vmatprep.mubr.bf16.mxu0 %v13399_v58  ;;  %v4133_v23 = vadd.f32 1.0, %v6319_v45  ;;  %v11275_v58 = vmul.f32 %v4245_v33, %v13403_v49  ;;  %v4249_v33 = vmul.f32 0.5, %v4121_v10  ;;  %v4120_v49 = vadd.f32 1.0, %v11159_v12 }
 0x899   : > { %v4244_v42 = vmul.f32 0.5, %v4116_v46  ;;  %v11290_v46 = vmul.f32 %v4247_v13, %v13406_v48  ;;  %v4246_v43 = vmul.f32 0.5, %v4118_v15  ;;  %v4122_v12 = vadd.f32 1.0, %v11175_v22  ;;  %v13411_v48 = vld [vmem:[#allocation68_spill] sm:$0xff] }
 0x89a   : > { %v4261_v19 = vmul.f32 0.5, %v4133_v23  ;;  %v11301_v10 = vmul.f32 %v4249_v33, %v13408_v7  ;;  %v4248_v13 = vmul.f32 0.5, %v4120_v49  ;;  %v13410_v23 = vpack.c.bf16 %v10897_v47, %v13409_v35  ;;  %v13412_v33 = vld [vmem:[#allocation69_spill] sm:$0xff] }
 0x89b   : > { %v11286_v45 = vmul.f32 %v4244_v42, %v13405_v31  ;;  %v13407_v42 = vpack.c.bf16 %v10884_v50, %v10872_v44  ;;  %v4251_v31 = vmul.f32 0.5, %v4123_v63  ;;  %v11308_v14 = vmul.f32 %v4246_v43, %v13411_v48  ;;  %v13413_v63 = vld [vmem:[#allocation124_spill] sm:$0xff]  ;;  %v13414_v47 = vld [vmem:[#allocation125_spill] sm:$0xff] }
 0x89c   : > { %v4253_v15 = vmul.f32 0.5, %v4125_v57  ;;  %v4124_v39 = vadd.f32 1.0, %v11191_v24  ;;  %v4127_v44 = vadd.f32 1.0, %v11215_v21  ;;  %v4447_v50 = vpack.c.bf16 %v11301_v10, %v11290_v46  ;;  %v13415_v21 = vld [vmem:[#allocation70_spill] sm:$0xff] }
 0x89d   : > { %v11315_v49 = vmul.f32 %v4248_v13, %v13412_v33  ;;  %v11318_v22 = vmul.f32 %v4251_v31, %v13413_v63  ;;  %v4129_v35 = vadd.f32 1.0, %v6311_v37  ;;  %v4126_v48 = vadd.f32 1.0, %v11208_v0 }
 0x89e   : > { %v11321_v7 = vmul.f32 %v4253_v15, %v13414_v47  ;;  %v4252_v43 = vmul.f32 0.5, %v4124_v39  ;;  %v4255_v57 = vmul.f32 0.5, %v4127_v44  ;;  %v4128_v13 = vadd.f32 1.0, %v11221_v1  ;;  %v13417_v39 = vld [vmem:[#allocation126_spill] sm:$0xff] }
 0x89f   : > { %4736 = vmatmul.mubr.bf16.gmra.mrb[84].mxu0 %v13407_v42  ;;  %v4250_v42 = vmul.f32 0.5, %v4122_v12  ;;  %v4446_v24 = vpack.c.bf16 %v11315_v49, %v11308_v14  ;;  %v13416_v12 = vld [vmem:[#allocation49_spill] sm:$0xff]  ;;  %v4257_v15 = vmul.f32 0.5, %v4129_v35  ;;  %v4254_v44 = vmul.f32 0.5, %v4126_v48 }
 0x8a0   : > { %4743 = vmatprep.mubr.bf16.mxu0 %v13410_v23  ;;  %v4449_v31 = vpack.c.bf16 %v11321_v7, %v11318_v22  ;;  %v11333_v33 = vmul.f32 %v4252_v43, %v13416_v12  ;;  %v11336_v37 = vmul.f32 %v4255_v57, %v13417_v39  ;;  %v4256_v63 = vmul.f32 0.5, %v4128_v13  ;;  %v13419_v22 = vld [vmem:[#allocation127_spill] sm:$0xff] }
 0x8a1   : > { %v11326_v23 = vmul.f32 %v4250_v42, %v13415_v21  ;;  %v4131_v47 = vadd.f32 1.0, %v11245_v53  ;;  %v4130_v42 = vadd.f32 1.0, %v11239_v18  ;;  %v13418_v21 = vld [vmem:[#allocation129_spill] sm:$0xff]  ;;  %v4385_v7 = vmul.f32 %v4257_v15, %v13419_v22  ;;  %v13421_v57 = vld [vmem:[#allocation51_spill] sm:$0xff]  ;;  %v13425_v15 = vld [vmem:[#allocation6_spill] sm:$0xff] }
 0x8a2   : > { %v11341_v0 = vmul.f32 %v4261_v19, %v13418_v21  ;;  %v4132_v43 = vadd.f32 1.0, %v11256_v55  ;;  %v13420_v35 = vpack.c.bf16 %v10916_v16, %v10904_v3  ;;  %v11351_v48 = vmul.f32 %v4254_v44, %v13421_v57  ;;  %v13422_v53 = vld [vmem:[#allocation53_spill] sm:$0xff]  ;;  %v13424_v3 = vld [vmem:[#allocation128_spill] sm:$0xff]  ;;  %v13426_v44 = vld [vmem:[#allocation119_spill] sm:$0xff] }
 0x8a3   : > { %v4448_v1 = vpack.c.bf16 %v11333_v33, %v11326_v23  ;;  %v11354_v13 = vmul.f32 %v4256_v63, %v13422_v53  ;;  %v4259_v18 = vmul.f32 0.5, %v4131_v47  ;;  %v4258_v19 = vmul.f32 0.5, %v4130_v42  ;;  %v13436_v22 = vld [vmem:[#allocation46_spill] sm:$0xff]  ;;  %v13451_v53 = vld [vmem:[#allocation72_spill] sm:$0xff] }
 0x8a4   : > { %v13423_v12 = vpack.c.bf16 %v10934_v51, %v10923_v4  ;;  %v4451_v23 = vpack.c.bf16 %v4385_v7, %v11336_v37  ;;  %v4260_v33 = vmul.f32 0.5, %v4132_v43  ;;  %v13427_v4 = vpack.c.bf16 %v10951_v28, %v10943_v34  ;;  %v13433_v28 = vld [vmem:[#allocation57_spill] sm:$0xff]  ;;  %v13441_v7 = vld [vmem:[#allocation47_spill] sm:$0xff]  ;;  %v13444_v43 = vld [vmem:[#allocation48_spill] sm:$0xff] }
 0x8a5   : > { %v4450_v55 = vpack.c.bf16 %v11354_v13, %v11351_v48  ;;  %v4387_v16 = vmul.f32 %v4259_v18, %v13424_v3  ;;  %v11364_v39 = vmul.f32 %v4258_v19, %v13425_v15  ;;  %v13428_v51 = vpack.c.bf16 %v10971_v11, %v10958_v20  ;;  %v13435_v11 = vld [vmem:[#allocation59_spill] sm:$0xff]  ;;  %v13449_v57 = vld [vmem:[#allocation50_spill] sm:$0xff]  ;;  %v13452_v13 = vld [vmem:[#allocation8_spill] sm:$0xff] }
 0x8a6   : > { %v4388_v63 = vmul.f32 %v4260_v33, %v13426_v44  ;;  %v13429_v37 = vpack.c.bf16 %v10986_v6, %v10977_v36  ;;  %v13430_v21 = vpack.c.bf16 %v11007_v9, %v10995_v41  ;;  %v13432_v34 = vpack.c.bf16 %v11043_v60, %v11034_v32  ;;  %v13438_v6 = vld [vmem:[#allocation61_spill] sm:$0xff]  ;;  %v13457_v33 = vld [vmem:[#allocation54_spill] sm:$0xff] }
 0x8a7   : > { %4744 = vmatmul.mubr.bf16.gmra.mrb[88].mxu0 %v13420_v35  ;;  %v4453_v47 = vpack.c.bf16 %v11341_v0, %v4387_v16  ;;  %v13431_v0 = vpack.c.bf16 %v11027_v2, %v11014_v54  ;;  %v13434_v20 = vpack.c.bf16 %v11061_v17, %v13433_v28  ;;  %v13437_v36 = vpack.c.bf16 %v13435_v11, %v13436_v22  ;;  %v13440_v9 = vld [vmem:[#allocation13_spill] sm:$0xff]  ;;  %v13443_v2 = vld [vmem:[#allocation12_spill] sm:$0xff] }
 0x8a8   : > { %4751 = vmatprep.mubr.bf16.mxu0 %v13423_v12  ;;  %v4452_v42 = vpack.c.bf16 %v4388_v63, %v11364_v39  ;;  %v13439_v41 = vpack.c.bf16 %v11100_v61, %v13438_v6  ;;  %v13442_v54 = vpack.c.bf16 %v13440_v9, %v13441_v7  ;;  %v13445_v32 = vpack.c.bf16 %v13443_v2, %v13444_v43  ;;  %v13446_v60 = vld [vmem:[#allocation17_spill] sm:$0xff]  ;;  %v13448_v35 = vld [vmem:[#allocation52_spill] sm:$0xff] }
 0x8a9   : > { %v13447_v17 = vpack.c.bf16 %v11157_v59, %v13446_v60  ;;  %v13450_v48 = vpack.c.bf16 %v13448_v35, %v13449_v57  ;;  %v13453_v61 = vpack.c.bf16 %v13451_v53, %v13452_v13  ;;  %v13454_v18 = vpack.c.bf16 %v11213_v30, %v11204_v8  ;;  %v13456_v12 = vld [vmem:[#allocation9_spill] sm:$0xff] }
 0x8aa   : > { %v13455_v19 = vpack.c.bf16 %v11226_v26, %v11218_v29  ;;  %v13458_v59 = vpack.c.bf16 %v13456_v12, %v13457_v33  ;;  %v13459_v8 = vpack.c.bf16 %v11275_v58, %v11272_v38  ;;  %v13460_v56 = vpack.c.bf16 %v11286_v45, %v11280_v62 }
 0x8af   : > { %4752 = vmatmul.mubr.bf16.gmra.mrb[92].mxu0 %v13427_v4 }
 0x8b0   : > { %4759 = vmatprep.mubr.bf16.mxu0 %v13428_v51 }
 0x8b7   : > { %4760 = vmatmul.mubr.bf16.gmra.mrb[96].mxu0 %v13429_v37 }
 0x8b8   : > { %4767 = vmatprep.mubr.bf16.mxu0 %v13430_v21 }
 0x8bf   : > { %4768 = vmatmul.mubr.bf16.gmra.mrb[100].mxu0 %v13431_v0 }
 0x8c0   : > { %4775 = vmatprep.mubr.bf16.mxu0 %v13432_v34 }
 0x8c7   : > { %4776 = vmatmul.mubr.bf16.gmra.mrb[104].mxu0 %v13434_v20 }
 0x8c8   : > { %4783 = vmatprep.mubr.bf16.mxu0 %v13437_v36 }
 0x8cf   : > { %4784 = vmatmul.mubr.bf16.gmra.mrb[108].mxu0 %v13439_v41 }
 0x8d0   : > { %4791 = vmatprep.mubr.bf16.mxu0 %v13442_v54 }
 0x8d7   : > { %4792 = vmatmul.mubr.bf16.gmra.mrb[112].mxu0 %v13445_v32 }
 0x8d8   : > { %4799 = vmatprep.mubr.bf16.mxu0 %v13447_v17 }
 0x8df   : > { %4800 = vmatmul.mubr.bf16.gmra.mrb[116].mxu0 %v13450_v48 }
 0x8e0   : > { %4807 = vmatprep.mubr.bf16.mxu0 %v13453_v61 }
 0x8e7   : > { %4808 = vmatmul.mubr.bf16.gmra.mrb[120].mxu0 %v13454_v18 }
 0x8e8   : > { %4815 = vmatprep.mubr.bf16.mxu0 %v13455_v19 }
 0x8ef   : > { %4816 = vmatmul.mubr.bf16.gmra.mrb[124].mxu0 %v13458_v59 }
 0x8f0   : > { %4823 = vmatprep.mubr.bf16.mxu0 %v4443_v52 }
 0x8f7   : > { %4824 = vmatmul.mubr.bf16.gmra.mrb[128].mxu0 %v4442_v5 }
 0x8f8   : > { %4831 = vmatprep.mubr.bf16.mxu0 %v13459_v8  ;;  %v11429_v30 = vpop.f32.mrb[24].mxu0 }
 0x8f9   : > { %4904 = vrot.lane.b32.xlu0 %v11429_v30, %s6333_s28  ;;  %v4619_v26 = vpop.f32.mrb[25].mxu0 }
 0x8fa   : > { %v11433_v29 = vpop.f32.mrb[26].mxu0 }
 0x8fb   : > { %v4622_v3 = vpop.f32.mrb[27].mxu0 }
 0x8fd   : > { %4906 = vrot.lane.b32.xlu0 %v11433_v29, %s6333_s28 }
 0x8ff   : > { %4832 = vmatmul.mubr.bf16.gmra.mrb[132].mxu0 %v13460_v56 }
 0x900   : > { %4839 = vmatprep.mubr.bf16.mxu0 %v4447_v50  ;;  %v11443_v25 = vpop.f32.mrb[28].mxu0 }
 0x901   : > { %4908 = vrot.lane.b32.xlu1 %v11443_v25, %s6333_s28  ;;  %v4627_v27 = vpop.f32.mrb[29].mxu0 }
 0x902   : > { %v11447_v52 = vpop.f32.mrb[30].mxu0 }
 0x903   : > { %v4630_v40 = vpop.f32.mrb[31].mxu0 }
 0x905   : > { %4910 = vrot.lane.b32.xlu1 %v11447_v52, %s6333_s28 }
 0x907   : > { %4840 = vmatmul.mubr.bf16.gmra.mrb[136].mxu0 %v4446_v24 }
 0x908   : > { %4847 = vmatprep.mubr.bf16.mxu0 %v4449_v31  ;;  %v11454_v38 = vpop.f32.mrb[32].mxu0 }
 0x909   : > { %4912 = vrot.lane.b32.xlu0 %v11454_v38, %s6333_s28  ;;  %v4635_v58 = vpop.f32.mrb[33].mxu0 }
 0x90a   : > { %v11458_v5 = vpop.f32.mrb[34].mxu0 }
 0x90b   : > { %4914 = vrot.lane.b32.xlu1 %v11458_v5, %s6333_s28  ;;  %v4638_v62 = vpop.f32.mrb[35].mxu0 }
 0x90f   : > { %4848 = vmatmul.mubr.bf16.gmra.mrb[140].mxu0 %v4448_v1 }
 0x910   : > { %4855 = vmatprep.mubr.bf16.mxu0 %v4451_v23  ;;  %v11462_v45 = vpop.f32.mrb[36].mxu0 }
 0x911   : > { %4916 = vrot.lane.b32.xlu0 %v11462_v45, %s6333_s28  ;;  %v4643_v46 = vpop.f32.mrb[37].mxu0 }
 0x912   : > { %v11466_v14 = vpop.f32.mrb[38].mxu0 }
 0x913   : > { %4918 = vrot.lane.b32.xlu1 %v11466_v14, %s6333_s28  ;;  %v4646_v10 = vpop.f32.mrb[39].mxu0 }
 0x917   : > { %4856 = vmatmul.mubr.bf16.gmra.mrb[144].mxu0 %v4450_v55 }
 0x918   : > { %4863 = vmatprep.mubr.bf16.mxu0 %v4453_v47  ;;  %v11470_v50 = vpop.f32.mrb[40].mxu0 }
 0x919   : > { %4920 = vrot.lane.b32.xlu0 %v11470_v50, %s6333_s28  ;;  %v4651_v49 = vpop.f32.mrb[41].mxu0 }
 0x91a   : > { %v11474_v24 = vpop.f32.mrb[42].mxu0 }
 0x91b   : > { %4922 = vrot.lane.b32.xlu1 %v11474_v24, %s6333_s28  ;;  %v4654_v31 = vpop.f32.mrb[43].mxu0 }
 0x91f   : > { %4864 = vmatmul.mubr.bf16.gmra.mrb[148].mxu0 %v4452_v42 }
 0x920   : > { %v11478_v1 = vpop.f32.mrb[44].mxu0 }
 0x921   : > { %4924 = vrot.lane.b32.xlu0 %v11478_v1, %s6333_s28  ;;  %v4659_v23 = vpop.f32.mrb[45].mxu0 }
 0x922   : > { %v11482_v55 = vpop.f32.mrb[46].mxu0 }
 0x923   : > { %4926 = vrot.lane.b32.xlu1 %v11482_v55, %s6333_s28  ;;  %v4662_v16 = vpop.f32.mrb[47].mxu0 }
 0x928   : > { %v11486_v15 = vpop.f32.mrb[48].mxu0 }
 0x929   : > { %4928 = vrot.lane.b32.xlu0 %v11486_v15, %s6333_s28  ;;  %v4667_v39 = vpop.f32.mrb[49].mxu0 }
 0x92a   : > { %v11490_v44 = vpop.f32.mrb[50].mxu0 }
 0x92b   : > { %4930 = vrot.lane.b32.xlu1 %v11490_v44, %s6333_s28  ;;  %v4670_v63 = vpop.f32.mrb[51].mxu0 }
 0x930   : > { %v11494_v47 = vpop.f32.mrb[52].mxu0 }
 0x931   : > { %4932 = vrot.lane.b32.xlu0 %v11494_v47, %s6333_s28  ;;  %v4675_v42 = vpop.f32.mrb[53].mxu0 }
 0x932   : > { %v11498_v4 = vpop.f32.mrb[54].mxu0 }
 0x933   : > { %4934 = vrot.lane.b32.xlu1 %v11498_v4, %s6333_s28  ;;  %v4678_v51 = vpop.f32.mrb[55].mxu0 }
 0x938   : > { %v11502_v37 = vpop.f32.mrb[56].mxu0 }
 0x939   : > { %4936 = vrot.lane.b32.xlu0 %v11502_v37, %s6333_s28  ;;  %v4683_v21 = vpop.f32.mrb[57].mxu0 }
 0x93a   : > { %v11506_v0 = vpop.f32.mrb[58].mxu0 }
 0x93b   : > { %4938 = vrot.lane.b32.xlu1 %v11506_v0, %s6333_s28  ;;  %v4686_v34 = vpop.f32.mrb[59].mxu0 }
 0x940   : > { %v11510_v28 = vpop.f32.mrb[60].mxu0 }
 0x941   : > { %4940 = vrot.lane.b32.xlu0 %v11510_v28, %s6333_s28  ;;  %v4691_v20 = vpop.f32.mrb[61].mxu0 }
 0x942   : > { %v11514_v11 = vpop.f32.mrb[62].mxu0 }
 0x943   : > { %4942 = vrot.lane.b32.xlu1 %v11514_v11, %s6333_s28  ;;  %v4694_v22 = vpop.f32.mrb[63].mxu0 }
 0x948   : > { %v11518_v36 = vpop.f32.mrb[64].mxu0 }
 0x949   : > { %4944 = vrot.lane.b32.xlu0 %v11518_v36, %s6333_s28  ;;  %v4699_v6 = vpop.f32.mrb[65].mxu0 }
 0x94a   : > { %v11522_v41 = vpop.f32.mrb[66].mxu0 }
 0x94b   : > { %4946 = vrot.lane.b32.xlu1 %v11522_v41, %s6333_s28  ;;  %v4702_v9 = vpop.f32.mrb[67].mxu0 }
 0x950   : > { %v11526_v7 = vpop.f32.mrb[68].mxu0 }
 0x951   : > { %4948 = vrot.lane.b32.xlu0 %v11526_v7, %s6333_s28  ;;  %v4707_v54 = vpop.f32.mrb[69].mxu0 }
 0x952   : > { %v11530_v2 = vpop.f32.mrb[70].mxu0 }
 0x953   : > { %4950 = vrot.lane.b32.xlu1 %v11530_v2, %s6333_s28  ;;  %v4710_v43 = vpop.f32.mrb[71].mxu0 }
 0x95a   : > { %v11534_v32 = vpop.f32.mrb[72].mxu0 }
 0x95b   : > { %4952 = vrot.lane.b32.xlu0 %v11534_v32, %s6333_s28  ;;  %v4715_v60 = vpop.f32.mrb[73].mxu0 }
 0x95c   : > { %v11538_v17 = vpop.f32.mrb[74].mxu0 }
 0x95d   : > { %4954 = vrot.lane.b32.xlu1 %v11538_v17, %s6333_s28  ;;  %v4718_v35 = vpop.f32.mrb[75].mxu0 }
 0x962   : > { %v11542_v57 = vpop.f32.mrb[76].mxu0 }
 0x963   : > { %4956 = vrot.lane.b32.xlu0 %v11542_v57, %s6333_s28  ;;  %v4723_v48 = vpop.f32.mrb[77].mxu0 }
 0x964   : > { %v11546_v53 = vpop.f32.mrb[78].mxu0 }
 0x965   : > { %4958 = vrot.lane.b32.xlu1 %v11546_v53, %s6333_s28  ;;  %v4726_v13 = vpop.f32.mrb[79].mxu0 }
 0x96a   : > { %v11550_v61 = vpop.f32.mrb[80].mxu0 }
 0x96b   : > { %4960 = vrot.lane.b32.xlu0 %v11550_v61, %s6333_s28  ;;  %v4731_v18 = vpop.f32.mrb[81].mxu0  ;;  %v4905_v3 = vpop.permute.xlu0 %4904 }
 0x96c   : > { %v11554_v19 = vpop.f32.mrb[82].mxu0 }
 0x96d   : > { %4962 = vrot.lane.b32.xlu1 %v11554_v19, %s6333_s28  ;;  %v4734_v12 = vpop.f32.mrb[83].mxu0 }
 0x96f   : > { %v4907_v58 = vpop.permute.xlu0 %4906 }
 0x972   : > { %v11558_v33 = vpop.f32.mrb[84].mxu0 }
 0x973   : > { %4964 = vrot.lane.b32.xlu0 %v11558_v33, %s6333_s28  ;;  %v4739_v59 = vpop.f32.mrb[85].mxu0  ;;  %v4909_v49 = vpop.permute.xlu1 %4908 }
 0x974   : > { %v11562_v8 = vpop.f32.mrb[86].mxu0 }
 0x975   : > { %4966 = vrot.lane.b32.xlu1 %v11562_v8, %s6333_s28  ;;  %v4742_v26 = vpop.f32.mrb[87].mxu0 }
 0x977   : > { %v4911_v39 = vpop.permute.xlu1 %4910 }
 0x97a   : > { %v4745_v56 = vpop.f32.mrb[88].mxu0 }
 0x97b   : > { %v11566_v27 = vadd.f32 %v4905_v3, %v4745_v56  ;;  %5097 = vrot.lane.b32.xlu0 %v4745_v56, %s6334_s29  ;;  %v4747_v40 = vpop.f32.mrb[89].mxu0  ;;  %v4913_v21 = vpop.permute.xlu0 %4912 }
 0x97c   : > { %v4748_v62 = vpop.f32.mrb[90].mxu0 }
 0x97d   : > { %v11569_v46 = vadd.f32 %v4907_v58, %v4748_v62  ;;  %5099 = vrot.lane.b32.xlu1 %v4748_v62, %s6334_s29  ;;  %v4750_v10 = vpop.f32.mrb[91].mxu0  ;;  %v4915_v6 = vpop.permute.xlu1 %4914 }
 0x982   : > { %v4753_v31 = vpop.f32.mrb[92].mxu0 }
 0x983   : > { %v11572_v23 = vadd.f32 %v4909_v49, %v4753_v31  ;;  %5101 = vrot.lane.b32.xlu0 %v4753_v31, %s6334_s29  ;;  %v4755_v16 = vpop.f32.mrb[93].mxu0  ;;  %v4917_v60 = vpop.permute.xlu0 %4916 }
 0x984   : > { %v4756_v63 = vpop.f32.mrb[94].mxu0 }
 0x985   : > { %v11575_v42 = vadd.f32 %v4911_v39, %v4756_v63  ;;  %5103 = vrot.lane.b32.xlu1 %v4756_v63, %s6334_s29  ;;  %v4758_v51 = vpop.f32.mrb[95].mxu0  ;;  %v4919_v18 = vpop.permute.xlu1 %4918 }
 0x98a   : > { %v4761_v34 = vpop.f32.mrb[96].mxu0 }
 0x98b   : > { %v11578_v20 = vadd.f32 %v4913_v21, %v4761_v34  ;;  %5105 = vrot.lane.b32.xlu0 %v4761_v34, %s6334_s29  ;;  %v4763_v22 = vpop.f32.mrb[97].mxu0  ;;  %v4921_v3 = vpop.permute.xlu0 %4920 }
 0x98c   : > { %v4764_v9 = vpop.f32.mrb[98].mxu0 }
 0x98d   : > { %v11581_v54 = vadd.f32 %v4915_v6, %v4764_v9  ;;  %5107 = vrot.lane.b32.xlu1 %v4764_v9, %s6334_s29  ;;  %v4766_v43 = vpop.f32.mrb[99].mxu0  ;;  %v4923_v62 = vpop.permute.xlu1 %4922 }
 0x992   : > { %v4769_v35 = vpop.f32.mrb[100].mxu0 }
 0x993   : > { %v11584_v48 = vadd.f32 %v4917_v60, %v4769_v35  ;;  %5109 = vrot.lane.b32.xlu0 %v4769_v35, %s6334_s29  ;;  %v4771_v13 = vpop.f32.mrb[101].mxu0  ;;  %v4925_v16 = vpop.permute.xlu0 %4924 }
 0x994   : > { %v4772_v12 = vpop.f32.mrb[102].mxu0 }
 0x995   : > { %v11587_v59 = vadd.f32 %v4919_v18, %v4772_v12  ;;  %5111 = vrot.lane.b32.xlu1 %v4772_v12, %s6334_s29  ;;  %v4774_v26 = vpop.f32.mrb[103].mxu0  ;;  %v4927_v21 = vpop.permute.xlu1 %4926 }
 0x99a   : > { %v4777_v56 = vpop.f32.mrb[104].mxu0 }
 0x99b   : > { %v11590_v40 = vadd.f32 %v4921_v3, %v4777_v56  ;;  %5113 = vrot.lane.b32.xlu0 %v4777_v56, %s6334_s29  ;;  %v4779_v58 = vpop.f32.mrb[105].mxu0  ;;  %v4929_v9 = vpop.permute.xlu0 %4928 }
 0x99c   : > { %v4780_v10 = vpop.f32.mrb[106].mxu0 }
 0x99d   : > { %v11593_v49 = vadd.f32 %v4923_v62, %v4780_v10  ;;  %5115 = vrot.lane.b32.xlu1 %v4780_v10, %s6334_s29  ;;  %v4782_v31 = vpop.f32.mrb[107].mxu0  ;;  %v4931_v13 = vpop.permute.xlu1 %4930 }
 0x9a2   : > { %v4785_v39 = vpop.f32.mrb[108].mxu0 }
 0x9a3   : > { %v11596_v63 = vadd.f32 %v4925_v16, %v4785_v39  ;;  %5117 = vrot.lane.b32.xlu0 %v4785_v39, %s6334_s29  ;;  %v4787_v51 = vpop.f32.mrb[109].mxu0  ;;  %v4933_v3 = vpop.permute.xlu0 %4932 }
 0x9a4   : > { %v4788_v34 = vpop.f32.mrb[110].mxu0 }
 0x9a5   : > { %v11599_v22 = vadd.f32 %v4927_v21, %v4788_v34  ;;  %5119 = vrot.lane.b32.xlu1 %v4788_v34, %s6334_s29  ;;  %v4790_v6 = vpop.f32.mrb[111].mxu0  ;;  %v4935_v10 = vpop.permute.xlu1 %4934 }
 0x9aa   : > { %v4793_v43 = vpop.f32.mrb[112].mxu0 }
 0x9ab   : > { %v11602_v60 = vadd.f32 %v4929_v9, %v4793_v43  ;;  %5121 = vrot.lane.b32.xlu0 %v4793_v43, %s6334_s29  ;;  %v4795_v35 = vpop.f32.mrb[113].mxu0  ;;  %v4937_v51 = vpop.permute.xlu0 %4936 }
 0x9ac   : > { %v4796_v18 = vpop.f32.mrb[114].mxu0 }
 0x9ad   : > { %v11605_v12 = vadd.f32 %v4931_v13, %v4796_v18  ;;  %5123 = vrot.lane.b32.xlu1 %v4796_v18, %s6334_s29  ;;  %v4798_v26 = vpop.f32.mrb[115].mxu0  ;;  %v4939_v9 = vpop.permute.xlu1 %4938 }
 0x9b2   : > { %v4801_v56 = vpop.f32.mrb[116].mxu0 }
 0x9b3   : > { %v11608_v58 = vadd.f32 %v4933_v3, %v4801_v56  ;;  %5125 = vrot.lane.b32.xlu0 %v4801_v56, %s6334_s29  ;;  %v4803_v62 = vpop.f32.mrb[117].mxu0  ;;  %v4941_v18 = vpop.permute.xlu0 %4940 }
 0x9b4   : > { %v4804_v31 = vpop.f32.mrb[118].mxu0 }
 0x9b5   : > { %v11611_v16 = vadd.f32 %v4935_v10, %v4804_v31  ;;  %5127 = vrot.lane.b32.xlu1 %v4804_v31, %s6334_s29  ;;  %v4806_v39 = vpop.f32.mrb[119].mxu0  ;;  %v4943_v62 = vpop.permute.xlu1 %4942 }
 0x9ba   : > { %v4809_v21 = vpop.f32.mrb[120].mxu0 }
 0x9bb   : > { %v11614_v34 = vadd.f32 %v4937_v51, %v4809_v21  ;;  %5129 = vrot.lane.b32.xlu0 %v4809_v21, %s6334_s29  ;;  %v4811_v6 = vpop.f32.mrb[121].mxu0  ;;  %v4945_v51 = vpop.permute.xlu0 %4944 }
 0x9bc   : > { %v4812_v43 = vpop.f32.mrb[122].mxu0 }
 0x9bd   : > { %v11617_v35 = vadd.f32 %v4939_v9, %v4812_v43  ;;  %5131 = vrot.lane.b32.xlu1 %v4812_v43, %s6334_s29  ;;  %v4814_v13 = vpop.f32.mrb[123].mxu0  ;;  %v4947_v43 = vpop.permute.xlu1 %4946 }
 0x9c2   : > { %v4817_v26 = vpop.f32.mrb[124].mxu0 }
 0x9c3   : > { %v11620_v3 = vadd.f32 %v4941_v18, %v4817_v26  ;;  %5133 = vrot.lane.b32.xlu0 %v4817_v26, %s6334_s29  ;;  %v4819_v56 = vpop.f32.mrb[125].mxu0 }
 0x9c4   : > { %v4820_v10 = vpop.f32.mrb[126].mxu0  ;;  %v4949_v56 = vpop.permute.xlu0 %4948 }
 0x9c5   : > { %13461 = vst [vmem:[#allocation74_spill] sm:$0xff] %v11620_v3  ;;  %v11623_v31 = vadd.f32 %v4943_v62, %v4820_v10  ;;  %5135 = vrot.lane.b32.xlu1 %v4820_v10, %s6334_s29  ;;  %v4822_v39 = vpop.f32.mrb[127].mxu0 }
 0x9c6   : > { %v4951_v39 = vpop.permute.xlu1 %4950 }
 0x9c7   : > { %13462 = vst [vmem:[#allocation131_spill] sm:$0xff] %v11623_v31 }
 0x9ca   : > { %v4825_v21 = vpop.f32.mrb[128].mxu0 }
 0x9cb   : > { %v11626_v6 = vadd.f32 %v4945_v51, %v4825_v21  ;;  %5137 = vrot.lane.b32.xlu0 %v4825_v21, %s6334_s29  ;;  %v4827_v9 = vpop.f32.mrb[129].mxu0 }
 0x9cc   : > { %v4828_v13 = vpop.f32.mrb[130].mxu0 }
 0x9cd   : > { %13463 = vst [vmem:[#allocation76_spill] sm:$0xff] %v11626_v6  ;;  %v11629_v18 = vadd.f32 %v4947_v43, %v4828_v13  ;;  %5139 = vrot.lane.b32.xlu1 %v4828_v13, %s6334_s29  ;;  %v4830_v26 = vpop.f32.mrb[131].mxu0  ;;  %v4953_v9 = vpop.permute.xlu0 %4952 }
 0x9cf   : > { %13464 = vst [vmem:[#allocation132_spill] sm:$0xff] %v11629_v18  ;;  %v4955_v26 = vpop.permute.xlu1 %4954 }
 0x9d2   : > { %v4833_v62 = vpop.f32.mrb[132].mxu0 }
 0x9d3   : > { %v11632_v31 = vadd.f32 %v4949_v56, %v4833_v62  ;;  %5141 = vrot.lane.b32.xlu0 %v4833_v62, %s6334_s29  ;;  %v4835_v10 = vpop.f32.mrb[133].mxu0 }
 0x9d4   : > { %v4836_v51 = vpop.f32.mrb[134].mxu0 }
 0x9d5   : > { %13465 = vst [vmem:[#allocation56_spill] sm:$0xff] %v11632_v31  ;;  %v11635_v6 = vadd.f32 %v4951_v39, %v4836_v51  ;;  %5143 = vrot.lane.b32.xlu1 %v4836_v51, %s6334_s29  ;;  %v4838_v21 = vpop.f32.mrb[135].mxu0  ;;  %v4957_v10 = vpop.permute.xlu0 %4956 }
 0x9d7   : > { %13466 = vst [vmem:[#allocation133_spill] sm:$0xff] %v11635_v6  ;;  %v4959_v6 = vpop.permute.xlu1 %4958 }
 0x9da   : > { %v4841_v43 = vpop.f32.mrb[136].mxu0 }
 0x9db   : > { %v11638_v18 = vadd.f32 %v4953_v9, %v4841_v43  ;;  %5145 = vrot.lane.b32.xlu0 %v4841_v43, %s6334_s29  ;;  %v4843_v13 = vpop.f32.mrb[137].mxu0 }
 0x9dc   : > { %v4844_v56 = vpop.f32.mrb[138].mxu0 }
 0x9dd   : > { %13467 = vst [vmem:[#allocation58_spill] sm:$0xff] %v11638_v18  ;;  %v11641_v31 = vadd.f32 %v4955_v26, %v4844_v56  ;;  %5147 = vrot.lane.b32.xlu1 %v4844_v56, %s6334_s29  ;;  %v4846_v62 = vpop.f32.mrb[139].mxu0  ;;  %v4961_v9 = vpop.permute.xlu0 %4960 }
 0x9df   : > { %13468 = vst [vmem:[#allocation134_spill] sm:$0xff] %v11641_v31  ;;  %v4963_v13 = vpop.permute.xlu1 %4962 }
 0x9e2   : > { %v4849_v39 = vpop.f32.mrb[140].mxu0 }
 0x9e3   : > { %v11644_v3 = vadd.f32 %v4957_v10, %v4849_v39  ;;  %5149 = vrot.lane.b32.xlu0 %v4849_v39, %s6334_s29  ;;  %v4851_v51 = vpop.f32.mrb[141].mxu0 }
 0x9e4   : > { %v4852_v21 = vpop.f32.mrb[142].mxu0 }
 0x9e5   : > { %13469 = vst [vmem:[#allocation78_spill] sm:$0xff] %v11644_v3  ;;  %v11647_v18 = vadd.f32 %v4959_v6, %v4852_v21  ;;  %5151 = vrot.lane.b32.xlu1 %v4852_v21, %s6334_s29  ;;  %v4854_v43 = vpop.f32.mrb[143].mxu0  ;;  %v4965_v26 = vpop.permute.xlu0 %4964  ;;  %v11658_v6 = vld [vmem:[%s11945_s10] ss:$0 sm:$0xff] }
 0x9e7   : > { %v4967_v62 = vpop.permute.xlu1 %4966 }
 0x9ea   : > { %v4857_v56 = vpop.f32.mrb[144].mxu0 }
 0x9eb   : > { %v11650_v31 = vadd.f32 %v4961_v9, %v4857_v56  ;;  %5153 = vrot.lane.b32.xlu0 %v4857_v56, %s6334_s29  ;;  %v4859_v10 = vpop.f32.mrb[145].mxu0 }
 0x9ec   : > { %v4860_v3 = vpop.f32.mrb[146].mxu0 }
 0x9ed   : > { %v11653_v39 = vadd.f32 %v4963_v13, %v4860_v3  ;;  %v5098_v51 = vpop.permute.xlu0 %5097  ;;  %5155 = vrot.lane.b32.xlu1 %v4860_v3, %s6334_s29  ;;  %v4862_v21 = vpop.f32.mrb[147].mxu0 }
 0x9ee   : > { %v5196_v43 = vadd.f32 %v5098_v51, %v11429_v30 }
 0x9ef   : > { %13470 = vst [vmem:[#allocation135_spill] sm:$0xff] %v11653_v39  ;;  %v5100_v9 = vpop.permute.xlu1 %5099 }
 0x9f0   : > { %v5266_v13 = vadd.f32 %v11658_v6, %v5196_v43  ;;  %v5197_v56 = vadd.f32 %v5100_v9, %v11433_v29 }
 0x9f2   : > { %5331 = vst.msk [vmem:[%s11667_s21] sm:$0xff] %vm5330_vm5, %v5266_v13  ;;  %v5267_v3 = vadd.f32 %v11658_v6, %v5197_v56  ;;  %v4865_v30 = vpop.f32.mrb[148].mxu0 }
 0x9f3   : > { %v11674_v10 = vadd.f32 %v4965_v26, %v4865_v30  ;;  %5157 = vrot.lane.b32.xlu0 %v4865_v30, %s6334_s29  ;;  %v4867_v51 = vpop.f32.mrb[149].mxu0  ;;  %v13471_v26 = vmov 0.0  }
 0x9f4   : > { %5332 = vst.msk [vmem:[%s11667_s21 + $0x8] sm:$0xff] %vm5330_vm5, %v5267_v3  ;;  %v4868_v21 = vpop.f32.mrb[150].mxu0 }
 0x9f5   : > { %v11679_v39 = vadd.f32 %v4967_v62, %v4868_v21  ;;  %v5102_v43 = vpop.permute.xlu0 %5101  ;;  %5159 = vrot.lane.b32.xlu1 %v4868_v21, %s6334_s29  ;;  %v4870_v29 = vpop.f32.mrb[151].mxu0 }
 0x9f6   : > { %v5198_v9 = vadd.f32 %v5102_v43, %v11443_v25 }
 0x9f7   : > { %v5104_v13 = vpop.permute.xlu1 %5103  ;;  %5161 = vrot.lane.b32.xlu0 %v13471_v26, %s6334_s29 }
 0x9f8   : > { %v5268_v56 = vadd.f32 %v11658_v6, %v5198_v9  ;;  %v5199_v30 = vadd.f32 %v5104_v13, %v11447_v52 }
 0x9fa   : > { %5333 = vst.msk [vmem:[%s11667_s21 + $0x10] sm:$0xff] %vm5330_vm5, %v5268_v56  ;;  %v5269_v62 = vadd.f32 %v11658_v6, %v5199_v30 }
 0x9fc   : > { %5334 = vst.msk [vmem:[%s11667_s21 + $0x18] sm:$0xff] %vm5330_vm5, %v5269_v62 }
 0x9fd   : > { %v5106_v3 = vpop.permute.xlu0 %5105 }
 0x9fe   : > { %v5200_v51 = vadd.f32 %v5106_v3, %v11454_v38 }
 0x9ff   : > { %v5108_v25 = vpop.permute.xlu1 %5107 }
 0xa00   : > { %v5270_v21 = vadd.f32 %v11658_v6, %v5200_v51  ;;  %v5201_v43 = vadd.f32 %v5108_v25, %v11458_v5 }
 0xa02   : > { %5335 = vst.msk [vmem:[%s11667_s21 + $0x20] sm:$0xff] %vm5330_vm5, %v5270_v21  ;;  %v5271_v52 = vadd.f32 %v11658_v6, %v5201_v43 }
 0xa04   : > { %5336 = vst.msk [vmem:[%s11667_s21 + $0x28] sm:$0xff] %vm5330_vm5, %v5271_v52 }
 0xa05   : > { %v5110_v29 = vpop.permute.xlu0 %5109 }
 0xa06   : > { %v5202_v9 = vadd.f32 %v5110_v29, %v11462_v45 }
 0xa07   : > { %v5112_v13 = vpop.permute.xlu1 %5111 }
 0xa08   : > { %v5272_v26 = vadd.f32 %v11658_v6, %v5202_v9  ;;  %v5203_v38 = vadd.f32 %v5112_v13, %v11466_v14 }
 0xa0a   : > { %5337 = vst.msk [vmem:[%s11667_s21 + $0x30] sm:$0xff] %vm5330_vm5, %v5272_v26  ;;  %v5273_v5 = vadd.f32 %v11658_v6, %v5203_v38 }
 0xa0c   : > { %5338 = vst.msk [vmem:[%s11667_s21 + $0x38] sm:$0xff] %vm5330_vm5, %v5273_v5 }
 0xa0d   : > { %v5114_v56 = vpop.permute.xlu0 %5113 }
 0xa0e   : > { %v5204_v30 = vadd.f32 %v5114_v56, %v11470_v50 }
 0xa0f   : > { %v5116_v62 = vpop.permute.xlu1 %5115 }
 0xa10   : > { %v5274_v3 = vadd.f32 %v11658_v6, %v5204_v30  ;;  %v5205_v45 = vadd.f32 %v5116_v62, %v11474_v24 }
 0xa12   : > { %5339 = vst.msk [vmem:[%s11667_s21 + $0x40] sm:$0xff] %vm5330_vm5, %v5274_v3  ;;  %v5275_v14 = vadd.f32 %v11658_v6, %v5205_v45 }
 0xa14   : > { %5340 = vst.msk [vmem:[%s11667_s21 + $0x48] sm:$0xff] %vm5330_vm5, %v5275_v14 }
 0xa15   : > { %v5118_v51 = vpop.permute.xlu0 %5117 }
 0xa16   : > { %v5206_v25 = vadd.f32 %v5118_v51, %v11478_v1 }
 0xa17   : > { %v5120_v21 = vpop.permute.xlu1 %5119 }
 0xa18   : > { %v5276_v43 = vadd.f32 %v11658_v6, %v5206_v25  ;;  %v5207_v50 = vadd.f32 %v5120_v21, %v11482_v55 }
 0xa1a   : > { %5341 = vst.msk [vmem:[%s11667_s21 + $0x50] sm:$0xff] %vm5330_vm5, %v5276_v43  ;;  %v5277_v24 = vadd.f32 %v11658_v6, %v5207_v50 }
 0xa1c   : > { %5342 = vst.msk [vmem:[%s11667_s21 + $0x58] sm:$0xff] %vm5330_vm5, %v5277_v24 }
 0xa1d   : > { %v5122_v52 = vpop.permute.xlu0 %5121 }
 0xa1e   : > { %v5208_v29 = vadd.f32 %v5122_v52, %v11486_v15 }
 0xa1f   : > { %v5124_v9 = vpop.permute.xlu1 %5123 }
 0xa20   : > { %v5278_v13 = vadd.f32 %v11658_v6, %v5208_v29  ;;  %v5209_v1 = vadd.f32 %v5124_v9, %v11490_v44 }
 0xa22   : > { %5343 = vst.msk [vmem:[%s11667_s21 + $0x60] sm:$0xff] %vm5330_vm5, %v5278_v13  ;;  %v5279_v55 = vadd.f32 %v11658_v6, %v5209_v1 }
 0xa24   : > { %5344 = vst.msk [vmem:[%s11667_s21 + $0x68] sm:$0xff] %vm5330_vm5, %v5279_v55 }
 0xa25   : > { %v5126_v26 = vpop.permute.xlu0 %5125 }
 0xa26   : > { %v5210_v38 = vadd.f32 %v5126_v26, %v11494_v47 }
 0xa27   : > { %v5128_v5 = vpop.permute.xlu1 %5127 }
 0xa28   : > { %v5280_v56 = vadd.f32 %v11658_v6, %v5210_v38  ;;  %v5211_v15 = vadd.f32 %v5128_v5, %v11498_v4 }
 0xa2a   : > { %5345 = vst.msk [vmem:[%s11667_s21 + $0x70] sm:$0xff] %vm5330_vm5, %v5280_v56  ;;  %v5281_v44 = vadd.f32 %v11658_v6, %v5211_v15 }
 0xa2c   : > { %5346 = vst.msk [vmem:[%s11667_s21 + $0x78] sm:$0xff] %vm5330_vm5, %v5281_v44 }
 0xa2d   : > { %v5130_v30 = vpop.permute.xlu0 %5129 }
 0xa2e   : > { %v5212_v62 = vadd.f32 %v5130_v30, %v11502_v37 }
 0xa2f   : > { %v5132_v3 = vpop.permute.xlu1 %5131 }
 0xa30   : > { %v5282_v45 = vadd.f32 %v11658_v6, %v5212_v62  ;;  %v5213_v47 = vadd.f32 %v5132_v3, %v11506_v0 }
 0xa32   : > { %5347 = vst.msk [vmem:[%s11667_s21 + $0x80] sm:$0xff] %vm5330_vm5, %v5282_v45  ;;  %v5283_v4 = vadd.f32 %v11658_v6, %v5213_v47 }
 0xa34   : > { %5348 = vst.msk [vmem:[%s11667_s21 + $0x88] sm:$0xff] %vm5330_vm5, %v5283_v4 }
 0xa35   : > { %v5134_v14 = vpop.permute.xlu0 %5133 }
 0xa36   : > { %v5214_v51 = vadd.f32 %v5134_v14, %v11510_v28 }
 0xa37   : > { %v5136_v25 = vpop.permute.xlu1 %5135 }
 0xa38   : > { %v5284_v21 = vadd.f32 %v11658_v6, %v5214_v51  ;;  %v5215_v37 = vadd.f32 %v5136_v25, %v11514_v11 }
 0xa3a   : > { %5349 = vst.msk [vmem:[%s11667_s21 + $0x90] sm:$0xff] %vm5330_vm5, %v5284_v21  ;;  %v5285_v0 = vadd.f32 %v11658_v6, %v5215_v37 }
 0xa3c   : > { %5350 = vst.msk [vmem:[%s11667_s21 + $0x98] sm:$0xff] %vm5330_vm5, %v5285_v0 }
 0xa3d   : > { %v5138_v43 = vpop.permute.xlu0 %5137 }
 0xa3e   : > { %v5216_v50 = vadd.f32 %v5138_v43, %v11518_v36 }
 0xa3f   : > { %v5140_v24 = vpop.permute.xlu1 %5139 }
 0xa40   : > { %v5286_v52 = vadd.f32 %v11658_v6, %v5216_v50  ;;  %v5217_v28 = vadd.f32 %v5140_v24, %v11522_v41 }
 0xa42   : > { %5351 = vst.msk [vmem:[%s11667_s21 + $0xa0] sm:$0xff] %vm5330_vm5, %v5286_v52  ;;  %v5287_v11 = vadd.f32 %v11658_v6, %v5217_v28 }
 0xa44   : > { %5352 = vst.msk [vmem:[%s11667_s21 + $0xa8] sm:$0xff] %vm5330_vm5, %v5287_v11 }
 0xa45   : > { %v5142_v29 = vpop.permute.xlu0 %5141 }
 0xa46   : > { %v5218_v9 = vadd.f32 %v5142_v29, %v11526_v7  ;;  %v13472_v29 = vld [vmem:[#allocation74_spill] sm:$0xff] }
 0xa47   : > { %v5144_v13 = vpop.permute.xlu1 %5143 }
 0xa48   : > { %v5288_v1 = vadd.f32 %v11658_v6, %v5218_v9  ;;  %v5219_v36 = vadd.f32 %v5144_v13, %v11530_v2  ;;  %v13473_v9 = vld [vmem:[#allocation131_spill] sm:$0xff]  ;;  %v13474_v13 = vld [vmem:[#allocation76_spill] sm:$0xff] }
 0xa4a   : > { %5353 = vst.msk [vmem:[%s11667_s21 + $0xb0] sm:$0xff] %vm5330_vm5, %v5288_v1  ;;  %v5289_v41 = vadd.f32 %v11658_v6, %v5219_v36  ;;  %v13475_v1 = vld [vmem:[#allocation132_spill] sm:$0xff] }
 0xa4b   : > { %v13476_v36 = vld [vmem:[#allocation56_spill] sm:$0xff] }
 0xa4c   : > { %5354 = vst.msk [vmem:[%s11667_s21 + $0xb8] sm:$0xff] %vm5330_vm5, %v5289_v41  ;;  %v13477_v41 = vld [vmem:[#allocation133_spill] sm:$0xff] }
 0xa4d   : > { %v5146_v55 = vpop.permute.xlu0 %5145 }
 0xa4e   : > { %v5220_v26 = vadd.f32 %v5146_v55, %v11534_v32  ;;  %v13478_v55 = vld [vmem:[#allocation58_spill] sm:$0xff] }
 0xa4f   : > { %v5148_v38 = vpop.permute.xlu1 %5147 }
 0xa50   : > { %v5290_v5 = vadd.f32 %v11658_v6, %v5220_v26  ;;  %v5221_v7 = vadd.f32 %v5148_v38, %v11538_v17  ;;  %v13479_v26 = vld [vmem:[#allocation134_spill] sm:$0xff] }
 0xa51   : > { %v13480_v38 = vld [vmem:[#allocation78_spill] sm:$0xff] }
 0xa52   : > { %5355 = vst.msk [vmem:[%s11667_s21 + $0xc0] sm:$0xff] %vm5330_vm5, %v5290_v5  ;;  %v5291_v2 = vadd.f32 %v11658_v6, %v5221_v7  ;;  %v13481_v7 = vld [vmem:[#allocation135_spill] sm:$0xff] }
 0xa54   : > { %5356 = vst.msk [vmem:[%s11667_s21 + $0xc8] sm:$0xff] %vm5330_vm5, %v5291_v2 }
 0xa55   : > { %v5150_v56 = vpop.permute.xlu0 %5149 }
 0xa56   : > { %v5222_v15 = vadd.f32 %v5150_v56, %v11542_v57 }
 0xa57   : > { %v5152_v44 = vpop.permute.xlu1 %5151 }
 0xa58   : > { %v5292_v30 = vadd.f32 %v11658_v6, %v5222_v15  ;;  %v5223_v32 = vadd.f32 %v5152_v44, %v11546_v53 }
 0xa5a   : > { %5357 = vst.msk [vmem:[%s11667_s21 + $0xd0] sm:$0xff] %vm5330_vm5, %v5292_v30  ;;  %v5293_v17 = vadd.f32 %v11658_v6, %v5223_v32 }
 0xa5c   : > { %5358 = vst.msk [vmem:[%s11667_s21 + $0xd8] sm:$0xff] %vm5330_vm5, %v5293_v17 }
 0xa5d   : > { %v5154_v62 = vpop.permute.xlu0 %5153 }
 0xa5e   : > { %v5224_v3 = vadd.f32 %v5154_v62, %v11550_v61 }
 0xa5f   : > { %v5156_v45 = vpop.permute.xlu1 %5155 }
 0xa60   : > { %v5294_v47 = vadd.f32 %v11658_v6, %v5224_v3  ;;  %v5225_v57 = vadd.f32 %v5156_v45, %v11554_v19 }
 0xa62   : > { %5359 = vst.msk [vmem:[%s11667_s21 + $0xe0] sm:$0xff] %vm5330_vm5, %v5294_v47  ;;  %v5295_v4 = vadd.f32 %v11658_v6, %v5225_v57 }
 0xa64   : > { %5360 = vst.msk [vmem:[%s11667_s21 + $0xe8] sm:$0xff] %vm5330_vm5, %v5295_v4 }
 0xa65   : > { %v5158_v53 = vpop.permute.xlu0 %5157 }
 0xa66   : > { %v5226_v14 = vadd.f32 %v5158_v53, %v11558_v33 }
 0xa67   : > { %v5160_v51 = vpop.permute.xlu1 %5159 }
 0xa68   : > { %v5296_v25 = vadd.f32 %v11658_v6, %v5226_v14  ;;  %v5227_v61 = vadd.f32 %v5160_v51, %v11562_v8 }
 0xa69   : > { %v5162_v21 = vpop.permute.xlu0 %5161 }
 0xa6a   : > { %5361 = vst.msk [vmem:[%s11667_s21 + $0xf0] sm:$0xff] %vm5330_vm5, %v5296_v25  ;;  %v5297_v19 = vadd.f32 %v11658_v6, %v5227_v61  ;;  %v5228_v37 = vadd.f32 %v5162_v21, %v11566_v27  ;;  %v5229_v0 = vadd.f32 %v5162_v21, %v11569_v46  ;;  %v5230_v43 = vadd.f32 %v5162_v21, %v11572_v23 }
 0xa6b   : > { %v5231_v50 = vadd.f32 %v5162_v21, %v11575_v42  ;;  %v5232_v33 = vadd.f32 %v5162_v21, %v11578_v20  ;;  %v5233_v24 = vadd.f32 %v5162_v21, %v11581_v54  ;;  %v5234_v52 = vadd.f32 %v5162_v21, %v11584_v48 }
 0xa6c   : > { %5362 = vst.msk [vmem:[%s11667_s21 + $0xf8] sm:$0xff] %vm5330_vm5, %v5297_v19  ;;  %v5235_v8 = vadd.f32 %v5162_v21, %v11587_v59  ;;  %v5236_v28 = vadd.f32 %v5162_v21, %v11590_v40  ;;  %v5237_v27 = vadd.f32 %v5162_v21, %v11593_v49  ;;  %v5238_v46 = vadd.f32 %v5162_v21, %v11596_v63 }
 0xa6d   : > { %v5239_v23 = vadd.f32 %v5162_v21, %v11599_v22  ;;  %v5240_v42 = vadd.f32 %v5162_v21, %v11602_v60  ;;  %v5241_v20 = vadd.f32 %v5162_v21, %v11605_v12  ;;  %v5242_v54 = vadd.f32 %v5162_v21, %v11608_v58 }
 0xa6e   : > { %v5243_v48 = vadd.f32 %v5162_v21, %v11611_v16  ;;  %v5244_v11 = vadd.f32 %v5162_v21, %v11614_v34  ;;  %v5245_v59 = vadd.f32 %v5162_v21, %v11617_v35  ;;  %v5246_v40 = vadd.f32 %v5162_v21, %v13472_v29 }
 0xa6f   : > { %v5247_v49 = vadd.f32 %v5162_v21, %v13473_v9  ;;  %v5248_v63 = vadd.f32 %v5162_v21, %v13474_v13  ;;  %v5249_v22 = vadd.f32 %v5162_v21, %v13475_v1  ;;  %v5250_v60 = vadd.f32 %v5162_v21, %v13476_v36 }
 0xa70   : > { %v5251_v12 = vadd.f32 %v5162_v21, %v13477_v41  ;;  %v5252_v58 = vadd.f32 %v5162_v21, %v13478_v55  ;;  %v5253_v16 = vadd.f32 %v5162_v21, %v13479_v26  ;;  %v5254_v34 = vadd.f32 %v5162_v21, %v13480_v38 }
 0xa71   : > { %v5255_v35 = vadd.f32 %v5162_v21, %v11647_v18  ;;  %v5256_v5 = vadd.f32 %v5162_v21, %v11650_v31  ;;  %v5257_v2 = vadd.f32 %v5162_v21, %v13481_v7  ;;  %v5258_v56 = vadd.f32 %v5162_v21, %v11674_v10 }
 0xa72   : > { %v5259_v15 = vadd.f32 %v5162_v21, %v11679_v39  ;;  %v5298_v44 = vadd.f32 %v11658_v6, %v5228_v37  ;;  %v5299_v30 = vadd.f32 %v11658_v6, %v5229_v0  ;;  %v5300_v32 = vadd.f32 %v11658_v6, %v5230_v43 }
 0xa73   : > { %v5301_v18 = vadd.f32 %v11658_v6, %v5231_v50  ;;  %v5302_v31 = vadd.f32 %v11658_v6, %v5232_v33  ;;  %v5303_v17 = vadd.f32 %v11658_v6, %v5233_v24  ;;  %v5304_v10 = vadd.f32 %v11658_v6, %v5234_v52 }
 0xa74   : > { %v5305_v39 = vadd.f32 %v11658_v6, %v5235_v8  ;;  %v5306_v62 = vadd.f32 %v11658_v6, %v5236_v28  ;;  %v5307_v3 = vadd.f32 %v11658_v6, %v5237_v27  ;;  %v5308_v45 = vadd.f32 %v11658_v6, %v5238_v46  ;;  %5363 = vst.msk [vmem:[%s11667_s21 + $0x100] sm:$0xff] %vm5330_vm5, %v5298_v44 }
 0xa75   : > { %5364 = vst.msk [vmem:[%s11667_s21 + $0x108] sm:$0xff] %vm5330_vm5, %v5299_v30  ;;  %5365 = vst.msk [vmem:[%s11667_s21 + $0x110] sm:$0xff] %vm5330_vm5, %v5300_v32  ;;  %v5309_v47 = vadd.f32 %v11658_v6, %v5239_v23  ;;  %v5310_v57 = vadd.f32 %v11658_v6, %v5240_v42  ;;  %v5311_v4 = vadd.f32 %v11658_v6, %v5241_v20 }
 0xa76   : > { %v5312_v53 = vadd.f32 %v11658_v6, %v5242_v54  ;;  %5366 = vst.msk [vmem:[%s11667_s21 + $0x118] sm:$0xff] %vm5330_vm5, %v5301_v18  ;;  %5367 = vst.msk [vmem:[%s11667_s21 + $0x120] sm:$0xff] %vm5330_vm5, %v5302_v31  ;;  %v5313_v14 = vadd.f32 %v11658_v6, %v5243_v48  ;;  %v5314_v51 = vadd.f32 %v11658_v6, %v5244_v11 }
 0xa77   : > { %5368 = vst.msk [vmem:[%s11667_s21 + $0x128] sm:$0xff] %vm5330_vm5, %v5303_v17  ;;  %5369 = vst.msk [vmem:[%s11667_s21 + $0x130] sm:$0xff] %vm5330_vm5, %v5304_v10  ;;  %v5315_v25 = vadd.f32 %v11658_v6, %v5245_v59  ;;  %v5316_v61 = vadd.f32 %v11658_v6, %v5246_v40  ;;  %v5317_v21 = vadd.f32 %v11658_v6, %v5247_v49 }
 0xa78   : > { %5370 = vst.msk [vmem:[%s11667_s21 + $0x138] sm:$0xff] %vm5330_vm5, %v5305_v39  ;;  %5371 = vst.msk [vmem:[%s11667_s21 + $0x140] sm:$0xff] %vm5330_vm5, %v5306_v62  ;;  %v5318_v19 = vadd.f32 %v11658_v6, %v5248_v63  ;;  %v5319_v37 = vadd.f32 %v11658_v6, %v5249_v22  ;;  %v5320_v0 = vadd.f32 %v11658_v6, %v5250_v60 }
 0xa79   : > { %5372 = vst.msk [vmem:[%s11667_s21 + $0x148] sm:$0xff] %vm5330_vm5, %v5307_v3  ;;  %5373 = vst.msk [vmem:[%s11667_s21 + $0x150] sm:$0xff] %vm5330_vm5, %v5308_v45  ;;  %v5321_v43 = vadd.f32 %v11658_v6, %v5251_v12  ;;  %v5322_v50 = vadd.f32 %v11658_v6, %v5252_v58  ;;  %v5323_v33 = vadd.f32 %v11658_v6, %v5253_v16 }
 0xa7a   : > { %5374 = vst.msk [vmem:[%s11667_s21 + $0x158] sm:$0xff] %vm5330_vm5, %v5309_v47  ;;  %5375 = vst.msk [vmem:[%s11667_s21 + $0x160] sm:$0xff] %vm5330_vm5, %v5310_v57  ;;  %v5324_v24 = vadd.f32 %v11658_v6, %v5254_v34  ;;  %v5325_v52 = vadd.f32 %v11658_v6, %v5255_v35  ;;  %v5326_v8 = vadd.f32 %v11658_v6, %v5256_v5 }
 0xa7b   : > { %5376 = vst.msk [vmem:[%s11667_s21 + $0x168] sm:$0xff] %vm5330_vm5, %v5311_v4  ;;  %5377 = vst.msk [vmem:[%s11667_s21 + $0x170] sm:$0xff] %vm5330_vm5, %v5312_v53  ;;  %v5327_v28 = vadd.f32 %v11658_v6, %v5257_v2  ;;  %v5328_v27 = vadd.f32 %v11658_v6, %v5258_v56  ;;  %v5329_v46 = vadd.f32 %v11658_v6, %v5259_v15 }
 0xa7c   : > { %5378 = vst.msk [vmem:[%s11667_s21 + $0x178] sm:$0xff] %vm5330_vm5, %v5313_v14  ;;  %5379 = vst.msk [vmem:[%s11667_s21 + $0x180] sm:$0xff] %vm5330_vm5, %v5314_v51 }
 0xa7d   : > { %5380 = vst.msk [vmem:[%s11667_s21 + $0x188] sm:$0xff] %vm5330_vm5, %v5315_v25  ;;  %5381 = vst.msk [vmem:[%s11667_s21 + $0x190] sm:$0xff] %vm5330_vm5, %v5316_v61 }
 0xa7e   : > { %5382 = vst.msk [vmem:[%s11667_s21 + $0x198] sm:$0xff] %vm5330_vm5, %v5317_v21  ;;  %5383 = vst.msk [vmem:[%s11667_s21 + $0x1a0] sm:$0xff] %vm5330_vm5, %v5318_v19 }
 0xa7f   : > { %5384 = vst.msk [vmem:[%s11667_s21 + $0x1a8] sm:$0xff] %vm5330_vm5, %v5319_v37  ;;  %5385 = vst.msk [vmem:[%s11667_s21 + $0x1b0] sm:$0xff] %vm5330_vm5, %v5320_v0 }
 0xa80   : > { %5386 = vst.msk [vmem:[%s11667_s21 + $0x1b8] sm:$0xff] %vm5330_vm5, %v5321_v43  ;;  %5387 = vst.msk [vmem:[%s11667_s21 + $0x1c0] sm:$0xff] %vm5330_vm5, %v5322_v50 }
 0xa81   : > { %5388 = vst.msk [vmem:[%s11667_s21 + $0x1c8] sm:$0xff] %vm5330_vm5, %v5323_v33  ;;  %5389 = vst.msk [vmem:[%s11667_s21 + $0x1d0] sm:$0xff] %vm5330_vm5, %v5324_v24 }
 0xa82   : > { %5390 = vst.msk [vmem:[%s11667_s21 + $0x1d8] sm:$0xff] %vm5330_vm5, %v5325_v52  ;;  %5391 = vst.msk [vmem:[%s11667_s21 + $0x1e0] sm:$0xff] %vm5330_vm5, %v5326_v8 }
 0xa83   : > { %5392 = vst.msk [vmem:[%s11667_s21 + $0x1e8] sm:$0xff] %vm5330_vm5, %v5327_v28  ;;  %5393 = vst.msk [vmem:[%s11667_s21 + $0x1f0] sm:$0xff] %vm5330_vm5, %v5328_v27 }
 0xa84   : > { %5394 = vst.msk [vmem:[%s11667_s21 + $0x1f8] sm:$0xff] %vm5330_vm5, %v5329_v46 }
 0xa85 PF: > { %s25_s18 = sadd.s32 1, %s6326_s18  }
 0xa86   : > { %p22_p4 = scmp.ge.s32.totalorder %s25_s18, 4  }
 0xa88   :  { %24 = sbr.rel (!%p22_p4) target bundleno = 1 (0x1), region = 110 }

</bundles_post_ra>
